<compile_context>
chip_gen: v7x
topology: tpu7x:2x2x1
jax: 0.10.0
libtpu: 0.0.40
codegen_flags: <defaults>
</compile_context>

<pallas_src>
import functools

import jax
import jax.numpy as jnp
from jax.experimental import pallas as pl
from jax.experimental.pallas import tpu as pltpu

COUT_PAD = 128   # lane-dense padded width of the final layer's output


def _gradient_cnn_kernel(x_ref, w1_ref, b1_ref, w2_ref, b2_ref, w3_ref, b3_ref,
                         o_ref,
                         pad1, pad2, pad3, pat1, pat2, pat3, *, H, W):
    """Fused 3-layer 3x3 'same' conv for one image.

    x_ref : (1, H, W, 3)         input image (NHWC)
    wN_ref: (9*Cin_N, Cout_N)    im2col-flattened HWIO weights (layer 3 is
                                 lane-padded to Cout=128 with zero columns)
    bN_ref: (1, Cout_N)          bias (layer 3 lane-padded)
    o_ref : (1, H*W, 128)        lane-dense output slab (channels 0..1 real)
    padN  : (H+2, W+2, Cin_N)    VMEM scratch: zero-padded activation
    patN  : (H*W, 9*Cin_N)       VMEM scratch: im2col patch matrix
    """
    HW = H * W

    def conv_layer(pad_ref, pat_ref, cin, w_ref, b_ref, relu):
        # Build the (H*W, 9*cin) patch matrix once (9 shifted copies).
        xp = pad_ref[...]                                   # (H+2, W+2, cin)
        for kh in range(3):
            for kw in range(3):
                c0 = (kh * 3 + kw) * cin
                pat_ref[:, c0:c0 + cin] = (
                    xp[kh:kh + H, kw:kw + W, :].reshape(HW, cin))
        # One MXU matmul with K = 9*cin, plus bias / ReLU epilogue on the VPU.
        acc = jnp.dot(pat_ref[...], w_ref[...],
                      preferred_element_type=jnp.float32) + b_ref[...]
        return jnp.maximum(acc, 0.0) if relu else acc       # (HW, cout)

    # ---- layer 1: 3 -> 32, ReLU -------------------------------------------
    pad1[...] = jnp.zeros_like(pad1)
    pad1[1:H + 1, 1:W + 1, :] = x_ref[...][0]
    a1 = conv_layer(pad1, pat1, 3, w1_ref, b1_ref, relu=True)

    # ---- layer 2: 32 -> 64, ReLU (activation never leaves VMEM) ------------
    pad2[...] = jnp.zeros_like(pad2)
    pad2[1:H + 1, 1:W + 1, :] = a1.reshape(H, W, 32)
    a2 = conv_layer(pad2, pat2, 32, w2_ref, b2_ref, relu=True)

    # ---- layer 3: 64 -> 2 (lane-padded to 128), no ReLU ---------------------
    pad3[...] = jnp.zeros_like(pad3)
    pad3[1:H + 1, 1:W + 1, :] = a2.reshape(H, W, 64)
    a3 = conv_layer(pad3, pat3, 64, w3_ref, b3_ref, relu=False)

    o_ref[...] = a3.reshape(1, HW, COUT_PAD).astype(o_ref.dtype)


def gradient_cnn_pallas(x_nhwc, params):
    """Fused forward on NHWC input; returns (N, H, W, 2)."""
    N, H, W, _ = x_nhwc.shape
    (w1, b1), (w2, b2), (w3, b3) = params             # HWIO weights

    # im2col weight layout: row index = (kh, kw, cin).
    w1f = w1.reshape(9 * 3, 32)
    w2f = w2.reshape(9 * 32, 64)
    w3f = jnp.zeros((9 * 64, COUT_PAD), jnp.float32).at[:, :2].set(
        w3.reshape(9 * 64, 2))
    b3f = jnp.zeros((1, COUT_PAD), jnp.float32).at[0, :2].set(b3)

    kern = functools.partial(_gradient_cnn_kernel, H=H, W=W)
    out = pl.pallas_call(
        kern,
        out_shape=jax.ShapeDtypeStruct((N, H * W, COUT_PAD), jnp.float32),
        grid=(N,),
        in_specs=[
            pl.BlockSpec((1, H, W, 3), lambda n: (n, 0, 0, 0)),
            pl.BlockSpec((9 * 3, 32), lambda n: (0, 0)),
            pl.BlockSpec((1, 32), lambda n: (0, 0)),
            pl.BlockSpec((9 * 32, 64), lambda n: (0, 0)),
            pl.BlockSpec((1, 64), lambda n: (0, 0)),
            pl.BlockSpec((9 * 64, COUT_PAD), lambda n: (0, 0)),
            pl.BlockSpec((1, COUT_PAD), lambda n: (0, 0)),
        ],
        out_specs=pl.BlockSpec((1, H * W, COUT_PAD), lambda n: (n, 0, 0)),
        scratch_shapes=[
            pltpu.VMEM((H + 2, W + 2, 3), jnp.float32),    # pad1
            pltpu.VMEM((H + 2, W + 2, 32), jnp.float32),   # pad2
            pltpu.VMEM((H + 2, W + 2, 64), jnp.float32),   # pad3
            pltpu.VMEM((H * W, 9 * 3), jnp.float32),       # pat1
            pltpu.VMEM((H * W, 9 * 32), jnp.float32),      # pat2
            pltpu.VMEM((H * W, 9 * 64), jnp.float32),      # pat3
        ],
        compiler_params=pltpu.CompilerParams(
            dimension_semantics=("parallel",)),
    )(x_nhwc, w1f, b1.reshape(1, 32), w2f, b2.reshape(1, 64), w3f, b3f)

    # Slice the 2 real output channels out of the lane-dense slab.
    return out[:, :, :2].reshape(N, H, W, 2)


@jax.jit
def gradient_cnn_forward(x_nchw, params):
    """Forward pass equivalent to GradientCNN.forward (NCHW in, NCHW out)."""
    x = jnp.transpose(x_nchw, (0, 2, 3, 1))           # NCHW -> NHWC
    y = gradient_cnn_pallas(x, params)                # (N, H, W, 2)
    return jnp.transpose(y, (0, 3, 1, 2))             # NHWC -> NCHW


def init_params(key):
    """Deterministic PyTorch-style (kaiming-uniform-ish) init, HWIO weights."""
    def conv_init(k, cin, cout):
        k1, k2 = jax.random.split(k)
        bound = 1.0 / jnp.sqrt(jnp.float32(cin * 3 * 3))
        w = jax.random.uniform(k1, (3, 3, cin, cout), jnp.float32,
                               minval=-bound, maxval=bound)
        b = jax.random.uniform(k2, (cout,), jnp.float32,
                               minval=-bound, maxval=bound)
        return w, b

    k1, k2, k3 = jax.random.split(key, 3)
    return [conv_init(k1, 3, 32), conv_init(k2, 32, 64), conv_init(k3, 64, 2)]


def _reference_forward(x_nchw, params):
    """Pure-JAX reference (lax.conv) for a correctness check."""
    x = x_nchw
    for i, (w, b) in enumerate(params):
        x = jax.lax.conv_general_dilated(
            x, w, window_strides=(1, 1), padding="SAME",
            dimension_numbers=("NCHW", "HWIO", "NCHW"),
        ) + b[None, :, None, None]
        if i < 2:
            x = jnp.maximum(x, 0.0)
    return x


if __name__ == "__main__":
    key = jax.random.PRNGKey(0)
    kx, kp = jax.random.split(key)

    # GradientCNN expects 3 input channels; spatial 16x16, batch 2.
    x = jax.random.normal(kx, (2, 3, 16, 16), jnp.float32)   # NCHW
    params = init_params(kp)

    out = gradient_cnn_forward(x, params)
    out = jax.block_until_ready(out)

    assert out.shape == (2, 2, 16, 16), out.shape

    ref = _reference_forward(x, params)
    assert jnp.allclose(out, ref, atol=1e-4, rtol=1e-4), (
        float(jnp.max(jnp.abs(out - ref))))

    print("KERNEL_OK")
</pallas_src>

<mosaic_0001>
module attributes {stable_mosaic.version = 11 : i64} {
  func.func @_gradient_cnn_kernel(%arg0: i32, %arg1: memref<1x16x16x3xf32, #tpu.memory_space<vmem>>, %arg2: memref<27x32xf32, #tpu.memory_space<vmem>>, %arg3: memref<1x32xf32, #tpu.memory_space<vmem>>, %arg4: memref<288x64xf32, #tpu.memory_space<vmem>>, %arg5: memref<1x64xf32, #tpu.memory_space<vmem>>, %arg6: memref<576x128xf32, #tpu.memory_space<vmem>>, %arg7: memref<1x128xf32, #tpu.memory_space<vmem>>, %arg8: memref<1x256x128xf32, #tpu.memory_space<vmem>>, %arg9: memref<18x18x3xf32, #tpu.memory_space<vmem>>, %arg10: memref<18x18x32xf32, #tpu.memory_space<vmem>>, %arg11: memref<18x18x64xf32, #tpu.memory_space<vmem>>, %arg12: memref<256x27xf32, #tpu.memory_space<vmem>>, %arg13: memref<256x288xf32, #tpu.memory_space<vmem>>, %arg14: memref<256x576xf32, #tpu.memory_space<vmem>>) attributes {dimension_semantics = [#tpu.dimension_semantics<parallel>], iteration_bounds = array<i64: 2>, scalar_prefetch = 0 : i64, scratch_operands = 6 : i64, tpu.core_type = #tpu.core_type<tc>, window_params = [{transform_indices = @transform_0, window_bounds = array<i64: 1, 16, 16, 3>}, {pipeline_mode = #tpu.pipeline_mode<synchronous>, transform_indices = @transform_1, window_bounds = array<i64: 27, 32>}, {pipeline_mode = #tpu.pipeline_mode<synchronous>, transform_indices = @transform_2, window_bounds = array<i64: 1, 32>}, {pipeline_mode = #tpu.pipeline_mode<synchronous>, transform_indices = @transform_3, window_bounds = array<i64: 288, 64>}, {pipeline_mode = #tpu.pipeline_mode<synchronous>, transform_indices = @transform_4, window_bounds = array<i64: 1, 64>}, {pipeline_mode = #tpu.pipeline_mode<synchronous>, transform_indices = @transform_5, window_bounds = array<i64: 576, 128>}, {pipeline_mode = #tpu.pipeline_mode<synchronous>, transform_indices = @transform_6, window_bounds = array<i64: 1, 128>}, {transform_indices = @transform_7, window_bounds = array<i64: 1, 256, 128>}]} {
    %cst = arith.constant 0.000000e+00 : f32
    %0 = vector.broadcast %cst : f32 to vector<18x18x3xf32>
    %c0 = arith.constant 0 : index
    %c0_0 = arith.constant 0 : index
    %c0_1 = arith.constant 0 : index
    %1 = vector.load %arg9[%c0, %c0_0, %c0_1] : memref<18x18x3xf32, #tpu.memory_space<vmem>>, vector<18x18x3xf32>
    tpu.vector_store %arg9[%c0, %c0_0, %c0_1], %0 {strides = array<i32>} : memref<18x18x3xf32, #tpu.memory_space<vmem>>, vector<18x18x3xf32>,
    %c0_2 = arith.constant 0 : index
    %c0_3 = arith.constant 0 : index
    %c0_4 = arith.constant 0 : index
    %c0_5 = arith.constant 0 : index
    %2 = vector.load %arg1[%c0_2, %c0_3, %c0_4, %c0_5] : memref<1x16x16x3xf32, #tpu.memory_space<vmem>>, vector<1x16x16x3xf32>
    %3 = vector.shape_cast %2 : vector<1x16x16x3xf32> to vector<16x16x3xf32>
    %c1 = arith.constant 1 : index
    %c1_6 = arith.constant 1 : index
    %c0_7 = arith.constant 0 : index
    %4 = vector.load %arg9[%c1, %c1_6, %c0_7] : memref<18x18x3xf32, #tpu.memory_space<vmem>>, vector<16x16x3xf32>
    tpu.vector_store %arg9[%c1, %c1_6, %c0_7], %3 {strides = array<i32>} : memref<18x18x3xf32, #tpu.memory_space<vmem>>, vector<16x16x3xf32>,
    %c0_8 = arith.constant 0 : index
    %c0_9 = arith.constant 0 : index
    %c0_10 = arith.constant 0 : index
    %5 = vector.load %arg9[%c0_8, %c0_9, %c0_10] : memref<18x18x3xf32, #tpu.memory_space<vmem>>, vector<18x18x3xf32>
    %6 = vector.extract_strided_slice %5 {offsets = [0, 0, 0], sizes = [16, 16, 3], strides = [1, 1, 1]} : vector<18x18x3xf32> to vector<16x16x3xf32>
    %7 = vector.shape_cast %6 : vector<16x16x3xf32> to vector<256x3xf32>
    %c0_11 = arith.constant 0 : index
    %c0_12 = arith.constant 0 : index
    %8 = vector.load %arg12[%c0_11, %c0_12] : memref<256x27xf32, #tpu.memory_space<vmem>>, vector<256x3xf32>
    tpu.vector_store %arg12[%c0_11, %c0_12], %7 {strides = array<i32>} : memref<256x27xf32, #tpu.memory_space<vmem>>, vector<256x3xf32>,
    %9 = vector.extract_strided_slice %5 {offsets = [0, 1, 0], sizes = [16, 16, 3], strides = [1, 1, 1]} : vector<18x18x3xf32> to vector<16x16x3xf32>
    %10 = vector.shape_cast %9 : vector<16x16x3xf32> to vector<256x3xf32>
    %c0_13 = arith.constant 0 : index
    %c3 = arith.constant 3 : index
    %11 = vector.load %arg12[%c0_13, %c3] : memref<256x27xf32, #tpu.memory_space<vmem>>, vector<256x3xf32>
    tpu.vector_store %arg12[%c0_13, %c3], %10 {strides = array<i32>} : memref<256x27xf32, #tpu.memory_space<vmem>>, vector<256x3xf32>,
    %12 = vector.extract_strided_slice %5 {offsets = [0, 2, 0], sizes = [16, 16, 3], strides = [1, 1, 1]} : vector<18x18x3xf32> to vector<16x16x3xf32>
    %13 = vector.shape_cast %12 : vector<16x16x3xf32> to vector<256x3xf32>
    %c0_14 = arith.constant 0 : index
    %c6 = arith.constant 6 : index
    %14 = vector.load %arg12[%c0_14, %c6] : memref<256x27xf32, #tpu.memory_space<vmem>>, vector<256x3xf32>
    tpu.vector_store %arg12[%c0_14, %c6], %13 {strides = array<i32>} : memref<256x27xf32, #tpu.memory_space<vmem>>, vector<256x3xf32>,
    %15 = vector.extract_strided_slice %5 {offsets = [1, 0, 0], sizes = [16, 16, 3], strides = [1, 1, 1]} : vector<18x18x3xf32> to vector<16x16x3xf32>
    %16 = vector.shape_cast %15 : vector<16x16x3xf32> to vector<256x3xf32>
    %c0_15 = arith.constant 0 : index
    %c9 = arith.constant 9 : index
    %17 = vector.load %arg12[%c0_15, %c9] : memref<256x27xf32, #tpu.memory_space<vmem>>, vector<256x3xf32>
    tpu.vector_store %arg12[%c0_15, %c9], %16 {strides = array<i32>} : memref<256x27xf32, #tpu.memory_space<vmem>>, vector<256x3xf32>,
    %18 = vector.extract_strided_slice %5 {offsets = [1, 1, 0], sizes = [16, 16, 3], strides = [1, 1, 1]} : vector<18x18x3xf32> to vector<16x16x3xf32>
    %19 = vector.shape_cast %18 : vector<16x16x3xf32> to vector<256x3xf32>
    %c0_16 = arith.constant 0 : index
    %c12 = arith.constant 12 : index
    %20 = vector.load %arg12[%c0_16, %c12] : memref<256x27xf32, #tpu.memory_space<vmem>>, vector<256x3xf32>
    tpu.vector_store %arg12[%c0_16, %c12], %19 {strides = array<i32>} : memref<256x27xf32, #tpu.memory_space<vmem>>, vector<256x3xf32>,
    %21 = vector.extract_strided_slice %5 {offsets = [1, 2, 0], sizes = [16, 16, 3], strides = [1, 1, 1]} : vector<18x18x3xf32> to vector<16x16x3xf32>
    %22 = vector.shape_cast %21 : vector<16x16x3xf32> to vector<256x3xf32>
    %c0_17 = arith.constant 0 : index
    %c15 = arith.constant 15 : index
    %23 = vector.load %arg12[%c0_17, %c15] : memref<256x27xf32, #tpu.memory_space<vmem>>, vector<256x3xf32>
    tpu.vector_store %arg12[%c0_17, %c15], %22 {strides = array<i32>} : memref<256x27xf32, #tpu.memory_space<vmem>>, vector<256x3xf32>,
    %24 = vector.extract_strided_slice %5 {offsets = [2, 0, 0], sizes = [16, 16, 3], strides = [1, 1, 1]} : vector<18x18x3xf32> to vector<16x16x3xf32>
    %25 = vector.shape_cast %24 : vector<16x16x3xf32> to vector<256x3xf32>
    %c0_18 = arith.constant 0 : index
    %c18 = arith.constant 18 : index
    %26 = vector.load %arg12[%c0_18, %c18] : memref<256x27xf32, #tpu.memory_space<vmem>>, vector<256x3xf32>
    tpu.vector_store %arg12[%c0_18, %c18], %25 {strides = array<i32>} : memref<256x27xf32, #tpu.memory_space<vmem>>, vector<256x3xf32>,
    %27 = vector.extract_strided_slice %5 {offsets = [2, 1, 0], sizes = [16, 16, 3], strides = [1, 1, 1]} : vector<18x18x3xf32> to vector<16x16x3xf32>
    %28 = vector.shape_cast %27 : vector<16x16x3xf32> to vector<256x3xf32>
    %c0_19 = arith.constant 0 : index
    %c21 = arith.constant 21 : index
    %29 = vector.load %arg12[%c0_19, %c21] : memref<256x27xf32, #tpu.memory_space<vmem>>, vector<256x3xf32>
    tpu.vector_store %arg12[%c0_19, %c21], %28 {strides = array<i32>} : memref<256x27xf32, #tpu.memory_space<vmem>>, vector<256x3xf32>,
    %30 = vector.extract_strided_slice %5 {offsets = [2, 2, 0], sizes = [16, 16, 3], strides = [1, 1, 1]} : vector<18x18x3xf32> to vector<16x16x3xf32>
    %31 = vector.shape_cast %30 : vector<16x16x3xf32> to vector<256x3xf32>
    %c0_20 = arith.constant 0 : index
    %c24 = arith.constant 24 : index
    %32 = vector.load %arg12[%c0_20, %c24] : memref<256x27xf32, #tpu.memory_space<vmem>>, vector<256x3xf32>
    tpu.vector_store %arg12[%c0_20, %c24], %31 {strides = array<i32>} : memref<256x27xf32, #tpu.memory_space<vmem>>, vector<256x3xf32>,
    %c0_21 = arith.constant 0 : index
    %c0_22 = arith.constant 0 : index
    %33 = vector.load %arg12[%c0_21, %c0_22] : memref<256x27xf32, #tpu.memory_space<vmem>>, vector<256x27xf32>
    %c0_23 = arith.constant 0 : index
    %c0_24 = arith.constant 0 : index
    %34 = vector.load %arg2[%c0_23, %c0_24] : memref<27x32xf32, #tpu.memory_space<vmem>>, vector<27x32xf32>
    %cst_25 = arith.constant dense<0.000000e+00> : vector<256x32xf32>
    %35 = tpu.matmul %33, %34, %cst_25 {dimension_numbers = #tpu.dot_dimension_numbers<[1], [0], [0], [1], [0, 0, 1, 1], [], []>} : vector<256x27xf32>, vector<27x32xf32>, vector<256x32xf32> -> vector<256x32xf32>
    %c0_26 = arith.constant 0 : index
    %c0_27 = arith.constant 0 : index
    %36 = vector.load %arg3[%c0_26, %c0_27] : memref<1x32xf32, #tpu.memory_space<vmem>>, vector<1x32xf32>
    %37 = vector.broadcast %36 : vector<1x32xf32> to vector<256x32xf32>
    %38 = arith.addf %35, %37 : vector<256x32xf32>
    %cst_28 = arith.constant 0.000000e+00 : f32
    %39 = vector.broadcast %cst_28 : f32 to vector<256x32xf32>
    %40 = arith.maximumf %38, %39 : vector<256x32xf32>
    %cst_29 = arith.constant 0.000000e+00 : f32
    %41 = vector.broadcast %cst_29 : f32 to vector<18x18x32xf32>
    %c0_30 = arith.constant 0 : index
    %c0_31 = arith.constant 0 : index
    %c0_32 = arith.constant 0 : index
    %42 = vector.load %arg10[%c0_30, %c0_31, %c0_32] : memref<18x18x32xf32, #tpu.memory_space<vmem>>, vector<18x18x32xf32>
    tpu.vector_store %arg10[%c0_30, %c0_31, %c0_32], %41 {strides = array<i32>} : memref<18x18x32xf32, #tpu.memory_space<vmem>>, vector<18x18x32xf32>,
    %43 = vector.shape_cast %40 : vector<256x32xf32> to vector<16x16x32xf32>
    %c1_33 = arith.constant 1 : index
    %c1_34 = arith.constant 1 : index
    %c0_35 = arith.constant 0 : index
    %44 = vector.load %arg10[%c1_33, %c1_34, %c0_35] : memref<18x18x32xf32, #tpu.memory_space<vmem>>, vector<16x16x32xf32>
    tpu.vector_store %arg10[%c1_33, %c1_34, %c0_35], %43 {strides = array<i32>} : memref<18x18x32xf32, #tpu.memory_space<vmem>>, vector<16x16x32xf32>,
    %c0_36 = arith.constant 0 : index
    %c0_37 = arith.constant 0 : index
    %c0_38 = arith.constant 0 : index
    %45 = vector.load %arg10[%c0_36, %c0_37, %c0_38] : memref<18x18x32xf32, #tpu.memory_space<vmem>>, vector<18x18x32xf32>
    %46 = vector.extract_strided_slice %45 {offsets = [0, 0, 0], sizes = [16, 16, 32], strides = [1, 1, 1]} : vector<18x18x32xf32> to vector<16x16x32xf32>
    %47 = vector.shape_cast %46 : vector<16x16x32xf32> to vector<256x32xf32>
    %c0_39 = arith.constant 0 : index
    %c0_40 = arith.constant 0 : index
    %48 = vector.load %arg13[%c0_39, %c0_40] : memref<256x288xf32, #tpu.memory_space<vmem>>, vector<256x32xf32>
    tpu.vector_store %arg13[%c0_39, %c0_40], %47 {strides = array<i32>} : memref<256x288xf32, #tpu.memory_space<vmem>>, vector<256x32xf32>,
    %49 = vector.extract_strided_slice %45 {offsets = [0, 1, 0], sizes = [16, 16, 32], strides = [1, 1, 1]} : vector<18x18x32xf32> to vector<16x16x32xf32>
    %50 = vector.shape_cast %49 : vector<16x16x32xf32> to vector<256x32xf32>
    %c0_41 = arith.constant 0 : index
    %c32 = arith.constant 32 : index
    %51 = vector.load %arg13[%c0_41, %c32] : memref<256x288xf32, #tpu.memory_space<vmem>>, vector<256x32xf32>
    tpu.vector_store %arg13[%c0_41, %c32], %50 {strides = array<i32>} : memref<256x288xf32, #tpu.memory_space<vmem>>, vector<256x32xf32>,
    %52 = vector.extract_strided_slice %45 {offsets = [0, 2, 0], sizes = [16, 16, 32], strides = [1, 1, 1]} : vector<18x18x32xf32> to vector<16x16x32xf32>
    %53 = vector.shape_cast %52 : vector<16x16x32xf32> to vector<256x32xf32>
    %c0_42 = arith.constant 0 : index
    %c64 = arith.constant 64 : index
    %54 = vector.load %arg13[%c0_42, %c64] : memref<256x288xf32, #tpu.memory_space<vmem>>, vector<256x32xf32>
    tpu.vector_store %arg13[%c0_42, %c64], %53 {strides = array<i32>} : memref<256x288xf32, #tpu.memory_space<vmem>>, vector<256x32xf32>,
    %55 = vector.extract_strided_slice %45 {offsets = [1, 0, 0], sizes = [16, 16, 32], strides = [1, 1, 1]} : vector<18x18x32xf32> to vector<16x16x32xf32>
    %56 = vector.shape_cast %55 : vector<16x16x32xf32> to vector<256x32xf32>
    %c0_43 = arith.constant 0 : index
    %c96 = arith.constant 96 : index
    %57 = vector.load %arg13[%c0_43, %c96] : memref<256x288xf32, #tpu.memory_space<vmem>>, vector<256x32xf32>
    tpu.vector_store %arg13[%c0_43, %c96], %56 {strides = array<i32>} : memref<256x288xf32, #tpu.memory_space<vmem>>, vector<256x32xf32>,
    %58 = vector.extract_strided_slice %45 {offsets = [1, 1, 0], sizes = [16, 16, 32], strides = [1, 1, 1]} : vector<18x18x32xf32> to vector<16x16x32xf32>
    %59 = vector.shape_cast %58 : vector<16x16x32xf32> to vector<256x32xf32>
    %c0_44 = arith.constant 0 : index
    %c128 = arith.constant 128 : index
    %60 = vector.load %arg13[%c0_44, %c128] : memref<256x288xf32, #tpu.memory_space<vmem>>, vector<256x32xf32>
    tpu.vector_store %arg13[%c0_44, %c128], %59 {strides = array<i32>} : memref<256x288xf32, #tpu.memory_space<vmem>>, vector<256x32xf32>,
    %61 = vector.extract_strided_slice %45 {offsets = [1, 2, 0], sizes = [16, 16, 32], strides = [1, 1, 1]} : vector<18x18x32xf32> to vector<16x16x32xf32>
    %62 = vector.shape_cast %61 : vector<16x16x32xf32> to vector<256x32xf32>
    %c0_45 = arith.constant 0 : index
    %c160 = arith.constant 160 : index
    %63 = vector.load %arg13[%c0_45, %c160] : memref<256x288xf32, #tpu.memory_space<vmem>>, vector<256x32xf32>
    tpu.vector_store %arg13[%c0_45, %c160], %62 {strides = array<i32>} : memref<256x288xf32, #tpu.memory_space<vmem>>, vector<256x32xf32>,
    %64 = vector.extract_strided_slice %45 {offsets = [2, 0, 0], sizes = [16, 16, 32], strides = [1, 1, 1]} : vector<18x18x32xf32> to vector<16x16x32xf32>
    %65 = vector.shape_cast %64 : vector<16x16x32xf32> to vector<256x32xf32>
    %c0_46 = arith.constant 0 : index
    %c192 = arith.constant 192 : index
    %66 = vector.load %arg13[%c0_46, %c192] : memref<256x288xf32, #tpu.memory_space<vmem>>, vector<256x32xf32>
    tpu.vector_store %arg13[%c0_46, %c192], %65 {strides = array<i32>} : memref<256x288xf32, #tpu.memory_space<vmem>>, vector<256x32xf32>,
    %67 = vector.extract_strided_slice %45 {offsets = [2, 1, 0], sizes = [16, 16, 32], strides = [1, 1, 1]} : vector<18x18x32xf32> to vector<16x16x32xf32>
    %68 = vector.shape_cast %67 : vector<16x16x32xf32> to vector<256x32xf32>
    %c0_47 = arith.constant 0 : index
    %c224 = arith.constant 224 : index
    %69 = vector.load %arg13[%c0_47, %c224] : memref<256x288xf32, #tpu.memory_space<vmem>>, vector<256x32xf32>
    tpu.vector_store %arg13[%c0_47, %c224], %68 {strides = array<i32>} : memref<256x288xf32, #tpu.memory_space<vmem>>, vector<256x32xf32>,
    %70 = vector.extract_strided_slice %45 {offsets = [2, 2, 0], sizes = [16, 16, 32], strides = [1, 1, 1]} : vector<18x18x32xf32> to vector<16x16x32xf32>
    %71 = vector.shape_cast %70 : vector<16x16x32xf32> to vector<256x32xf32>
    %c0_48 = arith.constant 0 : index
    %c256 = arith.constant 256 : index
    %72 = vector.load %arg13[%c0_48, %c256] : memref<256x288xf32, #tpu.memory_space<vmem>>, vector<256x32xf32>
    tpu.vector_store %arg13[%c0_48, %c256], %71 {strides = array<i32>} : memref<256x288xf32, #tpu.memory_space<vmem>>, vector<256x32xf32>,
    %c0_49 = arith.constant 0 : index
    %c0_50 = arith.constant 0 : index
    %73 = vector.load %arg13[%c0_49, %c0_50] : memref<256x288xf32, #tpu.memory_space<vmem>>, vector<256x288xf32>
    %c0_51 = arith.constant 0 : index
    %c0_52 = arith.constant 0 : index
    %74 = vector.load %arg4[%c0_51, %c0_52] : memref<288x64xf32, #tpu.memory_space<vmem>>, vector<288x64xf32>
    %cst_53 = arith.constant dense<0.000000e+00> : vector<256x64xf32>
    %75 = tpu.matmul %73, %74, %cst_53 {dimension_numbers = #tpu.dot_dimension_numbers<[1], [0], [0], [1], [0, 0, 1, 1], [], []>} : vector<256x288xf32>, vector<288x64xf32>, vector<256x64xf32> -> vector<256x64xf32>
    %c0_54 = arith.constant 0 : index
    %c0_55 = arith.constant 0 : index
    %76 = vector.load %arg5[%c0_54, %c0_55] : memref<1x64xf32, #tpu.memory_space<vmem>>, vector<1x64xf32>
    %77 = vector.broadcast %76 : vector<1x64xf32> to vector<256x64xf32>
    %78 = arith.addf %75, %77 : vector<256x64xf32>
    %cst_56 = arith.constant 0.000000e+00 : f32
    %79 = vector.broadcast %cst_56 : f32 to vector<256x64xf32>
    %80 = arith.maximumf %78, %79 : vector<256x64xf32>
    %cst_57 = arith.constant 0.000000e+00 : f32
    %81 = vector.broadcast %cst_57 : f32 to vector<18x18x64xf32>
    %c0_58 = arith.constant 0 : index
    %c0_59 = arith.constant 0 : index
    %c0_60 = arith.constant 0 : index
    %82 = vector.load %arg11[%c0_58, %c0_59, %c0_60] : memref<18x18x64xf32, #tpu.memory_space<vmem>>, vector<18x18x64xf32>
    tpu.vector_store %arg11[%c0_58, %c0_59, %c0_60], %81 {strides = array<i32>} : memref<18x18x64xf32, #tpu.memory_space<vmem>>, vector<18x18x64xf32>,
    %83 = vector.shape_cast %80 : vector<256x64xf32> to vector<16x16x64xf32>
    %c1_61 = arith.constant 1 : index
    %c1_62 = arith.constant 1 : index
    %c0_63 = arith.constant 0 : index
    %84 = vector.load %arg11[%c1_61, %c1_62, %c0_63] : memref<18x18x64xf32, #tpu.memory_space<vmem>>, vector<16x16x64xf32>
    tpu.vector_store %arg11[%c1_61, %c1_62, %c0_63], %83 {strides = array<i32>} : memref<18x18x64xf32, #tpu.memory_space<vmem>>, vector<16x16x64xf32>,
    %c0_64 = arith.constant 0 : index
    %c0_65 = arith.constant 0 : index
    %c0_66 = arith.constant 0 : index
    %85 = vector.load %arg11[%c0_64, %c0_65, %c0_66] : memref<18x18x64xf32, #tpu.memory_space<vmem>>, vector<18x18x64xf32>
    %86 = vector.extract_strided_slice %85 {offsets = [0, 0, 0], sizes = [16, 16, 64], strides = [1, 1, 1]} : vector<18x18x64xf32> to vector<16x16x64xf32>
    %87 = vector.shape_cast %86 : vector<16x16x64xf32> to vector<256x64xf32>
    %c0_67 = arith.constant 0 : index
    %c0_68 = arith.constant 0 : index
    %88 = vector.load %arg14[%c0_67, %c0_68] : memref<256x576xf32, #tpu.memory_space<vmem>>, vector<256x64xf32>
    tpu.vector_store %arg14[%c0_67, %c0_68], %87 {strides = array<i32>} : memref<256x576xf32, #tpu.memory_space<vmem>>, vector<256x64xf32>,
    %89 = vector.extract_strided_slice %85 {offsets = [0, 1, 0], sizes = [16, 16, 64], strides = [1, 1, 1]} : vector<18x18x64xf32> to vector<16x16x64xf32>
    %90 = vector.shape_cast %89 : vector<16x16x64xf32> to vector<256x64xf32>
    %c0_69 = arith.constant 0 : index
    %c64_70 = arith.constant 64 : index
    %91 = vector.load %arg14[%c0_69, %c64_70] : memref<256x576xf32, #tpu.memory_space<vmem>>, vector<256x64xf32>
    tpu.vector_store %arg14[%c0_69, %c64_70], %90 {strides = array<i32>} : memref<256x576xf32, #tpu.memory_space<vmem>>, vector<256x64xf32>,
    %92 = vector.extract_strided_slice %85 {offsets = [0, 2, 0], sizes = [16, 16, 64], strides = [1, 1, 1]} : vector<18x18x64xf32> to vector<16x16x64xf32>
    %93 = vector.shape_cast %92 : vector<16x16x64xf32> to vector<256x64xf32>
    %c0_71 = arith.constant 0 : index
    %c128_72 = arith.constant 128 : index
    %94 = vector.load %arg14[%c0_71, %c128_72] : memref<256x576xf32, #tpu.memory_space<vmem>>, vector<256x64xf32>
    tpu.vector_store %arg14[%c0_71, %c128_72], %93 {strides = array<i32>} : memref<256x576xf32, #tpu.memory_space<vmem>>, vector<256x64xf32>,
    %95 = vector.extract_strided_slice %85 {offsets = [1, 0, 0], sizes = [16, 16, 64], strides = [1, 1, 1]} : vector<18x18x64xf32> to vector<16x16x64xf32>
    %96 = vector.shape_cast %95 : vector<16x16x64xf32> to vector<256x64xf32>
    %c0_73 = arith.constant 0 : index
    %c192_74 = arith.constant 192 : index
    %97 = vector.load %arg14[%c0_73, %c192_74] : memref<256x576xf32, #tpu.memory_space<vmem>>, vector<256x64xf32>
    tpu.vector_store %arg14[%c0_73, %c192_74], %96 {strides = array<i32>} : memref<256x576xf32, #tpu.memory_space<vmem>>, vector<256x64xf32>,
    %98 = vector.extract_strided_slice %85 {offsets = [1, 1, 0], sizes = [16, 16, 64], strides = [1, 1, 1]} : vector<18x18x64xf32> to vector<16x16x64xf32>
    %99 = vector.shape_cast %98 : vector<16x16x64xf32> to vector<256x64xf32>
    %c0_75 = arith.constant 0 : index
    %c256_76 = arith.constant 256 : index
    %100 = vector.load %arg14[%c0_75, %c256_76] : memref<256x576xf32, #tpu.memory_space<vmem>>, vector<256x64xf32>
    tpu.vector_store %arg14[%c0_75, %c256_76], %99 {strides = array<i32>} : memref<256x576xf32, #tpu.memory_space<vmem>>, vector<256x64xf32>,
    %101 = vector.extract_strided_slice %85 {offsets = [1, 2, 0], sizes = [16, 16, 64], strides = [1, 1, 1]} : vector<18x18x64xf32> to vector<16x16x64xf32>
    %102 = vector.shape_cast %101 : vector<16x16x64xf32> to vector<256x64xf32>
    %c0_77 = arith.constant 0 : index
    %c320 = arith.constant 320 : index
    %103 = vector.load %arg14[%c0_77, %c320] : memref<256x576xf32, #tpu.memory_space<vmem>>, vector<256x64xf32>
    tpu.vector_store %arg14[%c0_77, %c320], %102 {strides = array<i32>} : memref<256x576xf32, #tpu.memory_space<vmem>>, vector<256x64xf32>,
    %104 = vector.extract_strided_slice %85 {offsets = [2, 0, 0], sizes = [16, 16, 64], strides = [1, 1, 1]} : vector<18x18x64xf32> to vector<16x16x64xf32>
    %105 = vector.shape_cast %104 : vector<16x16x64xf32> to vector<256x64xf32>
    %c0_78 = arith.constant 0 : index
    %c384 = arith.constant 384 : index
    %106 = vector.load %arg14[%c0_78, %c384] : memref<256x576xf32, #tpu.memory_space<vmem>>, vector<256x64xf32>
    tpu.vector_store %arg14[%c0_78, %c384], %105 {strides = array<i32>} : memref<256x576xf32, #tpu.memory_space<vmem>>, vector<256x64xf32>,
    %107 = vector.extract_strided_slice %85 {offsets = [2, 1, 0], sizes = [16, 16, 64], strides = [1, 1, 1]} : vector<18x18x64xf32> to vector<16x16x64xf32>
    %108 = vector.shape_cast %107 : vector<16x16x64xf32> to vector<256x64xf32>
    %c0_79 = arith.constant 0 : index
    %c448 = arith.constant 448 : index
    %109 = vector.load %arg14[%c0_79, %c448] : memref<256x576xf32, #tpu.memory_space<vmem>>, vector<256x64xf32>
    tpu.vector_store %arg14[%c0_79, %c448], %108 {strides = array<i32>} : memref<256x576xf32, #tpu.memory_space<vmem>>, vector<256x64xf32>,
    %110 = vector.extract_strided_slice %85 {offsets = [2, 2, 0], sizes = [16, 16, 64], strides = [1, 1, 1]} : vector<18x18x64xf32> to vector<16x16x64xf32>
    %111 = vector.shape_cast %110 : vector<16x16x64xf32> to vector<256x64xf32>
    %c0_80 = arith.constant 0 : index
    %c512 = arith.constant 512 : index
    %112 = vector.load %arg14[%c0_80, %c512] : memref<256x576xf32, #tpu.memory_space<vmem>>, vector<256x64xf32>
    tpu.vector_store %arg14[%c0_80, %c512], %111 {strides = array<i32>} : memref<256x576xf32, #tpu.memory_space<vmem>>, vector<256x64xf32>,
    %c0_81 = arith.constant 0 : index
    %c0_82 = arith.constant 0 : index
    %113 = vector.load %arg14[%c0_81, %c0_82] : memref<256x576xf32, #tpu.memory_space<vmem>>, vector<256x576xf32>
    %c0_83 = arith.constant 0 : index
    %c0_84 = arith.constant 0 : index
    %114 = vector.load %arg6[%c0_83, %c0_84] : memref<576x128xf32, #tpu.memory_space<vmem>>, vector<576x128xf32>
    %cst_85 = arith.constant dense<0.000000e+00> : vector<256x128xf32>
    %115 = tpu.matmul %113, %114, %cst_85 {dimension_numbers = #tpu.dot_dimension_numbers<[1], [0], [0], [1], [0, 0, 1, 1], [], []>} : vector<256x576xf32>, vector<576x128xf32>, vector<256x128xf32> -> vector<256x128xf32>
    %c0_86 = arith.constant 0 : index
    %c0_87 = arith.constant 0 : index
    %116 = vector.load %arg7[%c0_86, %c0_87] : memref<1x128xf32, #tpu.memory_space<vmem>>, vector<1x128xf32>
    %117 = vector.broadcast %116 : vector<1x128xf32> to vector<256x128xf32>
    %118 = arith.addf %115, %117 : vector<256x128xf32>
    %119 = vector.shape_cast %118 : vector<256x128xf32> to vector<1x256x128xf32>
    %c0_88 = arith.constant 0 : index
    %c0_89 = arith.constant 0 : index
    %c0_90 = arith.constant 0 : index
    %120 = vector.load %arg8[%c0_88, %c0_89, %c0_90] : memref<1x256x128xf32, #tpu.memory_space<vmem>>, vector<1x256x128xf32>
    tpu.vector_store %arg8[%c0_88, %c0_89, %c0_90], %119 {strides = array<i32>} : memref<1x256x128xf32, #tpu.memory_space<vmem>>, vector<1x256x128xf32>,
    return
  }
  func.func @transform_0(%arg0: i32) -> (i32, i32, i32, i32) {
    %c0_i32 = arith.constant 0 : i32
    %c0_i32_0 = arith.constant 0 : i32
    %c0_i32_1 = arith.constant 0 : i32
    %c0_i32_2 = arith.constant 0 : i32
    return %arg0, %c0_i32, %c0_i32_0, %c0_i32_1 : i32, i32, i32, i32
  }
  func.func @transform_1(%arg0: i32) -> (i32, i32) {
    %c0_i32 = arith.constant 0 : i32
    %c0_i32_0 = arith.constant 0 : i32
    %c0_i32_1 = arith.constant 0 : i32
    return %c0_i32, %c0_i32_0 : i32, i32
  }
  func.func @transform_2(%arg0: i32) -> (i32, i32) {
    %c0_i32 = arith.constant 0 : i32
    %c0_i32_0 = arith.constant 0 : i32
    %c0_i32_1 = arith.constant 0 : i32
    return %c0_i32, %c0_i32_0 : i32, i32
  }
  func.func @transform_3(%arg0: i32) -> (i32, i32) {
    %c0_i32 = arith.constant 0 : i32
    %c0_i32_0 = arith.constant 0 : i32
    %c0_i32_1 = arith.constant 0 : i32
    return %c0_i32, %c0_i32_0 : i32, i32
  }
  func.func @transform_4(%arg0: i32) -> (i32, i32) {
    %c0_i32 = arith.constant 0 : i32
    %c0_i32_0 = arith.constant 0 : i32
    %c0_i32_1 = arith.constant 0 : i32
    return %c0_i32, %c0_i32_0 : i32, i32
  }
  func.func @transform_5(%arg0: i32) -> (i32, i32) {
    %c0_i32 = arith.constant 0 : i32
    %c0_i32_0 = arith.constant 0 : i32
    %c0_i32_1 = arith.constant 0 : i32
    return %c0_i32, %c0_i32_0 : i32, i32
  }
  func.func @transform_6(%arg0: i32) -> (i32, i32) {
    %c0_i32 = arith.constant 0 : i32
    %c0_i32_0 = arith.constant 0 : i32
    %c0_i32_1 = arith.constant 0 : i32
    return %c0_i32, %c0_i32_0 : i32, i32
  }
  func.func @transform_7(%arg0: i32) -> (i32, i32, i32) {
    %c0_i32 = arith.constant 0 : i32
    %c0_i32_0 = arith.constant 0 : i32
    %c0_i32_1 = arith.constant 0 : i32
    return %arg0, %c0_i32, %c0_i32_0 : i32, i32, i32
  }
}

</mosaic_0001>

<bundles_post_ra>
// kernel: gradient_cnn_forward.1
= control target key start
LH: loop header
LB: loop body
LE: loop exit
PB: predicated region body
PF: predicated region fallthrough
CT: control target
= control target key end

     0   :  { %s7090_s24 = smov 0   ;;  %s11381_s0 = inlined_call_operand.vmem [shape: f32[2,16,16,3], index: 0, kind: input, shape index: {}]   ;;  %s11382_s1 = inlined_call_operand.vmem [shape: f32[27,32], index: 1, kind: input, shape index: {}]   ;;  %s11383_s2 = inlined_call_operand.vmem [shape: f32[1,32], index: 2, kind: input, shape index: {}]   ;;  %s11384_s3 = inlined_call_operand.vmem [shape: f32[288,64], index: 3, kind: input, shape index: {}]   ;;  %s11385_s4 = inlined_call_operand.vmem [shape: f32[1,64], index: 4, kind: input, shape index: {}]   ;;  %s11386_s5 = inlined_call_operand.vmem [shape: f32[576,128], index: 5, kind: input, shape index: {}]   ;;  %s11387_s6 = inlined_call_operand.vmem [shape: f32[1,128], index: 6, kind: input, shape index: {}]   ;;  %s11388_s7 = inlined_call_operand.vmem [shape: f32[2,256,128], index: 7, kind: output, shape index: {}]  }
   0x1 LB: > { %s6311_s25 = sadd.s32 4294967295, %s7034_s24   ;;  %p6315_p0 = scmp.ge.s32.totalorder %s7034_s24, 1  ;;  %s7034_s24 = sphi %s7090_s24, %s17_s24  }
   0x2   : > { %p237_p1 = scmp.lt.s32.totalorder %s7034_s24, 3 }
   0x4   : > { %p238_p2 = pnand %p6315_p0, %p237_p1 }
   0x5   : > { %vm279_vm0 = vcmask (!%p238_p2), 23552   ;;  %v7036_v0 = vmov (!%p238_p2), 0.0   ;;  %vm282_vm1 = vcmask (!%p238_p2), 17408   ;;  %p7172_p3 = scmp.lt.s32.totalorder (!%p238_p2), %s6311_s25, 1  ;;  %vm744_vm2 = vcmask (!%p238_p2), 1045504   ;;  %s7037_s8 = smov (!%p238_p2), 6  }
   0x6   : > { %241 = sbr.rel (%p238_p2) target bundleno = 1710 (0x6ae), region = 48  ;;  %280 = vst.msk [vmem:[#allocation2] sm:$0xff] (!%p238_p2), %vm279_vm0, %v7036_v0  ;;  %281 = vst.msk [vmem:[#allocation2 + $0x8] sm:$0xff] (!%p238_p2), %vm279_vm0, %v7036_v0  ;;  %vm534_vm3 = vcmask (!%p238_p2), 1046528   ;;  %s7038_s9 = smov (!%p238_p2), 3   ;;  %v1786_v58 = vld [vmem:[%s11382_s1] sm:$0xff] (!%p238_p2) }
   0x7   : > { %284 = vst.msk [vmem:[#allocation2 + $0x18] sm:$0xff] (!%p238_p2), %vm279_vm0, %v7036_v0  ;;  %285 = vst.msk [vmem:[#allocation2 + $0x20] sm:$0xff] (!%p238_p2), %vm279_vm0, %v7036_v0  ;;  %s7039_s10 = smov (!%p238_p2), 9   ;;  %s7040_s11 = smov (!%p238_p2), 12   ;;  %v1787_v59 = vld [vmem:[%s11382_s1 + $0x8] sm:$0xff] (!%p238_p2)  ;;  %v1788_v62 = vld [vmem:[%s11382_s1 + $0x10] sm:$0xff] (!%p238_p2) }
   0x8   : > { %287 = vst.msk [vmem:[#allocation2 + $0x30] sm:$0xff] (!%p238_p2), %vm279_vm0, %v7036_v0  ;;  %288 = vst.msk [vmem:[#allocation2 + $0x38] sm:$0xff] (!%p238_p2), %vm279_vm0, %v7036_v0  ;;  %s7041_s12 = smov (!%p238_p2), 15   ;;  %s7042_s13 = smov (!%p238_p2), 18   ;;  %v6712_v60 = vpack.c.bf16 (!%p238_p2), %v1787_v59, %v1786_v58  ;;  %v1789_v63 = vld [vmem:[%s11382_s1 + $0x18] sm:$0x7] (!%p238_p2) }
   0x9   : > { %290 = vst.msk [vmem:[#allocation2 + $0x48] sm:$0xff] (!%p238_p2), %vm279_vm0, %v7036_v0  ;;  %291 = vst.msk [vmem:[#allocation2 + $0x50] sm:$0xff] (!%p238_p2), %vm279_vm0, %v7036_v0  ;;  %s7043_s18 = smov (!%p238_p2), 21   ;;  %vm1894_vm4 = vcmask (!%p238_p2), 1042432   ;;  %vm7044_vm5 = vmmov (!%p238_p2), 1   ;;  %s7045_s23 = smov (!%p238_p2), 24  }
   0xa   : > { %293 = vst.msk [vmem:[#allocation2 + $0x60] sm:$0xff] (!%p238_p2), %vm279_vm0, %v7036_v0  ;;  %294 = vst.msk [vmem:[#allocation2 + $0x68] sm:$0xff] (!%p238_p2), %vm279_vm0, %v7036_v0  ;;  %6713 = vmatprep.subr.bf16.mxu0 (!%p238_p2), %v6712_v60  ;;  %vm711_vm7 = vcmask (!%p238_p2), 48152   ;;  %vm921_vm8 = vcmask (!%p238_p2), 72752   ;;  %vm1052_vm9 = vcmask (!%p238_p2), 97352   ;;  %vm1187_vm10 = vcmask (!%p238_p2), 121952  }
   0xb   : > { %296 = vst.msk [vmem:[#allocation2 + $0x78] sm:$0xff] (!%p238_p2), %vm279_vm0, %v7036_v0  ;;  %297 = vst.msk [vmem:[#allocation2 + $0x80] sm:$0xff] (!%p238_p2), %vm279_vm0, %v7036_v0  ;;  %6715 = vmatpush3.bf16.msra.mxu0 (!%p238_p2), %v6712_v60  ;;  %vm1321_vm11 = vcmask (!%p238_p2), 146552   ;;  %vm1452_vm12 = vcmask (!%p238_p2), 171152   ;;  %vm1587_vm13 = vcmask (!%p238_p2), 195752   ;;  %vm1721_vm14 = vcmask (!%p238_p2), 220352  }
   0xc   : > { %299 = vst.msk [vmem:[#allocation2 + $0x90] sm:$0xff] (!%p238_p2), %vm279_vm0, %v7036_v0  ;;  %300 = vst.msk [vmem:[#allocation2 + $0x98] sm:$0xff] (!%p238_p2), %vm279_vm0, %v7036_v0  ;;  %vm1797_vm15 = vcmask (!%p238_p2), 220160   ;;  %s7049_s29 = smov (!%p238_p2), 96  }
   0xd   : > { %302 = vst.msk [vmem:[#allocation2 + $0xa8] sm:$0xff] %vm279_vm0, %v7036_v0  ;;  %303 = vst.msk [vmem:[#allocation2 + $0xb0] sm:$0xff] %vm279_vm0, %v7036_v0  ;;  %s11391_s25 = smov (!%p7172_p3, %s6311_s25), 1  ;;  %v400_v4 = vld [vmem:[#allocation2] sm:$0xff]  ;;  %v401_v5 = vld [vmem:[#allocation2 + $0x8] sm:$0xff] }
   0xe   : > { %305 = vst.msk [vmem:[#allocation2 + $0xc0] sm:$0xff] %vm279_vm0, %v7036_v0  ;;  %306 = vst.msk [vmem:[#allocation2 + $0xc8] sm:$0xff] %vm279_vm0, %v7036_v0  ;;  %s6422_s27 = sshll.u32 %s11391_s25, 8  ;;  %v745_v7 = vrot.slane %v400_v4, 2  ;;  %v746_v8 = vrot.slane %v401_v5, 2  ;;  %v535_v9 = vrot.slane %v400_v4, 1 }
   0xf   : > { %308 = vst.msk [vmem:[#allocation2 + $0xd8] sm:$0xff] %vm279_vm0, %v7036_v0  ;;  %309 = vst.msk [vmem:[#allocation2 + $0xe0] sm:$0xff] %vm279_vm0, %v7036_v0  ;;  %s7224_s30 = scalar_lea.vmem %s11381_s0, %s6422_s27  ;;  %v536_v10 = vrot.slane %v401_v5, 1  ;;  %s11301_s20 = scalar_lea.vmem %s11388_s7, %s6422_s27 }
  0x10   : > { %311 = vst.msk [vmem:[#allocation2 + $0xf0] sm:$0xff] %vm279_vm0, %v7036_v0  ;;  %312 = vst.msk [vmem:[#allocation2 + $0xf8] sm:$0xff] %vm279_vm0, %v7036_v0  ;;  %v335_v1 = vld [vmem:[%s7224_s30] sm:$0xff]  ;;  %v336_v2 = vld [vmem:[%s7224_s30 + $0x8] sm:$0xff]  ;;  %v747_v16 = vsel %vm744_vm2, %v745_v7, %v746_v8 }
  0x11   : > { %314 = vst.msk [vmem:[#allocation2 + $0x108] sm:$0xff] %vm279_vm0, %v7036_v0  ;;  %315 = vst.msk [vmem:[#allocation2 + $0x110] sm:$0xff] %vm279_vm0, %v7036_v0  ;;  %v337_v3 = vld [vmem:[%s7224_s30 + $0x10] sm:$0xff]  ;;  %v338_v6 = vld [vmem:[%s7224_s30 + $0x18] sm:$0xff]  ;;  %v537_v17 = vsel %vm534_vm3, %v535_v9, %v536_v10  ;;  %825 = vrot.lane.b32.xlu1 %v747_v16, %s7037_s8 }
  0x12   : > { %317 = vst.msk [vmem:[#allocation2 + $0x120] sm:$0xff] %vm279_vm0, %v7036_v0  ;;  %318 = vst.msk [vmem:[#allocation2 + $0x128] sm:$0xff] %vm279_vm0, %v7036_v0  ;;  %v339_v13 = vld [vmem:[%s7224_s30 + $0x20] sm:$0xff]  ;;  %v340_v14 = vld [vmem:[%s7224_s30 + $0x28] sm:$0xff]  ;;  %615 = vrot.lane.b32.xlu0 %v537_v17, %s7038_s9 }
  0x13   : > { %320 = vst.msk [vmem:[#allocation2 + $0x138] sm:$0xff] %vm279_vm0, %v7036_v0  ;;  %321 = vst.msk [vmem:[#allocation2 + $0x140] sm:$0xff] %vm279_vm0, %v7036_v0  ;;  %v341_v15 = vld [vmem:[%s7224_s30 + $0x30] sm:$0xff]  ;;  %v342_v18 = vld [vmem:[%s7224_s30 + $0x38] sm:$0xff] }
  0x14   : > { %323 = vst.msk [vmem:[#allocation2 + $0x150] sm:$0xff] %vm279_vm0, %v7036_v0  ;;  %324 = vst.msk [vmem:[#allocation2 + $0x158] sm:$0xff] %vm279_vm0, %v7036_v0  ;;  %v343_v19 = vld [vmem:[%s7224_s30 + $0x40] sm:$0xff]  ;;  %v344_v20 = vld [vmem:[%s7224_s30 + $0x48] sm:$0xff] }
  0x15   : > { %326 = vst.msk [vmem:[#allocation2 + $0x168] sm:$0xff] %vm279_vm0, %v7036_v0  ;;  %327 = vst.msk [vmem:[#allocation2 + $0x170] sm:$0xff] %vm279_vm0, %v7036_v0  ;;  %v345_v47 = vld [vmem:[%s7224_s30 + $0x50] sm:$0xff]  ;;  %v346_v48 = vld [vmem:[%s7224_s30 + $0x58] sm:$0xff] }
  0x16   : > { %329 = vst.msk [vmem:[#allocation2 + $0x180] sm:$0xff] %vm279_vm0, %v7036_v0  ;;  %330 = vst.msk [vmem:[#allocation2 + $0x188] sm:$0xff] %vm279_vm0, %v7036_v0 }
  0x17   : > { %332 = vst.msk [vmem:[#allocation2 + $0x198] sm:$0xff] %vm279_vm0, %v7036_v0  ;;  %333 = vst.msk [vmem:[#allocation2 + $0x1a0] sm:$0xff] %vm279_vm0, %v7036_v0 }
  0x18   : > { %283 = vst.msk [vmem:[#allocation2 + $0x10] sm:$0x3] %vm282_vm1, %v7036_v0  ;;  %286 = vst.msk [vmem:[#allocation2 + $0x28] sm:$0x3] %vm282_vm1, %v7036_v0 }
  0x19   : > { %289 = vst.msk [vmem:[#allocation2 + $0x40] sm:$0x3] %vm282_vm1, %v7036_v0  ;;  %292 = vst.msk [vmem:[#allocation2 + $0x58] sm:$0x3] %vm282_vm1, %v7036_v0 }
  0x1a   : > { %295 = vst.msk [vmem:[#allocation2 + $0x70] sm:$0x3] %vm282_vm1, %v7036_v0  ;;  %298 = vst.msk [vmem:[#allocation2 + $0x88] sm:$0x3] %vm282_vm1, %v7036_v0 }
  0x1b   : > { %301 = vst.msk [vmem:[#allocation2 + $0xa0] sm:$0x3] %vm282_vm1, %v7036_v0  ;;  %304 = vst.msk [vmem:[#allocation2 + $0xb8] sm:$0x3] %vm282_vm1, %v7036_v0 }
  0x1c   : > { %307 = vst.msk [vmem:[#allocation2 + $0xd0] sm:$0x3] %vm282_vm1, %v7036_v0  ;;  %310 = vst.msk [vmem:[#allocation2 + $0xe8] sm:$0x3] %vm282_vm1, %v7036_v0 }
  0x1d   : > { %313 = vst.msk [vmem:[#allocation2 + $0x100] sm:$0x3] %vm282_vm1, %v7036_v0  ;;  %316 = vst.msk [vmem:[#allocation2 + $0x118] sm:$0x3] %vm282_vm1, %v7036_v0 }
  0x1e   : > { %319 = vst.msk [vmem:[#allocation2 + $0x130] sm:$0x3] %vm282_vm1, %v7036_v0  ;;  %322 = vst.msk [vmem:[#allocation2 + $0x148] sm:$0x3] %vm282_vm1, %v7036_v0 }
  0x1f   : > { %325 = vst.msk [vmem:[#allocation2 + $0x160] sm:$0x3] %vm282_vm1, %v7036_v0  ;;  %328 = vst.msk [vmem:[#allocation2 + $0x178] sm:$0x3] %vm282_vm1, %v7036_v0  ;;  %v402_v11 = vld [vmem:[#allocation2 + $0x10] sm:$0x3] }
  0x20   : > { %331 = vst.msk [vmem:[#allocation2 + $0x190] sm:$0x3] %vm282_vm1, %v7036_v0  ;;  %334 = vst.msk [vmem:[#allocation2 + $0x1a8] sm:$0x3] %vm282_vm1, %v7036_v0  ;;  %v538_v12 = vrot.slane %v402_v11, 1  ;;  %v748_v22 = vrot.slane %v402_v11, 2 }
  0x21   : > { %368 = vst.msk [vmem:[#allocation2 + $0x19] sm:$0xff] %vm279_vm0, %v335_v1  ;;  %369 = vst.msk [vmem:[#allocation2 + $0x21] sm:$0xff] %vm279_vm0, %v336_v2  ;;  %v6716_v2 = vpack.c.bf16 %v1789_v63, %v1788_v62  ;;  %vm2155_vm1 = vcmask 261120  }
  0x22   : > { %370 = vst.msk [vmem:[#allocation2 + $0x31] sm:$0xff] %vm279_vm0, %v337_v3  ;;  %454 = vst.msk [vmem:[#allocation5] sm:$0xff] %vm279_vm0, %v400_v4  ;;  %v539_v21 = vsel %vm534_vm3, %v536_v10, %v538_v12  ;;  %v749_v30 = vsel %vm744_vm2, %v746_v8, %v748_v22  ;;  %v347_v3 = vld [vmem:[%s7224_s30 + $0x60] sm:$0xff]  ;;  %v348_v4 = vld [vmem:[%s7224_s30 + $0x68] sm:$0xff] }
  0x23   : > { %455 = vst.msk [vmem:[#allocation5 + $0x8] sm:$0xff] %vm279_vm0, %v401_v5  ;;  %371 = vst.msk [vmem:[#allocation2 + $0x39] sm:$0xff] %vm279_vm0, %v338_v6  ;;  %617 = vrot.lane.b32.xlu0 %v539_v21, %s7038_s9 }
  0x24   : > { %372 = vst.msk [vmem:[#allocation2 + $0x49] sm:$0xff] %vm279_vm0, %v339_v13  ;;  %373 = vst.msk [vmem:[#allocation2 + $0x51] sm:$0xff] %vm279_vm0, %v340_v14 }
  0x25   : > { %374 = vst.msk [vmem:[#allocation2 + $0x61] sm:$0xff] %vm279_vm0, %v341_v15  ;;  %375 = vst.msk [vmem:[#allocation2 + $0x69] sm:$0xff] %vm279_vm0, %v342_v18  ;;  %v349_v18 = vld [vmem:[%s7224_s30 + $0x70] sm:$0xff] }
  0x26   : > { %376 = vst.msk [vmem:[#allocation2 + $0x79] sm:$0xff] %vm279_vm0, %v343_v19  ;;  %377 = vst.msk [vmem:[#allocation2 + $0x81] sm:$0xff] %vm279_vm0, %v344_v20  ;;  %v350_v19 = vld [vmem:[%s7224_s30 + $0x78] sm:$0xff] }
  0x27   : > { %827 = vrot.lane.b32.xlu0 %v749_v30, %s7037_s8  ;;  %378 = vst.msk [vmem:[#allocation2 + $0x91] sm:$0xff] %vm279_vm0, %v345_v47  ;;  %379 = vst.msk [vmem:[#allocation2 + $0x99] sm:$0xff] %vm279_vm0, %v346_v48 }
  0x28   : > { %v403_v23 = vld [vmem:[#allocation2 + $0x18] sm:$0xff]  ;;  %v7253_v24 = vld [vmem:[#allocation2 + $0x20] sm:$0xff]  ;;  %v405_v29 = vld [vmem:[#allocation2 + $0x28] sm:$0x3]  ;;  %380 = vst.msk [vmem:[#allocation2 + $0xa9] sm:$0xff] %vm279_vm0, %v347_v3 }
  0x29   : > { %v7255_v25 = vld [vmem:[#allocation2 + $0x30] sm:$0xff]  ;;  %956 = vrot.lane.b32.xlu1 %v403_v23, %s7039_s10  ;;  %456 = vst.msk [vmem:[#allocation5 + $0x10] sm:$0xff] %vm279_vm0, %v403_v23  ;;  %v540_v26 = vrot.slane %v403_v23, 1  ;;  %v541_v27 = vrot.slane %v7253_v24, 1  ;;  %457 = vst.msk [vmem:[#allocation5 + $0x18] sm:$0xff] %vm279_vm0, %v7253_v24  ;;  %v543_v33 = vrot.slane %v405_v29, 1 }
  0x2a   : > { %v7263_v28 = vld [vmem:[#allocation2 + $0x38] sm:$0xff]  ;;  %458 = vst.msk [vmem:[#allocation5 + $0x20] sm:$0xff] %vm279_vm0, %v7255_v25  ;;  %v545_v31 = vrot.slane %v7255_v25, 1  ;;  %v7272_v34 = vld [vmem:[#allocation2 + $0x40] sm:$0x3]  ;;  %v750_v51 = vrot.slane %v403_v23, 2  ;;  %vm6717_vm6 = vmpackc.low %vm1894_vm4, %vm7044_vm5 }
  0x2b   : > { %v546_v32 = vrot.slane %v7263_v28, 1  ;;  %459 = vst.msk [vmem:[#allocation5 + $0x28] sm:$0xff] %vm279_vm0, %v7263_v28  ;;  %v542_v35 = vsel %vm534_vm3, %v540_v26, %v541_v27  ;;  %v7275_v36 = vld [vmem:[#allocation2 + $0x48] sm:$0xff]  ;;  %v7277_v37 = vld [vmem:[#allocation2 + $0x50] sm:$0xff]  ;;  %v548_v41 = vrot.slane %v7272_v34, 1  ;;  %v544_v44 = vsel %vm534_vm3, %v541_v27, %v543_v33  ;;  %6718 = vmatprep.subr.msk.bf16.mxu0 %vm6717_vm6, %v6716_v2  ;;  %381 = vst.msk [vmem:[#allocation2 + $0xb1] sm:$0xff] %vm279_vm0, %v348_v4 }
  0x2c   : > { %v7279_v38 = vld [vmem:[#allocation2 + $0x60] sm:$0xff]  ;;  %460 = vst.msk [vmem:[#allocation5 + $0x30] sm:$0xff] %vm279_vm0, %v7275_v36  ;;  %461 = vst.msk [vmem:[#allocation5 + $0x38] sm:$0xff] %vm279_vm0, %v7277_v37  ;;  %v7287_v39 = vld [vmem:[#allocation2 + $0x68] sm:$0xff]  ;;  %v550_v45 = vrot.slane %v7275_v36, 1  ;;  %v551_v46 = vrot.slane %v7277_v37, 1  ;;  %6721 = vmatpush3.bf16.msk.msra.mxu0 %vm6717_vm6, %v6716_v2 }
  0x2d   : > { %462 = vst.msk [vmem:[#allocation5 + $0x40] sm:$0xff] %vm279_vm0, %v7279_v38  ;;  %v7289_v40 = vld [vmem:[#allocation2 + $0x78] sm:$0xff]  ;;  %619 = vrot.lane.b32.xlu1 %v542_v35, %s7038_s9  ;;  %463 = vst.msk [vmem:[#allocation5 + $0x48] sm:$0xff] %vm279_vm0, %v7287_v39  ;;  %v7298_v42 = vld [vmem:[#allocation2 + $0x80] sm:$0xff]  ;;  %v547_v43 = vsel %vm534_vm3, %v545_v31, %v546_v32  ;;  %v549_v50 = vsel %vm534_vm3, %v546_v32, %v548_v41  ;;  %v751_v52 = vrot.slane %v7253_v24, 2  ;;  %v753_v56 = vrot.slane %v405_v29, 2 }
  0x2e   : > { %464 = vst.msk [vmem:[#allocation5 + $0x50] sm:$0xff] %vm279_vm0, %v7289_v40  ;;  %465 = vst.msk [vmem:[#allocation5 + $0x58] sm:$0xff] %vm279_vm0, %v7298_v42  ;;  %623 = vrot.lane.b32.xlu0 %v547_v43, %s7038_s9  ;;  %v7315_v49 = vsel %vm534_vm3, %v550_v45, %v551_v46  ;;  %v7322_v53 = vld [vmem:[#allocation2 + $0x90] sm:$0xff]  ;;  %v7324_v54 = vld [vmem:[#allocation2 + $0x98] sm:$0xff]  ;;  %v755_v61 = vrot.slane %v7255_v25, 2  ;;  %v756_v1 = vrot.slane %v7263_v28, 2 }
  0x2f   : > { %466 = vst.msk [vmem:[#allocation5 + $0x60] sm:$0xff] %vm279_vm0, %v7322_v53  ;;  %467 = vst.msk [vmem:[#allocation5 + $0x68] sm:$0xff] %vm279_vm0, %v7324_v54  ;;  %v752_v55 = vsel %vm744_vm2, %v750_v51, %v751_v52  ;;  %v754_v57 = vsel %vm744_vm2, %v751_v52, %v753_v56  ;;  %v758_v6 = vrot.slane %v7272_v34, 2  ;;  %v7374_v8 = vld [vmem:[#allocation2 + $0xa8] sm:$0xff]  ;;  %v411_v10 = vld [vmem:[#allocation2 + $0x58] sm:$0x3] }
  0x30   : > { %v757_v5 = vsel %vm744_vm2, %v755_v61, %v756_v1  ;;  %468 = vst.msk [vmem:[#allocation5 + $0x70] sm:$0xff] %vm279_vm0, %v7374_v8  ;;  %v553_v11 = vrot.slane %v411_v10, 1  ;;  %v760_v12 = vrot.slane %v7275_v36, 2  ;;  %v761_v13 = vrot.slane %v7277_v37, 2  ;;  %382 = vst.msk [vmem:[#allocation2 + $0xc1] sm:$0xff] %vm279_vm0, %v349_v18  ;;  %v351_v33 = vld [vmem:[%s7224_s30 + $0x80] sm:$0xff] }
  0x31   : > { %621 = vrot.lane.b32.xlu1 %v544_v44, %s7038_s9  ;;  %v759_v7 = vsel %vm744_vm2, %v756_v1, %v758_v6  ;;  %v763_v16 = vrot.slane %v411_v10, 2  ;;  %383 = vst.msk [vmem:[#allocation2 + $0xc9] sm:$0xff] %vm279_vm0, %v350_v19  ;;  %v555_v20 = vrot.slane %v7279_v38, 1  ;;  %v556_v21 = vrot.slane %v7287_v39, 1  ;;  %v414_v22 = vld [vmem:[#allocation2 + $0x70] sm:$0x3] }
  0x32   : > { %627 = vrot.lane.b32.xlu0 %v7315_v49, %s7038_s9  ;;  %v7376_v9 = vld [vmem:[#allocation2 + $0xb0] sm:$0xff]  ;;  %v554_v14 = vsel %vm534_vm3, %v551_v46, %v553_v11  ;;  %v762_v15 = vsel %vm744_vm2, %v760_v12, %v761_v13  ;;  %v558_v26 = vrot.slane %v414_v22, 1  ;;  %v765_v27 = vrot.slane %v7279_v38, 2  ;;  %v352_v34 = vld [vmem:[%s7224_s30 + $0x88] sm:$0xff]  ;;  %384 = vst.msk [vmem:[#allocation2 + $0xd9] sm:$0xff] %vm279_vm0, %v351_v33  ;;  %v354_v4 = vld [vmem:[%s7224_s30 + $0x98] sm:$0xff] }
  0x33   : > { %469 = vst.msk [vmem:[#allocation5 + $0x78] sm:$0xff] %vm279_vm0, %v7376_v9  ;;  %v764_v17 = vsel %vm744_vm2, %v761_v13, %v763_v16  ;;  %v768_v31 = vrot.slane %v414_v22, 2  ;;  %385 = vst.msk [vmem:[#allocation2 + $0xe1] sm:$0xff] %vm279_vm0, %v352_v34  ;;  %v770_v47 = vrot.slane %v7289_v40, 2  ;;  %v771_v48 = vrot.slane %v7298_v42, 2  ;;  %v353_v3 = vld [vmem:[%s7224_s30 + $0x90] sm:$0xff] }
  0x34   : > { %v559_v29 = vsel %vm534_vm3, %v556_v21, %v558_v26  ;;  %386 = vst.msk [vmem:[#allocation2 + $0xf1] sm:$0xff] %vm279_vm0, %v353_v3  ;;  %387 = vst.msk [vmem:[#allocation2 + $0xf9] sm:$0xff] %vm279_vm0, %v354_v4  ;;  %v565_v6 = vrot.slane %v7322_v53, 1  ;;  %v776_v18 = vrot.slane %v7324_v54, 2  ;;  %vm2158_vm4 = vcmask 254976  }
  0x35   : > { %625 = vrot.lane.b32.xlu1 %v549_v50, %s7038_s9  ;;  %v7490_v51 = vsel %vm744_vm2, %v770_v47, %v771_v48  ;;  %2161 = vst.msk [vmem:[#allocation3 + $0x20] sm:$0xff] %vm2155_vm1, %v7036_v0  ;;  %2156 = vst.msk [vmem:[#allocation3] sm:$0xff] %vm2155_vm1, %v7036_v0  ;;  %vm2763_vm5 = vcmask 785920   ;;  %vm2894_vm6 = vcmask 1048320  }
  0x36   : > { %958 = vrot.lane.b32.xlu0 %v7253_v24, %s7039_s10  ;;  %2162 = vst.msk [vmem:[#allocation3 + $0x28] sm:$0x3] %vm2158_vm4, %v7036_v0  ;;  %2159 = vst.msk [vmem:[#allocation3 + $0x10] sm:$0x3] %vm2158_vm4, %v7036_v0 }
  0x37   : > { %v7417_v23 = vld [vmem:[#allocation2 + $0xc0] sm:$0xff]  ;;  %2157 = vst.msk [vmem:[#allocation3 + $0x8] sm:$0xff] %vm2155_vm1, %v7036_v0  ;;  %2160 = vst.msk [vmem:[#allocation3 + $0x18] sm:$0xff] %vm2155_vm1, %v7036_v0 }
  0x38   : > { %v7419_v24 = vld [vmem:[#allocation2 + $0xc8] sm:$0xff]  ;;  %470 = vst.msk [vmem:[#allocation5 + $0x80] sm:$0xff] %vm279_vm0, %v7417_v23 }
  0x39   : > { %1091 = vrot.lane.b32.xlu1 %v542_v35, %s7040_s11  ;;  %471 = vst.msk [vmem:[#allocation5 + $0x88] sm:$0xff] %vm279_vm0, %v7419_v24  ;;  %v417_v35 = vld [vmem:[#allocation2 + $0x88] sm:$0x3] }
  0x3a   : > { %1093 = vrot.lane.b32.xlu0 %v544_v44, %s7040_s11  ;;  %v7464_v44 = vld [vmem:[#allocation2 + $0xe0] sm:$0xff]  ;;  %v773_v52 = vrot.slane %v417_v35, 2  ;;  %2163 = vst.msk [vmem:[#allocation3 + $0x30] sm:$0xff] %vm2155_vm1, %v7036_v0  ;;  %2164 = vst.msk [vmem:[#allocation3 + $0x38] sm:$0xff] %vm2155_vm1, %v7036_v0 }
  0x3b   : > { %473 = vst.msk [vmem:[#allocation5 + $0x98] sm:$0xff] %vm279_vm0, %v7464_v44  ;;  %v7536_v13 = vld [vmem:[#allocation2 + $0xf0] sm:$0xff] }
  0x3c   : > { %474 = vst.msk [vmem:[#allocation5 + $0xa0] sm:$0xff] %vm279_vm0, %v7536_v13 }
  0x3d   : > { %1225 = vrot.lane.b32.xlu1 %v752_v55, %s7041_s12  ;;  %2165 = vst.msk [vmem:[#allocation3 + $0x40] sm:$0x3] %vm2158_vm4, %v7036_v0  ;;  %2168 = vst.msk [vmem:[#allocation3 + $0x58] sm:$0x3] %vm2158_vm4, %v7036_v0 }
  0x3e   : > { %829 = vrot.lane.b32.xlu0 %v752_v55, %s7037_s8  ;;  %2166 = vst.msk [vmem:[#allocation3 + $0x48] sm:$0xff] %vm2155_vm1, %v7036_v0  ;;  %2167 = vst.msk [vmem:[#allocation3 + $0x50] sm:$0xff] %vm2155_vm1, %v7036_v0 }
  0x3f   : > { %2169 = vst.msk [vmem:[#allocation3 + $0x60] sm:$0xff] %vm2155_vm1, %v7036_v0  ;;  %2170 = vst.msk [vmem:[#allocation3 + $0x68] sm:$0xff] %vm2155_vm1, %v7036_v0 }
  0x40   : > { %2171 = vst.msk [vmem:[#allocation3 + $0x70] sm:$0x3] %vm2158_vm4, %v7036_v0  ;;  %2174 = vst.msk [vmem:[#allocation3 + $0x88] sm:$0x3] %vm2158_vm4, %v7036_v0 }
  0x41   : > { %1227 = vrot.lane.b32.xlu1 %v754_v57, %s7041_s12  ;;  %2172 = vst.msk [vmem:[#allocation3 + $0x78] sm:$0xff] %vm2155_vm1, %v7036_v0  ;;  %2173 = vst.msk [vmem:[#allocation3 + $0x80] sm:$0xff] %vm2155_vm1, %v7036_v0 }
  0x42   : > { %1356 = vrot.lane.b32.xlu0 %v7255_v25, %s7042_s13  ;;  %2175 = vst.msk [vmem:[#allocation3 + $0x90] sm:$0xff] %vm2155_vm1, %v7036_v0  ;;  %2176 = vst.msk [vmem:[#allocation3 + $0x98] sm:$0xff] %vm2155_vm1, %v7036_v0 }
  0x43   : > { %2177 = vst.msk [vmem:[#allocation3 + $0xa0] sm:$0x3] %vm2158_vm4, %v7036_v0  ;;  %2180 = vst.msk [vmem:[#allocation3 + $0xb8] sm:$0x3] %vm2158_vm4, %v7036_v0 }
  0x44   : > { %2178 = vst.msk [vmem:[#allocation3 + $0xa8] sm:$0xff] %vm2155_vm1, %v7036_v0  ;;  %2179 = vst.msk [vmem:[#allocation3 + $0xb0] sm:$0xff] %vm2155_vm1, %v7036_v0 }
  0x45   : > { %831 = vrot.lane.b32.xlu1 %v754_v57, %s7037_s8  ;;  %v7498_v57 = vsel %vm744_vm2, %v771_v48, %v773_v52  ;;  %2181 = vst.msk [vmem:[#allocation3 + $0xc0] sm:$0xff] %vm2155_vm1, %v7036_v0  ;;  %2182 = vst.msk [vmem:[#allocation3 + $0xc8] sm:$0xff] %vm2155_vm1, %v7036_v0 }
  0x46   : > { %960 = vrot.lane.b32.xlu0 %v7255_v25, %s7039_s10  ;;  %v557_v25 = vsel %vm534_vm3, %v555_v20, %v556_v21  ;;  %2183 = vst.msk [vmem:[#allocation3 + $0xd0] sm:$0x3] %vm2158_vm4, %v7036_v0  ;;  %2186 = vst.msk [vmem:[#allocation3 + $0xe8] sm:$0x3] %vm2158_vm4, %v7036_v0 }
  0x47   : > { %2184 = vst.msk [vmem:[#allocation3 + $0xd8] sm:$0xff] %vm2155_vm1, %v7036_v0  ;;  %2185 = vst.msk [vmem:[#allocation3 + $0xe0] sm:$0xff] %vm2155_vm1, %v7036_v0 }
  0x48   : > { %2187 = vst.msk [vmem:[#allocation3 + $0xf0] sm:$0xff] %vm2155_vm1, %v7036_v0  ;;  %2188 = vst.msk [vmem:[#allocation3 + $0xf8] sm:$0xff] %vm2155_vm1, %v7036_v0 }
  0x49   : > { %1358 = vrot.lane.b32.xlu1 %v7263_v28, %s7042_s13  ;;  %2189 = vst.msk [vmem:[#allocation3 + $0x100] sm:$0x3] %vm2158_vm4, %v7036_v0  ;;  %2192 = vst.msk [vmem:[#allocation3 + $0x118] sm:$0x3] %vm2158_vm4, %v7036_v0 }
  0x4a   : > { %1491 = vrot.lane.b32.xlu0 %v547_v43, %s7043_s18  ;;  %2190 = vst.msk [vmem:[#allocation3 + $0x108] sm:$0xff] %vm2155_vm1, %v7036_v0  ;;  %2191 = vst.msk [vmem:[#allocation3 + $0x110] sm:$0xff] %vm2155_vm1, %v7036_v0 }
  0x4b   : > { %2193 = vst.msk [vmem:[#allocation3 + $0x120] sm:$0xff] %vm2155_vm1, %v7036_v0  ;;  %2194 = vst.msk [vmem:[#allocation3 + $0x128] sm:$0xff] %vm2155_vm1, %v7036_v0 }
  0x4c   : > { %2195 = vst.msk [vmem:[#allocation3 + $0x130] sm:$0x3] %vm2158_vm4, %v7036_v0  ;;  %2198 = vst.msk [vmem:[#allocation3 + $0x148] sm:$0x3] %vm2158_vm4, %v7036_v0 }
  0x4d   : > { %962 = vrot.lane.b32.xlu1 %v7263_v28, %s7039_s10  ;;  %v766_v28 = vrot.slane %v7287_v39, 2  ;;  %2196 = vst.msk [vmem:[#allocation3 + $0x138] sm:$0xff] %vm2155_vm1, %v7036_v0  ;;  %2197 = vst.msk [vmem:[#allocation3 + $0x140] sm:$0xff] %vm2155_vm1, %v7036_v0 }
  0x4e   : > { %1095 = vrot.lane.b32.xlu0 %v547_v43, %s7040_s11  ;;  %v7462_v43 = vld [vmem:[#allocation2 + $0xd8] sm:$0xff]  ;;  %2199 = vst.msk [vmem:[#allocation3 + $0x150] sm:$0xff] %vm2155_vm1, %v7036_v0  ;;  %2200 = vst.msk [vmem:[#allocation3 + $0x158] sm:$0xff] %vm2155_vm1, %v7036_v0 }
  0x4f   : > { %v7436_v30 = vsel %vm744_vm2, %v765_v27, %v766_v28  ;;  %v769_v32 = vsel %vm744_vm2, %v766_v28, %v768_v31  ;;  %472 = vst.msk [vmem:[#allocation5 + $0x90] sm:$0xff] %vm279_vm0, %v7462_v43 }
  0x50   : > { %2201 = vst.msk [vmem:[#allocation3 + $0x160] sm:$0x3] %vm2158_vm4, %v7036_v0  ;;  %2204 = vst.msk [vmem:[#allocation3 + $0x178] sm:$0x3] %vm2158_vm4, %v7036_v0 }
  0x51   : > { %1493 = vrot.lane.b32.xlu1 %v549_v50, %s7043_s18  ;;  %2202 = vst.msk [vmem:[#allocation3 + $0x168] sm:$0xff] %vm2155_vm1, %v7036_v0  ;;  %2203 = vst.msk [vmem:[#allocation3 + $0x170] sm:$0xff] %vm2155_vm1, %v7036_v0 }
  0x52   : > { %1625 = vrot.lane.b32.xlu0 %v757_v5, %s7045_s23  ;;  %2205 = vst.msk [vmem:[#allocation3 + $0x180] sm:$0xff] %vm2155_vm1, %v7036_v0  ;;  %2206 = vst.msk [vmem:[#allocation3 + $0x188] sm:$0xff] %vm2155_vm1, %v7036_v0 }
  0x53   : > { %2207 = vst.msk [vmem:[#allocation3 + $0x190] sm:$0x3] %vm2158_vm4, %v7036_v0  ;;  %2210 = vst.msk [vmem:[#allocation3 + $0x1a8] sm:$0x3] %vm2158_vm4, %v7036_v0 }
  0x54   : > { %2208 = vst.msk [vmem:[#allocation3 + $0x198] sm:$0xff] %vm2155_vm1, %v7036_v0  ;;  %2209 = vst.msk [vmem:[#allocation3 + $0x1a0] sm:$0xff] %vm2155_vm1, %v7036_v0 }
  0x55   : > { %1097 = vrot.lane.b32.xlu1 %v549_v50, %s7040_s11 }
  0x56   : > { %1229 = vrot.lane.b32.xlu0 %v757_v5, %s7041_s12 }
  0x59   : > { %1627 = vrot.lane.b32.xlu1 %v759_v7, %s7045_s23 }
  0x5a   : > { %1231 = vrot.lane.b32.xlu0 %v759_v7, %s7041_s12 }
  0x5d   : > { %1360 = vrot.lane.b32.xlu1 %v7275_v36, %s7042_s13 }
  0x5e   : > { %1362 = vrot.lane.b32.xlu0 %v7277_v37, %s7042_s13 }
  0x61   : > { %1495 = vrot.lane.b32.xlu1 %v7315_v49, %s7043_s18 }
  0x62   : > { %1497 = vrot.lane.b32.xlu0 %v554_v14, %s7043_s18 }
  0x65   : > { %1629 = vrot.lane.b32.xlu1 %v762_v15, %s7045_s23 }
  0x66   : > { %1631 = vrot.lane.b32.xlu0 %v764_v17, %s7045_s23 }
  0x69   : > { %833 = vrot.lane.b32.xlu1 %v757_v5, %s7037_s8  ;;  %v420_v5 = vld [vmem:[#allocation2 + $0xa0] sm:$0x3] }
  0x6a   : > { %835 = vrot.lane.b32.xlu0 %v759_v7, %s7037_s8  ;;  %v566_v7 = vrot.slane %v7324_v54, 1  ;;  %v568_v10 = vrot.slane %v420_v5, 1  ;;  %v778_v22 = vrot.slane %v420_v5, 2 }
  0x6c   : > { %v7552_v16 = vsel %vm534_vm3, %v566_v7, %v568_v10  ;;  %v7572_v27 = vsel %vm744_vm2, %v776_v18, %v778_v22 }
  0x6d   : > { %964 = vrot.lane.b32.xlu1 %v7275_v36, %s7039_s10  ;;  %v560_v36 = vrot.slane %v7289_v40, 1 }
  0x6e   : > { %966 = vrot.lane.b32.xlu0 %v7277_v37, %s7039_s10  ;;  %v561_v37 = vrot.slane %v7298_v42, 1 }
  0x70   : > { %v7476_v45 = vsel %vm534_vm3, %v560_v36, %v561_v37 }
  0x71   : > { %1099 = vrot.lane.b32.xlu1 %v7315_v49, %s7040_s11 }
  0x72   : > { %1101 = vrot.lane.b32.xlu0 %v554_v14, %s7040_s11 }
  0x75   : > { %1233 = vrot.lane.b32.xlu1 %v762_v15, %s7041_s12 }
  0x76   : > { %1235 = vrot.lane.b32.xlu0 %v764_v17, %s7041_s12 }
  0x79   : > { %1364 = vrot.lane.b32.xlu1 %v7279_v38, %s7042_s13 }
  0x7a   : > { %1366 = vrot.lane.b32.xlu0 %v7287_v39, %s7042_s13 }
  0x7d   : > { %1499 = vrot.lane.b32.xlu1 %v557_v25, %s7043_s18 }
  0x7e   : > { %1501 = vrot.lane.b32.xlu0 %v559_v29, %s7043_s18 }
  0x81   : > { %1633 = vrot.lane.b32.xlu1 %v7436_v30, %s7045_s23 }
  0x82   : > { %1635 = vrot.lane.b32.xlu0 %v769_v32, %s7045_s23 }
  0x84   : > { %v616_v41 = vpop.permute.xlu0 %615 }
  0x85   : > { %629 = vrot.lane.b32.xlu1 %v554_v14, %s7038_s9  ;;  %712 = vst.msk [vmem:[#allocation5] sm:$0xff] %vm711_vm7, %v616_v41  ;;  %v7538_v14 = vld [vmem:[#allocation2 + $0xf8] sm:$0xff] }
  0x86   : > { %837 = vrot.lane.b32.xlu0 %v762_v15, %s7037_s8  ;;  %475 = vst.msk [vmem:[#allocation5 + $0xa8] sm:$0xff] %vm279_vm0, %v7538_v14  ;;  %v7549_v15 = vsel %vm534_vm3, %v565_v6, %v566_v7  ;;  %v423_v41 = vld [vmem:[#allocation2 + $0xb8] sm:$0x3] }
  0x87   : > { %v573_v47 = vrot.slane %v423_v41, 1 }
  0x89   : > { %839 = vrot.lane.b32.xlu1 %v764_v17, %s7037_s8  ;;  %v775_v17 = vrot.slane %v7322_v53, 2 }
  0x8a   : > { %968 = vrot.lane.b32.xlu0 %v7279_v38, %s7039_s10  ;;  %v563_v38 = vrot.slane %v417_v35, 1 }
  0x8b   : > { %v7563_v21 = vsel %vm744_vm2, %v775_v17, %v776_v18  ;;  %v575_v17 = vrot.slane %v7417_v23, 1  ;;  %v576_v18 = vrot.slane %v7419_v24, 1 }
  0x8c   : > { %v7479_v46 = vsel %vm534_vm3, %v561_v37, %v563_v38  ;;  %v355_v37 = vld [vmem:[%s7224_s30 + $0xa0] sm:$0xff]  ;;  %v356_v38 = vld [vmem:[%s7224_s30 + $0xa8] sm:$0xff] }
  0x8d   : > { %970 = vrot.lane.b32.xlu1 %v7287_v39, %s7039_s10  ;;  %v826_v39 = vpop.permute.xlu1 %825  ;;  %388 = vst.msk [vmem:[#allocation2 + $0x109] sm:$0xff] %vm279_vm0, %v355_v37  ;;  %389 = vst.msk [vmem:[#allocation2 + $0x111] sm:$0xff] %vm279_vm0, %v356_v38 }
  0x8e   : > { %1103 = vrot.lane.b32.xlu0 %v557_v25, %s7040_s11  ;;  %922 = vst.msk [vmem:[#allocation5] sm:$0xff] %vm921_vm8, %v826_v39 }
  0x91   : > { %1105 = vrot.lane.b32.xlu1 %v559_v29, %s7040_s11 }
  0x92   : > { %1237 = vrot.lane.b32.xlu0 %v7436_v30, %s7041_s12 }
  0x95   : > { %1239 = vrot.lane.b32.xlu1 %v769_v32, %s7041_s12  ;;  %v618_v49 = vpop.permute.xlu0 %617 }
  0x96   : > { %1368 = vrot.lane.b32.xlu0 %v7289_v40, %s7042_s13  ;;  %713 = vst.msk [vmem:[#allocation5 + $0x8] sm:$0xff] %vm711_vm7, %v618_v49 }
  0x99   : > { %1370 = vrot.lane.b32.xlu1 %v7298_v42, %s7042_s13  ;;  %v828_v55 = vpop.permute.xlu0 %827 }
  0x9a   : > { %1503 = vrot.lane.b32.xlu0 %v7476_v45, %s7043_s18  ;;  %923 = vst.msk [vmem:[#allocation5 + $0x8] sm:$0xff] %vm921_vm8, %v828_v55 }
  0x9b   : > { %v957_v50 = vpop.permute.xlu1 %956 }
  0x9c   : > { %1053 = vst.msk [vmem:[#allocation5] sm:$0xff] %vm1052_vm9, %v957_v50  ;;  %v7614_v50 = vld [vmem:[#allocation2 + $0x108] sm:$0xff] }
  0x9d   : > { %1505 = vrot.lane.b32.xlu1 %v7479_v46, %s7043_s18  ;;  %476 = vst.msk [vmem:[#allocation5 + $0xb0] sm:$0xff] %vm279_vm0, %v7614_v50 }
  0x9e   : > { %1637 = vrot.lane.b32.xlu0 %v7490_v51, %s7045_s23 }
  0x9f   : > { %v620_v56 = vpop.permute.xlu1 %619 }
  0xa0   : > { %714 = vst.msk [vmem:[#allocation5 + $0x10] sm:$0xff] %vm711_vm7, %v620_v56  ;;  %v624_v58 = vpop.permute.xlu0 %623  ;;  %v780_v56 = vrot.slane %v7374_v8, 2 }
  0xa1   : > { %631 = vrot.lane.b32.xlu1 %v557_v25, %s7038_s9  ;;  %716 = vst.msk [vmem:[#allocation5 + $0x20] sm:$0xff] %vm711_vm7, %v624_v58 }
  0xa2   : > { %1639 = vrot.lane.b32.xlu0 %v7498_v57, %s7045_s23 }
  0xa3   : > { %v622_v59 = vpop.permute.xlu1 %621 }
  0xa4   : > { %715 = vst.msk [vmem:[#allocation5 + $0x18] sm:$0xff] %vm711_vm7, %v622_v59  ;;  %v628_v60 = vpop.permute.xlu0 %627 }
  0xa5   : > { %633 = vrot.lane.b32.xlu1 %v559_v29, %s7038_s9  ;;  %718 = vst.msk [vmem:[#allocation5 + $0x30] sm:$0xff] %vm711_vm7, %v628_v60 }
  0xa6   : > { %841 = vrot.lane.b32.xlu0 %v7436_v30, %s7037_s8 }
  0xa7   : > { %v626_v61 = vpop.permute.xlu1 %625 }
  0xa8   : > { %717 = vst.msk [vmem:[#allocation5 + $0x28] sm:$0xff] %vm711_vm7, %v626_v61  ;;  %v959_v62 = vpop.permute.xlu0 %958  ;;  %v783_v61 = vrot.slane %v423_v41, 2 }
  0xa9   : > { %843 = vrot.lane.b32.xlu1 %v769_v32, %s7037_s8  ;;  %1054 = vst.msk [vmem:[#allocation5 + $0x8] sm:$0xff] %vm1052_vm9, %v959_v62 }
  0xaa   : > { %972 = vrot.lane.b32.xlu0 %v7289_v40, %s7039_s10 }
  0xab   : > { %v1092_v63 = vpop.permute.xlu1 %1091 }
  0xac   : > { %1188 = vst.msk [vmem:[#allocation5] sm:$0xff] %vm1187_vm10, %v1092_v63  ;;  %v1094_v1 = vpop.permute.xlu0 %1093 }
  0xad   : > { %974 = vrot.lane.b32.xlu1 %v7298_v42, %s7039_s10  ;;  %1189 = vst.msk [vmem:[#allocation5 + $0x8] sm:$0xff] %vm1187_vm10, %v1094_v1 }
  0xae   : > { %1107 = vrot.lane.b32.xlu0 %v7476_v45, %s7040_s11 }
  0xaf   : > { %v1226_v2 = vpop.permute.xlu1 %1225 }
  0xb0   : > { %1322 = vst.msk [vmem:[#allocation5] sm:$0xff] %vm1321_vm11, %v1226_v2  ;;  %v830_v40 = vpop.permute.xlu0 %829 }
  0xb1   : > { %1109 = vrot.lane.b32.xlu1 %v7479_v46, %s7040_s11  ;;  %924 = vst.msk [vmem:[#allocation5 + $0x10] sm:$0xff] %vm921_vm8, %v830_v40 }
  0xb2   : > { %1241 = vrot.lane.b32.xlu0 %v7490_v51, %s7041_s12 }
  0xb3   : > { %v1228_v42 = vpop.permute.xlu1 %1227 }
  0xb4   : > { %1323 = vst.msk [vmem:[#allocation5 + $0x8] sm:$0xff] %vm1321_vm11, %v1228_v42  ;;  %v1357_v11 = vpop.permute.xlu0 %1356 }
  0xb5   : > { %1243 = vrot.lane.b32.xlu1 %v7498_v57, %s7041_s12  ;;  %1453 = vst.msk [vmem:[#allocation5] sm:$0xff] %vm1452_vm12, %v1357_v11 }
  0xb6   : > { %1372 = vrot.lane.b32.xlu0 %v7322_v53, %s7042_s13 }
  0xb7   : > { %v832_v12 = vpop.permute.xlu1 %831 }
  0xb8   : > { %925 = vst.msk [vmem:[#allocation5 + $0x18] sm:$0xff] %vm921_vm8, %v832_v12  ;;  %v961_v19 = vpop.permute.xlu0 %960  ;;  %v357_v12 = vld [vmem:[%s7224_s30 + $0xb0] sm:$0xff] }
  0xb9   : > { %1374 = vrot.lane.b32.xlu1 %v7324_v54, %s7042_s13  ;;  %1055 = vst.msk [vmem:[#allocation5 + $0x10] sm:$0xff] %vm1052_vm9, %v961_v19 }
  0xba   : > { %1507 = vrot.lane.b32.xlu0 %v7549_v15, %s7043_s18  ;;  %390 = vst.msk [vmem:[#allocation2 + $0x121] sm:$0xff] %vm279_vm0, %v357_v12 }
  0xbb   : > { %v1359_v20 = vpop.permute.xlu1 %1358 }
  0xbc   : > { %1454 = vst.msk [vmem:[#allocation5 + $0x8] sm:$0xff] %vm1452_vm12, %v1359_v20  ;;  %v1492_v25 = vpop.permute.xlu0 %1491 }
  0xbd   : > { %1509 = vrot.lane.b32.xlu1 %v7552_v16, %s7043_s18  ;;  %1588 = vst.msk [vmem:[#allocation5] sm:$0xff] %vm1587_vm13, %v1492_v25 }
  0xbe   : > { %1641 = vrot.lane.b32.xlu0 %v7563_v21, %s7045_s23 }
  0xbf   : > { %v963_v26 = vpop.permute.xlu1 %962 }
  0xc0   : > { %1056 = vst.msk [vmem:[#allocation5 + $0x18] sm:$0xff] %vm1052_vm9, %v963_v26  ;;  %v1096_v28 = vpop.permute.xlu0 %1095  ;;  %v7705_v26 = vsel %vm534_vm3, %v575_v17, %v576_v18 }
  0xc1   : > { %635 = vrot.lane.b32.xlu1 %v7476_v45, %s7038_s9  ;;  %1190 = vst.msk [vmem:[#allocation5 + $0x10] sm:$0xff] %vm1187_vm10, %v1096_v28  ;;  %v570_v45 = vrot.slane %v7374_v8, 1  ;;  %v7692_v22 = vld [vmem:[#allocation2 + $0x120] sm:$0xff]  ;;  %v785_v28 = vrot.slane %v7417_v23, 2 }
  0xc2   : > { %1643 = vrot.lane.b32.xlu0 %v7572_v27, %s7045_s23  ;;  %478 = vst.msk [vmem:[#allocation5 + $0xc0] sm:$0xff] %vm279_vm0, %v7692_v22 }
  0xc3   : > { %v1494_v29 = vpop.permute.xlu1 %1493 }
  0xc4   : > { %1589 = vst.msk [vmem:[#allocation5 + $0x8] sm:$0xff] %vm1587_vm13, %v1494_v29  ;;  %v1626_v30 = vpop.permute.xlu0 %1625  ;;  %v786_v29 = vrot.slane %v7419_v24, 2 }
  0xc5   : > { %637 = vrot.lane.b32.xlu1 %v7479_v46, %s7038_s9  ;;  %1722 = vst.msk [vmem:[#allocation5] sm:$0xff] %vm1721_vm14, %v1626_v30  ;;  %v571_v46 = vrot.slane %v7376_v9, 1 }
  0xc6   : > { %845 = vrot.lane.b32.xlu0 %v7490_v51, %s7037_s8  ;;  %v7616_v51 = vld [vmem:[#allocation2 + $0x110] sm:$0xff] }
  0xc7   : > { %v1098_v31 = vpop.permute.xlu1 %1097  ;;  %477 = vst.msk [vmem:[#allocation5 + $0xb8] sm:$0xff] %vm279_vm0, %v7616_v51  ;;  %v7627_v52 = vsel %vm534_vm3, %v570_v45, %v571_v46  ;;  %v7630_v55 = vsel %vm534_vm3, %v571_v46, %v573_v47 }
  0xc8   : > { %1191 = vst.msk [vmem:[#allocation5 + $0x18] sm:$0xff] %vm1187_vm10, %v1098_v31  ;;  %v1230_v32 = vpop.permute.xlu0 %1229 }
  0xc9   : > { %847 = vrot.lane.b32.xlu1 %v7498_v57, %s7037_s8  ;;  %1324 = vst.msk [vmem:[#allocation5 + $0x10] sm:$0xff] %vm1321_vm11, %v1230_v32  ;;  %v781_v57 = vrot.slane %v7376_v9, 2 }
  0xca   : > { %976 = vrot.lane.b32.xlu0 %v7322_v53, %s7039_s10 }
  0xcb   : > { %v1628_v33 = vpop.permute.xlu1 %1627  ;;  %v7641_v60 = vsel %vm744_vm2, %v780_v56, %v781_v57  ;;  %v7651_v2 = vsel %vm744_vm2, %v781_v57, %v783_v61  ;;  %v580_v56 = vrot.slane %v7462_v43, 1  ;;  %v581_v57 = vrot.slane %v7464_v44, 1 }
  0xcc   : > { %1723 = vst.msk [vmem:[#allocation5 + $0x8] sm:$0xff] %vm1721_vm14, %v1628_v33  ;;  %v1232_v34 = vpop.permute.xlu0 %1231  ;;  %v1754_v36 = vld [vmem:[#allocation5] sm:$0xff]  ;;  %v7720_v33 = vsel %vm744_vm2, %v785_v28, %v786_v29  ;;  %v585_v28 = vrot.slane %v7536_v13, 1 }
  0xcd   : > { %978 = vrot.lane.b32.xlu1 %v7324_v54, %s7039_s10  ;;  %1325 = vst.msk [vmem:[#allocation5 + $0x18] sm:$0xff] %vm1321_vm11, %v1232_v34  ;;  %6544 = vmatprep.mubr.msk.f32.mxu0 %vm1797_vm15, %v1754_v36 }
  0xce   : > { %1111 = vrot.lane.b32.xlu0 %v7549_v15, %s7040_s11 }
  0xcf   : > { %v1361_v35 = vpop.permute.xlu1 %1360 }
  0xd0   : > { %1455 = vst.msk [vmem:[#allocation5 + $0x10] sm:$0xff] %vm1452_vm12, %v1361_v35  ;;  %v1363_v53 = vpop.permute.xlu0 %1362 }
  0xd1   : > { %1113 = vrot.lane.b32.xlu1 %v7552_v16, %s7040_s11  ;;  %1456 = vst.msk [vmem:[#allocation5 + $0x18] sm:$0xff] %vm1452_vm12, %v1363_v53 }
  0xd2   : > { %1245 = vrot.lane.b32.xlu0 %v7563_v21, %s7041_s12 }
  0xd3   : > { %v1496_v54 = vpop.permute.xlu1 %1495  ;;  %v1755_v39 = vld [vmem:[#allocation5 + $0x8] sm:$0xff] }
  0xd4   : > { %1590 = vst.msk [vmem:[#allocation5 + $0x10] sm:$0xff] %vm1587_vm13, %v1496_v54  ;;  %6545 = vmatmul.mubr.msk.f32.vlgmr.msra.gmra.mrb[0].mxu0 %vm1797_vm15, %v1755_v39  ;;  %v1498_v48 = vpop.permute.xlu0 %1497 }
  0xd5   : > { %1247 = vrot.lane.b32.xlu1 %v7572_v27, %s7041_s12  ;;  %1591 = vst.msk [vmem:[#allocation5 + $0x18] sm:$0xff] %vm1587_vm13, %v1498_v48 }
  0xd6   : > { %1376 = vrot.lane.b32.xlu0 %v7374_v8, %s7042_s13 }
  0xd7   : > { %v1630_v49 = vpop.permute.xlu1 %1629 }
  0xd8   : > { %1724 = vst.msk [vmem:[#allocation5 + $0x10] sm:$0xff] %vm1721_vm14, %v1630_v49  ;;  %v1632_v58 = vpop.permute.xlu0 %1631  ;;  %v359_v49 = vld [vmem:[%s7224_s30 + $0xc0] sm:$0xff] }
  0xd9   : > { %1378 = vrot.lane.b32.xlu1 %v7376_v9, %s7042_s13  ;;  %1725 = vst.msk [vmem:[#allocation5 + $0x18] sm:$0xff] %vm1721_vm14, %v1632_v58 }
  0xda   : > { %1511 = vrot.lane.b32.xlu0 %v7627_v52, %s7043_s18  ;;  %392 = vst.msk [vmem:[#allocation2 + $0x139] sm:$0xff] %vm279_vm0, %v359_v49 }
  0xdb   : > { %v834_v59 = vpop.permute.xlu1 %833 }
  0xdc   : > { %926 = vst.msk [vmem:[#allocation5 + $0x20] sm:$0xff] %vm921_vm8, %v834_v59  ;;  %v836_v62 = vpop.permute.xlu0 %835 }
  0xdd   : > { %1513 = vrot.lane.b32.xlu1 %v7630_v55, %s7043_s18  ;;  %927 = vst.msk [vmem:[#allocation5 + $0x28] sm:$0xff] %vm921_vm8, %v836_v62 }
  0xde   : > { %1645 = vrot.lane.b32.xlu0 %v7641_v60, %s7045_s23 }
  0xdf   : > { %v965_v63 = vpop.permute.xlu1 %964  ;;  %v1756_v1 = vld [vmem:[#allocation5 + $0x10] sm:$0xff] }
  0xe0   : > { %1057 = vst.msk [vmem:[#allocation5 + $0x20] sm:$0xff] %vm1052_vm9, %v965_v63  ;;  %6547 = vmatprep.mubr.msk.f32.mxu0 %vm1797_vm15, %v1756_v1  ;;  %v967_v3 = vpop.permute.xlu0 %966  ;;  %v1757_v40 = vld [vmem:[#allocation5 + $0x18] sm:$0xff]  ;;  %v7783_v63 = vsel %vm534_vm3, %v580_v56, %v581_v57 }
  0xe1   : > { %639 = vrot.lane.b32.xlu1 %v7549_v15, %s7038_s9  ;;  %1058 = vst.msk [vmem:[#allocation5 + $0x28] sm:$0xff] %vm1052_vm9, %v967_v3  ;;  %6548 = vmatmul.mubr.msk.f32.gmra.mrb[2].mxu0 %vm1797_vm15, %v1757_v40  ;;  %v358_v15 = vld [vmem:[%s7224_s30 + $0xb8] sm:$0xff]  ;;  %v791_v3 = vrot.slane %v7464_v44, 2 }
  0xe2   : > { %1647 = vrot.lane.b32.xlu0 %v7651_v2, %s7045_s23  ;;  %391 = vst.msk [vmem:[#allocation2 + $0x129] sm:$0xff] %vm279_vm0, %v358_v15  ;;  %v7770_v61 = vld [vmem:[#allocation2 + $0x138] sm:$0xff] }
  0xe3   : > { %v1100_v4 = vpop.permute.xlu1 %1099  ;;  %480 = vst.msk [vmem:[#allocation5 + $0xd0] sm:$0xff] %vm279_vm0, %v7770_v61 }
  0xe4   : > { %1192 = vst.msk [vmem:[#allocation5 + $0x20] sm:$0xff] %vm1187_vm10, %v1100_v4  ;;  %v1102_v42 = vpop.permute.xlu0 %1101 }
  0xe5   : > { %641 = vrot.lane.b32.xlu1 %v7552_v16, %s7038_s9  ;;  %1193 = vst.msk [vmem:[#allocation5 + $0x28] sm:$0xff] %vm1187_vm10, %v1102_v42  ;;  %v426_v16 = vld [vmem:[#allocation2 + $0xd0] sm:$0x3] }
  0xe6   : > { %849 = vrot.lane.b32.xlu0 %v7563_v21, %s7037_s8  ;;  %v578_v19 = vrot.slane %v426_v16, 1  ;;  %v788_v34 = vrot.slane %v426_v16, 2 }
  0xe7   : > { %v1234_v5 = vpop.permute.xlu1 %1233 }
  0xe8   : > { %1326 = vst.msk [vmem:[#allocation5 + $0x20] sm:$0xff] %vm1321_vm11, %v1234_v5  ;;  %v1236_v6 = vpop.permute.xlu0 %1235  ;;  %v7730_v38 = vsel %vm744_vm2, %v786_v29, %v788_v34  ;;  %v586_v29 = vrot.slane %v7538_v14, 1 }
  0xe9   : > { %851 = vrot.lane.b32.xlu1 %v7572_v27, %s7037_s8  ;;  %1327 = vst.msk [vmem:[#allocation5 + $0x28] sm:$0xff] %vm1321_vm11, %v1236_v6  ;;  %v7694_v25 = vld [vmem:[#allocation2 + $0x128] sm:$0xff]  ;;  %v7708_v27 = vsel %vm534_vm3, %v576_v18, %v578_v19 }
  0xea   : > { %980 = vrot.lane.b32.xlu0 %v7374_v8, %s7039_s10  ;;  %479 = vst.msk [vmem:[#allocation5 + $0xc8] sm:$0xff] %vm279_vm0, %v7694_v25 }
  0xeb   : > { %v1365_v7 = vpop.permute.xlu1 %1364 }
  0xec   : > { %1457 = vst.msk [vmem:[#allocation5 + $0x20] sm:$0xff] %vm1452_vm12, %v1365_v7  ;;  %v1367_v10 = vpop.permute.xlu0 %1366 }
  0xed   : > { %982 = vrot.lane.b32.xlu1 %v7376_v9, %s7039_s10  ;;  %1458 = vst.msk [vmem:[#allocation5 + $0x28] sm:$0xff] %vm1452_vm12, %v1367_v10 }
  0xee   : > { %1115 = vrot.lane.b32.xlu0 %v7627_v52, %s7040_s11 }
  0xef   : > { %v1500_v11 = vpop.permute.xlu1 %1499 }
  0xf0   : > { %1592 = vst.msk [vmem:[#allocation5 + $0x20] sm:$0xff] %vm1587_vm13, %v1500_v11  ;;  %v1502_v8 = vpop.permute.xlu0 %1501 }
  0xf1   : > { %1117 = vrot.lane.b32.xlu1 %v7630_v55, %s7040_s11  ;;  %1593 = vst.msk [vmem:[#allocation5 + $0x28] sm:$0xff] %vm1587_vm13, %v1502_v8 }
  0xf2   : > { %1249 = vrot.lane.b32.xlu0 %v7641_v60, %s7041_s12 }
  0xf3   : > { %v1634_v9 = vpop.permute.xlu1 %1633 }
  0xf4   : > { %1726 = vst.msk [vmem:[#allocation5 + $0x20] sm:$0xff] %vm1721_vm14, %v1634_v9  ;;  %v1636_v20 = vpop.permute.xlu0 %1635 }
  0xf5   : > { %1251 = vrot.lane.b32.xlu1 %v7651_v2, %s7041_s12  ;;  %1727 = vst.msk [vmem:[#allocation5 + $0x28] sm:$0xff] %vm1721_vm14, %v1636_v20 }
  0xf6   : > { %1380 = vrot.lane.b32.xlu0 %v7417_v23, %s7042_s13 }
  0xf7   : > { %v630_v21 = vpop.permute.xlu1 %629 }
  0xf8   : > { %719 = vst.msk [vmem:[#allocation5 + $0x38] sm:$0xff] %vm711_vm7, %v630_v21  ;;  %v838_v30 = vpop.permute.xlu0 %837  ;;  %v361_v21 = vld [vmem:[%s7224_s30 + $0xd0] sm:$0xff] }
  0xf9   : > { %1382 = vrot.lane.b32.xlu1 %v7419_v24, %s7042_s13  ;;  %928 = vst.msk [vmem:[#allocation5 + $0x30] sm:$0xff] %vm921_vm8, %v838_v30 }
  0xfa   : > { %1515 = vrot.lane.b32.xlu0 %v7705_v26, %s7043_s18  ;;  %394 = vst.msk [vmem:[#allocation2 + $0x151] sm:$0xff] %vm279_vm0, %v361_v21 }
  0xfb   : > { %v840_v31 = vpop.permute.xlu1 %839  ;;  %v1758_v32 = vld [vmem:[#allocation5 + $0x20] sm:$0xff] }
  0xfc   : > { %929 = vst.msk [vmem:[#allocation5 + $0x38] sm:$0xff] %vm921_vm8, %v840_v31  ;;  %6550 = vmatprep.mubr.msk.f32.mxu0 %vm1797_vm15, %v1758_v32  ;;  %v969_v35 = vpop.permute.xlu0 %968  ;;  %v1759_v37 = vld [vmem:[#allocation5 + $0x28] sm:$0xff] }
  0xfd   : > { %1517 = vrot.lane.b32.xlu1 %v7708_v27, %s7043_s18  ;;  %1059 = vst.msk [vmem:[#allocation5 + $0x30] sm:$0xff] %vm1052_vm9, %v969_v35  ;;  %6551 = vmatmul.mubr.msk.f32.gmra.mrb[4].mxu0 %vm1797_vm15, %v1759_v37  ;;  %v7965_v35 = vsel %vm534_vm3, %v585_v28, %v586_v29  ;;  %v795_v37 = vrot.slane %v7536_v13, 2 }
  0xfe   : > { %1649 = vrot.lane.b32.xlu0 %v7720_v33, %s7045_s23 }
  0xff   : > { %v971_v36 = vpop.permute.xlu1 %970 }
 0x100   : > { %1060 = vst.msk [vmem:[#allocation5 + $0x38] sm:$0xff] %vm1052_vm9, %v971_v36  ;;  %v1104_v53 = vpop.permute.xlu0 %1103 }
 0x101   : > { %643 = vrot.lane.b32.xlu1 %v7627_v52, %s7038_s9  ;;  %1194 = vst.msk [vmem:[#allocation5 + $0x30] sm:$0xff] %vm1187_vm10, %v1104_v53  ;;  %v360_v52 = vld [vmem:[%s7224_s30 + $0xc8] sm:$0xff] }
 0x102   : > { %1651 = vrot.lane.b32.xlu0 %v7730_v38, %s7045_s23  ;;  %393 = vst.msk [vmem:[#allocation2 + $0x141] sm:$0xff] %vm279_vm0, %v360_v52 }
 0x103   : > { %v1106_v54 = vpop.permute.xlu1 %1105 }
 0x104   : > { %1195 = vst.msk [vmem:[#allocation5 + $0x38] sm:$0xff] %vm1187_vm10, %v1106_v54  ;;  %v1238_v39 = vpop.permute.xlu0 %1237 }
 0x105   : > { %645 = vrot.lane.b32.xlu1 %v7630_v55, %s7038_s9  ;;  %1328 = vst.msk [vmem:[#allocation5 + $0x30] sm:$0xff] %vm1321_vm11, %v1238_v39  ;;  %v429_v55 = vld [vmem:[#allocation2 + $0xe8] sm:$0x3] }
 0x106   : > { %853 = vrot.lane.b32.xlu0 %v7641_v60, %s7037_s8  ;;  %v583_v58 = vrot.slane %v429_v55, 1  ;;  %v793_v6 = vrot.slane %v429_v55, 2 }
 0x107   : > { %v1240_v41 = vpop.permute.xlu1 %1239 }
 0x108   : > { %1329 = vst.msk [vmem:[#allocation5 + $0x38] sm:$0xff] %vm1321_vm11, %v1240_v41  ;;  %v1369_v45 = vpop.permute.xlu0 %1368  ;;  %v7786_v1 = vsel %vm534_vm3, %v581_v57, %v583_v58  ;;  %v7808_v12 = vsel %vm744_vm2, %v791_v3, %v793_v6 }
 0x109   : > { %855 = vrot.lane.b32.xlu1 %v7651_v2, %s7037_s8  ;;  %1459 = vst.msk [vmem:[#allocation5 + $0x30] sm:$0xff] %vm1452_vm12, %v1369_v45  ;;  %v7772_v62 = vld [vmem:[#allocation2 + $0x140] sm:$0xff]  ;;  %v790_v2 = vrot.slane %v7462_v43, 2 }
 0x10a   : > { %984 = vrot.lane.b32.xlu0 %v7417_v23, %s7039_s10  ;;  %481 = vst.msk [vmem:[#allocation5 + $0xd8] sm:$0xff] %vm279_vm0, %v7772_v62 }
 0x10b   : > { %v1371_v46 = vpop.permute.xlu1 %1370  ;;  %v7798_v5 = vsel %vm744_vm2, %v790_v2, %v791_v3  ;;  %v590_v2 = vrot.slane %v7614_v50, 1  ;;  %v591_v3 = vrot.slane %v7616_v51, 1 }
 0x10c   : > { %1460 = vst.msk [vmem:[#allocation5 + $0x38] sm:$0xff] %vm1452_vm12, %v1371_v46  ;;  %v1504_v47 = vpop.permute.xlu0 %1503 }
 0x10d   : > { %986 = vrot.lane.b32.xlu1 %v7419_v24, %s7039_s10  ;;  %1594 = vst.msk [vmem:[#allocation5 + $0x30] sm:$0xff] %vm1587_vm13, %v1504_v47 }
 0x10e   : > { %1119 = vrot.lane.b32.xlu0 %v7705_v26, %s7040_s11 }
 0x10f   : > { %v1506_v48 = vpop.permute.xlu1 %1505 }
 0x110   : > { %1595 = vst.msk [vmem:[#allocation5 + $0x38] sm:$0xff] %vm1587_vm13, %v1506_v48  ;;  %v1638_v23 = vpop.permute.xlu0 %1637 }
 0x111   : > { %1121 = vrot.lane.b32.xlu1 %v7708_v27, %s7040_s11  ;;  %1728 = vst.msk [vmem:[#allocation5 + $0x30] sm:$0xff] %vm1721_vm14, %v1638_v23 }
 0x112   : > { %1253 = vrot.lane.b32.xlu0 %v7720_v33, %s7041_s12 }
 0x113   : > { %v632_v24 = vpop.permute.xlu1 %631 }
 0x114   : > { %720 = vst.msk [vmem:[#allocation5 + $0x40] sm:$0xff] %vm711_vm7, %v632_v24  ;;  %v1640_v59 = vpop.permute.xlu0 %1639 }
 0x115   : > { %1255 = vrot.lane.b32.xlu1 %v7730_v38, %s7041_s12  ;;  %1729 = vst.msk [vmem:[#allocation5 + $0x38] sm:$0xff] %vm1721_vm14, %v1640_v59 }
 0x116   : > { %1384 = vrot.lane.b32.xlu0 %v7462_v43, %s7042_s13 }
 0x117   : > { %v634_v60 = vpop.permute.xlu1 %633 }
 0x118   : > { %721 = vst.msk [vmem:[#allocation5 + $0x48] sm:$0xff] %vm711_vm7, %v634_v60  ;;  %v842_v4 = vpop.permute.xlu0 %841  ;;  %v1760_v42 = vld [vmem:[#allocation5 + $0x30] sm:$0xff] }
 0x119   : > { %1386 = vrot.lane.b32.xlu1 %v7464_v44, %s7042_s13  ;;  %930 = vst.msk [vmem:[#allocation5 + $0x40] sm:$0xff] %vm921_vm8, %v842_v4  ;;  %6553 = vmatprep.mubr.msk.f32.mxu0 %vm1797_vm15, %v1760_v42  ;;  %v363_v60 = vld [vmem:[%s7224_s30 + $0xe0] sm:$0xff] }
 0x11a   : > { %1519 = vrot.lane.b32.xlu0 %v7783_v63, %s7043_s18  ;;  %396 = vst.msk [vmem:[#allocation2 + $0x169] sm:$0xff] %vm279_vm0, %v363_v60 }
 0x11b   : > { %v844_v40 = vpop.permute.xlu1 %843 }
 0x11c   : > { %931 = vst.msk [vmem:[#allocation5 + $0x48] sm:$0xff] %vm921_vm8, %v844_v40  ;;  %v973_v7 = vpop.permute.xlu0 %972  ;;  %v1761_v11 = vld [vmem:[#allocation5 + $0x38] sm:$0xff] }
 0x11d   : > { %1521 = vrot.lane.b32.xlu1 %v7786_v1, %s7043_s18  ;;  %1061 = vst.msk [vmem:[#allocation5 + $0x40] sm:$0xff] %vm1052_vm9, %v973_v7  ;;  %6554 = vmatmul.mubr.msk.f32.gmra.mrb[6].mxu0 %vm1797_vm15, %v1761_v11  ;;  %v8043_v7 = vsel %vm534_vm3, %v590_v2, %v591_v3  ;;  %v800_v11 = vrot.slane %v7614_v50, 2 }
 0x11e   : > { %1653 = vrot.lane.b32.xlu0 %v7798_v5, %s7045_s23 }
 0x11f   : > { %v975_v10 = vpop.permute.xlu1 %974 }
 0x120   : > { %1062 = vst.msk [vmem:[#allocation5 + $0x48] sm:$0xff] %vm1052_vm9, %v975_v10  ;;  %v1108_v15 = vpop.permute.xlu0 %1107 }
 0x121   : > { %647 = vrot.lane.b32.xlu1 %v7705_v26, %s7038_s9  ;;  %1196 = vst.msk [vmem:[#allocation5 + $0x40] sm:$0xff] %vm1187_vm10, %v1108_v15  ;;  %v362_v26 = vld [vmem:[%s7224_s30 + $0xd8] sm:$0xff] }
 0x122   : > { %1655 = vrot.lane.b32.xlu0 %v7808_v12, %s7045_s23  ;;  %395 = vst.msk [vmem:[#allocation2 + $0x159] sm:$0xff] %vm279_vm0, %v362_v26 }
 0x123   : > { %v1110_v8 = vpop.permute.xlu1 %1109 }
 0x124   : > { %1197 = vst.msk [vmem:[#allocation5 + $0x48] sm:$0xff] %vm1187_vm10, %v1110_v8  ;;  %v1242_v9 = vpop.permute.xlu0 %1241 }
 0x125   : > { %649 = vrot.lane.b32.xlu1 %v7708_v27, %s7038_s9  ;;  %1330 = vst.msk [vmem:[#allocation5 + $0x40] sm:$0xff] %vm1321_vm11, %v1242_v9  ;;  %v432_v27 = vld [vmem:[#allocation2 + $0x100] sm:$0x3] }
 0x126   : > { %857 = vrot.lane.b32.xlu0 %v7720_v33, %s7037_s8  ;;  %v588_v30 = vrot.slane %v432_v27, 1  ;;  %v7960_v33 = vld [vmem:[#allocation2 + $0x150] sm:$0xff]  ;;  %v798_v45 = vrot.slane %v432_v27, 2 }
 0x127   : > { %v1244_v16 = vpop.permute.xlu1 %1243  ;;  %482 = vst.msk [vmem:[#allocation5 + $0xe0] sm:$0xff] %vm279_vm0, %v7960_v33 }
 0x128   : > { %1331 = vst.msk [vmem:[#allocation5 + $0x48] sm:$0xff] %vm1321_vm11, %v1244_v16  ;;  %v1373_v17 = vpop.permute.xlu0 %1372  ;;  %v7968_v36 = vsel %vm534_vm3, %v586_v29, %v588_v30 }
 0x129   : > { %859 = vrot.lane.b32.xlu1 %v7730_v38, %s7037_s8  ;;  %1461 = vst.msk [vmem:[#allocation5 + $0x40] sm:$0xff] %vm1452_vm12, %v1373_v17  ;;  %v7962_v34 = vld [vmem:[#allocation2 + $0x158] sm:$0xff]  ;;  %v796_v38 = vrot.slane %v7538_v14, 2 }
 0x12a   : > { %988 = vrot.lane.b32.xlu0 %v7462_v43, %s7039_s10  ;;  %483 = vst.msk [vmem:[#allocation5 + $0xe8] sm:$0xff] %vm279_vm0, %v7962_v34 }
 0x12b   : > { %v1375_v18 = vpop.permute.xlu1 %1374  ;;  %v7984_v41 = vsel %vm744_vm2, %v795_v37, %v796_v38  ;;  %v7994_v49 = vsel %vm744_vm2, %v796_v38, %v798_v45  ;;  %v595_v37 = vrot.slane %v7692_v22, 1  ;;  %v596_v38 = vrot.slane %v7694_v25, 1 }
 0x12c   : > { %1462 = vst.msk [vmem:[#allocation5 + $0x48] sm:$0xff] %vm1452_vm12, %v1375_v18  ;;  %v1508_v19 = vpop.permute.xlu0 %1507 }
 0x12d   : > { %990 = vrot.lane.b32.xlu1 %v7464_v44, %s7039_s10  ;;  %1596 = vst.msk [vmem:[#allocation5 + $0x40] sm:$0xff] %vm1587_vm13, %v1508_v19 }
 0x12e   : > { %1123 = vrot.lane.b32.xlu0 %v7783_v63, %s7040_s11 }
 0x12f   : > { %v1510_v20 = vpop.permute.xlu1 %1509 }
 0x130   : > { %1597 = vst.msk [vmem:[#allocation5 + $0x48] sm:$0xff] %vm1587_vm13, %v1510_v20  ;;  %v1642_v43 = vpop.permute.xlu0 %1641 }
 0x131   : > { %1125 = vrot.lane.b32.xlu1 %v7786_v1, %s7040_s11  ;;  %1730 = vst.msk [vmem:[#allocation5 + $0x40] sm:$0xff] %vm1721_vm14, %v1642_v43 }
 0x132   : > { %1257 = vrot.lane.b32.xlu0 %v7798_v5, %s7041_s12 }
 0x133   : > { %v636_v44 = vpop.permute.xlu1 %635 }
 0x134   : > { %722 = vst.msk [vmem:[#allocation5 + $0x50] sm:$0xff] %vm711_vm7, %v636_v44  ;;  %v1644_v31 = vpop.permute.xlu0 %1643 }
 0x135   : > { %1259 = vrot.lane.b32.xlu1 %v7808_v12, %s7041_s12  ;;  %1731 = vst.msk [vmem:[#allocation5 + $0x48] sm:$0xff] %vm1721_vm14, %v1644_v31 }
 0x136   : > { %1388 = vrot.lane.b32.xlu0 %v7536_v13, %s7042_s13 }
 0x137   : > { %v638_v32 = vpop.permute.xlu1 %637 }
 0x138   : > { %723 = vst.msk [vmem:[#allocation5 + $0x58] sm:$0xff] %vm711_vm7, %v638_v32  ;;  %v846_v53 = vpop.permute.xlu0 %845  ;;  %v1762_v39 = vld [vmem:[#allocation5 + $0x40] sm:$0xff] }
 0x139   : > { %1390 = vrot.lane.b32.xlu1 %v7538_v14, %s7042_s13  ;;  %932 = vst.msk [vmem:[#allocation5 + $0x50] sm:$0xff] %vm921_vm8, %v846_v53  ;;  %6556 = vmatprep.mubr.msk.f32.mxu0 %vm1797_vm15, %v1762_v39  ;;  %v365_v32 = vld [vmem:[%s7224_s30 + $0xf0] sm:$0xff] }
 0x13a   : > { %1523 = vrot.lane.b32.xlu0 %v7965_v35, %s7043_s18  ;;  %398 = vst.msk [vmem:[#allocation2 + $0x181] sm:$0xff] %vm279_vm0, %v365_v32 }
 0x13b   : > { %v848_v54 = vpop.permute.xlu1 %847 }
 0x13c   : > { %933 = vst.msk [vmem:[#allocation5 + $0x58] sm:$0xff] %vm921_vm8, %v848_v54  ;;  %v977_v46 = vpop.permute.xlu0 %976  ;;  %v1763_v48 = vld [vmem:[#allocation5 + $0x48] sm:$0xff] }
 0x13d   : > { %1525 = vrot.lane.b32.xlu1 %v7968_v36, %s7043_s18  ;;  %1063 = vst.msk [vmem:[#allocation5 + $0x50] sm:$0xff] %vm1052_vm9, %v977_v46  ;;  %6557 = vmatmul.mubr.msk.f32.gmra.mrb[8].mxu0 %vm1797_vm15, %v1763_v48  ;;  %v805_v46 = vrot.slane %v7692_v22, 2 }
 0x13e   : > { %1657 = vrot.lane.b32.xlu0 %v7984_v41, %s7045_s23 }
 0x13f   : > { %v979_v47 = vpop.permute.xlu1 %978 }
 0x140   : > { %1064 = vst.msk [vmem:[#allocation5 + $0x58] sm:$0xff] %vm1052_vm9, %v979_v47  ;;  %v1112_v52 = vpop.permute.xlu0 %1111  ;;  %v806_v47 = vrot.slane %v7694_v25, 2 }
 0x141   : > { %651 = vrot.lane.b32.xlu1 %v7783_v63, %s7038_s9  ;;  %1198 = vst.msk [vmem:[#allocation5 + $0x50] sm:$0xff] %vm1187_vm10, %v1112_v52  ;;  %v364_v63 = vld [vmem:[%s7224_s30 + $0xe8] sm:$0xff] }
 0x142   : > { %1659 = vrot.lane.b32.xlu0 %v7994_v49, %s7045_s23  ;;  %397 = vst.msk [vmem:[#allocation2 + $0x171] sm:$0xff] %vm279_vm0, %v364_v63 }
 0x143   : > { %v1114_v23 = vpop.permute.xlu1 %1113 }
 0x144   : > { %1199 = vst.msk [vmem:[#allocation5 + $0x58] sm:$0xff] %vm1187_vm10, %v1114_v23  ;;  %v1246_v24 = vpop.permute.xlu0 %1245  ;;  %v8132_v23 = vsel %vm744_vm2, %v805_v46, %v806_v47 }
 0x145   : > { %653 = vrot.lane.b32.xlu1 %v7786_v1, %s7038_s9  ;;  %1332 = vst.msk [vmem:[#allocation5 + $0x50] sm:$0xff] %vm1321_vm11, %v1246_v24  ;;  %v435_v1 = vld [vmem:[#allocation2 + $0x118] sm:$0x3] }
 0x146   : > { %861 = vrot.lane.b32.xlu0 %v7798_v5, %s7037_s8  ;;  %v593_v4 = vrot.slane %v435_v1, 1  ;;  %v8038_v5 = vld [vmem:[#allocation2 + $0x168] sm:$0xff]  ;;  %v803_v17 = vrot.slane %v435_v1, 2 }
 0x147   : > { %v1248_v55 = vpop.permute.xlu1 %1247  ;;  %484 = vst.msk [vmem:[#allocation5 + $0xf0] sm:$0xff] %vm279_vm0, %v8038_v5 }
 0x148   : > { %1333 = vst.msk [vmem:[#allocation5 + $0x58] sm:$0xff] %vm1321_vm11, %v1248_v55  ;;  %v1377_v56 = vpop.permute.xlu0 %1376  ;;  %v8046_v10 = vsel %vm534_vm3, %v591_v3, %v593_v4 }
 0x149   : > { %863 = vrot.lane.b32.xlu1 %v7808_v12, %s7037_s8  ;;  %1463 = vst.msk [vmem:[#allocation5 + $0x50] sm:$0xff] %vm1452_vm12, %v1377_v56  ;;  %v8040_v6 = vld [vmem:[#allocation2 + $0x170] sm:$0xff]  ;;  %v801_v12 = vrot.slane %v7616_v51, 2 }
 0x14a   : > { %992 = vrot.lane.b32.xlu0 %v7536_v13, %s7039_s10  ;;  %485 = vst.msk [vmem:[#allocation5 + $0xf8] sm:$0xff] %vm279_vm0, %v8040_v6 }
 0x14b   : > { %v1379_v57 = vpop.permute.xlu1 %1378  ;;  %v8062_v16 = vsel %vm744_vm2, %v800_v11, %v801_v12  ;;  %v8072_v21 = vsel %vm744_vm2, %v801_v12, %v803_v17 }
 0x14c   : > { %1464 = vst.msk [vmem:[#allocation5 + $0x58] sm:$0xff] %vm1452_vm12, %v1379_v57  ;;  %v1512_v58 = vpop.permute.xlu0 %1511 }
 0x14d   : > { %994 = vrot.lane.b32.xlu1 %v7538_v14, %s7039_s10  ;;  %1598 = vst.msk [vmem:[#allocation5 + $0x50] sm:$0xff] %vm1587_vm13, %v1512_v58 }
 0x14e   : > { %1127 = vrot.lane.b32.xlu0 %v7965_v35, %s7040_s11 }
 0x14f   : > { %v1514_v59 = vpop.permute.xlu1 %1513 }
 0x150   : > { %1599 = vst.msk [vmem:[#allocation5 + $0x58] sm:$0xff] %vm1587_vm13, %v1514_v59  ;;  %v1646_v13 = vpop.permute.xlu0 %1645 }
 0x151   : > { %1129 = vrot.lane.b32.xlu1 %v7968_v36, %s7040_s11  ;;  %1732 = vst.msk [vmem:[#allocation5 + $0x50] sm:$0xff] %vm1721_vm14, %v1646_v13 }
 0x152   : > { %1261 = vrot.lane.b32.xlu0 %v7984_v41, %s7041_s12 }
 0x153   : > { %v640_v14 = vpop.permute.xlu1 %639 }
 0x154   : > { %724 = vst.msk [vmem:[#allocation5 + $0x60] sm:$0xff] %vm711_vm7, %v640_v14  ;;  %v1648_v40 = vpop.permute.xlu0 %1647 }
 0x155   : > { %1263 = vrot.lane.b32.xlu1 %v7994_v49, %s7041_s12  ;;  %1733 = vst.msk [vmem:[#allocation5 + $0x58] sm:$0xff] %vm1721_vm14, %v1648_v40 }
 0x156   : > { %1392 = vrot.lane.b32.xlu0 %v7614_v50, %s7042_s13 }
 0x157   : > { %v642_v42 = vpop.permute.xlu1 %641 }
 0x158   : > { %725 = vst.msk [vmem:[#allocation5 + $0x68] sm:$0xff] %vm711_vm7, %v642_v42  ;;  %v850_v15 = vpop.permute.xlu0 %849  ;;  %v1764_v9 = vld [vmem:[#allocation5 + $0x50] sm:$0xff]  ;;  %v441_v42 = vld [vmem:[#allocation2 + $0x148] sm:$0x3] }
 0x159   : > { %1394 = vrot.lane.b32.xlu1 %v7616_v51, %s7042_s13  ;;  %934 = vst.msk [vmem:[#allocation5 + $0x60] sm:$0xff] %vm921_vm8, %v850_v15  ;;  %6559 = vmatprep.mubr.msk.f32.mxu0 %vm1797_vm15, %v1764_v9  ;;  %v811_v9 = vrot.slane %v7772_v62, 2 }
 0x15a   : > { %1527 = vrot.lane.b32.xlu0 %v8043_v7, %s7043_s18 }
 0x15b   : > { %v852_v8 = vpop.permute.xlu1 %851 }
 0x15c   : > { %935 = vst.msk [vmem:[#allocation5 + $0x68] sm:$0xff] %vm921_vm8, %v852_v8  ;;  %v981_v18 = vpop.permute.xlu0 %980  ;;  %v1765_v20 = vld [vmem:[#allocation5 + $0x58] sm:$0xff]  ;;  %v810_v8 = vrot.slane %v7770_v61, 2 }
 0x15d   : > { %1529 = vrot.lane.b32.xlu1 %v8046_v10, %s7043_s18  ;;  %1065 = vst.msk [vmem:[#allocation5 + $0x60] sm:$0xff] %vm1052_vm9, %v981_v18  ;;  %6560 = vmatmul.mubr.msk.f32.gmra.mrb[10].mxu0 %vm1797_vm15, %v1765_v20  ;;  %v813_v20 = vrot.slane %v441_v42, 2 }
 0x15e   : > { %1661 = vrot.lane.b32.xlu0 %v8062_v16, %s7045_s23 }
 0x15f   : > { %v983_v19 = vpop.permute.xlu1 %982 }
 0x160   : > { %1066 = vst.msk [vmem:[#allocation5 + $0x68] sm:$0xff] %vm1052_vm9, %v983_v19  ;;  %v1116_v26 = vpop.permute.xlu0 %1115  ;;  %v8198_v19 = vsel %vm744_vm2, %v810_v8, %v811_v9  ;;  %v815_v8 = vrot.slane %v7960_v33, 2 }
 0x161   : > { %655 = vrot.lane.b32.xlu1 %v7965_v35, %s7038_s9  ;;  %1200 = vst.msk [vmem:[#allocation5 + $0x60] sm:$0xff] %vm1187_vm10, %v1116_v26  ;;  %v366_v35 = vld [vmem:[%s7224_s30 + $0xf8] sm:$0xff] }
 0x162   : > { %1663 = vrot.lane.b32.xlu0 %v8072_v21, %s7045_s23  ;;  %399 = vst.msk [vmem:[#allocation2 + $0x189] sm:$0xff] %vm279_vm0, %v366_v35  ;;  %v8225_v35 = vld [vmem:[%s11383_s2] ss:$0 sm:$0xff]  ;;  %vm2554_vm0 = vcmask 523520  }
 0x163   : > { %v1118_v43 = vpop.permute.xlu1 %1117 }
 0x164   : > { %1201 = vst.msk [vmem:[#allocation5 + $0x68] sm:$0xff] %vm1187_vm10, %v1118_v43  ;;  %v1250_v44 = vpop.permute.xlu0 %1249 }
 0x165   : > { %657 = vrot.lane.b32.xlu1 %v7968_v36, %s7038_s9  ;;  %1334 = vst.msk [vmem:[#allocation5 + $0x60] sm:$0xff] %vm1321_vm11, %v1250_v44  ;;  %v438_v36 = vld [vmem:[#allocation2 + $0x130] sm:$0x3]  ;;  %v8208_v44 = vsel %vm744_vm2, %v811_v9, %v813_v20  ;;  %v816_v9 = vrot.slane %v7962_v34, 2 }
 0x166   : > { %865 = vrot.lane.b32.xlu0 %v7984_v41, %s7037_s8  ;;  %v598_v53 = vrot.slane %v438_v36, 1  ;;  %v8117_v41 = vsel %vm534_vm3, %v595_v37, %v596_v38  ;;  %v808_v24 = vrot.slane %v438_v36, 2 }
 0x167   : > { %v1252_v27 = vpop.permute.xlu1 %1251 }
 0x168   : > { %1335 = vst.msk [vmem:[#allocation5 + $0x68] sm:$0xff] %vm1321_vm11, %v1252_v27  ;;  %v1381_v28 = vpop.permute.xlu0 %1380  ;;  %v8120_v45 = vsel %vm534_vm3, %v596_v38, %v598_v53  ;;  %v8142_v58 = vsel %vm744_vm2, %v806_v47, %v808_v24  ;;  %v2244_v27 = vld [vmem:[#allocation3] sm:$0xff] }
 0x169   : > { %867 = vrot.lane.b32.xlu1 %v7994_v49, %s7037_s8  ;;  %1465 = vst.msk [vmem:[#allocation5 + $0x60] sm:$0xff] %vm1452_vm12, %v1381_v28  ;;  %v8210_v28 = vld [vmem:[#allocation3 + $0x8] sm:$0xff]  ;;  %v2587_v37 = vrot.slane %v2244_v27, 2 }
 0x16a   : > { %996 = vrot.lane.b32.xlu0 %v7614_v50, %s7039_s10  ;;  %v2379_v32 = vrot.slane %v8210_v28, 1  ;;  %2298 = vst.msk [vmem:[#allocation6] sm:$0xff] %vm2155_vm1, %v2244_v27  ;;  %2299 = vst.msk [vmem:[#allocation6 + $0x18] sm:$0xff] %vm2155_vm1, %v8210_v28  ;;  %v2588_v38 = vrot.slane %v8210_v28, 2 }
 0x16b   : > { %v1383_v29 = vpop.permute.xlu1 %1382 }
 0x16c   : > { %1466 = vst.msk [vmem:[#allocation5 + $0x68] sm:$0xff] %vm1452_vm12, %v1383_v29  ;;  %v1516_v30 = vpop.permute.xlu0 %1515 }
 0x16d   : > { %998 = vrot.lane.b32.xlu1 %v7616_v51, %s7039_s10  ;;  %1600 = vst.msk [vmem:[#allocation5 + $0x60] sm:$0xff] %vm1587_vm13, %v1516_v30 }
 0x16e   : > { %1131 = vrot.lane.b32.xlu0 %v8043_v7, %s7040_s11 }
 0x16f   : > { %v1518_v31 = vpop.permute.xlu1 %1517 }
 0x170   : > { %1601 = vst.msk [vmem:[#allocation5 + $0x68] sm:$0xff] %vm1587_vm13, %v1518_v31  ;;  %v1650_v50 = vpop.permute.xlu0 %1649  ;;  %v2378_v31 = vrot.slane %v2244_v27, 1 }
 0x171   : > { %1133 = vrot.lane.b32.xlu1 %v8046_v10, %s7040_s11  ;;  %1734 = vst.msk [vmem:[#allocation5 + $0x60] sm:$0xff] %vm1721_vm14, %v1650_v50 }
 0x172   : > { %1265 = vrot.lane.b32.xlu0 %v8062_v16, %s7041_s12  ;;  %v8230_v50 = vsel %vm534_vm3, %v2378_v31, %v2379_v32 }
 0x173   : > { %v644_v51 = vpop.permute.xlu1 %643 }
 0x174   : > { %726 = vst.msk [vmem:[#allocation5 + $0x70] sm:$0xff] %vm711_vm7, %v644_v51  ;;  %v1652_v54 = vpop.permute.xlu0 %1651 }
 0x175   : > { %1267 = vrot.lane.b32.xlu1 %v8072_v21, %s7041_s12  ;;  %1735 = vst.msk [vmem:[#allocation5 + $0x68] sm:$0xff] %vm1721_vm14, %v1652_v54 }
 0x176   : > { %1396 = vrot.lane.b32.xlu0 %v7692_v22, %s7042_s13 }
 0x177   : > { %v646_v39 = vpop.permute.xlu1 %645 }
 0x178   : > { %727 = vst.msk [vmem:[#allocation5 + $0x78] sm:$0xff] %vm711_vm7, %v646_v39  ;;  %v854_v48 = vpop.permute.xlu0 %853  ;;  %v1766_v52 = vld [vmem:[#allocation5 + $0x60] sm:$0xff] }
 0x179   : > { %1398 = vrot.lane.b32.xlu1 %v7694_v25, %s7042_s13  ;;  %936 = vst.msk [vmem:[#allocation5 + $0x70] sm:$0xff] %vm921_vm8, %v854_v48  ;;  %6562 = vmatprep.mubr.msk.f32.mxu0 %vm1797_vm15, %v1766_v52 }
 0x17a   : > { %1531 = vrot.lane.b32.xlu0 %v8117_v41, %s7043_s18 }
 0x17b   : > { %v856_v49 = vpop.permute.xlu1 %855 }
 0x17c   : > { %937 = vst.msk [vmem:[#allocation5 + $0x78] sm:$0xff] %vm921_vm8, %v856_v49  ;;  %v985_v55 = vpop.permute.xlu0 %984  ;;  %v1767_v57 = vld [vmem:[#allocation5 + $0x68] sm:$0xff] }
 0x17d   : > { %1533 = vrot.lane.b32.xlu1 %v8120_v45, %s7043_s18  ;;  %1067 = vst.msk [vmem:[#allocation5 + $0x70] sm:$0xff] %vm1052_vm9, %v985_v55  ;;  %6563 = vmatmul.mubr.msk.f32.gmra.mrb[12].mxu0 %vm1797_vm15, %v1767_v57  ;;  %v444_v55 = vld [vmem:[#allocation2 + $0x160] sm:$0x3] }
 0x17e   : > { %1665 = vrot.lane.b32.xlu0 %v8132_v23, %s7045_s23 }
 0x17f   : > { %v987_v56 = vpop.permute.xlu1 %986 }
 0x180   : > { %1068 = vst.msk [vmem:[#allocation5 + $0x78] sm:$0xff] %vm1052_vm9, %v987_v56  ;;  %v1120_v59 = vpop.permute.xlu0 %1119 }
 0x181   : > { %659 = vrot.lane.b32.xlu1 %v8043_v7, %s7038_s9  ;;  %1202 = vst.msk [vmem:[#allocation5 + $0x70] sm:$0xff] %vm1187_vm10, %v1120_v59  ;;  %v603_v7 = vrot.slane %v441_v42, 1  ;;  %v605_v59 = vrot.slane %v7960_v33, 1 }
 0x182   : > { %1667 = vrot.lane.b32.xlu0 %v8142_v58, %s7045_s23 }
 0x183   : > { %v1122_v60 = vpop.permute.xlu1 %1121 }
 0x184   : > { %1203 = vst.msk [vmem:[#allocation5 + $0x78] sm:$0xff] %vm1187_vm10, %v1122_v60  ;;  %v1254_v63 = vpop.permute.xlu0 %1253  ;;  %v606_v60 = vrot.slane %v7962_v34, 1 }
 0x185   : > { %661 = vrot.lane.b32.xlu1 %v8046_v10, %s7038_s9  ;;  %1336 = vst.msk [vmem:[#allocation5 + $0x70] sm:$0xff] %vm1321_vm11, %v1254_v63 }
 0x186   : > { %869 = vrot.lane.b32.xlu0 %v8062_v16, %s7037_s8 }
 0x187   : > { %v1256_v13 = vpop.permute.xlu1 %1255 }
 0x188   : > { %1337 = vst.msk [vmem:[#allocation5 + $0x78] sm:$0xff] %vm1321_vm11, %v1256_v13  ;;  %v1385_v14 = vpop.permute.xlu0 %1384  ;;  %v608_v13 = vrot.slane %v444_v55, 1 }
 0x189   : > { %871 = vrot.lane.b32.xlu1 %v8072_v21, %s7037_s8  ;;  %1467 = vst.msk [vmem:[#allocation5 + $0x70] sm:$0xff] %vm1452_vm12, %v1385_v14 }
 0x18a   : > { %1000 = vrot.lane.b32.xlu0 %v7692_v22, %s7039_s10  ;;  %v600_v22 = vrot.slane %v7770_v61, 1 }
 0x18b   : > { %v1387_v1 = vpop.permute.xlu1 %1386 }
 0x18c   : > { %1468 = vst.msk [vmem:[#allocation5 + $0x78] sm:$0xff] %vm1452_vm12, %v1387_v1  ;;  %v1520_v2 = vpop.permute.xlu0 %1519 }
 0x18d   : > { %1002 = vrot.lane.b32.xlu1 %v7694_v25, %s7039_s10  ;;  %1602 = vst.msk [vmem:[#allocation5 + $0x70] sm:$0xff] %vm1587_vm13, %v1520_v2  ;;  %v601_v25 = vrot.slane %v7772_v62, 1 }
 0x18e   : > { %1135 = vrot.lane.b32.xlu0 %v8117_v41, %s7040_s11 }
 0x18f   : > { %v1522_v3 = vpop.permute.xlu1 %1521  ;;  %v8183_v12 = vsel %vm534_vm3, %v600_v22, %v601_v25  ;;  %v8186_v15 = vsel %vm534_vm3, %v601_v25, %v603_v7  ;;  %v8296_v7 = vsel %vm534_vm3, %v605_v59, %v606_v60 }
 0x190   : > { %1603 = vst.msk [vmem:[#allocation5 + $0x78] sm:$0xff] %vm1587_vm13, %v1522_v3  ;;  %v1654_v4 = vpop.permute.xlu0 %1653 }
 0x191   : > { %1137 = vrot.lane.b32.xlu1 %v8120_v45, %s7040_s11  ;;  %1736 = vst.msk [vmem:[#allocation5 + $0x70] sm:$0xff] %vm1721_vm14, %v1654_v4 }
 0x192   : > { %1269 = vrot.lane.b32.xlu0 %v8132_v23, %s7041_s12 }
 0x193   : > { %v648_v40 = vpop.permute.xlu1 %647 }
 0x194   : > { %728 = vst.msk [vmem:[#allocation5 + $0x80] sm:$0xff] %vm711_vm7, %v648_v40  ;;  %v1656_v10 = vpop.permute.xlu0 %1655 }
 0x195   : > { %1271 = vrot.lane.b32.xlu1 %v8142_v58, %s7041_s12  ;;  %1737 = vst.msk [vmem:[#allocation5 + $0x78] sm:$0xff] %vm1721_vm14, %v1656_v10 }
 0x196   : > { %1400 = vrot.lane.b32.xlu0 %v7770_v61, %s7042_s13 }
 0x197   : > { %v650_v11 = vpop.permute.xlu1 %649 }
 0x198   : > { %729 = vst.msk [vmem:[#allocation5 + $0x88] sm:$0xff] %vm711_vm7, %v650_v11  ;;  %v858_v16 = vpop.permute.xlu0 %857  ;;  %v1768_v18 = vld [vmem:[#allocation5 + $0x70] sm:$0xff]  ;;  %v8303_v11 = vsel %vm534_vm3, %v606_v60, %v608_v13  ;;  %v447_v60 = vld [vmem:[#allocation2 + $0x178] sm:$0x3] }
 0x199   : > { %1402 = vrot.lane.b32.xlu1 %v7772_v62, %s7042_s13  ;;  %938 = vst.msk [vmem:[#allocation5 + $0x80] sm:$0xff] %vm921_vm8, %v858_v16  ;;  %6565 = vmatprep.mubr.msk.f32.mxu0 %vm1797_vm15, %v1768_v18 }
 0x19a   : > { %1535 = vrot.lane.b32.xlu0 %v8183_v12, %s7043_s18 }
 0x19b   : > { %v860_v17 = vpop.permute.xlu1 %859 }
 0x19c   : > { %939 = vst.msk [vmem:[#allocation5 + $0x88] sm:$0xff] %vm921_vm8, %v860_v17  ;;  %v989_v21 = vpop.permute.xlu0 %988  ;;  %v1769_v43 = vld [vmem:[#allocation5 + $0x78] sm:$0xff] }
 0x19d   : > { %1537 = vrot.lane.b32.xlu1 %v8186_v15, %s7043_s18  ;;  %1069 = vst.msk [vmem:[#allocation5 + $0x80] sm:$0xff] %vm1052_vm9, %v989_v21  ;;  %6566 = vmatmul.mubr.msk.f32.gmra.mrb[14].mxu0 %vm1797_vm15, %v1769_v43  ;;  %v8317_v21 = vsel %vm744_vm2, %v815_v8, %v816_v9 }
 0x19e   : > { %1669 = vrot.lane.b32.xlu0 %v8198_v19, %s7045_s23 }
 0x19f   : > { %v991_v26 = vpop.permute.xlu1 %990 }
 0x1a0   : > { %1070 = vst.msk [vmem:[#allocation5 + $0x88] sm:$0xff] %vm1052_vm9, %v991_v26  ;;  %v1124_v29 = vpop.permute.xlu0 %1123  ;;  %v818_v26 = vrot.slane %v444_v55, 2 }
 0x1a1   : > { %663 = vrot.lane.b32.xlu1 %v8117_v41, %s7038_s9  ;;  %1204 = vst.msk [vmem:[#allocation5 + $0x80] sm:$0xff] %vm1187_vm10, %v1124_v29 }
 0x1a2   : > { %1671 = vrot.lane.b32.xlu0 %v8208_v44, %s7045_s23 }
 0x1a3   : > { %v1126_v30 = vpop.permute.xlu1 %1125 }
 0x1a4   : > { %1205 = vst.msk [vmem:[#allocation5 + $0x88] sm:$0xff] %vm1187_vm10, %v1126_v30  ;;  %v1258_v51 = vpop.permute.xlu0 %1257  ;;  %v8327_v30 = vsel %vm744_vm2, %v816_v9, %v818_v26  ;;  %v820_v9 = vrot.slane %v8038_v5, 2 }
 0x1a5   : > { %665 = vrot.lane.b32.xlu1 %v8120_v45, %s7038_s9  ;;  %1338 = vst.msk [vmem:[#allocation5 + $0x80] sm:$0xff] %vm1321_vm11, %v1258_v51  ;;  %v8244_v45 = vsel %vm744_vm2, %v2587_v37, %v2588_v38 }
 0x1a6   : > { %873 = vrot.lane.b32.xlu0 %v8132_v23, %s7037_s8 }
 0x1a7   : > { %v6546_v36 = vpop.f32.mrb[0].mxu0  ;;  %v1260_v54 = vpop.permute.xlu1 %1259 }
 0x1a8   : > { %v1970_v53 = vadd.f32 %v6546_v36, %v8225_v35  ;;  %v1964_v39 = vpop.f32.mrb[1].mxu0  ;;  %1339 = vst.msk [vmem:[#allocation5 + $0x88] sm:$0xff] %vm1321_vm11, %v1260_v54  ;;  %v1389_v48 = vpop.permute.xlu0 %1388 }
 0x1a9   : > { %v1965_v41 = vadd.f32 %v8225_v35, %v1964_v39  ;;  %875 = vrot.lane.b32.xlu1 %v8142_v58, %s7037_s8  ;;  %1469 = vst.msk [vmem:[#allocation5 + $0x80] sm:$0xff] %vm1452_vm12, %v1389_v48 }
 0x1aa   : > { %v2124_v46 = vmax.f32 %v1970_v53, 0.0  ;;  %1004 = vrot.lane.b32.xlu0 %v7770_v61, %s7039_s10 }
 0x1ab   : > { %v2123_v47 = vmax.f32 %v1965_v41, 0.0  ;;  %v1391_v49 = vpop.permute.xlu1 %1390 }
 0x1ac   : > { %2213 = vst.msk [vmem:[#allocation3 + $0x21] sm:$0xff] %vm2155_vm1, %v2124_v46  ;;  %v1524_v52 = vpop.permute.xlu0 %1523 }
 0x1ad   : > { %2212 = vst.msk [vmem:[#allocation3 + $0x19] sm:$0xff] %vm2155_vm1, %v2123_v47  ;;  %1006 = vrot.lane.b32.xlu1 %v7772_v62, %s7039_s10 }
 0x1ae   : > { %1470 = vst.msk [vmem:[#allocation5 + $0x88] sm:$0xff] %vm1452_vm12, %v1391_v49  ;;  %1139 = vrot.lane.b32.xlu0 %v8183_v12, %s7040_s11 }
 0x1af   : > { %1604 = vst.msk [vmem:[#allocation5 + $0x80] sm:$0xff] %vm1587_vm13, %v1524_v52  ;;  %v1526_v23 = vpop.permute.xlu1 %1525 }
 0x1b0   : > { %1605 = vst.msk [vmem:[#allocation5 + $0x88] sm:$0xff] %vm1587_vm13, %v1526_v23  ;;  %v1658_v24 = vpop.permute.xlu0 %1657 }
 0x1b1   : > { %1141 = vrot.lane.b32.xlu1 %v8186_v15, %s7040_s11  ;;  %1738 = vst.msk [vmem:[#allocation5 + $0x80] sm:$0xff] %vm1721_vm14, %v1658_v24 }
 0x1b2   : > { %1273 = vrot.lane.b32.xlu0 %v8198_v19, %s7041_s12 }
 0x1b3   : > { %v8260_v56 = vld [vmem:[#allocation3 + $0x28] sm:$0x3]  ;;  %v652_v61 = vpop.permute.xlu1 %651 }
 0x1b4   : > { %v8263_v62 = vld [vmem:[#allocation3 + $0x18] sm:$0xff]  ;;  %v8265_v57 = vld [vmem:[#allocation3 + $0x20] sm:$0xff]  ;;  %v2386_v58 = vrot.slane %v8260_v56, 1  ;;  %730 = vst.msk [vmem:[#allocation5 + $0x90] sm:$0xff] %vm711_vm7, %v652_v61  ;;  %v1660_v1 = vpop.permute.xlu0 %1659  ;;  %v6549_v2 = vpop.f32.mrb[2].mxu0 }
 0x1b5   : > { %1275 = vrot.lane.b32.xlu1 %v8208_v44, %s7041_s12  ;;  %2300 = vst.msk [vmem:[#allocation6 + $0x30] sm:$0xff] %vm2155_vm1, %v8263_v62  ;;  %2301 = vst.msk [vmem:[#allocation6 + $0x48] sm:$0xff] %vm2155_vm1, %v8265_v57  ;;  %v2383_v63 = vrot.slane %v8263_v62, 1  ;;  %v2384_v14 = vrot.slane %v8265_v57, 1  ;;  %v1980_v4 = vadd.f32 %v6549_v2, %v8225_v35  ;;  %v1974_v40 = vpop.f32.mrb[3].mxu0  ;;  %v611_v2 = vrot.slane %v8040_v6, 1 }
 0x1b6   : > { %1739 = vst.msk [vmem:[#allocation5 + $0x88] sm:$0xff] %vm1721_vm14, %v1660_v1  ;;  %v1975_v25 = vadd.f32 %v8225_v35, %v1974_v40  ;;  %1404 = vrot.lane.b32.xlu0 %v7960_v33, %s7042_s13  ;;  %v610_v1 = vrot.slane %v8038_v5, 1 }
 0x1b7   : > { %v654_v3 = vpop.permute.xlu1 %653  ;;  %v8284_v42 = vsel %vm534_vm3, %v2383_v63, %v2384_v14  ;;  %v8287_v22 = vsel %vm534_vm3, %v2384_v14, %v2386_v58  ;;  %v2126_v10 = vmax.f32 %v1980_v4, 0.0 }
 0x1b8   : > { %731 = vst.msk [vmem:[#allocation5 + $0x98] sm:$0xff] %vm711_vm7, %v654_v3  ;;  %v2125_v16 = vmax.f32 %v1975_v25, 0.0  ;;  %v862_v17 = vpop.permute.xlu0 %861  ;;  %v1770_v18 = vld [vmem:[#allocation5 + $0x80] sm:$0xff]  ;;  %v613_v3 = vrot.slane %v447_v60, 1 }
 0x1b9   : > { %1406 = vrot.lane.b32.xlu1 %v7962_v34, %s7042_s13  ;;  %2965 = vst.msk [vmem:[#allocation6 + $0x8] sm:$0xff] %vm2155_vm1, %v8284_v42  ;;  %2966 = vst.msk [vmem:[#allocation6 + $0x20] sm:$0xff] %vm2155_vm1, %v8287_v22  ;;  %6568 = vmatprep.mubr.msk.f32.mxu0 %vm1797_vm15, %v1770_v18 }
 0x1ba   : > { %2215 = vst.msk [vmem:[#allocation3 + $0x39] sm:$0xff] %vm2155_vm1, %v2126_v10  ;;  %2214 = vst.msk [vmem:[#allocation3 + $0x31] sm:$0xff] %vm2155_vm1, %v2125_v16  ;;  %1539 = vrot.lane.b32.xlu0 %v8296_v7, %s7043_s18  ;;  %v8404_v10 = vsel %vm534_vm3, %v610_v1, %v611_v2  ;;  %v8407_v8 = vsel %vm534_vm3, %v611_v2, %v613_v3  ;;  %v821_v16 = vrot.slane %v8040_v6, 2  ;;  %v3561_v1 = vld [vmem:[%s11384_s3 + $0x10] sm:$0xff] }
 0x1bb   : > { %940 = vst.msk [vmem:[#allocation5 + $0x90] sm:$0xff] %vm921_vm8, %v862_v17  ;;  %v864_v20 = vpop.permute.xlu1 %863 }
 0x1bc   : > { %941 = vst.msk [vmem:[#allocation5 + $0x98] sm:$0xff] %vm921_vm8, %v864_v20  ;;  %v993_v43 = vpop.permute.xlu0 %992  ;;  %v8419_v26 = vsel %vm744_vm2, %v820_v9, %v821_v16  ;;  %v8508_v9 = vld [vmem:[#allocation2 + $0x180] sm:$0xff] }
 0x1bd   : > { %1541 = vrot.lane.b32.xlu1 %v8303_v11, %s7043_s18  ;;  %v1771_v27 = vld [vmem:[#allocation5 + $0x88] sm:$0xff]  ;;  %1071 = vst.msk [vmem:[#allocation5 + $0x90] sm:$0xff] %vm1052_vm9, %v993_v43  ;;  %v823_v43 = vrot.slane %v447_v60, 2 }
 0x1be   : > { %6569 = vmatmul.mubr.msk.f32.gmra.mrb[16].mxu0 %vm1797_vm15, %v1771_v27  ;;  %1673 = vrot.lane.b32.xlu0 %v8317_v21, %s7045_s23 }
 0x1bf   : > { %v995_v29 = vpop.permute.xlu1 %994 }
 0x1c0   : > { %1072 = vst.msk [vmem:[#allocation5 + $0x98] sm:$0xff] %vm1052_vm9, %v995_v29  ;;  %v1128_v31 = vpop.permute.xlu0 %1127 }
 0x1c1   : > { %667 = vrot.lane.b32.xlu1 %v8183_v12, %s7038_s9  ;;  %v2252_v51 = vld [vmem:[#allocation3 + $0x40] sm:$0x3]  ;;  %1206 = vst.msk [vmem:[#allocation5 + $0x90] sm:$0xff] %vm1187_vm10, %v1128_v31  ;;  %v8330_v37 = vld [vmem:[#allocation3 + $0x30] sm:$0xff]  ;;  %v8332_v53 = vld [vmem:[#allocation3 + $0x38] sm:$0xff] }
 0x1c2   : > { %v2391_v54 = vrot.slane %v2252_v51, 1  ;;  %v2600_v39 = vrot.slane %v2252_v51, 2  ;;  %1675 = vrot.lane.b32.xlu0 %v8327_v30, %s7045_s23  ;;  %2302 = vst.msk [vmem:[#allocation6 + $0x60] sm:$0xff] %vm2155_vm1, %v8330_v37  ;;  %v2388_v12 = vrot.slane %v8330_v37, 1  ;;  %v2389_v41 = vrot.slane %v8332_v53, 1  ;;  %2303 = vst.msk [vmem:[#allocation6 + $0x78] sm:$0xff] %vm2155_vm1, %v8332_v53 }
 0x1c3   : > { %v1130_v36 = vpop.permute.xlu1 %1129  ;;  %v2597_v46 = vrot.slane %v8330_v37, 2  ;;  %v2598_v47 = vrot.slane %v8332_v53, 2 }
 0x1c4   : > { %1207 = vst.msk [vmem:[#allocation5 + $0x98] sm:$0xff] %vm1187_vm10, %v1130_v36  ;;  %v1262_v48 = vpop.permute.xlu0 %1261  ;;  %v8348_v49 = vsel %vm534_vm3, %v2388_v12, %v2389_v41 }
 0x1c5   : > { %669 = vrot.lane.b32.xlu1 %v8186_v15, %s7038_s9  ;;  %v8351_v15 = vsel %vm534_vm3, %v2389_v41, %v2391_v54  ;;  %v8354_v52 = vsel %vm744_vm2, %v2597_v46, %v2598_v47  ;;  %v8357_v23 = vsel %vm744_vm2, %v2598_v47, %v2600_v39  ;;  %1340 = vst.msk [vmem:[#allocation5 + $0x90] sm:$0xff] %vm1321_vm11, %v1262_v48 }
 0x1c6   : > { %2967 = vst.msk [vmem:[#allocation6 + $0x38] sm:$0xff] %vm2155_vm1, %v8348_v49  ;;  %2968 = vst.msk [vmem:[#allocation6 + $0x50] sm:$0xff] %vm2155_vm1, %v8351_v15  ;;  %877 = vrot.lane.b32.xlu0 %v8198_v19, %s7037_s8 }
 0x1c7   : > { %v1264_v24 = vpop.permute.xlu1 %1263  ;;  %3431 = vst.msk [vmem:[#allocation6 + $0x10] sm:$0xff] %vm2155_vm1, %v8354_v52  ;;  %3432 = vst.msk [vmem:[#allocation6 + $0x28] sm:$0xff] %vm2155_vm1, %v8357_v23 }
 0x1c8   : > { %1341 = vst.msk [vmem:[#allocation5 + $0x98] sm:$0xff] %vm1321_vm11, %v1264_v24  ;;  %v1393_v55 = vpop.permute.xlu0 %1392  ;;  %v8441_v24 = vsel %vm744_vm2, %v821_v16, %v823_v43  ;;  %v8510_v16 = vld [vmem:[#allocation2 + $0x188] sm:$0xff] }
 0x1c9   : > { %879 = vrot.lane.b32.xlu1 %v8208_v44, %s7037_s8  ;;  %1471 = vst.msk [vmem:[#allocation5 + $0x90] sm:$0xff] %vm1452_vm12, %v1393_v55 }
 0x1ca   : > { %1008 = vrot.lane.b32.xlu0 %v7960_v33, %s7039_s10 }
 0x1cb   : > { %v1395_v61 = vpop.permute.xlu1 %1394 }
 0x1cc   : > { %1472 = vst.msk [vmem:[#allocation5 + $0x98] sm:$0xff] %vm1452_vm12, %v1395_v61  ;;  %v1528_v58 = vpop.permute.xlu0 %1527 }
 0x1cd   : > { %1010 = vrot.lane.b32.xlu1 %v7962_v34, %s7039_s10  ;;  %1606 = vst.msk [vmem:[#allocation5 + $0x90] sm:$0xff] %vm1587_vm13, %v1528_v58 }
 0x1ce   : > { %1143 = vrot.lane.b32.xlu0 %v8296_v7, %s7040_s11 }
 0x1cf   : > { %v1530_v59 = vpop.permute.xlu1 %1529 }
 0x1d0   : > { %1607 = vst.msk [vmem:[#allocation5 + $0x98] sm:$0xff] %vm1587_vm13, %v1530_v59  ;;  %v1662_v19 = vpop.permute.xlu0 %1661  ;;  %v6552_v44 = vpop.f32.mrb[4].mxu0 }
 0x1d1   : > { %1145 = vrot.lane.b32.xlu1 %v8303_v11, %s7040_s11  ;;  %1740 = vst.msk [vmem:[#allocation5 + $0x90] sm:$0xff] %vm1721_vm14, %v1662_v19  ;;  %v1990_v34 = vadd.f32 %v6552_v44, %v8225_v35  ;;  %v1984_v63 = vpop.f32.mrb[5].mxu0 }
 0x1d2   : > { %v1985_v13 = vadd.f32 %v8225_v35, %v1984_v63  ;;  %1277 = vrot.lane.b32.xlu0 %v8317_v21, %s7041_s12  ;;  %v7046_v63 = vmov 0.0|0.0  }
 0x1d3   : > { %v656_v33 = vpop.permute.xlu1 %655  ;;  %v2128_v14 = vmax.f32 %v1990_v34, 0.0  ;;  %v3560_v34 = vld [vmem:[%s11384_s3 + $0x8] sm:$0xff]  ;;  %6722 = vmatprep.subr.bf16.mxu1 %v7046_v63 }
 0x1d4   : > { %732 = vst.msk [vmem:[#allocation5 + $0xa0] sm:$0xff] %vm711_vm7, %v656_v33  ;;  %v2127_v4 = vmax.f32 %v1985_v13, 0.0  ;;  %v1664_v40 = vpop.permute.xlu0 %1663  ;;  %v3559_v33 = vld [vmem:[%s11384_s3] sm:$0xff] }
 0x1d5   : > { %1279 = vrot.lane.b32.xlu1 %v8327_v30, %s7041_s12  ;;  %2217 = vst.msk [vmem:[#allocation3 + $0x51] sm:$0xff] %vm2155_vm1, %v2128_v14 }
 0x1d6   : > { %1741 = vst.msk [vmem:[#allocation5 + $0x98] sm:$0xff] %vm1721_vm14, %v1664_v40  ;;  %1408 = vrot.lane.b32.xlu0 %v8038_v5, %s7042_s13  ;;  %v3564_v40 = vld [vmem:[%s11384_s3 + $0x28] sm:$0xff] }
 0x1d7   : > { %v658_v25 = vpop.permute.xlu1 %657  ;;  %2216 = vst.msk [vmem:[#allocation3 + $0x49] sm:$0xff] %vm2155_vm1, %v2127_v4  ;;  %v3563_v4 = vld [vmem:[%s11384_s3 + $0x20] sm:$0xff] }
 0x1d8   : > { %733 = vst.msk [vmem:[#allocation5 + $0xa8] sm:$0xff] %vm711_vm7, %v658_v25  ;;  %v866_v17 = vpop.permute.xlu0 %865  ;;  %v1772_v18 = vld [vmem:[#allocation5 + $0x90] sm:$0xff] }
 0x1d9   : > { %1410 = vrot.lane.b32.xlu1 %v8040_v6, %s7042_s13  ;;  %942 = vst.msk [vmem:[#allocation5 + $0xa0] sm:$0xff] %vm921_vm8, %v866_v17  ;;  %6571 = vmatprep.mubr.msk.f32.mxu0 %vm1797_vm15, %v1772_v18  ;;  %v8512_v17 = vld [vmem:[#allocation2 + $0x190] sm:$0x3] }
 0x1da   : > { %1543 = vrot.lane.b32.xlu0 %v8404_v10, %s7043_s18 }
 0x1db   : > { %v868_v20 = vpop.permute.xlu1 %867 }
 0x1dc   : > { %943 = vst.msk [vmem:[#allocation5 + $0xa8] sm:$0xff] %vm921_vm8, %v868_v20  ;;  %v997_v27 = vpop.permute.xlu0 %996  ;;  %v2255_v31 = vld [vmem:[#allocation3 + $0x58] sm:$0x3] }
 0x1dd   : > { %1545 = vrot.lane.b32.xlu1 %v8407_v8, %s7043_s18  ;;  %v1773_v29 = vld [vmem:[#allocation5 + $0x98] sm:$0xff]  ;;  %1073 = vst.msk [vmem:[#allocation5 + $0xa0] sm:$0xff] %vm1052_vm9, %v997_v27  ;;  %v2396_v39 = vrot.slane %v2255_v31, 1  ;;  %v2605_v12 = vrot.slane %v2255_v31, 2  ;;  %v3565_v27 = vld [vmem:[%s11384_s3 + $0x30] sm:$0xff] }
 0x1de   : > { %6572 = vmatmul.mubr.msk.f32.gmra.mrb[18].mxu0 %vm1797_vm15, %v1773_v29  ;;  %v8423_v36 = vld [vmem:[#allocation3 + $0x48] sm:$0xff]  ;;  %v8425_v54 = vld [vmem:[#allocation3 + $0x50] sm:$0xff]  ;;  %1677 = vrot.lane.b32.xlu0 %v8419_v26, %s7045_s23 }
 0x1df   : > { %v999_v51 = vpop.permute.xlu1 %998  ;;  %2304 = vst.msk [vmem:[#allocation6 + $0x90] sm:$0xff] %vm2155_vm1, %v8423_v36  ;;  %v2393_v41 = vrot.slane %v8423_v36, 1  ;;  %v2394_v46 = vrot.slane %v8425_v54, 1  ;;  %2305 = vst.msk [vmem:[#allocation6 + $0xa8] sm:$0xff] %vm2155_vm1, %v8425_v54  ;;  %v2602_v47 = vrot.slane %v8423_v36, 2  ;;  %v2603_v48 = vrot.slane %v8425_v54, 2 }
 0x1e0   : > { %1074 = vst.msk [vmem:[#allocation5 + $0xa8] sm:$0xff] %vm1052_vm9, %v999_v51  ;;  %v1132_v55 = vpop.permute.xlu0 %1131  ;;  %v3566_v29 = vld [vmem:[%s11384_s3 + $0x38] sm:$0xff] }
 0x1e1   : > { %671 = vrot.lane.b32.xlu1 %v8296_v7, %s7038_s9  ;;  %v8444_v7 = vsel %vm534_vm3, %v2393_v41, %v2394_v46  ;;  %v8447_v61 = vsel %vm534_vm3, %v2394_v46, %v2396_v39  ;;  %v8450_v58 = vsel %vm744_vm2, %v2602_v47, %v2603_v48  ;;  %v8453_v59 = vsel %vm744_vm2, %v2603_v48, %v2605_v12 }
 0x1e2   : > { %1208 = vst.msk [vmem:[#allocation5 + $0xa0] sm:$0xff] %vm1187_vm10, %v1132_v55  ;;  %1679 = vrot.lane.b32.xlu0 %v8441_v24, %s7045_s23  ;;  %v6732_v51 = vpack.c.bf16 %v3566_v29, %v3565_v27  ;;  %v1086_v12 = vrot.slane %v8508_v9, 1  ;;  %v1087_v41 = vrot.slane %v8510_v16, 1  ;;  %v1089_v46 = vrot.slane %v8512_v17, 1 }
 0x1e3   : > { %v1134_v19 = vpop.permute.xlu1 %1133  ;;  %2969 = vst.msk [vmem:[#allocation6 + $0x68] sm:$0xff] %vm2155_vm1, %v8444_v7  ;;  %2970 = vst.msk [vmem:[#allocation6 + $0x80] sm:$0xff] %vm2155_vm1, %v8447_v61 }
 0x1e4   : > { %3433 = vst.msk [vmem:[#allocation6 + $0x40] sm:$0xff] %vm2155_vm1, %v8450_v58  ;;  %3434 = vst.msk [vmem:[#allocation6 + $0x58] sm:$0xff] %vm2155_vm1, %v8453_v59  ;;  %v1266_v44 = vpop.permute.xlu0 %1265 }
 0x1e5   : > { %1209 = vst.msk [vmem:[#allocation5 + $0xa8] sm:$0xff] %vm1187_vm10, %v1134_v19  ;;  %673 = vrot.lane.b32.xlu1 %v8303_v11, %s7038_s9  ;;  %v6723_v11 = vpack.c.bf16 %v3560_v34, %v3559_v33  ;;  %v3567_v19 = vld [vmem:[%s11384_s3 + $0x40] sm:$0xff]  ;;  %v1220_v33 = vrot.slane %v8508_v9, 2  ;;  %v1221_v34 = vrot.slane %v8510_v16, 2 }
 0x1e6   : > { %1342 = vst.msk [vmem:[#allocation5 + $0xa0] sm:$0xff] %vm1321_vm11, %v1266_v44  ;;  %881 = vrot.lane.b32.xlu0 %v8317_v21, %s7037_s8  ;;  %v3562_v21 = vld [vmem:[%s11384_s3 + $0x18] sm:$0xff]  ;;  %v3568_v44 = vld [vmem:[%s11384_s3 + $0x48] sm:$0xff] }
 0x1e7   : > { %v1268_v60 = vpop.permute.xlu1 %1267  ;;  %6724 = vmatpush1.bf16.msra.mxu1 %v6723_v11  ;;  %v8550_v11 = vsel %vm534_vm3, %v1086_v12, %v1087_v41 }
 0x1e8   : > { %1343 = vst.msk [vmem:[#allocation5 + $0xa8] sm:$0xff] %vm1321_vm11, %v1268_v60  ;;  %v1397_v13 = vpop.permute.xlu0 %1396  ;;  %6725 = vmatprep.subr.bf16.mxu1 %v7046_v63  ;;  %v6735_v60 = vpack.c.bf16 %v3568_v44, %v3567_v19 }
 0x1e9   : > { %883 = vrot.lane.b32.xlu1 %v8327_v30, %s7037_s8  ;;  %1473 = vst.msk [vmem:[#allocation5 + $0xa0] sm:$0xff] %vm1452_vm12, %v1397_v13  ;;  %v6726_v30 = vpack.c.bf16 %v3562_v21, %v3561_v1  ;;  %v8553_v13 = vsel %vm534_vm3, %v1087_v41, %v1089_v46  ;;  %v3572_v41 = vld [vmem:[%s11384_s3 + $0x68] sm:$0xff] }
 0x1ea   : > { %1012 = vrot.lane.b32.xlu0 %v8038_v5, %s7039_s10  ;;  %v6729_v5 = vpack.c.bf16 %v3564_v40, %v3563_v4  ;;  %v8570_v4 = vsel %vm744_vm2, %v1220_v33, %v1221_v34  ;;  %v1223_v40 = vrot.slane %v8512_v17, 2  ;;  %v3571_v17 = vld [vmem:[%s11384_s3 + $0x60] sm:$0xff]  ;;  %v3573_v33 = vld [vmem:[%s11384_s3 + $0x70] sm:$0xff] }
 0x1eb   : > { %v1399_v14 = vpop.permute.xlu1 %1398  ;;  %6727 = vmatpush1.bf16.msra.mxu1 %v6726_v30  ;;  %v3569_v30 = vld [vmem:[%s11384_s3 + $0x50] sm:$0xff]  ;;  %v6741_v46 = vpack.c.bf16 %v3572_v41, %v3571_v17  ;;  %v451_v17 = vld [vmem:[#allocation2 + $0x198] sm:$0xff] }
 0x1ec   : > { %1474 = vst.msk [vmem:[#allocation5 + $0xa8] sm:$0xff] %vm1452_vm12, %v1399_v14  ;;  %v1532_v2 = vpop.permute.xlu0 %1531  ;;  %6728 = vmatprep.subr.bf16.mxu1 %v7046_v63 }
 0x1ed   : > { %1014 = vrot.lane.b32.xlu1 %v8040_v6, %s7039_s10  ;;  %1608 = vst.msk [vmem:[#allocation5 + $0xa0] sm:$0xff] %vm1587_vm13, %v1532_v2  ;;  %v3570_v2 = vld [vmem:[%s11384_s3 + $0x58] sm:$0xff] }
 0x1ee   : > { %1147 = vrot.lane.b32.xlu0 %v8404_v10, %s7040_s11 }
 0x1ef   : > { %v1534_v3 = vpop.permute.xlu1 %1533  ;;  %6730 = vmatpush1.bf16.msra.mxu1 %v6729_v5 }
 0x1f0   : > { %1609 = vst.msk [vmem:[#allocation5 + $0xa8] sm:$0xff] %vm1587_vm13, %v1534_v3  ;;  %v1666_v6 = vpop.permute.xlu0 %1665  ;;  %v6555_v25 = vpop.f32.mrb[6].mxu0  ;;  %6731 = vmatprep.subr.bf16.mxu1 %v7046_v63  ;;  %v6738_v3 = vpack.c.bf16 %v3570_v2, %v3569_v30  ;;  %v3575_v30 = vld [vmem:[%s11384_s3 + $0x80] sm:$0xff]  ;;  %v3576_v2 = vld [vmem:[%s11384_s3 + $0x88] sm:$0xff] }
 0x1f1   : > { %1149 = vrot.lane.b32.xlu1 %v8407_v8, %s7040_s11  ;;  %1742 = vst.msk [vmem:[#allocation5 + $0xa0] sm:$0xff] %vm1721_vm14, %v1666_v6  ;;  %v2000_v20 = vadd.f32 %v6555_v25, %v8225_v35  ;;  %v1994_v43 = vpop.f32.mrb[7].mxu0 }
 0x1f2   : > { %v1995_v31 = vadd.f32 %v8225_v35, %v1994_v43  ;;  %1281 = vrot.lane.b32.xlu0 %v8419_v26, %s7041_s12 }
 0x1f3   : > { %v660_v18 = vpop.permute.xlu1 %659  ;;  %v2130_v39 = vmax.f32 %v2000_v20, 0.0  ;;  %6733 = vmatpush1.bf16.msra.mxu1 %v6732_v51 }
 0x1f4   : > { %734 = vst.msk [vmem:[#allocation5 + $0xb0] sm:$0xff] %vm711_vm7, %v660_v18  ;;  %v2129_v47 = vmax.f32 %v1995_v31, 0.0  ;;  %v1668_v48 = vpop.permute.xlu0 %1667  ;;  %6734 = vmatprep.subr.bf16.mxu1 %v7046_v63 }
 0x1f5   : > { %1283 = vrot.lane.b32.xlu1 %v8441_v24, %s7041_s12  ;;  %2219 = vst.msk [vmem:[#allocation3 + $0x69] sm:$0xff] %vm2155_vm1, %v2130_v39 }
 0x1f6   : > { %1743 = vst.msk [vmem:[#allocation5 + $0xa8] sm:$0xff] %vm1721_vm14, %v1668_v48  ;;  %1412 = vrot.lane.b32.xlu0 %v8508_v9, %s7042_s13 }
 0x1f7   : > { %v662_v55 = vpop.permute.xlu1 %661  ;;  %2218 = vst.msk [vmem:[#allocation3 + $0x61] sm:$0xff] %vm2155_vm1, %v2129_v47  ;;  %6736 = vmatpush1.bf16.msra.mxu1 %v6735_v60 }
 0x1f8   : > { %735 = vst.msk [vmem:[#allocation5 + $0xb8] sm:$0xff] %vm711_vm7, %v662_v55  ;;  %v870_v14 = vpop.permute.xlu0 %869  ;;  %v1774_v1 = vld [vmem:[#allocation5 + $0xa0] sm:$0xff]  ;;  %6737 = vmatprep.subr.bf16.mxu1 %v7046_v63 }
 0x1f9   : > { %1414 = vrot.lane.b32.xlu1 %v8510_v16, %s7042_s13  ;;  %944 = vst.msk [vmem:[#allocation5 + $0xb0] sm:$0xff] %vm921_vm8, %v870_v14  ;;  %6574 = vmatprep.mubr.msk.f32.mxu0 %vm1797_vm15, %v1774_v1 }
 0x1fa   : > { %1547 = vrot.lane.b32.xlu0 %v8550_v11, %s7043_s18 }
 0x1fb   : > { %v872_v21 = vpop.permute.xlu1 %871  ;;  %6739 = vmatpush1.bf16.msra.mxu1 %v6738_v3 }
 0x1fc   : > { %945 = vst.msk [vmem:[#allocation5 + $0xb8] sm:$0xff] %vm921_vm8, %v872_v21  ;;  %v1001_v5 = vpop.permute.xlu0 %1000  ;;  %v2258_v25 = vld [vmem:[#allocation3 + $0x70] sm:$0x3]  ;;  %6740 = vmatprep.subr.bf16.mxu1 %v7046_v63 }
 0x1fd   : > { %1549 = vrot.lane.b32.xlu1 %v8553_v13, %s7043_s18  ;;  %v1775_v6 = vld [vmem:[#allocation5 + $0xa8] sm:$0xff]  ;;  %1075 = vst.msk [vmem:[#allocation5 + $0xb0] sm:$0xff] %vm1052_vm9, %v1001_v5  ;;  %v2401_v27 = vrot.slane %v2258_v25, 1  ;;  %v2610_v29 = vrot.slane %v2258_v25, 2  ;;  %v3577_v5 = vld [vmem:[%s11384_s3 + $0x90] sm:$0xff] }
 0x1fe   : > { %6575 = vmatmul.mubr.msk.f32.gmra.mrb[20].mxu0 %vm1797_vm15, %v1775_v6  ;;  %v8575_v20 = vld [vmem:[#allocation3 + $0x60] sm:$0xff]  ;;  %v8577_v43 = vld [vmem:[#allocation3 + $0x68] sm:$0xff]  ;;  %1681 = vrot.lane.b32.xlu0 %v8570_v4, %s7045_s23 }
 0x1ff   : > { %v1003_v18 = vpop.permute.xlu1 %1002  ;;  %2306 = vst.msk [vmem:[#allocation6 + $0xc0] sm:$0xff] %vm2155_vm1, %v8575_v20  ;;  %v2398_v31 = vrot.slane %v8575_v20, 1  ;;  %v2399_v51 = vrot.slane %v8577_v43, 1  ;;  %2307 = vst.msk [vmem:[#allocation6 + $0xd8] sm:$0xff] %vm2155_vm1, %v8577_v43  ;;  %v2607_v39 = vrot.slane %v8575_v20, 2  ;;  %v2608_v12 = vrot.slane %v8577_v43, 2  ;;  %6742 = vmatpush1.bf16.msra.mxu1 %v6741_v46 }
 0x200   : > { %1076 = vst.msk [vmem:[#allocation5 + $0xb8] sm:$0xff] %vm1052_vm9, %v1003_v18  ;;  %v1136_v47 = vpop.permute.xlu0 %1135  ;;  %6743 = vmatprep.subr.bf16.mxu1 %v7046_v63  ;;  %v3578_v6 = vld [vmem:[%s11384_s3 + $0x98] sm:$0xff]  ;;  %v3579_v18 = vld [vmem:[%s11384_s3 + $0xa0] sm:$0xff] }
 0x201   : > { %675 = vrot.lane.b32.xlu1 %v8404_v10, %s7038_s9  ;;  %v8600_v10 = vsel %vm744_vm2, %v1221_v34, %v1223_v40  ;;  %v8603_v48 = vsel %vm534_vm3, %v2398_v31, %v2399_v51  ;;  %v8606_v55 = vsel %vm534_vm3, %v2399_v51, %v2401_v27  ;;  %v8609_v19 = vsel %vm744_vm2, %v2607_v39, %v2608_v12  ;;  %v3574_v34 = vld [vmem:[%s11384_s3 + $0x78] sm:$0xff]  ;;  %v3580_v27 = vld [vmem:[%s11384_s3 + $0xa8] sm:$0xff]  ;;  %v452_v31 = vld [vmem:[#allocation2 + $0x1a0] sm:$0xff] }
 0x202   : > { %v8612_v44 = vsel %vm744_vm2, %v2608_v12, %v2610_v29  ;;  %1210 = vst.msk [vmem:[#allocation5 + $0xb0] sm:$0xff] %vm1187_vm10, %v1136_v47  ;;  %1683 = vrot.lane.b32.xlu0 %v8600_v10, %s7045_s23  ;;  %v6744_v14 = vpack.c.bf16 %v3574_v34, %v3573_v33  ;;  %v453_v51 = vld [vmem:[#allocation2 + $0x1a8] sm:$0x3]  ;;  %v1486_v33 = vrot.slane %v451_v17, 1  ;;  %v1487_v34 = vrot.slane %v452_v31, 1 }
 0x203   : > { %v1138_v60 = vpop.permute.xlu1 %1137  ;;  %2971 = vst.msk [vmem:[#allocation6 + $0x98] sm:$0xff] %vm2155_vm1, %v8603_v48  ;;  %2972 = vst.msk [vmem:[#allocation6 + $0xb0] sm:$0xff] %vm2155_vm1, %v8606_v55 }
 0x204   : > { %3435 = vst.msk [vmem:[#allocation6 + $0x70] sm:$0xff] %vm2155_vm1, %v8609_v19  ;;  %3436 = vst.msk [vmem:[#allocation6 + $0x88] sm:$0xff] %vm2155_vm1, %v8612_v44  ;;  %v1270_v1 = vpop.permute.xlu0 %1269  ;;  %6745 = vmatpush1.bf16.msra.mxu1 %v6744_v14  ;;  %v1489_v14 = vrot.slane %v453_v51, 1 }
 0x205   : > { %1211 = vst.msk [vmem:[#allocation5 + $0xb8] sm:$0xff] %vm1187_vm10, %v1138_v60  ;;  %677 = vrot.lane.b32.xlu1 %v8407_v8, %s7038_s9  ;;  %v6747_v8 = vpack.c.bf16 %v3576_v2, %v3575_v30  ;;  %6746 = vmatprep.subr.bf16.mxu1 %v7046_v63  ;;  %v3591_v30 = vld [vmem:[%s11384_s3 + $0x100] sm:$0xff]  ;;  %s7048_s9 = smov 64  }
 0x206   : > { %1344 = vst.msk [vmem:[#allocation5 + $0xb0] sm:$0xff] %vm1321_vm11, %v1270_v1  ;;  %885 = vrot.lane.b32.xlu0 %v8419_v26, %s7037_s8  ;;  %v6750_v26 = vpack.c.bf16 %v3578_v6, %v3577_v5  ;;  %v3583_v2 = vld [vmem:[%s11384_s3 + $0xc0] sm:$0xff]  ;;  %v1621_v5 = vrot.slane %v452_v31, 2  ;;  %v1488_v6 = vsel %vm534_vm3, %v1486_v33, %v1487_v34 }
 0x207   : > { %v1272_v21 = vpop.permute.xlu1 %1271 }
 0x208   : > { %1345 = vst.msk [vmem:[#allocation5 + $0xb8] sm:$0xff] %vm1321_vm11, %v1272_v21  ;;  %v1401_v3 = vpop.permute.xlu0 %1400  ;;  %6748 = vmatpush1.bf16.msra.mxu1 %v6747_v8  ;;  %v3584_v8 = vld [vmem:[%s11384_s3 + $0xc8] sm:$0xff] }
 0x209   : > { %887 = vrot.lane.b32.xlu1 %v8441_v24, %s7037_s8  ;;  %1475 = vst.msk [vmem:[#allocation5 + $0xb0] sm:$0xff] %vm1452_vm12, %v1401_v3  ;;  %6749 = vmatprep.subr.bf16.mxu1 %v7046_v63  ;;  %v1620_v3 = vrot.slane %v451_v17, 2 }
 0x20a   : > { %1016 = vrot.lane.b32.xlu0 %v8508_v9, %s7039_s10  ;;  %v6753_v9 = vpack.c.bf16 %v3580_v27, %v3579_v18  ;;  %v3593_v27 = vld [vmem:[%s11384_s3 + $0x110] sm:$0xff] }
 0x20b   : > { %v1403_v40 = vpop.permute.xlu1 %1402 }
 0x20c   : > { %1476 = vst.msk [vmem:[#allocation5 + $0xb8] sm:$0xff] %vm1452_vm12, %v1403_v40  ;;  %v1536_v24 = vpop.permute.xlu0 %1535  ;;  %6751 = vmatpush1.bf16.msra.mxu1 %v6750_v26  ;;  %v6759_v40 = vpack.c.bf16 %v3584_v8, %v3583_v2  ;;  %v1490_v26 = vsel %vm534_vm3, %v1487_v34, %v1489_v14  ;;  %v3588_v2 = vld [vmem:[%s11384_s3 + $0xe8] sm:$0xff] }
 0x20d   : > { %1018 = vrot.lane.b32.xlu1 %v8510_v16, %s7039_s10  ;;  %1610 = vst.msk [vmem:[#allocation5 + $0xb0] sm:$0xff] %vm1587_vm13, %v1536_v24  ;;  %6752 = vmatprep.subr.bf16.mxu1 %v7046_v63  ;;  %v1623_v24 = vrot.slane %v453_v51, 2 }
 0x20e   : > { %1151 = vrot.lane.b32.xlu0 %v8550_v11, %s7040_s11  ;;  %v3581_v11 = vld [vmem:[%s11384_s3 + $0xb0] sm:$0xff] }
 0x20f   : > { %v1538_v25 = vpop.permute.xlu1 %1537 }
 0x210   : > { %1611 = vst.msk [vmem:[#allocation5 + $0xb8] sm:$0xff] %vm1587_vm13, %v1538_v25  ;;  %v1670_v16 = vpop.permute.xlu0 %1669  ;;  %v6558_v29 = vpop.f32.mrb[8].mxu0  ;;  %6754 = vmatpush1.bf16.msra.mxu1 %v6753_v9  ;;  %v3594_v9 = vld [vmem:[%s11384_s3 + $0x118] sm:$0xff] }
 0x211   : > { %1153 = vrot.lane.b32.xlu1 %v8553_v13, %s7040_s11  ;;  %1744 = vst.msk [vmem:[#allocation5 + $0xb0] sm:$0xff] %vm1721_vm14, %v1670_v16  ;;  %v2010_v12 = vadd.f32 %v6558_v29, %v8225_v35  ;;  %v2004_v41 = vpop.f32.mrb[9].mxu0  ;;  %v3582_v13 = vld [vmem:[%s11384_s3 + $0xb8] sm:$0xff]  ;;  %6755 = vmatprep.subr.bf16.mxu1 %v7046_v63  ;;  %v6774_v29 = vpack.c.bf16 %v3594_v9, %v3593_v27 }
 0x212   : > { %v2005_v46 = vadd.f32 %v8225_v35, %v2004_v41  ;;  %1285 = vrot.lane.b32.xlu0 %v8570_v4, %s7041_s12  ;;  %v6756_v47 = vpack.c.bf16 %v3582_v13, %v3581_v11  ;;  %v3592_v35 = vld [vmem:[%s11384_s3 + $0x108] sm:$0xff]  ;;  %v2592_v13 = vrot.slane %v8263_v62, 2  ;;  %v3590_v27 = vld [vmem:[%s11384_s3 + $0xf8] sm:$0xff] }
 0x213   : > { %v664_v39 = vpop.permute.xlu1 %663  ;;  %v2132_v60 = vmax.f32 %v2010_v12, 0.0  ;;  %v1624_v12 = vsel %vm744_vm2, %v1621_v5, %v1623_v24 }
 0x214   : > { %736 = vst.msk [vmem:[#allocation5 + $0xc0] sm:$0xff] %vm711_vm7, %v664_v39  ;;  %v2131_v1 = vmax.f32 %v2005_v46, 0.0  ;;  %v1672_v21 = vpop.permute.xlu0 %1671  ;;  %6757 = vmatpush1.bf16.msra.mxu1 %v6756_v47  ;;  %v1622_v39 = vsel %vm744_vm2, %v1620_v3, %v1621_v5 }
 0x215   : > { %1287 = vrot.lane.b32.xlu1 %v8600_v10, %s7041_s12  ;;  %2221 = vst.msk [vmem:[#allocation3 + $0x81] sm:$0xff] %vm2155_vm1, %v2132_v60  ;;  %v6770_v10 = vpack.c.bf16 %v3592_v35, %v3591_v30  ;;  %6758 = vmatprep.subr.bf16.mxu1 %v7046_v63  ;;  %v2593_v60 = vrot.slane %v8265_v57, 2  ;;  %s7047_s12 = smov 32  }
 0x216   : > { %1745 = vst.msk [vmem:[#allocation5 + $0xb8] sm:$0xff] %vm1721_vm14, %v1672_v21  ;;  %1416 = vrot.lane.b32.xlu0 %v451_v17, %s7042_s13  ;;  %v3585_v17 = vld [vmem:[%s11384_s3 + $0xd0] sm:$0xff]  ;;  %v3587_v21 = vld [vmem:[%s11384_s3 + $0xe0] sm:$0xff] }
 0x217   : > { %v666_v4 = vpop.permute.xlu1 %665  ;;  %2220 = vst.msk [vmem:[#allocation3 + $0x79] sm:$0xff] %vm2155_vm1, %v2131_v1  ;;  %6771 = vmatprep.subr.bf16.mxu0 %v6770_v10  ;;  %v6765_v8 = vpack.c.bf16 %v3588_v2, %v3587_v21 }
 0x218   : > { %737 = vst.msk [vmem:[#allocation5 + $0xc8] sm:$0xff] %vm711_vm7, %v666_v4  ;;  %v874_v25 = vpop.permute.xlu0 %873  ;;  %v1776_v18 = vld [vmem:[#allocation5 + $0xb0] sm:$0xff]  ;;  %6773 = vmatpush3.bf16.msra.mxu0 %v6770_v10  ;;  %6760 = vmatpush1.bf16.msra.mxu1 %v6759_v40 }
 0x219   : > { %1418 = vrot.lane.b32.xlu1 %v452_v31, %s7042_s13  ;;  %946 = vst.msk [vmem:[#allocation5 + $0xc0] sm:$0xff] %vm921_vm8, %v874_v25  ;;  %6577 = vmatprep.mubr.msk.f32.mxu0 %vm1797_vm15, %v1776_v18  ;;  %v3586_v31 = vld [vmem:[%s11384_s3 + $0xd8] sm:$0xff]  ;;  %v8773_v25 = vsel %vm744_vm2, %v2592_v13, %v2593_v60  ;;  %v3589_v18 = vld [vmem:[%s11384_s3 + $0xf0] sm:$0xff] }
 0x21a   : > { %1551 = vrot.lane.b32.xlu0 %v1488_v6, %s7043_s18  ;;  %v6762_v51 = vpack.c.bf16 %v3586_v31, %v3585_v17  ;;  %6761 = vmatprep.subr.bf16.mxu1 %v7046_v63  ;;  %v6768_v9 = vpack.c.bf16 %v3590_v27, %v3589_v18 }
 0x21b   : > { %v876_v16 = vpop.permute.xlu1 %875  ;;  %6775 = vmatprep.subr.bf16.mxu0 %v6774_v29 }
 0x21c   : > { %947 = vst.msk [vmem:[#allocation5 + $0xc8] sm:$0xff] %vm921_vm8, %v876_v16  ;;  %v1005_v41 = vpop.permute.xlu0 %1004  ;;  %v2261_v46 = vld [vmem:[#allocation3 + $0x88] sm:$0x3]  ;;  %6777 = vmatpush3.bf16.msra.mxu0 %v6774_v29  ;;  %6763 = vmatpush1.bf16.msra.mxu1 %v6762_v51  ;;  %v2246_v29 = vld [vmem:[#allocation3 + $0x10] sm:$0x3] }
 0x21d   : > { %1553 = vrot.lane.b32.xlu1 %v1490_v26, %s7043_s18  ;;  %v1777_v11 = vld [vmem:[#allocation5 + $0xb8] sm:$0xff]  ;;  %1077 = vst.msk [vmem:[#allocation5 + $0xc0] sm:$0xff] %vm1052_vm9, %v1005_v41  ;;  %v2406_v14 = vrot.slane %v2261_v46, 1  ;;  %v2615_v1 = vrot.slane %v2261_v46, 2  ;;  %6764 = vmatprep.subr.bf16.mxu1 %v7046_v63  ;;  %v2381_v31 = vrot.slane %v2246_v29, 1 }
 0x21e   : > { %6578 = vmatmul.mubr.msk.f32.gmra.mrb[22].mxu0 %vm1797_vm15, %v1777_v11  ;;  %v8734_v33 = vld [vmem:[#allocation3 + $0x78] sm:$0xff]  ;;  %v8736_v34 = vld [vmem:[#allocation3 + $0x80] sm:$0xff]  ;;  %1685 = vrot.lane.b32.xlu0 %v1622_v39, %s7045_s23  ;;  %v2595_v39 = vrot.slane %v8260_v56, 2 }
 0x21f   : > { %v1007_v47 = vpop.permute.xlu1 %1006  ;;  %2308 = vst.msk [vmem:[#allocation6 + $0xf0] sm:$0xff] %vm2155_vm1, %v8734_v33  ;;  %v2403_v30 = vrot.slane %v8734_v33, 1  ;;  %v2404_v35 = vrot.slane %v8736_v34, 1  ;;  %2309 = vst.msk [vmem:[#allocation6 + $0x108] sm:$0xff] %vm2155_vm1, %v8736_v34  ;;  %v2612_v4 = vrot.slane %v8734_v33, 2  ;;  %v2613_v10 = vrot.slane %v8736_v34, 2  ;;  %6778 = vmatprep.subr.bf16.mxu0 %v7046_v63 }
 0x220   : > { %1078 = vst.msk [vmem:[#allocation5 + $0xc8] sm:$0xff] %vm1052_vm9, %v1007_v47  ;;  %v1140_v3 = vpop.permute.xlu0 %1139  ;;  %6766 = vmatpush1.bf16.msra.mxu1 %v6765_v8  ;;  %v8816_v56 = vsel %vm744_vm2, %v2593_v60, %v2595_v39  ;;  %v8829_v47 = vld [vmem:[%s11383_s2] ss:$0 sm:$0xff] }
 0x221   : > { %1687 = vrot.lane.b32.xlu1 %v1624_v12, %s7045_s23  ;;  %v8758_v40 = vsel %vm534_vm3, %v2403_v30, %v2404_v35  ;;  %v8761_v5 = vsel %vm534_vm3, %v2404_v35, %v2406_v14  ;;  %v8764_v6 = vsel %vm744_vm2, %v2612_v4, %v2613_v10  ;;  %v8767_v26 = vsel %vm744_vm2, %v2613_v10, %v2615_v1 }
 0x222   : > { %1212 = vst.msk [vmem:[#allocation5 + $0xc0] sm:$0xff] %vm1187_vm10, %v1140_v3  ;;  %3002 = vrot.lane.b32.xlu0 %v8773_v25, %s7047_s12  ;;  %6767 = vmatprep.subr.bf16.mxu1 %v7046_v63  ;;  %v2590_v12 = vrot.slane %v2246_v29, 2 }
 0x223   : > { %v1142_v24 = vpop.permute.xlu1 %1141  ;;  %2973 = vst.msk [vmem:[#allocation6 + $0xc8] sm:$0xff] %vm2155_vm1, %v8758_v40  ;;  %2974 = vst.msk [vmem:[#allocation6 + $0xe0] sm:$0xff] %vm2155_vm1, %v8761_v5 }
 0x224   : > { %3437 = vst.msk [vmem:[#allocation6 + $0xa0] sm:$0xff] %vm2155_vm1, %v8764_v6  ;;  %3438 = vst.msk [vmem:[#allocation6 + $0xb8] sm:$0xff] %vm2155_vm1, %v8767_v26  ;;  %v1274_v16 = vpop.permute.xlu0 %1273  ;;  %6769 = vmatpush1.bf16.msra.mxu1 %v6768_v9 }
 0x225   : > { %1213 = vst.msk [vmem:[#allocation5 + $0xc8] sm:$0xff] %vm1187_vm10, %v1142_v24  ;;  %2458 = vrot.lane.b32.xlu1 %v8230_v50, %s7047_s12  ;;  %6890 = vmatprep.subr.bf16.mxu1 %v7046_v63 }
 0x226   : > { %1346 = vst.msk [vmem:[#allocation5 + $0xc0] sm:$0xff] %vm1321_vm11, %v1274_v16  ;;  %3132 = vrot.lane.b32.xlu0 %v8330_v37, %s7048_s9 }
 0x227   : > { %v1276_v17 = vpop.permute.xlu1 %1275 }
 0x228   : > { %1347 = vst.msk [vmem:[#allocation5 + $0xc8] sm:$0xff] %vm1321_vm11, %v1276_v17  ;;  %v1405_v50 = vpop.permute.xlu0 %1404 }
 0x229   : > { %2667 = vrot.lane.b32.xlu1 %v8244_v45, %s7048_s9  ;;  %1477 = vst.msk [vmem:[#allocation5 + $0xc0] sm:$0xff] %vm1452_vm12, %v1405_v50  ;;  %v2382_v45 = vsel %vm534_vm3, %v2379_v32, %v2381_v31  ;;  %v2591_v32 = vsel %vm744_vm2, %v2588_v38, %v2590_v12 }
 0x22a   : > { %3266 = vrot.lane.b32.xlu0 %v8348_v49, %s7049_s29 }
 0x22b   : > { %v1407_v51 = vpop.permute.xlu1 %1406 }
 0x22c   : > { %1478 = vst.msk [vmem:[#allocation5 + $0xc8] sm:$0xff] %vm1452_vm12, %v1407_v51  ;;  %v1540_v41 = vpop.permute.xlu0 %1539 }
 0x22d   : > { %2798 = vrot.lane.b32.xlu1 %v8263_v62, %s7049_s29  ;;  %1612 = vst.msk [vmem:[#allocation5 + $0xc0] sm:$0xff] %vm1587_vm13, %v1540_v41 }
 0x22e   : > { %3004 = vrot.lane.b32.xlu0 %v8816_v56, %s7047_s12 }
 0x22f   : > { %v1542_v11 = vpop.permute.xlu1 %1541 }
 0x230   : > { %1613 = vst.msk [vmem:[#allocation5 + $0xc8] sm:$0xff] %vm1587_vm13, %v1542_v11  ;;  %v1674_v62 = vpop.permute.xlu0 %1673  ;;  %v6561_v13 = vpop.f32.mrb[10].mxu0 }
 0x231   : > { %2460 = vrot.lane.b32.xlu1 %v2382_v45, %s7047_s12  ;;  %1746 = vst.msk [vmem:[#allocation5 + $0xc0] sm:$0xff] %vm1721_vm14, %v1674_v62  ;;  %v2020_v60 = vadd.f32 %v8829_v47, %v6561_v13  ;;  %v2014_v14 = vpop.f32.mrb[11].mxu0 }
 0x232   : > { %v2015_v1 = vadd.f32 %v8829_v47, %v2014_v14  ;;  %3134 = vrot.lane.b32.xlu0 %v8332_v53, %s7048_s9 }
 0x233   : > { %v668_v46 = vpop.permute.xlu1 %667  ;;  %v2134_v28 = vmax.f32 %v2020_v60, 0.0 }
 0x234   : > { %738 = vst.msk [vmem:[#allocation5 + $0xd0] sm:$0xff] %vm711_vm7, %v668_v46  ;;  %v2133_v38 = vmax.f32 %v2015_v1, 0.0  ;;  %v1676_v21 = vpop.permute.xlu0 %1675 }
 0x235   : > { %2669 = vrot.lane.b32.xlu1 %v2591_v32, %s7048_s9  ;;  %2223 = vst.msk [vmem:[#allocation3 + $0x99] sm:$0xff] %vm2155_vm1, %v2134_v28 }
 0x236   : > { %1747 = vst.msk [vmem:[#allocation5 + $0xc8] sm:$0xff] %vm1721_vm14, %v1676_v21  ;;  %3268 = vrot.lane.b32.xlu0 %v8351_v15, %s7049_s29 }
 0x237   : > { %v670_v30 = vpop.permute.xlu1 %669  ;;  %2222 = vst.msk [vmem:[#allocation3 + $0x91] sm:$0xff] %vm2155_vm1, %v2133_v38 }
 0x238   : > { %739 = vst.msk [vmem:[#allocation5 + $0xd8] sm:$0xff] %vm711_vm7, %v670_v30  ;;  %v878_v35 = vpop.permute.xlu0 %877  ;;  %v1778_v4 = vld [vmem:[#allocation5 + $0xc0] sm:$0xff] }
 0x239   : > { %2800 = vrot.lane.b32.xlu1 %v8265_v57, %s7049_s29  ;;  %948 = vst.msk [vmem:[#allocation5 + $0xd0] sm:$0xff] %vm921_vm8, %v878_v35  ;;  %6580 = vmatprep.mubr.msk.f32.mxu0 %vm1797_vm15, %v1778_v4 }
 0x23a   : > { %3006 = vrot.lane.b32.xlu0 %v8354_v52, %s7047_s12 }
 0x23b   : > { %v880_v10 = vpop.permute.xlu1 %879 }
 0x23c   : > { %949 = vst.msk [vmem:[#allocation5 + $0xd8] sm:$0xff] %vm921_vm8, %v880_v10  ;;  %v1009_v2 = vpop.permute.xlu0 %1008  ;;  %v2264_v8 = vld [vmem:[#allocation3 + $0xa0] sm:$0x3] }
 0x23d   : > { %2462 = vrot.lane.b32.xlu1 %v8284_v42, %s7047_s12  ;;  %v1779_v57 = vld [vmem:[#allocation5 + $0xc8] sm:$0xff]  ;;  %1079 = vst.msk [vmem:[#allocation5 + $0xd0] sm:$0xff] %vm1052_vm9, %v1009_v2  ;;  %v2411_v27 = vrot.slane %v2264_v8, 1  ;;  %v2620_v9 = vrot.slane %v2264_v8, 2 }
 0x23e   : > { %6581 = vmatmul.mubr.msk.f32.gmra.mrb[24].mxu0 %vm1797_vm15, %v1779_v57  ;;  %v8854_v24 = vld [vmem:[#allocation3 + $0x90] sm:$0xff]  ;;  %v8856_v18 = vld [vmem:[#allocation3 + $0x98] sm:$0xff]  ;;  %3136 = vrot.lane.b32.xlu0 %v8423_v36, %s7048_s9 }
 0x23f   : > { %v1011_v3 = vpop.permute.xlu1 %1010  ;;  %2310 = vst.msk [vmem:[#allocation6 + $0x120] sm:$0xff] %vm2155_vm1, %v8854_v24  ;;  %v2408_v42 = vrot.slane %v8854_v24, 1  ;;  %v2409_v16 = vrot.slane %v8856_v18, 1  ;;  %2311 = vst.msk [vmem:[#allocation6 + $0x138] sm:$0xff] %vm2155_vm1, %v8856_v18  ;;  %v2617_v29 = vrot.slane %v8854_v24, 2  ;;  %v2618_v17 = vrot.slane %v8856_v18, 2 }
 0x240   : > { %1080 = vst.msk [vmem:[#allocation5 + $0xd8] sm:$0xff] %vm1052_vm9, %v1011_v3  ;;  %v1144_v31 = vpop.permute.xlu0 %1143 }
 0x241   : > { %2671 = vrot.lane.b32.xlu1 %v8773_v25, %s7048_s9  ;;  %v8872_v25 = vsel %vm534_vm3, %v2408_v42, %v2409_v16  ;;  %v8875_v50 = vsel %vm534_vm3, %v2409_v16, %v2411_v27  ;;  %v8878_v51 = vsel %vm744_vm2, %v2617_v29, %v2618_v17  ;;  %v8881_v39 = vsel %vm744_vm2, %v2618_v17, %v2620_v9 }
 0x242   : > { %1214 = vst.msk [vmem:[#allocation5 + $0xd0] sm:$0xff] %vm1187_vm10, %v1144_v31  ;;  %3270 = vrot.lane.b32.xlu0 %v8444_v7, %s7049_s29 }
 0x243   : > { %v1146_v45 = vpop.permute.xlu1 %1145  ;;  %2975 = vst.msk [vmem:[#allocation6 + $0xf8] sm:$0xff] %vm2155_vm1, %v8872_v25  ;;  %2976 = vst.msk [vmem:[#allocation6 + $0x110] sm:$0xff] %vm2155_vm1, %v8875_v50 }
 0x244   : > { %3439 = vst.msk [vmem:[#allocation6 + $0xd0] sm:$0xff] %vm2155_vm1, %v8878_v51  ;;  %3440 = vst.msk [vmem:[#allocation6 + $0xe8] sm:$0xff] %vm2155_vm1, %v8881_v39  ;;  %v1278_v12 = vpop.permute.xlu0 %1277 }
 0x245   : > { %1215 = vst.msk [vmem:[#allocation5 + $0xd8] sm:$0xff] %vm1187_vm10, %v1146_v45  ;;  %2802 = vrot.lane.b32.xlu1 %v8330_v37, %s7049_s29 }
 0x246   : > { %1348 = vst.msk [vmem:[#allocation5 + $0xd0] sm:$0xff] %vm1321_vm11, %v1278_v12  ;;  %3008 = vrot.lane.b32.xlu0 %v8357_v23, %s7047_s12 }
 0x247   : > { %v1280_v41 = vpop.permute.xlu1 %1279 }
 0x248   : > { %1349 = vst.msk [vmem:[#allocation5 + $0xd8] sm:$0xff] %vm1321_vm11, %v1280_v41  ;;  %v1409_v11 = vpop.permute.xlu0 %1408 }
 0x249   : > { %2464 = vrot.lane.b32.xlu1 %v8287_v22, %s7047_s12  ;;  %1479 = vst.msk [vmem:[#allocation5 + $0xd0] sm:$0xff] %vm1452_vm12, %v1409_v11 }
 0x24a   : > { %3138 = vrot.lane.b32.xlu0 %v8425_v54, %s7048_s9 }
 0x24b   : > { %v1411_v32 = vpop.permute.xlu1 %1410 }
 0x24c   : > { %1480 = vst.msk [vmem:[#allocation5 + $0xd8] sm:$0xff] %vm1452_vm12, %v1411_v32  ;;  %v1544_v37 = vpop.permute.xlu0 %1543 }
 0x24d   : > { %2673 = vrot.lane.b32.xlu1 %v8816_v56, %s7048_s9  ;;  %1614 = vst.msk [vmem:[#allocation5 + $0xd0] sm:$0xff] %vm1587_vm13, %v1544_v37 }
 0x24e   : > { %3272 = vrot.lane.b32.xlu0 %v8447_v61, %s7049_s29 }
 0x24f   : > { %v1546_v62 = vpop.permute.xlu1 %1545 }
 0x250   : > { %1615 = vst.msk [vmem:[#allocation5 + $0xd8] sm:$0xff] %vm1587_vm13, %v1546_v62  ;;  %v1678_v22 = vpop.permute.xlu0 %1677  ;;  %v6564_v13 = vpop.f32.mrb[12].mxu0 }
 0x251   : > { %2804 = vrot.lane.b32.xlu1 %v8332_v53, %s7049_s29  ;;  %1748 = vst.msk [vmem:[#allocation5 + $0xd0] sm:$0xff] %vm1721_vm14, %v1678_v22  ;;  %v2030_v46 = vadd.f32 %v8829_v47, %v6564_v13  ;;  %v2024_v60 = vpop.f32.mrb[13].mxu0 }
 0x252   : > { %v2025_v14 = vadd.f32 %v8829_v47, %v2024_v60  ;;  %3010 = vrot.lane.b32.xlu0 %v8450_v58, %s7047_s12 }
 0x253   : > { %v672_v56 = vpop.permute.xlu1 %671  ;;  %v2136_v53 = vmax.f32 %v2030_v46, 0.0 }
 0x254   : > { %740 = vst.msk [vmem:[#allocation5 + $0xe0] sm:$0xff] %vm711_vm7, %v672_v56  ;;  %v2135_v1 = vmax.f32 %v2025_v14, 0.0  ;;  %v1680_v28 = vpop.permute.xlu0 %1679 }
 0x255   : > { %2466 = vrot.lane.b32.xlu1 %v8348_v49, %s7047_s12  ;;  %2225 = vst.msk [vmem:[#allocation3 + $0xb1] sm:$0xff] %vm2155_vm1, %v2136_v53 }
 0x256   : > { %1749 = vst.msk [vmem:[#allocation5 + $0xd8] sm:$0xff] %vm1721_vm14, %v1680_v28  ;;  %3140 = vrot.lane.b32.xlu0 %v8575_v20, %s7048_s9 }
 0x257   : > { %v674_v38 = vpop.permute.xlu1 %673  ;;  %2224 = vst.msk [vmem:[#allocation3 + $0xa9] sm:$0xff] %vm2155_vm1, %v2135_v1 }
 0x258   : > { %741 = vst.msk [vmem:[#allocation5 + $0xe8] sm:$0xff] %vm711_vm7, %v674_v38  ;;  %v882_v49 = vpop.permute.xlu0 %881  ;;  %v1780_v21 = vld [vmem:[#allocation5 + $0xd0] sm:$0xff] }
 0x259   : > { %2675 = vrot.lane.b32.xlu1 %v8354_v52, %s7048_s9  ;;  %950 = vst.msk [vmem:[#allocation5 + $0xe0] sm:$0xff] %vm921_vm8, %v882_v49  ;;  %6583 = vmatprep.mubr.msk.f32.mxu0 %vm1797_vm15, %v1780_v21 }
 0x25a   : > { %3274 = vrot.lane.b32.xlu0 %v8603_v48, %s7049_s29 }
 0x25b   : > { %v884_v30 = vpop.permute.xlu1 %883 }
 0x25c   : > { %951 = vst.msk [vmem:[#allocation5 + $0xe8] sm:$0xff] %vm921_vm8, %v884_v30  ;;  %v1013_v35 = vpop.permute.xlu0 %1012  ;;  %v2267_v4 = vld [vmem:[#allocation3 + $0xb8] sm:$0x3] }
 0x25d   : > { %2806 = vrot.lane.b32.xlu1 %v8423_v36, %s7049_s29  ;;  %v1781_v52 = vld [vmem:[#allocation5 + $0xd8] sm:$0xff]  ;;  %1081 = vst.msk [vmem:[#allocation5 + $0xe0] sm:$0xff] %vm1052_vm9, %v1013_v35  ;;  %v2416_v8 = vrot.slane %v2267_v4, 1  ;;  %v2625_v3 = vrot.slane %v2267_v4, 2 }
 0x25e   : > { %6584 = vmatmul.mubr.msk.f32.gmra.mrb[26].mxu0 %vm1797_vm15, %v1781_v52  ;;  %v8940_v2 = vld [vmem:[#allocation3 + $0xa8] sm:$0xff]  ;;  %v8942_v57 = vld [vmem:[#allocation3 + $0xb0] sm:$0xff]  ;;  %3012 = vrot.lane.b32.xlu0 %v8453_v59, %s7047_s12 }
 0x25f   : > { %v1015_v10 = vpop.permute.xlu1 %1014  ;;  %v2622_v36 = vrot.slane %v8940_v2, 2  ;;  %2312 = vst.msk [vmem:[#allocation6 + $0x150] sm:$0xff] %vm2155_vm1, %v8940_v2  ;;  %v2413_v27 = vrot.slane %v8940_v2, 1  ;;  %v2414_v9 = vrot.slane %v8942_v57, 1  ;;  %v2623_v42 = vrot.slane %v8942_v57, 2  ;;  %2313 = vst.msk [vmem:[#allocation6 + $0x168] sm:$0xff] %vm2155_vm1, %v8942_v57 }
 0x260   : > { %1082 = vst.msk [vmem:[#allocation5 + $0xe8] sm:$0xff] %vm1052_vm9, %v1015_v10  ;;  %v1148_v16 = vpop.permute.xlu0 %1147 }
 0x261   : > { %2468 = vrot.lane.b32.xlu1 %v8351_v15, %s7047_s12  ;;  %v8958_v15 = vsel %vm534_vm3, %v2413_v27, %v2414_v9  ;;  %v8961_v29 = vsel %vm744_vm2, %v2622_v36, %v2623_v42  ;;  %v8964_v17 = vsel %vm534_vm3, %v2414_v9, %v2416_v8  ;;  %v8967_v31 = vsel %vm744_vm2, %v2623_v42, %v2625_v3 }
 0x262   : > { %1216 = vst.msk [vmem:[#allocation5 + $0xe0] sm:$0xff] %vm1187_vm10, %v1148_v16  ;;  %3142 = vrot.lane.b32.xlu0 %v8577_v43, %s7048_s9 }
 0x263   : > { %v1150_v45 = vpop.permute.xlu1 %1149  ;;  %3441 = vst.msk [vmem:[#allocation6 + $0x100] sm:$0xff] %vm2155_vm1, %v8961_v29  ;;  %2977 = vst.msk [vmem:[#allocation6 + $0x128] sm:$0xff] %vm2155_vm1, %v8958_v15 }
 0x264   : > { %3442 = vst.msk [vmem:[#allocation6 + $0x118] sm:$0xff] %vm2155_vm1, %v8967_v31  ;;  %2978 = vst.msk [vmem:[#allocation6 + $0x140] sm:$0xff] %vm2155_vm1, %v8964_v17  ;;  %v1282_v12 = vpop.permute.xlu0 %1281 }
 0x265   : > { %1217 = vst.msk [vmem:[#allocation5 + $0xe8] sm:$0xff] %vm1187_vm10, %v1150_v45  ;;  %2677 = vrot.lane.b32.xlu1 %v8357_v23, %s7048_s9 }
 0x266   : > { %1350 = vst.msk [vmem:[#allocation5 + $0xe0] sm:$0xff] %vm1321_vm11, %v1282_v12  ;;  %3276 = vrot.lane.b32.xlu0 %v8606_v55, %s7049_s29 }
 0x267   : > { %v1284_v41 = vpop.permute.xlu1 %1283 }
 0x268   : > { %1351 = vst.msk [vmem:[#allocation5 + $0xe8] sm:$0xff] %vm1321_vm11, %v1284_v41  ;;  %v1413_v11 = vpop.permute.xlu0 %1412 }
 0x269   : > { %2808 = vrot.lane.b32.xlu1 %v8425_v54, %s7049_s29  ;;  %1481 = vst.msk [vmem:[#allocation5 + $0xe0] sm:$0xff] %vm1452_vm12, %v1413_v11 }
 0x26a   : > { %3014 = vrot.lane.b32.xlu0 %v8609_v19, %s7047_s12 }
 0x26b   : > { %v1415_v32 = vpop.permute.xlu1 %1414 }
 0x26c   : > { %1482 = vst.msk [vmem:[#allocation5 + $0xe8] sm:$0xff] %vm1452_vm12, %v1415_v32  ;;  %v1548_v23 = vpop.permute.xlu0 %1547 }
 0x26d   : > { %2470 = vrot.lane.b32.xlu1 %v8444_v7, %s7047_s12  ;;  %1616 = vst.msk [vmem:[#allocation5 + $0xe0] sm:$0xff] %vm1587_vm13, %v1548_v23 }
 0x26e   : > { %3144 = vrot.lane.b32.xlu0 %v8734_v33, %s7048_s9 }
 0x26f   : > { %v1550_v37 = vpop.permute.xlu1 %1549 }
 0x270   : > { %1617 = vst.msk [vmem:[#allocation5 + $0xe8] sm:$0xff] %vm1587_vm13, %v1550_v37  ;;  %v1682_v54 = vpop.permute.xlu0 %1681  ;;  %v6567_v62 = vpop.f32.mrb[14].mxu0 }
 0x271   : > { %2679 = vrot.lane.b32.xlu1 %v8450_v58, %s7048_s9  ;;  %1750 = vst.msk [vmem:[#allocation5 + $0xe0] sm:$0xff] %vm1721_vm14, %v1682_v54  ;;  %v2040_v22 = vadd.f32 %v8829_v47, %v6567_v62  ;;  %v2034_v13 = vpop.f32.mrb[15].mxu0 }
 0x272   : > { %v2035_v56 = vadd.f32 %v8829_v47, %v2034_v13  ;;  %3278 = vrot.lane.b32.xlu0 %v8758_v40, %s7049_s29 }
 0x273   : > { %v676_v7 = vpop.permute.xlu1 %675  ;;  %v2138_v58 = vmax.f32 %v2040_v22, 0.0 }
 0x274   : > { %742 = vst.msk [vmem:[#allocation5 + $0xf0] sm:$0xff] %vm711_vm7, %v676_v7  ;;  %v2137_v46 = vmax.f32 %v2035_v56, 0.0  ;;  %v1684_v60 = vpop.permute.xlu0 %1683 }
 0x275   : > { %2810 = vrot.lane.b32.xlu1 %v8575_v20, %s7049_s29  ;;  %2227 = vst.msk [vmem:[#allocation3 + $0xc9] sm:$0xff] %vm2155_vm1, %v2138_v58 }
 0x276   : > { %1751 = vst.msk [vmem:[#allocation5 + $0xe8] sm:$0xff] %vm1721_vm14, %v1684_v60  ;;  %3016 = vrot.lane.b32.xlu0 %v8612_v44, %s7047_s12 }
 0x277   : > { %v678_v14 = vpop.permute.xlu1 %677  ;;  %2226 = vst.msk [vmem:[#allocation3 + $0xc1] sm:$0xff] %vm2155_vm1, %v2137_v46 }
 0x278   : > { %743 = vst.msk [vmem:[#allocation5 + $0xf8] sm:$0xff] %vm711_vm7, %v678_v14  ;;  %v886_v20 = vpop.permute.xlu0 %885  ;;  %v1782_v53 = vld [vmem:[#allocation5 + $0xe0] sm:$0xff]  ;;  %vm4180_vm7 = vcmask 523264  }
 0x279   : > { %2472 = vrot.lane.b32.xlu1 %v8447_v61, %s7047_s12  ;;  %952 = vst.msk [vmem:[#allocation5 + $0xf0] sm:$0xff] %vm921_vm8, %v886_v20  ;;  %6586 = vmatprep.mubr.msk.f32.mxu0 %vm1797_vm15, %v1782_v53 }
 0x27a   : > { %3146 = vrot.lane.b32.xlu0 %v8736_v34, %s7048_s9  ;;  %4185 = vst.msk [vmem:[#allocation4 + $0x18] sm:$0xff] %vm4180_vm7, %v7036_v0  ;;  %4186 = vst.msk [vmem:[#allocation4 + $0x20] sm:$0xff] %vm4180_vm7, %v7036_v0 }
 0x27b   : > { %v888_v1 = vpop.permute.xlu1 %887  ;;  %4181 = vst.msk [vmem:[#allocation4] sm:$0xff] %vm4180_vm7, %v7036_v0  ;;  %4182 = vst.msk [vmem:[#allocation4 + $0x8] sm:$0xff] %vm4180_vm7, %v7036_v0 }
 0x27c   : > { %953 = vst.msk [vmem:[#allocation5 + $0xf8] sm:$0xff] %vm921_vm8, %v888_v1  ;;  %v2270_v28 = vld [vmem:[#allocation3 + $0xd0] sm:$0x3]  ;;  %v1017_v61 = vpop.permute.xlu0 %1016  ;;  %vm4183_vm8 = vcmask 517120  }
 0x27d   : > { %2681 = vrot.lane.b32.xlu1 %v8453_v59, %s7048_s9  ;;  %v1783_v38 = vld [vmem:[#allocation5 + $0xe8] sm:$0xff]  ;;  %v2630_v49 = vrot.slane %v2270_v28, 2  ;;  %1083 = vst.msk [vmem:[#allocation5 + $0xf0] sm:$0xff] %vm1052_vm9, %v1017_v61  ;;  %v2421_v52 = vrot.slane %v2270_v28, 1 }
 0x27e   : > { %v9024_v21 = vld [vmem:[#allocation3 + $0xc0] sm:$0xff]  ;;  %v9026_v30 = vld [vmem:[#allocation3 + $0xc8] sm:$0xff]  ;;  %6587 = vmatmul.mubr.msk.f32.gmra.mrb[28].mxu0 %vm1797_vm15, %v1783_v38  ;;  %3280 = vrot.lane.b32.xlu0 %v8761_v5, %s7049_s29  ;;  %4188 = vst.msk [vmem:[#allocation4 + $0x30] sm:$0xff] %vm4180_vm7, %v7036_v0  ;;  %4189 = vst.msk [vmem:[#allocation4 + $0x38] sm:$0xff] %vm4180_vm7, %v7036_v0 }
 0x27f   : > { %v1019_v35 = vpop.permute.xlu1 %1018  ;;  %2314 = vst.msk [vmem:[#allocation6 + $0x180] sm:$0xff] %vm2155_vm1, %v9024_v21  ;;  %2315 = vst.msk [vmem:[#allocation6 + $0x198] sm:$0xff] %vm2155_vm1, %v9026_v30  ;;  %v2627_v59 = vrot.slane %v9024_v21, 2  ;;  %v2628_v4 = vrot.slane %v9026_v30, 2  ;;  %v2418_v10 = vrot.slane %v9024_v21, 1  ;;  %v2419_v8 = vrot.slane %v9026_v30, 1 }
 0x280   : > { %1084 = vst.msk [vmem:[#allocation5 + $0xf8] sm:$0xff] %vm1052_vm9, %v1019_v35  ;;  %v1152_v3 = vpop.permute.xlu0 %1151  ;;  %v3468_v28 = vld [vmem:[#allocation6 + $0x28] sm:$0xff]  ;;  %vm4579_vm9 = vcmask 1048064  }
 0x281   : > { %2812 = vrot.lane.b32.xlu1 %v8577_v43, %s7049_s29  ;;  %v9044_v36 = vsel %vm744_vm2, %v2627_v59, %v2628_v4  ;;  %v9047_v27 = vsel %vm744_vm2, %v2628_v4, %v2630_v49  ;;  %v9050_v43 = vsel %vm534_vm3, %v2418_v10, %v2419_v8  ;;  %v9053_v9 = vsel %vm534_vm3, %v2419_v8, %v2421_v52 }
 0x282   : > { %1218 = vst.msk [vmem:[#allocation5 + $0xf0] sm:$0xff] %vm1187_vm10, %v1152_v3  ;;  %3018 = vrot.lane.b32.xlu0 %v8764_v6, %s7047_s12 }
 0x283   : > { %v1154_v42 = vpop.permute.xlu1 %1153  ;;  %3443 = vst.msk [vmem:[#allocation6 + $0x130] sm:$0xff] %vm2155_vm1, %v9044_v36  ;;  %3444 = vst.msk [vmem:[#allocation6 + $0x148] sm:$0xff] %vm2155_vm1, %v9047_v27 }
 0x284   : > { %2979 = vst.msk [vmem:[#allocation6 + $0x158] sm:$0xff] %vm2155_vm1, %v9050_v43  ;;  %2980 = vst.msk [vmem:[#allocation6 + $0x170] sm:$0xff] %vm2155_vm1, %v9053_v9  ;;  %v1286_v16 = vpop.permute.xlu0 %1285 }
 0x285   : > { %1219 = vst.msk [vmem:[#allocation5 + $0xf8] sm:$0xff] %vm1187_vm10, %v1154_v42  ;;  %2474 = vrot.lane.b32.xlu1 %v8603_v48, %s7047_s12  ;;  %v3474_v42 = vld [vmem:[#allocation6 + $0x58] sm:$0xff] }
 0x286   : > { %1352 = vst.msk [vmem:[#allocation5 + $0xf0] sm:$0xff] %vm1321_vm11, %v1286_v16  ;;  %3148 = vrot.lane.b32.xlu0 %v8854_v24, %s7048_s9  ;;  %v3477_v16 = vld [vmem:[#allocation6 + $0x70] sm:$0xff] }
 0x287   : > { %v1288_v45 = vpop.permute.xlu1 %1287  ;;  %4191 = vst.msk [vmem:[#allocation4 + $0x48] sm:$0xff] %vm4180_vm7, %v7036_v0  ;;  %4192 = vst.msk [vmem:[#allocation4 + $0x50] sm:$0xff] %vm4180_vm7, %v7036_v0 }
 0x288   : > { %1353 = vst.msk [vmem:[#allocation5 + $0xf8] sm:$0xff] %vm1321_vm11, %v1288_v45  ;;  %v1417_v12 = vpop.permute.xlu0 %1416 }
 0x289   : > { %2683 = vrot.lane.b32.xlu1 %v8609_v19, %s7048_s9  ;;  %1483 = vst.msk [vmem:[#allocation5 + $0xf0] sm:$0xff] %vm1452_vm12, %v1417_v12 }
 0x28a   : > { %3282 = vrot.lane.b32.xlu0 %v8872_v25, %s7049_s29  ;;  %4194 = vst.msk [vmem:[#allocation4 + $0x60] sm:$0xff] %vm4180_vm7, %v7036_v0  ;;  %4195 = vst.msk [vmem:[#allocation4 + $0x68] sm:$0xff] %vm4180_vm7, %v7036_v0 }
 0x28b   : > { %v1419_v41 = vpop.permute.xlu1 %1418  ;;  %4197 = vst.msk [vmem:[#allocation4 + $0x78] sm:$0xff] %vm4180_vm7, %v7036_v0  ;;  %4198 = vst.msk [vmem:[#allocation4 + $0x80] sm:$0xff] %vm4180_vm7, %v7036_v0 }
 0x28c   : > { %1484 = vst.msk [vmem:[#allocation5 + $0xf8] sm:$0xff] %vm1452_vm12, %v1419_v41  ;;  %v1552_v48 = vpop.permute.xlu0 %1551 }
 0x28d   : > { %2814 = vrot.lane.b32.xlu1 %v8734_v33, %s7049_s29  ;;  %1618 = vst.msk [vmem:[#allocation5 + $0xf0] sm:$0xff] %vm1587_vm13, %v1552_v48  ;;  %v3480_v48 = vld [vmem:[#allocation6 + $0x88] sm:$0xff] }
 0x28e   : > { %3020 = vrot.lane.b32.xlu0 %v8767_v26, %s7047_s12  ;;  %4200 = vst.msk [vmem:[#allocation4 + $0x90] sm:$0xff] %vm4180_vm7, %v7036_v0  ;;  %4201 = vst.msk [vmem:[#allocation4 + $0x98] sm:$0xff] %vm4180_vm7, %v7036_v0 }
 0x28f   : > { %v1554_v11 = vpop.permute.xlu1 %1553  ;;  %4203 = vst.msk [vmem:[#allocation4 + $0xa8] sm:$0xff] %vm4180_vm7, %v7036_v0  ;;  %4204 = vst.msk [vmem:[#allocation4 + $0xb0] sm:$0xff] %vm4180_vm7, %v7036_v0 }
 0x290   : > { %1619 = vst.msk [vmem:[#allocation5 + $0xf8] sm:$0xff] %vm1587_vm13, %v1554_v11  ;;  %v1686_v19 = vpop.permute.xlu0 %1685 }
 0x291   : > { %2476 = vrot.lane.b32.xlu1 %v8606_v55, %s7047_s12  ;;  %v6570_v32 = vpop.f32.mrb[16].mxu0  ;;  %1752 = vst.msk [vmem:[#allocation5 + $0xf0] sm:$0xff] %vm1721_vm14, %v1686_v19 }
 0x292   : > { %v2050_v23 = vadd.f32 %v8829_v47, %v6570_v32  ;;  %v2044_v37 = vpop.f32.mrb[17].mxu0  ;;  %3150 = vrot.lane.b32.xlu0 %v8856_v18, %s7048_s9  ;;  %4206 = vst.msk [vmem:[#allocation4 + $0xc0] sm:$0xff] %vm4180_vm7, %v7036_v0  ;;  %4207 = vst.msk [vmem:[#allocation4 + $0xc8] sm:$0xff] %vm4180_vm7, %v7036_v0 }
 0x293   : > { %v1688_v33 = vpop.permute.xlu1 %1687  ;;  %v2045_v54 = vadd.f32 %v8829_v47, %v2044_v37  ;;  %4209 = vst.msk [vmem:[#allocation4 + $0xd8] sm:$0xff] %vm4180_vm7, %v7036_v0  ;;  %4210 = vst.msk [vmem:[#allocation4 + $0xe0] sm:$0xff] %vm4180_vm7, %v7036_v0 }
 0x294   : > { %1753 = vst.msk [vmem:[#allocation5 + $0xf8] sm:$0xff] %vm1721_vm14, %v1688_v33  ;;  %v2140_v55 = vmax.f32 %v2050_v23, 0.0  ;;  %v3003_v7 = vpop.permute.xlu0 %3002  ;;  %v3486_v33 = vld [vmem:[#allocation6 + $0xb8] sm:$0xff] }
 0x295   : > { %2685 = vrot.lane.b32.xlu1 %v8612_v44, %s7048_s9  ;;  %v2139_v62 = vmax.f32 %v2045_v54, 0.0  ;;  %3098 = vst.msk [vmem:[#allocation6 + $0x8] sm:$0xff] %vm2554_vm0, %v3003_v7  ;;  %v3492_v54 = vld [vmem:[#allocation6 + $0xe8] sm:$0xff] }
 0x296   : > { %2229 = vst.msk [vmem:[#allocation3 + $0xe1] sm:$0xff] %vm2155_vm1, %v2140_v55  ;;  %3284 = vrot.lane.b32.xlu0 %v8875_v50, %s7049_s29  ;;  %v3495_v55 = vld [vmem:[#allocation6 + $0x100] sm:$0xff] }
 0x297   : > { %v2459_v22 = vpop.permute.xlu1 %2458  ;;  %2228 = vst.msk [vmem:[#allocation3 + $0xd9] sm:$0xff] %vm2155_vm1, %v2139_v62 }
 0x298   : > { %2555 = vst.msk [vmem:[#allocation6] sm:$0xff] %vm2554_vm0, %v2459_v22  ;;  %v3133_v44 = vpop.permute.xlu0 %3132  ;;  %v1784_v13 = vld [vmem:[#allocation5 + $0xf0] sm:$0xff] }
 0x299   : > { %2816 = vrot.lane.b32.xlu1 %v8736_v34, %s7049_s29  ;;  %3228 = vst.msk [vmem:[#allocation6 + $0x8] sm:$0xff] %vm2763_vm5, %v3133_v44  ;;  %6589 = vmatprep.mubr.msk.f32.mxu0 %vm1797_vm15, %v1784_v13  ;;  %v3465_v34 = vld [vmem:[#allocation6 + $0x10] sm:$0xff] }
 0x29a   : > { %3022 = vrot.lane.b32.xlu0 %v8878_v51, %s7047_s12  ;;  %4212 = vst.msk [vmem:[#allocation4 + $0xf0] sm:$0xff] %vm4180_vm7, %v7036_v0  ;;  %4213 = vst.msk [vmem:[#allocation4 + $0xf8] sm:$0xff] %vm4180_vm7, %v7036_v0 }
 0x29b   : > { %v2668_v56 = vpop.permute.xlu1 %2667  ;;  %v1785_v58 = vld [vmem:[#allocation5 + $0xf8] sm:$0xff]  ;;  %4215 = vst.msk [vmem:[#allocation4 + $0x108] sm:$0xff] %vm4180_vm7, %v7036_v0  ;;  %4216 = vst.msk [vmem:[#allocation4 + $0x110] sm:$0xff] %vm4180_vm7, %v7036_v0 }
 0x29c   : > { %2764 = vst.msk [vmem:[#allocation6] sm:$0xff] %vm2763_vm5, %v2668_v56  ;;  %6590 = vmatmul.mubr.msk.f32.gmra.mrb[30].mxu0 %vm1797_vm15, %v1785_v58  ;;  %v3267_v60 = vpop.permute.xlu0 %3266  ;;  %v3498_v56 = vld [vmem:[#allocation6 + $0x118] sm:$0xff] }
 0x29d   : > { %2478 = vrot.lane.b32.xlu1 %v8758_v40, %s7047_s12  ;;  %6600 = vmatprep.mubr.msk.f32.mxu0 %vm2155_vm1, %v3465_v34  ;;  %v2273_v46 = vld [vmem:[#allocation3 + $0xe8] sm:$0x3]  ;;  %3362 = vst.msk [vmem:[#allocation6 + $0x8] sm:$0xff] %vm2894_vm6, %v3267_v60  ;;  %v3471_v40 = vld [vmem:[#allocation6 + $0x40] sm:$0xff] }
 0x29e   : > { %v2635_v14 = vrot.slane %v2273_v46, 2  ;;  %v9112_v20 = vld [vmem:[#allocation3 + $0xd8] sm:$0xff]  ;;  %v9114_v53 = vld [vmem:[#allocation3 + $0xe0] sm:$0xff]  ;;  %v2426_v61 = vrot.slane %v2273_v46, 1  ;;  %3152 = vrot.lane.b32.xlu0 %v8940_v2, %s7048_s9  ;;  %v3501_v46 = vld [vmem:[#allocation6 + $0x130] sm:$0xff]  ;;  %4218 = vst.msk [vmem:[#allocation4 + $0x120] sm:$0xff] %vm4180_vm7, %v7036_v0 }
 0x29f   : > { %v2799_v1 = vpop.permute.xlu1 %2798  ;;  %2316 = vst.msk [vmem:[#allocation6 + $0x1b0] sm:$0xff] %vm2155_vm1, %v9112_v20  ;;  %2317 = vst.msk [vmem:[#allocation6 + $0x1c8] sm:$0xff] %vm2155_vm1, %v9114_v53  ;;  %v2632_v38 = vrot.slane %v9112_v20, 2  ;;  %v2633_v49 = vrot.slane %v9114_v53, 2  ;;  %v2423_v35 = vrot.slane %v9112_v20, 1  ;;  %v2424_v52 = vrot.slane %v9114_v53, 1 }
 0x2a0   : > { %2895 = vst.msk [vmem:[#allocation6] sm:$0xff] %vm2894_vm6, %v2799_v1  ;;  %6601 = vmatmul.mubr.msk.f32.vlgmr.msra.gmra.mrb[32].mxu0 %vm2155_vm1, %v3468_v28  ;;  %v3005_v59 = vpop.permute.xlu0 %3004  ;;  %v3504_v28 = vld [vmem:[#allocation6 + $0x148] sm:$0xff] }
 0x2a1   : > { %2687 = vrot.lane.b32.xlu1 %v8764_v6, %s7048_s9  ;;  %6603 = vmatprep.mubr.msk.f32.mxu0 %vm2155_vm1, %v3471_v40  ;;  %v9133_v4 = vsel %vm744_vm2, %v2632_v38, %v2633_v49  ;;  %v9136_v6 = vsel %vm744_vm2, %v2633_v49, %v2635_v14  ;;  %v9139_v10 = vsel %vm534_vm3, %v2423_v35, %v2424_v52 }
 0x2a2   : > { %v9142_v8 = vsel %vm534_vm3, %v2424_v52, %v2426_v61  ;;  %3099 = vst.msk [vmem:[#allocation6 + $0x20] sm:$0xff] %vm2554_vm0, %v3005_v59  ;;  %3286 = vrot.lane.b32.xlu0 %v8958_v15, %s7049_s29 }
 0x2a3   : > { %v2461_v3 = vpop.permute.xlu1 %2460  ;;  %3445 = vst.msk [vmem:[#allocation6 + $0x160] sm:$0xff] %vm2155_vm1, %v9133_v4  ;;  %3446 = vst.msk [vmem:[#allocation6 + $0x178] sm:$0xff] %vm2155_vm1, %v9136_v6 }
 0x2a4   : > { %2981 = vst.msk [vmem:[#allocation6 + $0x188] sm:$0xff] %vm2155_vm1, %v9139_v10  ;;  %2982 = vst.msk [vmem:[#allocation6 + $0x1a0] sm:$0xff] %vm2155_vm1, %v9142_v8  ;;  %6604 = vmatmul.mubr.msk.f32.gmra.mrb[34].mxu0 %vm2155_vm1, %v3474_v42  ;;  %v3135_v45 = vpop.permute.xlu0 %3134  ;;  %v3464_v12 = vld [vmem:[#allocation6 + $0x8] sm:$0xff] }
 0x2a5   : > { %2556 = vst.msk [vmem:[#allocation6 + $0x18] sm:$0xff] %vm2554_vm0, %v2461_v3  ;;  %2818 = vrot.lane.b32.xlu1 %v8854_v24, %s7049_s29  ;;  %6606 = vmatprep.mubr.msk.f32.mxu0 %vm2155_vm1, %v3477_v16  ;;  %v3483_v24 = vld [vmem:[#allocation6 + $0xa0] sm:$0xff] }
 0x2a6   : > { %3229 = vst.msk [vmem:[#allocation6 + $0x20] sm:$0xff] %vm2763_vm5, %v3135_v45  ;;  %3762 = vmatprep.mubr.f32.mxu1 %v3464_v12  ;;  %3024 = vrot.lane.b32.xlu0 %v8881_v39, %s7047_s12 }
 0x2a7   : > { %v2670_v41 = vpop.permute.xlu1 %2669  ;;  %v3463_v11 = vld [vmem:[#allocation6] sm:$0xff]  ;;  %4219 = vst.msk [vmem:[#allocation4 + $0x128] sm:$0xff] %vm4180_vm7, %v7036_v0  ;;  %4221 = vst.msk [vmem:[#allocation4 + $0x138] sm:$0xff] %vm4180_vm7, %v7036_v0 }
 0x2a8   : > { %2765 = vst.msk [vmem:[#allocation6 + $0x18] sm:$0xff] %vm2763_vm5, %v2670_v41  ;;  %6607 = vmatmul.mubr.msk.f32.gmra.mrb[36].mxu0 %vm2155_vm1, %v3480_v48  ;;  %3763 = vmatmul.mubr.f32.vlgmr.msra.gmra.mrb[0].mxu1 %v3463_v11  ;;  %v3269_v19 = vpop.permute.xlu0 %3268 }
 0x2a9   : > { %2480 = vrot.lane.b32.xlu1 %v8761_v5, %s7047_s12  ;;  %6609 = vmatprep.mubr.msk.f32.mxu0 %vm2155_vm1, %v3483_v24  ;;  %3363 = vst.msk [vmem:[#allocation6 + $0x20] sm:$0xff] %vm2894_vm6, %v3269_v19  ;;  %v3489_v5 = vld [vmem:[#allocation6 + $0xd0] sm:$0xff] }
 0x2aa   : > { %3154 = vrot.lane.b32.xlu0 %v8942_v57, %s7048_s9  ;;  %v3510_v38 = vld [vmem:[#allocation6 + $0x178] sm:$0xff]  ;;  %4222 = vst.msk [vmem:[#allocation4 + $0x140] sm:$0xff] %vm4180_vm7, %v7036_v0  ;;  %4224 = vst.msk [vmem:[#allocation4 + $0x150] sm:$0xff] %vm4180_vm7, %v7036_v0 }
 0x2ab   : > { %v2801_v32 = vpop.permute.xlu1 %2800  ;;  %4225 = vst.msk [vmem:[#allocation4 + $0x158] sm:$0xff] %vm4180_vm7, %v7036_v0  ;;  %4227 = vst.msk [vmem:[#allocation4 + $0x168] sm:$0xff] %vm4180_vm7, %v7036_v0 }
 0x2ac   : > { %2896 = vst.msk [vmem:[#allocation6 + $0x18] sm:$0xff] %vm2894_vm6, %v2801_v32  ;;  %6610 = vmatmul.mubr.msk.f32.gmra.mrb[38].mxu0 %vm2155_vm1, %v3486_v33  ;;  %v3007_v23 = vpop.permute.xlu0 %3006 }
 0x2ad   : > { %2689 = vrot.lane.b32.xlu1 %v8767_v26, %s7048_s9  ;;  %6612 = vmatprep.mubr.msk.f32.mxu0 %vm2155_vm1, %v3489_v5  ;;  %3100 = vst.msk [vmem:[#allocation6 + $0x38] sm:$0xff] %vm2554_vm0, %v3007_v23 }
 0x2ae   : > { %3288 = vrot.lane.b32.xlu0 %v8964_v17, %s7049_s29  ;;  %4228 = vst.msk [vmem:[#allocation4 + $0x170] sm:$0xff] %vm4180_vm7, %v7036_v0  ;;  %4230 = vst.msk [vmem:[#allocation4 + $0x180] sm:$0xff] %vm4180_vm7, %v7036_v0 }
 0x2af   : > { %v2463_v37 = vpop.permute.xlu1 %2462  ;;  %4231 = vst.msk [vmem:[#allocation4 + $0x188] sm:$0xff] %vm4180_vm7, %v7036_v0  ;;  %4233 = vst.msk [vmem:[#allocation4 + $0x198] sm:$0xff] %vm4180_vm7, %v7036_v0 }
 0x2b0   : > { %2557 = vst.msk [vmem:[#allocation6 + $0x30] sm:$0xff] %vm2554_vm0, %v2463_v37  ;;  %6613 = vmatmul.mubr.msk.f32.gmra.mrb[40].mxu0 %vm2155_vm1, %v3492_v54  ;;  %v3137_v62 = vpop.permute.xlu0 %3136  ;;  %v3467_v7 = vld [vmem:[#allocation6 + $0x20] sm:$0xff] }
 0x2b1   : > { %2820 = vrot.lane.b32.xlu1 %v8856_v18, %s7049_s29  ;;  %6615 = vmatprep.mubr.msk.f32.mxu0 %vm2155_vm1, %v3495_v55  ;;  %v6573_v26 = vpop.f32.mrb[18].mxu0  ;;  %3230 = vst.msk [vmem:[#allocation6 + $0x38] sm:$0xff] %vm2763_vm5, %v3137_v62 }
 0x2b2   : > { %v2060_v44 = vadd.f32 %v8829_v47, %v6573_v26  ;;  %v2054_v13 = vpop.f32.mrb[19].mxu0  ;;  %3767 = vmatprep.mubr.f32.mxu1 %v3467_v7  ;;  %3026 = vrot.lane.b32.xlu0 %v8961_v29, %s7047_s12  ;;  %4234 = vst.msk [vmem:[#allocation4 + $0x1a0] sm:$0xff] %vm4180_vm7, %v7036_v0 }
 0x2b3   : > { %v2672_v22 = vpop.permute.xlu1 %2671  ;;  %v3466_v58 = vld [vmem:[#allocation6 + $0x18] sm:$0xff]  ;;  %v2055_v18 = vadd.f32 %v8829_v47, %v2054_v13  ;;  %4187 = vst.msk [vmem:[#allocation4 + $0x28] sm:$0x3] %vm4183_vm8, %v7036_v0  ;;  %4184 = vst.msk [vmem:[#allocation4 + $0x10] sm:$0x3] %vm4183_vm8, %v7036_v0 }
 0x2b4   : > { %2766 = vst.msk [vmem:[#allocation6 + $0x30] sm:$0xff] %vm2763_vm5, %v2672_v22  ;;  %6616 = vmatmul.mubr.msk.f32.gmra.mrb[42].mxu0 %vm2155_vm1, %v3498_v56  ;;  %v2142_v34 = vmax.f32 %v2060_v44, 0.0  ;;  %3768 = vmatmul.mubr.f32.gmra.mrb[2].mxu1 %v3466_v58  ;;  %v3271_v14 = vpop.permute.xlu0 %3270 }
 0x2b5   : > { %2482 = vrot.lane.b32.xlu1 %v8872_v25, %s7047_s12  ;;  %v2141_v60 = vmax.f32 %v2055_v18, 0.0  ;;  %6618 = vmatprep.mubr.msk.f32.mxu0 %vm2155_vm1, %v3501_v46  ;;  %3364 = vst.msk [vmem:[#allocation6 + $0x38] sm:$0xff] %vm2894_vm6, %v3271_v14  ;;  %v3507_v25 = vld [vmem:[#allocation6 + $0x160] sm:$0xff] }
 0x2b6   : > { %2231 = vst.msk [vmem:[#allocation3 + $0xf9] sm:$0xff] %vm2155_vm1, %v2142_v34  ;;  %3156 = vrot.lane.b32.xlu0 %v9024_v21, %s7048_s9 }
 0x2b7   : > { %v2803_v1 = vpop.permute.xlu1 %2802  ;;  %2230 = vst.msk [vmem:[#allocation3 + $0xf1] sm:$0xff] %vm2155_vm1, %v2141_v60 }
 0x2b8   : > { %2897 = vst.msk [vmem:[#allocation6 + $0x30] sm:$0xff] %vm2894_vm6, %v2803_v1  ;;  %6619 = vmatmul.mubr.msk.f32.gmra.mrb[44].mxu0 %vm2155_vm1, %v3504_v28  ;;  %v3009_v61 = vpop.permute.xlu0 %3008 }
 0x2b9   : > { %2691 = vrot.lane.b32.xlu1 %v8878_v51, %s7048_s9  ;;  %6621 = vmatprep.mubr.msk.f32.mxu0 %vm2155_vm1, %v3507_v25  ;;  %3101 = vst.msk [vmem:[#allocation6 + $0x50] sm:$0xff] %vm2554_vm0, %v3009_v61 }
 0x2ba   : > { %3290 = vrot.lane.b32.xlu0 %v9050_v43, %s7049_s29  ;;  %4190 = vst.msk [vmem:[#allocation4 + $0x40] sm:$0x3] %vm4183_vm8, %v7036_v0  ;;  %4193 = vst.msk [vmem:[#allocation4 + $0x58] sm:$0x3] %vm4183_vm8, %v7036_v0 }
 0x2bb   : > { %v2465_v40 = vpop.permute.xlu1 %2464  ;;  %4196 = vst.msk [vmem:[#allocation4 + $0x70] sm:$0x3] %vm4183_vm8, %v7036_v0  ;;  %4199 = vst.msk [vmem:[#allocation4 + $0x88] sm:$0x3] %vm4183_vm8, %v7036_v0 }
 0x2bc   : > { %2558 = vst.msk [vmem:[#allocation6 + $0x48] sm:$0xff] %vm2554_vm0, %v2465_v40  ;;  %6622 = vmatmul.mubr.msk.f32.gmra.mrb[46].mxu0 %vm2155_vm1, %v3510_v38  ;;  %v3139_v49 = vpop.permute.xlu0 %3138  ;;  %v3470_v35 = vld [vmem:[#allocation6 + $0x38] sm:$0xff] }
 0x2bd   : > { %2822 = vrot.lane.b32.xlu1 %v8940_v2, %s7049_s29  ;;  %v2276_v51 = vld [vmem:[#allocation3 + $0x100] sm:$0x3]  ;;  %3231 = vst.msk [vmem:[#allocation6 + $0x50] sm:$0xff] %vm2763_vm5, %v3139_v49  ;;  %3772 = vmatprep.mubr.f32.mxu1 %v3470_v35 }
 0x2be   : > { %v2640_v52 = vrot.slane %v2276_v51, 2  ;;  %v9211_v59 = vld [vmem:[#allocation3 + $0xf0] sm:$0xff]  ;;  %v9213_v3 = vld [vmem:[#allocation3 + $0xf8] sm:$0xff]  ;;  %v2431_v45 = vrot.slane %v2276_v51, 1  ;;  %3028 = vrot.lane.b32.xlu0 %v8967_v31, %s7047_s12  ;;  %4202 = vst.msk [vmem:[#allocation4 + $0xa0] sm:$0x3] %vm4183_vm8, %v7036_v0 }
 0x2bf   : > { %v2674_v42 = vpop.permute.xlu1 %2673  ;;  %v3469_v16 = vld [vmem:[#allocation6 + $0x30] sm:$0xff]  ;;  %2318 = vst.msk [vmem:[#allocation6 + $0x1e0] sm:$0xff] %vm2155_vm1, %v9211_v59  ;;  %2319 = vst.msk [vmem:[#allocation6 + $0x1f8] sm:$0xff] %vm2155_vm1, %v9213_v3  ;;  %v2637_v2 = vrot.slane %v9211_v59, 2  ;;  %v2638_v12 = vrot.slane %v9213_v3, 2  ;;  %v2428_v41 = vrot.slane %v9211_v59, 1 }
 0x2c0   : > { %2767 = vst.msk [vmem:[#allocation6 + $0x48] sm:$0xff] %vm2763_vm5, %v2674_v42  ;;  %3773 = vmatmul.mubr.f32.gmra.mrb[4].mxu1 %v3469_v16  ;;  %v2429_v48 = vrot.slane %v9213_v3, 1  ;;  %v3273_v11 = vpop.permute.xlu0 %3272 }
 0x2c1   : > { %2484 = vrot.lane.b32.xlu1 %v8875_v50, %s7047_s12  ;;  %v9230_v24 = vsel %vm744_vm2, %v2637_v2, %v2638_v12  ;;  %v9233_v19 = vsel %vm744_vm2, %v2638_v12, %v2640_v52  ;;  %3365 = vst.msk [vmem:[#allocation6 + $0x50] sm:$0xff] %vm2894_vm6, %v3273_v11 }
 0x2c2   : > { %v9236_v50 = vsel %vm534_vm3, %v2428_v41, %v2429_v48  ;;  %v9239_v32 = vsel %vm534_vm3, %v2429_v48, %v2431_v45  ;;  %3447 = vst.msk [vmem:[#allocation6 + $0x190] sm:$0xff] %vm2155_vm1, %v9230_v24  ;;  %3448 = vst.msk [vmem:[#allocation6 + $0x1a8] sm:$0xff] %vm2155_vm1, %v9233_v19  ;;  %3158 = vrot.lane.b32.xlu0 %v9026_v30, %s7048_s9 }
 0x2c3   : > { %v2805_v33 = vpop.permute.xlu1 %2804  ;;  %2983 = vst.msk [vmem:[#allocation6 + $0x1b8] sm:$0xff] %vm2155_vm1, %v9236_v50  ;;  %2984 = vst.msk [vmem:[#allocation6 + $0x1d0] sm:$0xff] %vm2155_vm1, %v9239_v32 }
 0x2c4   : > { %2898 = vst.msk [vmem:[#allocation6 + $0x48] sm:$0xff] %vm2894_vm6, %v2805_v33  ;;  %v3011_v5 = vpop.permute.xlu0 %3010 }
 0x2c5   : > { %2693 = vrot.lane.b32.xlu1 %v8881_v39, %s7048_s9  ;;  %3102 = vst.msk [vmem:[#allocation6 + $0x68] sm:$0xff] %vm2554_vm0, %v3011_v5 }
 0x2c6   : > { %3292 = vrot.lane.b32.xlu0 %v9053_v9, %s7049_s29  ;;  %4205 = vst.msk [vmem:[#allocation4 + $0xb8] sm:$0x3] %vm4183_vm8, %v7036_v0  ;;  %4208 = vst.msk [vmem:[#allocation4 + $0xd0] sm:$0x3] %vm4183_vm8, %v7036_v0 }
 0x2c7   : > { %v2467_v23 = vpop.permute.xlu1 %2466  ;;  %4211 = vst.msk [vmem:[#allocation4 + $0xe8] sm:$0x3] %vm4183_vm8, %v7036_v0  ;;  %4214 = vst.msk [vmem:[#allocation4 + $0x100] sm:$0x3] %vm4183_vm8, %v7036_v0 }
 0x2c8   : > { %2559 = vst.msk [vmem:[#allocation6 + $0x60] sm:$0xff] %vm2554_vm0, %v2467_v23  ;;  %v3141_v37 = vpop.permute.xlu0 %3140  ;;  %v3473_v54 = vld [vmem:[#allocation6 + $0x50] sm:$0xff] }
 0x2c9   : > { %2824 = vrot.lane.b32.xlu1 %v8942_v57, %s7049_s29  ;;  %v3513_v55 = vld [vmem:[#allocation6 + $0x190] sm:$0xff]  ;;  %v3516_v26 = vld [vmem:[#allocation6 + $0x1a8] sm:$0xff]  ;;  %3232 = vst.msk [vmem:[#allocation6 + $0x68] sm:$0xff] %vm2763_vm5, %v3141_v37  ;;  %3777 = vmatprep.mubr.f32.mxu1 %v3473_v54 }
 0x2ca   : > { %6624 = vmatprep.mubr.msk.f32.mxu0 %vm2155_vm1, %v3513_v55  ;;  %3030 = vrot.lane.b32.xlu0 %v9044_v36, %s7047_s12  ;;  %4217 = vst.msk [vmem:[#allocation4 + $0x118] sm:$0x3] %vm4183_vm8, %v7036_v0  ;;  %4220 = vst.msk [vmem:[#allocation4 + $0x130] sm:$0x3] %vm4183_vm8, %v7036_v0 }
 0x2cb   : > { %v2676_v39 = vpop.permute.xlu1 %2675  ;;  %v3472_v62 = vld [vmem:[#allocation6 + $0x48] sm:$0xff]  ;;  %6625 = vmatmul.mubr.msk.f32.gmra.mrb[48].mxu0 %vm2155_vm1, %v3516_v26  ;;  %4223 = vst.msk [vmem:[#allocation4 + $0x148] sm:$0x3] %vm4183_vm8, %v7036_v0  ;;  %4226 = vst.msk [vmem:[#allocation4 + $0x160] sm:$0x3] %vm4183_vm8, %v7036_v0 }
 0x2cc   : > { %2768 = vst.msk [vmem:[#allocation6 + $0x60] sm:$0xff] %vm2763_vm5, %v2676_v39  ;;  %3778 = vmatmul.mubr.f32.gmra.mrb[6].mxu1 %v3472_v62  ;;  %v3275_v57 = vpop.permute.xlu0 %3274  ;;  %v9364_v39 = vld [vmem:[%s11383_s2] ss:$0 sm:$0xff] }
 0x2cd   : > { %2486 = vrot.lane.b32.xlu1 %v8958_v15, %s7047_s12  ;;  %3366 = vst.msk [vmem:[#allocation6 + $0x68] sm:$0xff] %vm2894_vm6, %v3275_v57 }
 0x2ce   : > { %3160 = vrot.lane.b32.xlu0 %v9112_v20, %s7048_s9  ;;  %4229 = vst.msk [vmem:[#allocation4 + $0x178] sm:$0x3] %vm4183_vm8, %v7036_v0  ;;  %4232 = vst.msk [vmem:[#allocation4 + $0x190] sm:$0x3] %vm4183_vm8, %v7036_v0 }
 0x2cf   : > { %v2807_v7 = vpop.permute.xlu1 %2806  ;;  %4235 = vst.msk [vmem:[#allocation4 + $0x1a8] sm:$0x3] %vm4183_vm8, %v7036_v0 }
 0x2d0   : > { %2899 = vst.msk [vmem:[#allocation6 + $0x60] sm:$0xff] %vm2894_vm6, %v2807_v7  ;;  %v3013_v44 = vpop.permute.xlu0 %3012 }
 0x2d1   : > { %2695 = vrot.lane.b32.xlu1 %v8961_v29, %s7048_s9  ;;  %v6576_v22 = vpop.f32.mrb[20].mxu0  ;;  %3103 = vst.msk [vmem:[#allocation6 + $0x80] sm:$0xff] %vm2554_vm0, %v3013_v44 }
 0x2d2   : > { %v2070_v15 = vadd.f32 %v8829_v47, %v6576_v22  ;;  %v2064_v56 = vpop.f32.mrb[21].mxu0  ;;  %3294 = vrot.lane.b32.xlu0 %v9139_v10, %s7049_s29 }
 0x2d3   : > { %v2469_v13 = vpop.permute.xlu1 %2468  ;;  %v2065_v58 = vadd.f32 %v8829_v47, %v2064_v56 }
 0x2d4   : > { %2560 = vst.msk [vmem:[#allocation6 + $0x78] sm:$0xff] %vm2554_vm0, %v2469_v13  ;;  %v2144_v18 = vmax.f32 %v2070_v15, 0.0  ;;  %v3143_v34 = vpop.permute.xlu0 %3142  ;;  %v3476_v46 = vld [vmem:[#allocation6 + $0x68] sm:$0xff] }
 0x2d5   : > { %2826 = vrot.lane.b32.xlu1 %v9024_v21, %s7049_s29  ;;  %v2143_v29 = vmax.f32 %v2065_v58, 0.0  ;;  %3233 = vst.msk [vmem:[#allocation6 + $0x80] sm:$0xff] %vm2763_vm5, %v3143_v34  ;;  %3782 = vmatprep.mubr.f32.mxu1 %v3476_v46 }
 0x2d6   : > { %2233 = vst.msk [vmem:[#allocation3 + $0x111] sm:$0xff] %vm2155_vm1, %v2144_v18  ;;  %3032 = vrot.lane.b32.xlu0 %v9047_v27, %s7047_s12 }
 0x2d7   : > { %v2678_v60 = vpop.permute.xlu1 %2677  ;;  %v3475_v14 = vld [vmem:[#allocation6 + $0x60] sm:$0xff]  ;;  %2232 = vst.msk [vmem:[#allocation3 + $0x109] sm:$0xff] %vm2155_vm1, %v2143_v29 }
 0x2d8   : > { %2769 = vst.msk [vmem:[#allocation6 + $0x78] sm:$0xff] %vm2763_vm5, %v2678_v60  ;;  %3783 = vmatmul.mubr.f32.gmra.mrb[8].mxu1 %v3475_v14  ;;  %v3277_v47 = vpop.permute.xlu0 %3276 }
 0x2d9   : > { %2488 = vrot.lane.b32.xlu1 %v8964_v17, %s7047_s12  ;;  %3367 = vst.msk [vmem:[#allocation6 + $0x80] sm:$0xff] %vm2894_vm6, %v3277_v47 }
 0x2da   : > { %3162 = vrot.lane.b32.xlu0 %v9114_v53, %s7048_s9 }
 0x2db   : > { %v2809_v21 = vpop.permute.xlu1 %2808 }
 0x2dc   : > { %2900 = vst.msk [vmem:[#allocation6 + $0x78] sm:$0xff] %vm2894_vm6, %v2809_v21  ;;  %v3015_v28 = vpop.permute.xlu0 %3014 }
 0x2dd   : > { %2697 = vrot.lane.b32.xlu1 %v8967_v31, %s7048_s9  ;;  %v2279_v1 = vld [vmem:[#allocation3 + $0x118] sm:$0x3]  ;;  %3104 = vst.msk [vmem:[#allocation6 + $0x98] sm:$0xff] %vm2554_vm0, %v3015_v28 }
 0x2de   : > { %v2645_v25 = vrot.slane %v2279_v1, 2  ;;  %v9297_v17 = vld [vmem:[#allocation3 + $0x108] sm:$0xff]  ;;  %v9299_v61 = vld [vmem:[#allocation3 + $0x110] sm:$0xff]  ;;  %v2436_v38 = vrot.slane %v2279_v1, 1  ;;  %3296 = vrot.lane.b32.xlu0 %v9142_v8, %s7049_s29 }
 0x2df   : > { %v2471_v40 = vpop.permute.xlu1 %2470  ;;  %2320 = vst.msk [vmem:[#allocation6 + $0x210] sm:$0xff] %vm2155_vm1, %v9297_v17  ;;  %2321 = vst.msk [vmem:[#allocation6 + $0x228] sm:$0xff] %vm2155_vm1, %v9299_v61  ;;  %v2642_v31 = vrot.slane %v9297_v17, 2  ;;  %v2643_v51 = vrot.slane %v9299_v61, 2  ;;  %v2433_v49 = vrot.slane %v9297_v17, 1  ;;  %v2434_v35 = vrot.slane %v9299_v61, 1 }
 0x2e0   : > { %2561 = vst.msk [vmem:[#allocation6 + $0x90] sm:$0xff] %vm2554_vm0, %v2471_v40  ;;  %v3145_v52 = vpop.permute.xlu0 %3144  ;;  %v3479_v42 = vld [vmem:[#allocation6 + $0x80] sm:$0xff] }
 0x2e1   : > { %2828 = vrot.lane.b32.xlu1 %v9026_v30, %s7049_s29  ;;  %v9316_v16 = vsel %vm744_vm2, %v2642_v31, %v2643_v51  ;;  %v9319_v45 = vsel %vm744_vm2, %v2643_v51, %v2645_v25  ;;  %v9322_v30 = vsel %vm534_vm3, %v2433_v49, %v2434_v35  ;;  %v9325_v2 = vsel %vm534_vm3, %v2434_v35, %v2436_v38 }
 0x2e2   : > { %3234 = vst.msk [vmem:[#allocation6 + $0x98] sm:$0xff] %vm2763_vm5, %v3145_v52  ;;  %3787 = vmatprep.mubr.f32.mxu1 %v3479_v42  ;;  %3034 = vrot.lane.b32.xlu0 %v9133_v4, %s7047_s12 }
 0x2e3   : > { %v2680_v12 = vpop.permute.xlu1 %2679  ;;  %v3478_v41 = vld [vmem:[#allocation6 + $0x78] sm:$0xff]  ;;  %3449 = vst.msk [vmem:[#allocation6 + $0x1c0] sm:$0xff] %vm2155_vm1, %v9316_v16  ;;  %3450 = vst.msk [vmem:[#allocation6 + $0x1d8] sm:$0xff] %vm2155_vm1, %v9319_v45 }
 0x2e4   : > { %2985 = vst.msk [vmem:[#allocation6 + $0x1e8] sm:$0xff] %vm2155_vm1, %v9322_v30  ;;  %2986 = vst.msk [vmem:[#allocation6 + $0x200] sm:$0xff] %vm2155_vm1, %v9325_v2  ;;  %3788 = vmatmul.mubr.f32.gmra.mrb[10].mxu1 %v3478_v41  ;;  %v3279_v48 = vpop.permute.xlu0 %3278 }
 0x2e5   : > { %2770 = vst.msk [vmem:[#allocation6 + $0x90] sm:$0xff] %vm2763_vm5, %v2680_v12  ;;  %2490 = vrot.lane.b32.xlu1 %v9050_v43, %s7047_s12 }
 0x2e6   : > { %3368 = vst.msk [vmem:[#allocation6 + $0x98] sm:$0xff] %vm2894_vm6, %v3279_v48  ;;  %3164 = vrot.lane.b32.xlu0 %v9211_v59, %s7048_s9 }
 0x2e7   : > { %v2811_v11 = vpop.permute.xlu1 %2810 }
 0x2e8   : > { %2901 = vst.msk [vmem:[#allocation6 + $0x90] sm:$0xff] %vm2894_vm6, %v2811_v11  ;;  %v3017_v33 = vpop.permute.xlu0 %3016 }
 0x2e9   : > { %2699 = vrot.lane.b32.xlu1 %v9044_v36, %s7048_s9  ;;  %3105 = vst.msk [vmem:[#allocation6 + $0xb0] sm:$0xff] %vm2554_vm0, %v3017_v33 }
 0x2ea   : > { %v3519_v5 = vld [vmem:[#allocation6 + $0x1c0] sm:$0xff]  ;;  %v3522_v23 = vld [vmem:[#allocation6 + $0x1d8] sm:$0xff]  ;;  %3298 = vrot.lane.b32.xlu0 %v9236_v50, %s7049_s29 }
 0x2eb   : > { %v2473_v43 = vpop.permute.xlu1 %2472  ;;  %6627 = vmatprep.mubr.msk.f32.mxu0 %vm2155_vm1, %v3519_v5 }
 0x2ec   : > { %2562 = vst.msk [vmem:[#allocation6 + $0xa8] sm:$0xff] %vm2554_vm0, %v2473_v43  ;;  %6628 = vmatmul.mubr.msk.f32.gmra.mrb[50].mxu0 %vm2155_vm1, %v3522_v23  ;;  %v3147_v36 = vpop.permute.xlu0 %3146 }
 0x2ed   : > { %2830 = vrot.lane.b32.xlu1 %v9112_v20, %s7049_s29  ;;  %v3482_v37 = vld [vmem:[#allocation6 + $0x98] sm:$0xff]  ;;  %3235 = vst.msk [vmem:[#allocation6 + $0xb0] sm:$0xff] %vm2763_vm5, %v3147_v36 }
 0x2ee   : > { %3792 = vmatprep.mubr.f32.mxu1 %v3482_v37  ;;  %3036 = vrot.lane.b32.xlu0 %v9136_v6, %s7047_s12 }
 0x2ef   : > { %v2682_v54 = vpop.permute.xlu1 %2681  ;;  %v3481_v55 = vld [vmem:[#allocation6 + $0x90] sm:$0xff] }
 0x2f0   : > { %2771 = vst.msk [vmem:[#allocation6 + $0xa8] sm:$0xff] %vm2763_vm5, %v2682_v54  ;;  %3793 = vmatmul.mubr.f32.gmra.mrb[12].mxu1 %v3481_v55  ;;  %v3281_v26 = vpop.permute.xlu0 %3280 }
 0x2f1   : > { %2492 = vrot.lane.b32.xlu1 %v9053_v9, %s7047_s12  ;;  %v6579_v20 = vpop.f32.mrb[22].mxu0  ;;  %3369 = vst.msk [vmem:[#allocation6 + $0xb0] sm:$0xff] %vm2894_vm6, %v3281_v26  ;;  %v9578_v26 = vld [vmem:[#allocation3 + $0x1a0] sm:$0xff] }
 0x2f2   : > { %v2080_v62 = vadd.f32 %v9364_v39, %v6579_v20  ;;  %v2074_v7 = vpop.f32.mrb[23].mxu0  ;;  %3166 = vrot.lane.b32.xlu0 %v9213_v3, %s7048_s9 }
 0x2f3   : > { %v2813_v57 = vpop.permute.xlu1 %2812  ;;  %v2075_v9 = vadd.f32 %v9364_v39, %v2074_v7 }
 0x2f4   : > { %2902 = vst.msk [vmem:[#allocation6 + $0xa8] sm:$0xff] %vm2894_vm6, %v2813_v57  ;;  %v2146_v22 = vmax.f32 %v2080_v62, 0.0  ;;  %v3019_v15 = vpop.permute.xlu0 %3018 }
 0x2f5   : > { %2701 = vrot.lane.b32.xlu1 %v9047_v27, %s7048_s9  ;;  %v2145_v44 = vmax.f32 %v2075_v9, 0.0  ;;  %3106 = vst.msk [vmem:[#allocation6 + $0xc8] sm:$0xff] %vm2554_vm0, %v3019_v15  ;;  %v3395_v9 = vrot.slane %v9578_v26, 2 }
 0x2f6   : > { %2235 = vst.msk [vmem:[#allocation3 + $0x129] sm:$0xff] %vm2155_vm1, %v2146_v22  ;;  %3300 = vrot.lane.b32.xlu0 %v9239_v32, %s7049_s29 }
 0x2f7   : > { %v2475_v13 = vpop.permute.xlu1 %2474  ;;  %2234 = vst.msk [vmem:[#allocation3 + $0x121] sm:$0xff] %vm2155_vm1, %v2145_v44 }
 0x2f8   : > { %2563 = vst.msk [vmem:[#allocation6 + $0xc0] sm:$0xff] %vm2554_vm0, %v2475_v13  ;;  %v3149_v27 = vpop.permute.xlu0 %3148  ;;  %v3485_v56 = vld [vmem:[#allocation6 + $0xb0] sm:$0xff] }
 0x2f9   : > { %2832 = vrot.lane.b32.xlu1 %v9114_v53, %s7049_s29  ;;  %3236 = vst.msk [vmem:[#allocation6 + $0xc8] sm:$0xff] %vm2763_vm5, %v3149_v27  ;;  %3797 = vmatprep.mubr.f32.mxu1 %v3485_v56 }
 0x2fa   : > { %3038 = vrot.lane.b32.xlu0 %v9230_v24, %s7047_s12 }
 0x2fb   : > { %v2684_v58 = vpop.permute.xlu1 %2683  ;;  %v3484_v18 = vld [vmem:[#allocation6 + $0xa8] sm:$0xff] }
 0x2fc   : > { %2772 = vst.msk [vmem:[#allocation6 + $0xc0] sm:$0xff] %vm2763_vm5, %v2684_v58  ;;  %3798 = vmatmul.mubr.f32.gmra.mrb[14].mxu1 %v3484_v18  ;;  %v3283_v29 = vpop.permute.xlu0 %3282 }
 0x2fd   : > { %2494 = vrot.lane.b32.xlu1 %v9139_v10, %s7047_s12  ;;  %v2282_v53 = vld [vmem:[#allocation3 + $0x130] sm:$0x3]  ;;  %3370 = vst.msk [vmem:[#allocation6 + $0xc8] sm:$0xff] %vm2894_vm6, %v3283_v29 }
 0x2fe   : > { %v2650_v34 = vrot.slane %v2282_v53, 2  ;;  %v9388_v46 = vld [vmem:[#allocation3 + $0x120] sm:$0xff]  ;;  %v9390_v60 = vld [vmem:[#allocation3 + $0x128] sm:$0xff]  ;;  %v2441_v47 = vrot.slane %v2282_v53, 1  ;;  %3168 = vrot.lane.b32.xlu0 %v9297_v17, %s7048_s9 }
 0x2ff   : > { %v2815_v14 = vpop.permute.xlu1 %2814  ;;  %2322 = vst.msk [vmem:[#allocation6 + $0x240] sm:$0xff] %vm2155_vm1, %v9388_v46  ;;  %2323 = vst.msk [vmem:[#allocation6 + $0x258] sm:$0xff] %vm2155_vm1, %v9390_v60  ;;  %v2647_v10 = vrot.slane %v9388_v46, 2  ;;  %v2648_v21 = vrot.slane %v9390_v60, 2  ;;  %v2438_v1 = vrot.slane %v9388_v46, 1  ;;  %v2439_v28 = vrot.slane %v9390_v60, 1 }
 0x300   : > { %2903 = vst.msk [vmem:[#allocation6 + $0xc0] sm:$0xff] %vm2894_vm6, %v2815_v14  ;;  %v3021_v25 = vpop.permute.xlu0 %3020 }
 0x301   : > { %2703 = vrot.lane.b32.xlu1 %v9133_v4, %s7048_s9  ;;  %v9407_v40 = vsel %vm744_vm2, %v2647_v10, %v2648_v21  ;;  %v9410_v38 = vsel %vm744_vm2, %v2648_v21, %v2650_v34  ;;  %v9413_v4 = vsel %vm534_vm3, %v2438_v1, %v2439_v28  ;;  %v9416_v31 = vsel %vm534_vm3, %v2439_v28, %v2441_v47  ;;  %v9608_v47 = vld [vmem:[#allocation4] sm:$0xff] }
 0x302   : > { %3107 = vst.msk [vmem:[#allocation6 + $0xe0] sm:$0xff] %vm2554_vm0, %v3021_v25  ;;  %3302 = vrot.lane.b32.xlu0 %v9322_v30, %s7049_s29 }
 0x303   : > { %v2477_v51 = vpop.permute.xlu1 %2476  ;;  %3451 = vst.msk [vmem:[#allocation6 + $0x1f0] sm:$0xff] %vm2155_vm1, %v9407_v40  ;;  %3452 = vst.msk [vmem:[#allocation6 + $0x208] sm:$0xff] %vm2155_vm1, %v9410_v38 }
 0x304   : > { %2987 = vst.msk [vmem:[#allocation6 + $0x218] sm:$0xff] %vm2155_vm1, %v9413_v4  ;;  %2988 = vst.msk [vmem:[#allocation6 + $0x230] sm:$0xff] %vm2155_vm1, %v9416_v31  ;;  %v3151_v49 = vpop.permute.xlu0 %3150  ;;  %v3488_v35 = vld [vmem:[#allocation6 + $0xc8] sm:$0xff] }
 0x305   : > { %2564 = vst.msk [vmem:[#allocation6 + $0xd8] sm:$0xff] %vm2554_vm0, %v2477_v51  ;;  %2834 = vrot.lane.b32.xlu1 %v9211_v59, %s7049_s29  ;;  %3802 = vmatprep.mubr.f32.mxu1 %v3488_v35 }
 0x306   : > { %3237 = vst.msk [vmem:[#allocation6 + $0xe0] sm:$0xff] %vm2763_vm5, %v3151_v49  ;;  %3040 = vrot.lane.b32.xlu0 %v9233_v19, %s7047_s12  ;;  %v9642_v49 = vld [vmem:[#allocation3 + $0x1a8] sm:$0x3] }
 0x307   : > { %v2686_v52 = vpop.permute.xlu1 %2685  ;;  %v3487_v42 = vld [vmem:[#allocation6 + $0xc0] sm:$0xff]  ;;  %4323 = vst.msk [vmem:[#allocation7] sm:$0xff] %vm4180_vm7, %v9608_v47 }
 0x308   : > { %2773 = vst.msk [vmem:[#allocation6 + $0xd8] sm:$0xff] %vm2763_vm5, %v2686_v52  ;;  %3803 = vmatmul.mubr.f32.gmra.mrb[16].mxu1 %v3487_v42  ;;  %v3285_v59 = vpop.permute.xlu0 %3284 }
 0x309   : > { %2496 = vrot.lane.b32.xlu1 %v9142_v8, %s7047_s12  ;;  %3371 = vst.msk [vmem:[#allocation6 + $0xe0] sm:$0xff] %vm2894_vm6, %v3285_v59 }
 0x30a   : > { %v3525_v12 = vld [vmem:[#allocation6 + $0x1f0] sm:$0xff]  ;;  %v3528_v41 = vld [vmem:[#allocation6 + $0x208] sm:$0xff]  ;;  %3170 = vrot.lane.b32.xlu0 %v9299_v61, %s7048_s9 }
 0x30b   : > { %v2817_v48 = vpop.permute.xlu1 %2816  ;;  %6630 = vmatprep.mubr.msk.f32.mxu0 %vm2155_vm1, %v3525_v12 }
 0x30c   : > { %2904 = vst.msk [vmem:[#allocation6 + $0xd8] sm:$0xff] %vm2894_vm6, %v2817_v48  ;;  %6631 = vmatmul.mubr.msk.f32.gmra.mrb[52].mxu0 %vm2155_vm1, %v3528_v41  ;;  %v3023_v8 = vpop.permute.xlu0 %3022 }
 0x30d   : > { %2705 = vrot.lane.b32.xlu1 %v9136_v6, %s7048_s9  ;;  %3108 = vst.msk [vmem:[#allocation6 + $0xf8] sm:$0xff] %vm2554_vm0, %v3023_v8 }
 0x30e   : > { %3304 = vrot.lane.b32.xlu0 %v9325_v2, %s7049_s29 }
 0x30f   : > { %v2479_v6 = vpop.permute.xlu1 %2478 }
 0x310   : > { %2565 = vst.msk [vmem:[#allocation6 + $0xf0] sm:$0xff] %vm2554_vm0, %v2479_v6  ;;  %v3491_v33 = vld [vmem:[#allocation6 + $0xe0] sm:$0xff]  ;;  %v3153_v43 = vpop.permute.xlu0 %3152 }
 0x311   : > { %2836 = vrot.lane.b32.xlu1 %v9213_v3, %s7049_s29  ;;  %v6582_v11 = vpop.f32.mrb[24].mxu0  ;;  %3807 = vmatprep.mubr.f32.mxu1 %v3491_v33  ;;  %3238 = vst.msk [vmem:[#allocation6 + $0xf8] sm:$0xff] %vm2763_vm5, %v3153_v43 }
 0x312   : > { %v2090_v5 = vadd.f32 %v9364_v39, %v6582_v11  ;;  %v2084_v36 = vpop.f32.mrb[25].mxu0  ;;  %3042 = vrot.lane.b32.xlu0 %v9316_v16, %s7047_s12 }
 0x313   : > { %v2688_v23 = vpop.permute.xlu1 %2687  ;;  %v3490_v0 = vld [vmem:[#allocation6 + $0xd8] sm:$0xff]  ;;  %v2085_v37 = vadd.f32 %v9364_v39, %v2084_v36 }
 0x314   : > { %2774 = vst.msk [vmem:[#allocation6 + $0xf0] sm:$0xff] %vm2763_vm5, %v2688_v23  ;;  %3808 = vmatmul.mubr.f32.gmra.mrb[18].mxu1 %v3490_v0  ;;  %v2148_v3 = vmax.f32 %v2090_v5, 0.0  ;;  %v3287_v20 = vpop.permute.xlu0 %3286 }
 0x315   : > { %2498 = vrot.lane.b32.xlu1 %v9236_v50, %s7047_s12  ;;  %v2147_v54 = vmax.f32 %v2085_v37, 0.0  ;;  %3372 = vst.msk [vmem:[#allocation6 + $0xf8] sm:$0xff] %vm2894_vm6, %v3287_v20  ;;  %v9576_v50 = vld [vmem:[#allocation3 + $0x198] sm:$0xff] }
 0x316   : > { %2237 = vst.msk [vmem:[#allocation3 + $0x141] sm:$0xff] %vm2155_vm1, %v2148_v3  ;;  %3172 = vrot.lane.b32.xlu0 %v9388_v46, %s7048_s9  ;;  %v3394_v7 = vrot.slane %v9576_v50, 2 }
 0x317   : > { %v2819_v55 = vpop.permute.xlu1 %2818  ;;  %2236 = vst.msk [vmem:[#allocation3 + $0x139] sm:$0xff] %vm2155_vm1, %v2147_v54 }
 0x318   : > { %2905 = vst.msk [vmem:[#allocation6 + $0xf0] sm:$0xff] %vm2894_vm6, %v2819_v55  ;;  %v3025_v57 = vpop.permute.xlu0 %3024 }
 0x319   : > { %2707 = vrot.lane.b32.xlu1 %v9230_v24, %s7048_s9  ;;  %3109 = vst.msk [vmem:[#allocation6 + $0x110] sm:$0xff] %vm2554_vm0, %v3025_v57  ;;  %v3396_v24 = vsel %vm744_vm2, %v3394_v7, %v3395_v9 }
 0x31a   : > { %3306 = vrot.lane.b32.xlu0 %v9413_v4, %s7049_s29  ;;  %3461 = vst.msk [vmem:[#allocation6 + $0x2e0] sm:$0xff] %vm2155_vm1, %v3396_v24 }
 0x31b   : > { %v2481_v62 = vpop.permute.xlu1 %2480 }
 0x31c   : > { %2566 = vst.msk [vmem:[#allocation6 + $0x108] sm:$0xff] %vm2554_vm0, %v2481_v62  ;;  %v3155_v13 = vpop.permute.xlu0 %3154  ;;  %v3494_v27 = vld [vmem:[#allocation6 + $0xf8] sm:$0xff] }
 0x31d   : > { %2838 = vrot.lane.b32.xlu1 %v9297_v17, %s7049_s29  ;;  %v2285_v22 = vld [vmem:[#allocation3 + $0x148] sm:$0x3]  ;;  %3239 = vst.msk [vmem:[#allocation6 + $0x110] sm:$0xff] %vm2763_vm5, %v3155_v13  ;;  %3812 = vmatprep.mubr.f32.mxu1 %v3494_v27 }
 0x31e   : > { %v2655_v44 = vrot.slane %v2285_v22, 2  ;;  %v2446_v58 = vrot.slane %v2285_v22, 1  ;;  %v9590_v18 = vld [vmem:[#allocation3 + $0x138] sm:$0xff]  ;;  %v9592_v53 = vld [vmem:[#allocation3 + $0x140] sm:$0xff]  ;;  %3044 = vrot.lane.b32.xlu0 %v9319_v45, %s7047_s12 }
 0x31f   : > { %v2690_v15 = vpop.permute.xlu1 %2689  ;;  %v3493_v56 = vld [vmem:[#allocation6 + $0xf0] sm:$0xff]  ;;  %2324 = vst.msk [vmem:[#allocation6 + $0x270] sm:$0xff] %vm2155_vm1, %v9590_v18  ;;  %2325 = vst.msk [vmem:[#allocation6 + $0x288] sm:$0xff] %vm2155_vm1, %v9592_v53  ;;  %v2652_v17 = vrot.slane %v9590_v18, 2  ;;  %v2653_v29 = vrot.slane %v9592_v53, 2  ;;  %v2443_v34 = vrot.slane %v9590_v18, 1 }
 0x320   : > { %2775 = vst.msk [vmem:[#allocation6 + $0x108] sm:$0xff] %vm2763_vm5, %v2690_v15  ;;  %3813 = vmatmul.mubr.f32.gmra.mrb[20].mxu1 %v3493_v56  ;;  %v2444_v14 = vrot.slane %v9592_v53, 1  ;;  %v3289_v21 = vpop.permute.xlu0 %3288 }
 0x321   : > { %2500 = vrot.lane.b32.xlu1 %v9239_v32, %s7047_s12  ;;  %v9610_v32 = vld [vmem:[#allocation4 + $0x8] sm:$0xff]  ;;  %v9613_v1 = vsel %vm744_vm2, %v2652_v17, %v2653_v29  ;;  %v9616_v28 = vsel %vm744_vm2, %v2653_v29, %v2655_v44  ;;  %3373 = vst.msk [vmem:[#allocation6 + $0x110] sm:$0xff] %vm2894_vm6, %v3289_v21 }
 0x322   : > { %v9619_v25 = vsel %vm534_vm3, %v2443_v34, %v2444_v14  ;;  %v9622_v51 = vsel %vm534_vm3, %v2444_v14, %v2446_v58  ;;  %4324 = vst.msk [vmem:[#allocation7 + $0x28] sm:$0xff] %vm4180_vm7, %v9610_v32  ;;  %3174 = vrot.lane.b32.xlu0 %v9390_v60, %s7048_s9 }
 0x323   : > { %v2821_v10 = vpop.permute.xlu1 %2820  ;;  %3453 = vst.msk [vmem:[#allocation6 + $0x220] sm:$0xff] %vm2155_vm1, %v9613_v1  ;;  %3454 = vst.msk [vmem:[#allocation6 + $0x238] sm:$0xff] %vm2155_vm1, %v9616_v28 }
 0x324   : > { %2906 = vst.msk [vmem:[#allocation6 + $0x108] sm:$0xff] %vm2894_vm6, %v2821_v10  ;;  %v3027_v52 = vpop.permute.xlu0 %3026 }
 0x325   : > { %2709 = vrot.lane.b32.xlu1 %v9233_v19, %s7048_s9  ;;  %2989 = vst.msk [vmem:[#allocation6 + $0x248] sm:$0xff] %vm2155_vm1, %v9619_v25  ;;  %2990 = vst.msk [vmem:[#allocation6 + $0x260] sm:$0xff] %vm2155_vm1, %v9622_v51  ;;  %v3397_v19 = vrot.slane %v9642_v49, 2 }
 0x326   : > { %3110 = vst.msk [vmem:[#allocation6 + $0x128] sm:$0xff] %vm2554_vm0, %v3027_v52  ;;  %3308 = vrot.lane.b32.xlu0 %v9416_v31, %s7049_s29 }
 0x327   : > { %v2483_v35 = vpop.permute.xlu1 %2482  ;;  %v3398_v42 = vsel %vm744_vm2, %v3395_v9, %v3397_v19 }
 0x328   : > { %2567 = vst.msk [vmem:[#allocation6 + $0x120] sm:$0xff] %vm2554_vm0, %v2483_v35  ;;  %v3157_v12 = vpop.permute.xlu0 %3156  ;;  %v3497_v41 = vld [vmem:[#allocation6 + $0x110] sm:$0xff] }
 0x329   : > { %2840 = vrot.lane.b32.xlu1 %v9299_v61, %s7049_s29  ;;  %3462 = vst.msk [vmem:[#allocation6 + $0x2f8] sm:$0xff] %vm2155_vm1, %v3398_v42  ;;  %3817 = vmatprep.mubr.f32.mxu1 %v3497_v41 }
 0x32a   : > { %v3531_v48 = vld [vmem:[#allocation6 + $0x220] sm:$0xff]  ;;  %v3534_v6 = vld [vmem:[#allocation6 + $0x238] sm:$0xff]  ;;  %3240 = vst.msk [vmem:[#allocation6 + $0x128] sm:$0xff] %vm2763_vm5, %v3157_v12  ;;  %3046 = vrot.lane.b32.xlu0 %v9407_v40, %s7047_s12 }
 0x32b   : > { %v2692_v59 = vpop.permute.xlu1 %2691  ;;  %6633 = vmatprep.mubr.msk.f32.mxu0 %vm2155_vm1, %v3531_v48  ;;  %v3496_v61 = vld [vmem:[#allocation6 + $0x108] sm:$0xff] }
 0x32c   : > { %2776 = vst.msk [vmem:[#allocation6 + $0x120] sm:$0xff] %vm2763_vm5, %v2692_v59  ;;  %6634 = vmatmul.mubr.msk.f32.gmra.mrb[54].mxu0 %vm2155_vm1, %v3534_v6  ;;  %3818 = vmatmul.mubr.f32.gmra.mrb[22].mxu1 %v3496_v61  ;;  %v3291_v11 = vpop.permute.xlu0 %3290 }
 0x32d   : > { %2502 = vrot.lane.b32.xlu1 %v9322_v30, %s7047_s12  ;;  %3374 = vst.msk [vmem:[#allocation6 + $0x128] sm:$0xff] %vm2894_vm6, %v3291_v11 }
 0x32e   : > { %3176 = vrot.lane.b32.xlu0 %v9590_v18, %s7048_s9 }
 0x32f   : > { %v2823_v8 = vpop.permute.xlu1 %2822 }
 0x330   : > { %2907 = vst.msk [vmem:[#allocation6 + $0x120] sm:$0xff] %vm2894_vm6, %v2823_v8  ;;  %v3029_v23 = vpop.permute.xlu0 %3028 }
 0x331   : > { %2711 = vrot.lane.b32.xlu1 %v9316_v16, %s7048_s9  ;;  %v6585_v33 = vpop.f32.mrb[26].mxu0  ;;  %3111 = vst.msk [vmem:[#allocation6 + $0x140] sm:$0xff] %vm2554_vm0, %v3029_v23 }
 0x332   : > { %v2100_v5 = vadd.f32 %v9364_v39, %v6585_v33  ;;  %v2094_v43 = vpop.f32.mrb[27].mxu0  ;;  %3310 = vrot.lane.b32.xlu0 %v9619_v25, %s7049_s29 }
 0x333   : > { %v2485_v30 = vpop.permute.xlu1 %2484  ;;  %v2095_v36 = vadd.f32 %v9364_v39, %v2094_v43 }
 0x334   : > { %2568 = vst.msk [vmem:[#allocation6 + $0x138] sm:$0xff] %vm2554_vm0, %v2485_v30  ;;  %v2150_v0 = vmax.f32 %v2100_v5, 0.0  ;;  %v3159_v37 = vpop.permute.xlu0 %3158  ;;  %v3500_v54 = vld [vmem:[#allocation6 + $0x128] sm:$0xff] }
 0x335   : > { %2842 = vrot.lane.b32.xlu1 %v9388_v46, %s7049_s29  ;;  %v2149_v16 = vmax.f32 %v2095_v36, 0.0  ;;  %3241 = vst.msk [vmem:[#allocation6 + $0x140] sm:$0xff] %vm2763_vm5, %v3159_v37  ;;  %3822 = vmatprep.mubr.f32.mxu1 %v3500_v54 }
 0x336   : > { %2239 = vst.msk [vmem:[#allocation3 + $0x159] sm:$0xff] %vm2155_vm1, %v2150_v0  ;;  %3048 = vrot.lane.b32.xlu0 %v9410_v38, %s7047_s12 }
 0x337   : > { %v2694_v3 = vpop.permute.xlu1 %2693  ;;  %v3499_v55 = vld [vmem:[#allocation6 + $0x120] sm:$0xff]  ;;  %2238 = vst.msk [vmem:[#allocation3 + $0x151] sm:$0xff] %vm2155_vm1, %v2149_v16 }
 0x338   : > { %2777 = vst.msk [vmem:[#allocation6 + $0x138] sm:$0xff] %vm2763_vm5, %v2694_v3  ;;  %3823 = vmatmul.mubr.f32.gmra.mrb[24].mxu1 %v3499_v55  ;;  %v3293_v20 = vpop.permute.xlu0 %3292 }
 0x339   : > { %2504 = vrot.lane.b32.xlu1 %v9325_v2, %s7047_s12  ;;  %3375 = vst.msk [vmem:[#allocation6 + $0x140] sm:$0xff] %vm2894_vm6, %v3293_v20 }
 0x33a   : > { %3178 = vrot.lane.b32.xlu0 %v9592_v53, %s7048_s9 }
 0x33b   : > { %v2825_v46 = vpop.permute.xlu1 %2824 }
 0x33c   : > { %2908 = vst.msk [vmem:[#allocation6 + $0x138] sm:$0xff] %vm2894_vm6, %v2825_v46  ;;  %v3031_v7 = vpop.permute.xlu0 %3030 }
 0x33d   : > { %2713 = vrot.lane.b32.xlu1 %v9319_v45, %s7048_s9  ;;  %v2288_v62 = vld [vmem:[#allocation3 + $0x160] sm:$0x3]  ;;  %3112 = vst.msk [vmem:[#allocation6 + $0x158] sm:$0xff] %vm2554_vm0, %v3031_v7 }
 0x33e   : > { %v2660_v2 = vrot.slane %v2288_v62, 2  ;;  %v2451_v9 = vrot.slane %v2288_v62, 1  ;;  %v9691_v24 = vld [vmem:[#allocation3 + $0x150] sm:$0xff]  ;;  %v9693_v22 = vld [vmem:[#allocation3 + $0x158] sm:$0xff]  ;;  %3312 = vrot.lane.b32.xlu0 %v9622_v51, %s7049_s29 }
 0x33f   : > { %v2487_v57 = vpop.permute.xlu1 %2486  ;;  %v2657_v45 = vrot.slane %v9691_v24, 2  ;;  %v2658_v44 = vrot.slane %v9693_v22, 2  ;;  %2326 = vst.msk [vmem:[#allocation6 + $0x2a0] sm:$0xff] %vm2155_vm1, %v9691_v24  ;;  %2327 = vst.msk [vmem:[#allocation6 + $0x2b8] sm:$0xff] %vm2155_vm1, %v9693_v22  ;;  %v2448_v15 = vrot.slane %v9691_v24, 1  ;;  %v2449_v13 = vrot.slane %v9693_v22, 1 }
 0x340   : > { %2569 = vst.msk [vmem:[#allocation6 + $0x150] sm:$0xff] %vm2554_vm0, %v2487_v57  ;;  %v3161_v56 = vpop.permute.xlu0 %3160 }
 0x341   : > { %2844 = vrot.lane.b32.xlu1 %v9390_v60, %s7049_s29  ;;  %v3503_v60 = vld [vmem:[#allocation6 + $0x140] sm:$0xff]  ;;  %v9708_v17 = vsel %vm744_vm2, %v2657_v45, %v2658_v44  ;;  %v9711_v29 = vsel %vm744_vm2, %v2658_v44, %v2660_v2  ;;  %v9714_v34 = vsel %vm534_vm3, %v2448_v15, %v2449_v13  ;;  %v9717_v14 = vsel %vm534_vm3, %v2449_v13, %v2451_v9  ;;  %v5374_v45 = vld [vmem:[%s11386_s5] sm:$0xff]  ;;  %v5375_v44 = vld [vmem:[%s11386_s5 + $0x8] sm:$0xff] }
 0x342   : > { %3242 = vst.msk [vmem:[#allocation6 + $0x158] sm:$0xff] %vm2763_vm5, %v3161_v56  ;;  %3827 = vmatprep.mubr.f32.mxu1 %v3503_v60  ;;  %3050 = vrot.lane.b32.xlu0 %v9613_v1, %s7047_s12  ;;  %v6779_v15 = vpack.c.bf16 %v5375_v44, %v5374_v45 }
 0x343   : > { %v2696_v27 = vpop.permute.xlu1 %2695  ;;  %v3502_v58 = vld [vmem:[#allocation6 + $0x138] sm:$0xff]  ;;  %3455 = vst.msk [vmem:[#allocation6 + $0x250] sm:$0xff] %vm2155_vm1, %v9708_v17  ;;  %3456 = vst.msk [vmem:[#allocation6 + $0x268] sm:$0xff] %vm2155_vm1, %v9711_v29 }
 0x344   : > { %2778 = vst.msk [vmem:[#allocation6 + $0x150] sm:$0xff] %vm2763_vm5, %v2696_v27  ;;  %3828 = vmatmul.mubr.f32.gmra.mrb[26].mxu1 %v3502_v58  ;;  %v3295_v21 = vpop.permute.xlu0 %3294  ;;  %6780 = vmatpush1.bf16.msra.mxu0 %v6779_v15  ;;  %v5377_v58 = vld [vmem:[%s11386_s5 + $0x18] sm:$0xff] }
 0x345   : > { %2991 = vst.msk [vmem:[#allocation6 + $0x278] sm:$0xff] %vm2155_vm1, %v9714_v34  ;;  %2992 = vst.msk [vmem:[#allocation6 + $0x290] sm:$0xff] %vm2155_vm1, %v9717_v14  ;;  %2506 = vrot.lane.b32.xlu1 %v9413_v4, %s7047_s12  ;;  %6781 = vmatprep.subr.bf16.mxu0 %v7046_v63 }
 0x346   : > { %3376 = vst.msk [vmem:[#allocation6 + $0x158] sm:$0xff] %vm2894_vm6, %v3295_v21  ;;  %3180 = vrot.lane.b32.xlu0 %v9691_v24, %s7048_s9 }
 0x347   : > { %v2827_v10 = vpop.permute.xlu1 %2826 }
 0x348   : > { %2909 = vst.msk [vmem:[#allocation6 + $0x150] sm:$0xff] %vm2894_vm6, %v2827_v10  ;;  %v3033_v52 = vpop.permute.xlu0 %3032 }
 0x349   : > { %2715 = vrot.lane.b32.xlu1 %v9407_v40, %s7048_s9  ;;  %3113 = vst.msk [vmem:[#allocation6 + $0x170] sm:$0xff] %vm2554_vm0, %v3033_v52 }
 0x34a   : > { %v3537_v19 = vld [vmem:[#allocation6 + $0x250] sm:$0xff]  ;;  %v3540_v4 = vld [vmem:[#allocation6 + $0x268] sm:$0xff]  ;;  %3314 = vrot.lane.b32.xlu0 %v9714_v34, %s7049_s29 }
 0x34b   : > { %v2489_v35 = vpop.permute.xlu1 %2488  ;;  %6636 = vmatprep.mubr.msk.f32.mxu0 %vm2155_vm1, %v3537_v19 }
 0x34c   : > { %2570 = vst.msk [vmem:[#allocation6 + $0x168] sm:$0xff] %vm2554_vm0, %v2489_v35  ;;  %6637 = vmatmul.mubr.msk.f32.gmra.mrb[56].mxu0 %vm2155_vm1, %v3540_v4  ;;  %v3163_v42 = vpop.permute.xlu0 %3162  ;;  %v5379_v4 = vld [vmem:[%s11386_s5 + $0x28] sm:$0xff] }
 0x34d   : > { %2846 = vrot.lane.b32.xlu1 %v9590_v18, %s7049_s29  ;;  %v3506_v59 = vld [vmem:[#allocation6 + $0x158] sm:$0xff]  ;;  %3243 = vst.msk [vmem:[#allocation6 + $0x170] sm:$0xff] %vm2763_vm5, %v3163_v42 }
 0x34e   : > { %3832 = vmatprep.mubr.f32.mxu1 %v3506_v59  ;;  %3052 = vrot.lane.b32.xlu0 %v9616_v28, %s7047_s12 }
 0x34f   : > { %v2698_v40 = vpop.permute.xlu1 %2697  ;;  %v3505_v12 = vld [vmem:[#allocation6 + $0x150] sm:$0xff] }
 0x350   : > { %2779 = vst.msk [vmem:[#allocation6 + $0x168] sm:$0xff] %vm2763_vm5, %v2698_v40  ;;  %3833 = vmatmul.mubr.f32.gmra.mrb[28].mxu1 %v3505_v12  ;;  %v3297_v6 = vpop.permute.xlu0 %3296 }
 0x351   : > { %2508 = vrot.lane.b32.xlu1 %v9416_v31, %s7047_s12  ;;  %v6588_v18 = vpop.f32.mrb[28].mxu0  ;;  %3377 = vst.msk [vmem:[#allocation6 + $0x170] sm:$0xff] %vm2894_vm6, %v3297_v6 }
 0x352   : > { %v2110_v41 = vadd.f32 %v9364_v39, %v6588_v18  ;;  %v2104_v61 = vpop.f32.mrb[29].mxu0  ;;  %3182 = vrot.lane.b32.xlu0 %v9693_v22, %s7048_s9 }
 0x353   : > { %v2829_v48 = vpop.permute.xlu1 %2828  ;;  %v2105_v11 = vadd.f32 %v9364_v39, %v2104_v61 }
 0x354   : > { %2910 = vst.msk [vmem:[#allocation6 + $0x168] sm:$0xff] %vm2894_vm6, %v2829_v48  ;;  %v2152_v8 = vmax.f32 %v2110_v41, 0.0  ;;  %v3035_v5 = vpop.permute.xlu0 %3034  ;;  %v5380_v41 = vld [vmem:[%s11386_s5 + $0x30] sm:$0xff]  ;;  %v5381_v48 = vld [vmem:[%s11386_s5 + $0x38] sm:$0xff] }
 0x355   : > { %2717 = vrot.lane.b32.xlu1 %v9410_v38, %s7048_s9  ;;  %v2151_v31 = vmax.f32 %v2105_v11, 0.0  ;;  %3114 = vst.msk [vmem:[#allocation6 + $0x188] sm:$0xff] %vm2554_vm0, %v3035_v5  ;;  %v6788_v61 = vpack.c.bf16 %v5381_v48, %v5380_v41 }
 0x356   : > { %2241 = vst.msk [vmem:[#allocation3 + $0x171] sm:$0xff] %vm2155_vm1, %v2152_v8  ;;  %3316 = vrot.lane.b32.xlu0 %v9717_v14, %s7049_s29 }
 0x357   : > { %v2491_v33 = vpop.permute.xlu1 %2490  ;;  %2240 = vst.msk [vmem:[#allocation3 + $0x169] sm:$0xff] %vm2155_vm1, %v2151_v31 }
 0x358   : > { %2571 = vst.msk [vmem:[#allocation6 + $0x180] sm:$0xff] %vm2554_vm0, %v2491_v33  ;;  %v3165_v30 = vpop.permute.xlu0 %3164  ;;  %v3509_v23 = vld [vmem:[#allocation6 + $0x170] sm:$0xff] }
 0x359   : > { %2848 = vrot.lane.b32.xlu1 %v9592_v53, %s7049_s29  ;;  %3244 = vst.msk [vmem:[#allocation6 + $0x188] sm:$0xff] %vm2763_vm5, %v3165_v30  ;;  %3837 = vmatprep.mubr.f32.mxu1 %v3509_v23  ;;  %v5382_v30 = vld [vmem:[%s11386_s5 + $0x40] sm:$0xff]  ;;  %v5383_v23 = vld [vmem:[%s11386_s5 + $0x48] sm:$0xff] }
 0x35a   : > { %3054 = vrot.lane.b32.xlu0 %v9708_v17, %s7047_s12 }
 0x35b   : > { %v2700_v38 = vpop.permute.xlu1 %2699  ;;  %v3508_v43 = vld [vmem:[#allocation6 + $0x168] sm:$0xff] }
 0x35c   : > { %2780 = vst.msk [vmem:[#allocation6 + $0x180] sm:$0xff] %vm2763_vm5, %v2700_v38  ;;  %3838 = vmatmul.mubr.f32.gmra.mrb[30].mxu1 %v3508_v43  ;;  %v3299_v36 = vpop.permute.xlu0 %3298  ;;  %v6791_v43 = vpack.c.bf16 %v5383_v23, %v5382_v30 }
 0x35d   : > { %2510 = vrot.lane.b32.xlu1 %v9619_v25, %s7047_s12  ;;  %v2291_v53 = vld [vmem:[#allocation3 + $0x178] sm:$0x3]  ;;  %3378 = vst.msk [vmem:[#allocation6 + $0x188] sm:$0xff] %vm2894_vm6, %v3299_v36 }
 0x35e   : > { %v2665_v16 = vrot.slane %v2291_v53, 2  ;;  %v2456_v3 = vrot.slane %v2291_v53, 1  ;;  %v9777_v37 = vld [vmem:[#allocation3 + $0x168] sm:$0xff]  ;;  %v9779_v54 = vld [vmem:[#allocation3 + $0x170] sm:$0xff] }
 0x35f   : > { %v2831_v0 = vpop.permute.xlu1 %2830  ;;  %v2662_v25 = vrot.slane %v9777_v37, 2  ;;  %2328 = vst.msk [vmem:[#allocation6 + $0x2d0] sm:$0xff] %vm2155_vm1, %v9777_v37  ;;  %v2453_v55 = vrot.slane %v9777_v37, 1  ;;  %v2454_v46 = vrot.slane %v9779_v54, 1  ;;  %v2663_v20 = vrot.slane %v9779_v54, 2  ;;  %2329 = vst.msk [vmem:[#allocation6 + $0x2e8] sm:$0xff] %vm2155_vm1, %v9779_v54  ;;  %3184 = vrot.lane.b32.xlu0 %v9777_v37, %s7048_s9 }
 0x360   : > { %2911 = vst.msk [vmem:[#allocation6 + $0x180] sm:$0xff] %vm2894_vm6, %v2831_v0  ;;  %v3037_v57 = vpop.permute.xlu0 %3036 }
 0x361   : > { %2719 = vrot.lane.b32.xlu1 %v9613_v1, %s7048_s9  ;;  %v9794_v1 = vsel %vm534_vm3, %v2453_v55, %v2454_v46  ;;  %v9797_v7 = vsel %vm744_vm2, %v2662_v25, %v2663_v20  ;;  %v9800_v2 = vsel %vm744_vm2, %v2663_v20, %v2665_v16  ;;  %v9803_v9 = vsel %vm534_vm3, %v2454_v46, %v2456_v3  ;;  %v5384_v16 = vld [vmem:[%s11386_s5 + $0x50] sm:$0xff]  ;;  %v5385_v3 = vld [vmem:[%s11386_s5 + $0x58] sm:$0xff]  ;;  %v9903_v25 = vld [vmem:[%s11385_s4] ss:$0 sm:$0xff] }
 0x362   : > { %3115 = vst.msk [vmem:[#allocation6 + $0x1a0] sm:$0xff] %vm2554_vm0, %v3037_v57  ;;  %v6794_v55 = vpack.c.bf16 %v5385_v3, %v5384_v16 }
 0x363   : > { %v2493_v62 = vpop.permute.xlu1 %2492  ;;  %3457 = vst.msk [vmem:[#allocation6 + $0x280] sm:$0xff] %vm2155_vm1, %v9797_v7  ;;  %3458 = vst.msk [vmem:[#allocation6 + $0x298] sm:$0xff] %vm2155_vm1, %v9800_v2  ;;  %3318 = vrot.lane.b32.xlu0 %v9794_v1, %s7049_s29 }
 0x364   : > { %2572 = vst.msk [vmem:[#allocation6 + $0x198] sm:$0xff] %vm2554_vm0, %v2493_v62  ;;  %v3167_v27 = vpop.permute.xlu0 %3166  ;;  %v3512_v56 = vld [vmem:[#allocation6 + $0x188] sm:$0xff] }
 0x365   : > { %2993 = vst.msk [vmem:[#allocation6 + $0x2a8] sm:$0xff] %vm2155_vm1, %v9794_v1  ;;  %2994 = vst.msk [vmem:[#allocation6 + $0x2c0] sm:$0xff] %vm2155_vm1, %v9803_v9  ;;  %2850 = vrot.lane.b32.xlu1 %v9691_v24, %s7049_s29  ;;  %3842 = vmatprep.mubr.f32.mxu1 %v3512_v56  ;;  %v5376_v24 = vld [vmem:[%s11386_s5 + $0x10] sm:$0xff] }
 0x366   : > { %3245 = vst.msk [vmem:[#allocation6 + $0x1a0] sm:$0xff] %vm2763_vm5, %v3167_v27  ;;  %v6782_v10 = vpack.c.bf16 %v5377_v58, %v5376_v24 }
 0x367   : > { %v2702_v13 = vpop.permute.xlu1 %2701  ;;  %v3511_v60 = vld [vmem:[#allocation6 + $0x180] sm:$0xff]  ;;  %3056 = vrot.lane.b32.xlu0 %v9711_v29, %s7047_s12 }
 0x368   : > { %2781 = vst.msk [vmem:[#allocation6 + $0x198] sm:$0xff] %vm2763_vm5, %v2702_v13  ;;  %3843 = vmatmul.mubr.f32.gmra.mrb[32].mxu1 %v3511_v60  ;;  %v3301_v35 = vpop.permute.xlu0 %3300  ;;  %6783 = vmatpush1.bf16.msra.mxu0 %v6782_v10 }
 0x369   : > { %2512 = vrot.lane.b32.xlu1 %v9622_v51, %s7047_s12  ;;  %3379 = vst.msk [vmem:[#allocation6 + $0x1a0] sm:$0xff] %vm2894_vm6, %v3301_v35  ;;  %v5378_v51 = vld [vmem:[%s11386_s5 + $0x20] sm:$0xff]  ;;  %6784 = vmatprep.subr.bf16.mxu0 %v7046_v63  ;;  %v5387_v35 = vld [vmem:[%s11386_s5 + $0x68] sm:$0xff] }
 0x36a   : > { %v3543_v52 = vld [vmem:[#allocation6 + $0x280] sm:$0xff]  ;;  %v3546_v19 = vld [vmem:[#allocation6 + $0x298] sm:$0xff]  ;;  %v6785_v40 = vpack.c.bf16 %v5379_v4, %v5378_v51 }
 0x36b   : > { %v2833_v21 = vpop.permute.xlu1 %2832  ;;  %6639 = vmatprep.mubr.msk.f32.mxu0 %vm2155_vm1, %v3543_v52  ;;  %3186 = vrot.lane.b32.xlu0 %v9779_v54, %s7048_s9 }
 0x36c   : > { %2912 = vst.msk [vmem:[#allocation6 + $0x198] sm:$0xff] %vm2894_vm6, %v2833_v21  ;;  %6640 = vmatmul.mubr.msk.f32.gmra.mrb[58].mxu0 %vm2155_vm1, %v3546_v19  ;;  %v3039_v59 = vpop.permute.xlu0 %3038  ;;  %v5386_v21 = vld [vmem:[%s11386_s5 + $0x60] sm:$0xff] }
 0x36d   : > { %2721 = vrot.lane.b32.xlu1 %v9616_v28, %s7048_s9  ;;  %3116 = vst.msk [vmem:[#allocation6 + $0x1b8] sm:$0xff] %vm2554_vm0, %v3039_v59  ;;  %6786 = vmatpush1.bf16.msra.mxu0 %v6785_v40 }
 0x36e   : > { %6787 = vmatprep.subr.bf16.mxu0 %v7046_v63 }
 0x36f   : > { %v2495_v42 = vpop.permute.xlu1 %2494  ;;  %v6591_v28 = vpop.f32.mrb[30].mxu0  ;;  %3320 = vrot.lane.b32.xlu0 %v9803_v9, %s7049_s29 }
 0x370   : > { %2573 = vst.msk [vmem:[#allocation6 + $0x1b0] sm:$0xff] %vm2554_vm0, %v2495_v42  ;;  %v2120_v12 = vadd.f32 %v9364_v39, %v6591_v28  ;;  %v2114_v18 = vpop.f32.mrb[31].mxu0  ;;  %v3169_v31 = vpop.permute.xlu0 %3168  ;;  %v6797_v42 = vpack.c.bf16 %v5387_v35, %v5386_v21  ;;  %v5395_v21 = vld [vmem:[%s11386_s5 + $0xa8] sm:$0xff] }
 0x371   : > { %2852 = vrot.lane.b32.xlu1 %v9693_v22, %s7049_s29  ;;  %v2115_v6 = vadd.f32 %v9364_v39, %v2114_v18  ;;  %v3515_v22 = vld [vmem:[#allocation6 + $0x1a0] sm:$0xff]  ;;  %3246 = vst.msk [vmem:[#allocation6 + $0x1b8] sm:$0xff] %vm2763_vm5, %v3169_v31  ;;  %6789 = vmatpush1.bf16.msra.mxu0 %v6788_v61 }
 0x372   : > { %v2154_v8 = vmax.f32 %v2120_v12, 0.0  ;;  %3847 = vmatprep.mubr.f32.mxu1 %v3515_v22  ;;  %6790 = vmatprep.subr.bf16.mxu0 %v7046_v63  ;;  %v5388_v61 = vld [vmem:[%s11386_s5 + $0x70] sm:$0xff] }
 0x373   : > { %v2704_v11 = vpop.permute.xlu1 %2703  ;;  %v3514_v33 = vld [vmem:[#allocation6 + $0x198] sm:$0xff]  ;;  %v2153_v5 = vmax.f32 %v2115_v6, 0.0  ;;  %v9870_v38 = vpop.f32.mrb[32].mxu0  ;;  %3058 = vrot.lane.b32.xlu0 %v9797_v7, %s7047_s12 }
 0x374   : > { %2782 = vst.msk [vmem:[#allocation6 + $0x1b0] sm:$0xff] %vm2763_vm5, %v2704_v11  ;;  %v3989_v39 = vpop.f32.mrb[33].mxu0  ;;  %3848 = vmatmul.mubr.f32.gmra.mrb[34].mxu1 %v3514_v33  ;;  %v3303_v0 = vpop.permute.xlu0 %3302 }
 0x375   : > { %2243 = vst.msk [vmem:[#allocation3 + $0x189] sm:$0xff] %vm2155_vm1, %v2154_v8  ;;  %2514 = vrot.lane.b32.xlu1 %v9714_v34, %s7047_s12  ;;  %2242 = vst.msk [vmem:[#allocation3 + $0x181] sm:$0xff] %vm2155_vm1, %v2153_v5  ;;  %6792 = vmatpush1.bf16.msra.mxu0 %v6791_v43  ;;  %v5389_v8 = vld [vmem:[%s11386_s5 + $0x78] sm:$0xff]  ;;  %v5390_v5 = vld [vmem:[%s11386_s5 + $0x80] sm:$0xff] }
 0x376   : > { %3380 = vst.msk [vmem:[#allocation6 + $0x1b8] sm:$0xff] %vm2894_vm6, %v3303_v0  ;;  %6793 = vmatprep.subr.bf16.mxu0 %v7046_v63  ;;  %v6800_v11 = vpack.c.bf16 %v5389_v8, %v5388_v61 }
 0x377   : > { %v2835_v53 = vpop.permute.xlu1 %2834  ;;  %v9887_v34 = vpop.f32.mrb[34].mxu0 }
 0x378   : > { %2913 = vst.msk [vmem:[#allocation6 + $0x1b0] sm:$0xff] %vm2894_vm6, %v2835_v53  ;;  %v9889_v36 = vpop.f32.mrb[35].mxu0  ;;  %v3041_v20 = vpop.permute.xlu0 %3040 }
 0x379   : > { %2723 = vrot.lane.b32.xlu1 %v9708_v17, %s7048_s9  ;;  %3117 = vst.msk [vmem:[#allocation6 + $0x1d0] sm:$0xff] %vm2554_vm0, %v3041_v20  ;;  %6795 = vmatpush1.bf16.msra.mxu0 %v6794_v55  ;;  %v5392_v20 = vld [vmem:[%s11386_s5 + $0x90] sm:$0xff] }
 0x37a   : > { %6796 = vmatprep.subr.bf16.mxu0 %v7046_v63 }
 0x37b   : > { %v2497_v46 = vpop.permute.xlu1 %2496  ;;  %v3764_v17 = vpop.f32.mrb[0].mxu1 }
 0x37c   : > { %2574 = vst.msk [vmem:[#allocation6 + $0x1c8] sm:$0xff] %vm2554_vm0, %v2497_v46  ;;  %v9907_v62 = vpop.f32.mrb[36].mxu0  ;;  %v2294_v57 = vld [vmem:[#allocation3 + $0x190] sm:$0x3]  ;;  %v3765_v45 = vadd.f32 %v9903_v25, %v3764_v17  ;;  %v3766_v15 = vpop.f32.mrb[1].mxu1  ;;  %v9914_v13 = vld [vmem:[#allocation3 + $0x180] sm:$0xff] }
 0x37d   : > { %v9910_v44 = vpop.f32.mrb[37].mxu0  ;;  %2854 = vrot.lane.b32.xlu1 %v9777_v37, %s7049_s29  ;;  %v9916_v27 = vld [vmem:[#allocation3 + $0x188] sm:$0xff]  ;;  %v3000_v56 = vrot.slane %v2294_v57, 2  ;;  %v2931_v60 = vrot.slane %v2294_v57, 1  ;;  %v2928_v24 = vrot.slane %v9914_v13, 1  ;;  %v2997_v58 = vrot.slane %v9914_v13, 2  ;;  %3188 = vrot.lane.b32.xlu0 %v9914_v13, %s7048_s9  ;;  %v3171_v51 = vpop.permute.xlu0 %3170 }
 0x37e   : > { %v2998_v10 = vrot.slane %v9916_v27, 2  ;;  %v2929_v37 = vrot.slane %v9916_v27, 1  ;;  %v3990_v52 = vadd.f32 %v3989_v39, %v3765_v45  ;;  %v3518_v4 = vld [vmem:[#allocation6 + $0x1b8] sm:$0xff]  ;;  %3247 = vst.msk [vmem:[#allocation6 + $0x1d0] sm:$0xff] %vm2763_vm5, %v3171_v51  ;;  %6798 = vmatpush1.bf16.msra.mxu0 %v6797_v42  ;;  %v5393_v17 = vld [vmem:[%s11386_s5 + $0x98] sm:$0xff]  ;;  %v3261_v42 = vrot.slane %v9576_v50, 1 }
 0x37f   : > { %v2706_v19 = vpop.permute.xlu1 %2705  ;;  %v3517_v40 = vld [vmem:[#allocation6 + $0x1b0] sm:$0xff]  ;;  %3852 = vmatprep.mubr.f32.mxu1 %v3518_v4  ;;  %v9939_v12 = vpop.f32.mrb[38].mxu0  ;;  %6799 = vmatprep.subr.bf16.mxu0 %v7046_v63  ;;  %v5391_v39 = vld [vmem:[%s11386_s5 + $0x88] sm:$0xff]  ;;  %v5396_v4 = vld [vmem:[%s11386_s5 + $0xb0] sm:$0xff] }
 0x380   : > { %v9932_v59 = vsel %vm744_vm2, %v2997_v58, %v2998_v10  ;;  %v9935_v28 = vsel %vm744_vm2, %v2998_v10, %v3000_v56  ;;  %2783 = vst.msk [vmem:[#allocation6 + $0x1c8] sm:$0xff] %vm2763_vm5, %v2706_v19  ;;  %v2930_v18 = vsel %vm534_vm3, %v2928_v24, %v2929_v37  ;;  %v9943_v41 = vsel %vm534_vm3, %v2929_v37, %v2931_v60  ;;  %v9949_v6 = vpop.f32.mrb[39].mxu0  ;;  %v5394_v37 = vld [vmem:[%s11386_s5 + $0xa0] sm:$0xff] }
 0x381   : > { %v4148_v48 = vmax.f32 %v3990_v52, 0.0  ;;  %3459 = vst.msk [vmem:[#allocation6 + $0x2b0] sm:$0xff] %vm2155_vm1, %v9932_v59  ;;  %3460 = vst.msk [vmem:[#allocation6 + $0x2c8] sm:$0xff] %vm2155_vm1, %v9935_v28  ;;  %2516 = vrot.lane.b32.xlu1 %v9717_v14, %s7047_s12  ;;  %3853 = vmatmul.mubr.f32.gmra.mrb[36].mxu1 %v3517_v40  ;;  %v3305_v31 = vpop.permute.xlu0 %3304  ;;  %v6803_v43 = vpack.c.bf16 %v5391_v39, %v5390_v5  ;;  %v6806_v24 = vpack.c.bf16 %v5393_v17, %v5392_v20  ;;  %v5397_v40 = vld [vmem:[%s11386_s5 + $0xb8] sm:$0xff] }
 0x382   : > { %2995 = vst.msk [vmem:[#allocation6 + $0x2d8] sm:$0xff] %vm2155_vm1, %v2930_v18  ;;  %2996 = vst.msk [vmem:[#allocation6 + $0x2f0] sm:$0xff] %vm2155_vm1, %v9943_v41  ;;  %3322 = vrot.lane.b32.xlu0 %v2930_v18, %s7049_s29  ;;  %6801 = vmatpush1.bf16.msra.mxu0 %v6800_v11  ;;  %v6809_v19 = vpack.c.bf16 %v5395_v21, %v5394_v37  ;;  %v3262_v18 = vrot.slane %v9578_v26, 1  ;;  %v6812_v61 = vpack.c.bf16 %v5397_v40, %v5396_v4  ;;  %v5398_v11 = vld [vmem:[%s11386_s5 + $0xc0] sm:$0xff]  ;;  %v4271_v40 = vld [vmem:[#allocation4 + $0x10] sm:$0x3] }
 0x383   : > { %4237 = vst.msk [vmem:[#allocation4 + $0x19] sm:$0xff] %vm4180_vm7, %v4148_v48  ;;  %v2837_v14 = vpop.permute.xlu1 %2836  ;;  %v9967_v22 = vpop.f32.mrb[40].mxu0  ;;  %6802 = vmatprep.subr.bf16.mxu0 %v7046_v63 }
 0x384   : > { %2914 = vst.msk [vmem:[#allocation6 + $0x1c8] sm:$0xff] %vm2894_vm6, %v2837_v14  ;;  %3381 = vst.msk [vmem:[#allocation6 + $0x1d0] sm:$0xff] %vm2894_vm6, %v3305_v31  ;;  %v9969_v33 = vpop.f32.mrb[41].mxu0  ;;  %v5399_v14 = vld [vmem:[%s11386_s5 + $0xc8] sm:$0xff]  ;;  %v3263_v31 = vsel %vm534_vm3, %v3261_v42, %v3262_v18  ;;  %v5402_v42 = vld [vmem:[%s11386_s5 + $0xe0] sm:$0xff] }
 0x385   : > { %2725 = vrot.lane.b32.xlu1 %v9711_v29, %s7048_s9  ;;  %v3043_v23 = vpop.permute.xlu0 %3042  ;;  %v6815_v20 = vpack.c.bf16 %v5399_v14, %v5398_v11 }
 0x386   : > { %3060 = vrot.lane.b32.xlu0 %v9800_v2, %s7047_s12  ;;  %3118 = vst.msk [vmem:[#allocation6 + $0x1e8] sm:$0xff] %vm2554_vm0, %v3043_v23  ;;  %6804 = vmatpush1.bf16.msra.mxu0 %v6803_v43 }
 0x387   : > { %v2499_v30 = vpop.permute.xlu1 %2498  ;;  %v3769_v29 = vpop.f32.mrb[2].mxu1  ;;  %6805 = vmatprep.subr.bf16.mxu0 %v7046_v63 }
 0x388   : > { %2575 = vst.msk [vmem:[#allocation6 + $0x1e0] sm:$0xff] %vm2554_vm0, %v2499_v30  ;;  %v9984_v53 = vpop.f32.mrb[42].mxu0  ;;  %v3549_v0 = vld [vmem:[#allocation6 + $0x2b0] sm:$0xff]  ;;  %v3552_v16 = vld [vmem:[#allocation6 + $0x2c8] sm:$0xff]  ;;  %v3770_v3 = vadd.f32 %v9903_v25, %v3769_v29  ;;  %v3771_v46 = vpop.f32.mrb[3].mxu1  ;;  %v3555_v30 = vld [vmem:[#allocation6 + $0x2e0] sm:$0xff] }
 0x389   : > { %v9987_v55 = vpop.f32.mrb[43].mxu0  ;;  %6642 = vmatprep.mubr.msk.f32.mxu0 %vm2155_vm1, %v3549_v0  ;;  %2856 = vrot.lane.b32.xlu1 %v9779_v54, %s7049_s29  ;;  %v3173_v54 = vpop.permute.xlu0 %3172  ;;  %v3558_v46 = vld [vmem:[#allocation6 + $0x2f8] sm:$0xff] }
 0x38a   : > { %6643 = vmatmul.mubr.msk.f32.gmra.mrb[60].mxu0 %vm2155_vm1, %v3552_v16  ;;  %3190 = vrot.lane.b32.xlu0 %v9916_v27, %s7048_s9  ;;  %v10001_v57 = vld [vmem:[#allocation4 + $0x18] sm:$0xff]  ;;  %v3995_v45 = vadd.f32 %v9870_v38, %v3770_v3  ;;  %3248 = vst.msk [vmem:[#allocation6 + $0x1e8] sm:$0xff] %vm2763_vm5, %v3173_v54 }
 0x38b   : > { %v2708_v15 = vpop.permute.xlu1 %2707  ;;  %v3521_v56 = vld [vmem:[#allocation6 + $0x1d0] sm:$0xff]  ;;  %v3520_v60 = vld [vmem:[#allocation6 + $0x1c8] sm:$0xff]  ;;  %4325 = vst.msk [vmem:[#allocation7 + $0x50] sm:$0xff] %vm4180_vm7, %v10001_v57  ;;  %v10008_v58 = vpop.f32.mrb[44].mxu0  ;;  %6807 = vmatpush1.bf16.msra.mxu0 %v6806_v24  ;;  %v4408_v5 = vrot.slane %v10001_v57, 1  ;;  %6645 = vmatprep.mubr.msk.f32.mxu0 %vm2155_vm1, %v3555_v30  ;;  %v7025_v30 = vld [vmem:[#allocation3 + $0x1a0] sm:$0xff] }
 0x38c   : > { %2784 = vst.msk [vmem:[#allocation6 + $0x1e0] sm:$0xff] %vm2763_vm5, %v2708_v15  ;;  %3857 = vmatprep.mubr.f32.mxu1 %v3521_v56  ;;  %v4149_v10 = vmax.f32 %v3995_v45, 0.0  ;;  %v10011_v38 = vpop.f32.mrb[45].mxu0  ;;  %6808 = vmatprep.subr.bf16.mxu0 %v7046_v63  ;;  %v5401_v24 = vld [vmem:[%s11386_s5 + $0xd8] sm:$0xff] }
 0x38d   : > { %2518 = vrot.lane.b32.xlu1 %v9794_v1, %s7047_s12  ;;  %3858 = vmatmul.mubr.f32.gmra.mrb[38].mxu1 %v3520_v60  ;;  %v3307_v52 = vpop.permute.xlu0 %3306  ;;  %v5400_v60 = vld [vmem:[%s11386_s5 + $0xd0] sm:$0xff] }
 0x38e   : > { %3324 = vrot.lane.b32.xlu0 %v9943_v41, %s7049_s29  ;;  %4238 = vst.msk [vmem:[#allocation4 + $0x21] sm:$0xff] %vm4180_vm7, %v4149_v10  ;;  %6646 = vmatmul.mubr.msk.f32.gmra.mrb[62].mxu0 %vm2155_vm1, %v3558_v46  ;;  %v4613_v10 = vrot.slane %v9610_v32, 2 }
 0x38f   : > { %v2839_v35 = vpop.permute.xlu1 %2838  ;;  %3382 = vst.msk [vmem:[#allocation6 + $0x1e8] sm:$0xff] %vm2894_vm6, %v3307_v52  ;;  %v10026_v1 = vpop.f32.mrb[46].mxu0  ;;  %6810 = vmatpush1.bf16.msra.mxu0 %v6809_v19  ;;  %v6818_v52 = vpack.c.bf16 %v5401_v24, %v5400_v60 }
 0x390   : > { %2915 = vst.msk [vmem:[#allocation6 + $0x1e0] sm:$0xff] %vm2894_vm6, %v2839_v35  ;;  %v10029_v51 = vpop.f32.mrb[47].mxu0  ;;  %6811 = vmatprep.subr.bf16.mxu0 %v7046_v63 }
 0x391   : > { %2727 = vrot.lane.b32.xlu1 %v9797_v7, %s7048_s9  ;;  %v3045_v48 = vpop.permute.xlu0 %3044 }
 0x392   : > { %3062 = vrot.lane.b32.xlu0 %v9932_v59, %s7047_s12  ;;  %3119 = vst.msk [vmem:[#allocation6 + $0x200] sm:$0xff] %vm2554_vm0, %v3045_v48  ;;  %v4403_v48 = vrot.slane %v9608_v47, 1 }
 0x393   : > { %v2501_v41 = vpop.permute.xlu1 %2500  ;;  %v3774_v7 = vpop.f32.mrb[4].mxu1  ;;  %6813 = vmatpush1.bf16.msra.mxu0 %v6812_v61  ;;  %v4404_v61 = vrot.slane %v9610_v32, 1 }
 0x394   : > { %2576 = vst.msk [vmem:[#allocation6 + $0x1f8] sm:$0xff] %vm2554_vm0, %v2501_v41  ;;  %v3775_v8 = vadd.f32 %v9903_v25, %v3774_v7  ;;  %v3776_v59 = vpop.f32.mrb[5].mxu1  ;;  %6814 = vmatprep.subr.bf16.mxu0 %v7046_v63  ;;  %v5403_v41 = vld [vmem:[%s11386_s5 + $0xe8] sm:$0xff]  ;;  %v4615_v7 = vrot.slane %v4271_v40, 2 }
 0x395   : > { %2858 = vrot.lane.b32.xlu1 %v9914_v13, %s7049_s29  ;;  %v10061_v39 = vld [vmem:[#allocation4 + $0x20] sm:$0xff]  ;;  %v4274_v13 = vld [vmem:[#allocation4 + $0x28] sm:$0x3]  ;;  %v3175_v29 = vpop.permute.xlu0 %3174  ;;  %v3264_v59 = vrot.slane %v9642_v49, 1  ;;  %v6821_v11 = vpack.c.bf16 %v5403_v41, %v5402_v42 }
 0x396   : > { %3192 = vrot.lane.b32.xlu0 %v9576_v50, %s7048_s9  ;;  %v4000_v23 = vadd.f32 %v9889_v36, %v3775_v8  ;;  %v3524_v0 = vld [vmem:[#allocation6 + $0x1e8] sm:$0xff]  ;;  %v4409_v3 = vrot.slane %v10061_v39, 1  ;;  %4326 = vst.msk [vmem:[#allocation7 + $0x78] sm:$0xff] %vm4180_vm7, %v10061_v39  ;;  %v4411_v50 = vrot.slane %v4274_v13, 1  ;;  %v4617_v36 = vrot.slane %v10001_v57, 2 }
 0x397   : > { %v2710_v43 = vpop.permute.xlu1 %2709  ;;  %v3523_v16 = vld [vmem:[#allocation6 + $0x1e0] sm:$0xff]  ;;  %3249 = vst.msk [vmem:[#allocation6 + $0x200] sm:$0xff] %vm2763_vm5, %v3175_v29  ;;  %3862 = vmatprep.mubr.f32.mxu1 %v3524_v0  ;;  %v4618_v17 = vrot.slane %v10061_v39, 2  ;;  %v4620_v45 = vrot.slane %v4274_v13, 2  ;;  %6816 = vmatpush1.bf16.msra.mxu0 %v6815_v20  ;;  %v5405_v13 = vld [vmem:[%s11386_s5 + $0xf8] sm:$0xff] }
 0x398   : > { %2785 = vst.msk [vmem:[#allocation6 + $0x1f8] sm:$0xff] %vm2763_vm5, %v2710_v43  ;;  %v4150_v15 = vmax.f32 %v4000_v23, 0.0  ;;  %3863 = vmatmul.mubr.f32.gmra.mrb[40].mxu1 %v3523_v16  ;;  %v10076_v54 = vsel %vm534_vm3, %v4408_v5, %v4409_v3  ;;  %v10079_v56 = vsel %vm534_vm3, %v4409_v3, %v4411_v50  ;;  %6817 = vmatprep.subr.bf16.mxu0 %v7046_v63  ;;  %v5404_v5 = vld [vmem:[%s11386_s5 + $0xf0] sm:$0xff]  ;;  %v4406_v43 = vrot.slane %v4271_v40, 1 }
 0x399   : > { %2520 = vrot.lane.b32.xlu1 %v9803_v9, %s7047_s12  ;;  %4924 = vst.msk [vmem:[#allocation7 + $0x10] sm:$0xff] %vm4180_vm7, %v10076_v54  ;;  %4925 = vst.msk [vmem:[#allocation7 + $0x38] sm:$0xff] %vm4180_vm7, %v10079_v56  ;;  %v4612_v9 = vrot.slane %v9608_v47, 2  ;;  %v10096_v37 = vsel %vm744_vm2, %v4617_v36, %v4618_v17  ;;  %v3309_v35 = vpop.permute.xlu0 %3308  ;;  %v10102_v19 = vsel %vm744_vm2, %v4618_v17, %v4620_v45 }
 0x39a   : > { %3326 = vrot.lane.b32.xlu0 %v3263_v31, %s7049_s29  ;;  %4239 = vst.msk [vmem:[#allocation4 + $0x31] sm:$0xff] %vm4180_vm7, %v4150_v15  ;;  %4726 = vst.msk [vmem:[#allocation7 + $0x58] sm:$0xff] %vm4180_vm7, %v10096_v37  ;;  %v4405_v23 = vsel %vm534_vm3, %v4403_v48, %v4404_v61  ;;  %v3265_v50 = vsel %vm534_vm3, %v3262_v18, %v3264_v59  ;;  %v6824_v46 = vpack.c.bf16 %v5405_v13, %v5404_v5 }
 0x39b   : > { %v2841_v21 = vpop.permute.xlu1 %2840  ;;  %3383 = vst.msk [vmem:[#allocation6 + $0x200] sm:$0xff] %vm2894_vm6, %v3309_v35  ;;  %v4614_v4 = vsel %vm744_vm2, %v4612_v9, %v4613_v10  ;;  %6819 = vmatpush1.bf16.msra.mxu0 %v6818_v52  ;;  %v4407_v26 = vsel %vm534_vm3, %v4404_v61, %v4406_v43 }
 0x39c   : > { %2916 = vst.msk [vmem:[#allocation6 + $0x1f8] sm:$0xff] %vm2894_vm6, %v2841_v21  ;;  %6820 = vmatprep.subr.bf16.mxu0 %v7046_v63 }
 0x39d   : > { %4727 = vst.msk [vmem:[#allocation7 + $0x80] sm:$0xff] %vm4180_vm7, %v10102_v19  ;;  %2729 = vrot.lane.b32.xlu1 %v9800_v2, %s7048_s9  ;;  %4724 = vst.msk [vmem:[#allocation7 + $0x8] sm:$0xff] %vm4180_vm7, %v4614_v4  ;;  %v3047_v14 = vpop.permute.xlu0 %3046 }
 0x39e   : > { %3064 = vrot.lane.b32.xlu0 %v9935_v28, %s7047_s12  ;;  %v10123_v8 = vpop.f32.mrb[48].mxu0  ;;  %v4616_v28 = vsel %vm744_vm2, %v4613_v10, %v4615_v7  ;;  %3120 = vst.msk [vmem:[#allocation6 + $0x218] sm:$0xff] %vm2554_vm0, %v3047_v14 }
 0x39f   : > { %v2503_v2 = vpop.permute.xlu1 %2502  ;;  %v3779_v31 = vpop.f32.mrb[6].mxu1  ;;  %4725 = vst.msk [vmem:[#allocation7 + $0x30] sm:$0xff] %vm4180_vm7, %v4616_v28  ;;  %6822 = vmatpush1.bf16.msra.mxu0 %v6821_v11 }
 0x3a0   : > { %2577 = vst.msk [vmem:[#allocation6 + $0x210] sm:$0xff] %vm2554_vm0, %v2503_v2  ;;  %v3780_v47 = vadd.f32 %v9903_v25, %v3779_v31  ;;  %v10131_v32 = vpop.f32.mrb[49].mxu0  ;;  %v3781_v49 = vpop.f32.mrb[7].mxu1  ;;  %6823 = vmatprep.subr.bf16.mxu0 %v7046_v63 }
 0x3a1   : > { %2860 = vrot.lane.b32.xlu1 %v9916_v27, %s7049_s29  ;;  %v4275_v29 = vld [vmem:[#allocation4 + $0x30] sm:$0xff]  ;;  %v3177_v20 = vpop.permute.xlu0 %3176 }
 0x3a2   : > { %3194 = vrot.lane.b32.xlu0 %v7025_v30, %s7048_s9  ;;  %v4005_v27 = vadd.f32 %v9887_v34, %v3780_v47  ;;  %v3527_v16 = vld [vmem:[#allocation6 + $0x200] sm:$0xff]  ;;  %4327 = vst.msk [vmem:[#allocation7 + $0xa0] sm:$0xff] %vm4180_vm7, %v4275_v29  ;;  %5089 = vst.msk [vmem:[#allocation7 + $0x18] sm:$0xff] %vm4180_vm7, %v4275_v29  ;;  %v4622_v35 = vrot.slane %v4275_v29, 2 }
 0x3a3   : > { %v2712_v0 = vpop.permute.xlu1 %2711  ;;  %v3526_v3 = vld [vmem:[#allocation6 + $0x1f8] sm:$0xff]  ;;  %3867 = vmatprep.mubr.f32.mxu1 %v3527_v16  ;;  %3250 = vst.msk [vmem:[#allocation6 + $0x218] sm:$0xff] %vm2763_vm5, %v3177_v20  ;;  %6825 = vmatpush1.bf16.msra.mxu0 %v6824_v46 }
 0x3a4   : > { %2786 = vst.msk [vmem:[#allocation6 + $0x210] sm:$0xff] %vm2763_vm5, %v2712_v0  ;;  %v4151_v34 = vmax.f32 %v4005_v27, 0.0  ;;  %3868 = vmatmul.mubr.f32.gmra.mrb[42].mxu1 %v3526_v3  ;;  %6826 = vmatprep.subr.bf16.mxu0 %v7046_v63 }
 0x3a5   : > { %4483 = vrot.lane.b32.xlu1 %v4405_v23, %s7048_s9  ;;  %v3311_v36 = vpop.permute.xlu0 %3310 }
 0x3a6   : > { %3328 = vrot.lane.b32.xlu0 %v3265_v50, %s7049_s29  ;;  %4240 = vst.msk [vmem:[#allocation4 + $0x39] sm:$0xff] %vm4180_vm7, %v4151_v34 }
 0x3a7   : > { %v2843_v18 = vpop.permute.xlu1 %2842  ;;  %3384 = vst.msk [vmem:[#allocation6 + $0x218] sm:$0xff] %vm2894_vm6, %v3311_v36 }
 0x3a8   : > { %2917 = vst.msk [vmem:[#allocation6 + $0x210] sm:$0xff] %vm2894_vm6, %v2843_v18 }
 0x3a9   : > { %4485 = vrot.lane.b32.xlu1 %v4407_v26, %s7048_s9  ;;  %v3049_v15 = vpop.permute.xlu0 %3048 }
 0x3aa   : > { %4758 = vrot.lane.b32.xlu0 %v10001_v57, %s7048_s9  ;;  %3121 = vst.msk [vmem:[#allocation6 + $0x230] sm:$0xff] %vm2554_vm0, %v3049_v15  ;;  %v4413_v57 = vrot.slane %v4275_v29, 1 }
 0x3ab   : > { %v2505_v17 = vpop.permute.xlu1 %2504  ;;  %v3784_v45 = vpop.f32.mrb[8].mxu1 }
 0x3ac   : > { %2578 = vst.msk [vmem:[#allocation6 + $0x228] sm:$0xff] %vm2554_vm0, %v2505_v17  ;;  %v3785_v60 = vadd.f32 %v9903_v25, %v3784_v45  ;;  %v3786_v24 = vpop.f32.mrb[9].mxu1 }
 0x3ad   : > { %4487 = vrot.lane.b32.xlu1 %v10076_v54, %s7048_s9  ;;  %v4276_v10 = vld [vmem:[#allocation4 + $0x38] sm:$0xff]  ;;  %v4277_v21 = vld [vmem:[#allocation4 + $0x40] sm:$0x3] }
 0x3ae   : > { %v4010_v9 = vadd.f32 %v9910_v44, %v3785_v60  ;;  %4760 = vrot.lane.b32.xlu0 %v10061_v39, %s7048_s9  ;;  %v4414_v40 = vrot.slane %v4276_v10, 1  ;;  %4328 = vst.msk [vmem:[#allocation7 + $0xc8] sm:$0xff] %vm4180_vm7, %v4276_v10  ;;  %5090 = vst.msk [vmem:[#allocation7 + $0x40] sm:$0xff] %vm4180_vm7, %v4276_v10  ;;  %v4416_v42 = vrot.slane %v4277_v21, 1  ;;  %v4625_v41 = vrot.slane %v4277_v21, 2  ;;  %v3179_v44 = vpop.permute.xlu0 %3178  ;;  %v3530_v61 = vld [vmem:[#allocation6 + $0x218] sm:$0xff] }
 0x3af   : > { %v2714_v52 = vpop.permute.xlu1 %2713  ;;  %v3529_v4 = vld [vmem:[#allocation6 + $0x210] sm:$0xff]  ;;  %v4623_v48 = vrot.slane %v4276_v10, 2  ;;  %3251 = vst.msk [vmem:[#allocation6 + $0x230] sm:$0xff] %vm2763_vm5, %v3179_v44  ;;  %3872 = vmatprep.mubr.f32.mxu1 %v3530_v61 }
 0x3b0   : > { %v4152_v54 = vmax.f32 %v4010_v9, 0.0  ;;  %2787 = vst.msk [vmem:[#allocation6 + $0x228] sm:$0xff] %vm2763_vm5, %v2714_v52  ;;  %v4415_v39 = vsel %vm534_vm3, %v4413_v57, %v4414_v40  ;;  %v4417_v7 = vsel %vm534_vm3, %v4414_v40, %v4416_v42  ;;  %3873 = vmatmul.mubr.f32.gmra.mrb[44].mxu1 %v3529_v4 }
 0x3b1   : > { %4489 = vrot.lane.b32.xlu1 %v10079_v56, %s7048_s9  ;;  %v10180_v2 = vsel %vm744_vm2, %v4622_v35, %v4623_v48  ;;  %4926 = vst.msk [vmem:[#allocation7 + $0x60] sm:$0xff] %vm4180_vm7, %v4415_v39  ;;  %4927 = vst.msk [vmem:[#allocation7 + $0x88] sm:$0xff] %vm4180_vm7, %v4417_v7  ;;  %v10191_v56 = vsel %vm744_vm2, %v4623_v48, %v4625_v41 }
 0x3b2   : > { %4241 = vst.msk [vmem:[#allocation4 + $0x49] sm:$0xff] %vm4180_vm7, %v4152_v54  ;;  %4762 = vrot.lane.b32.xlu0 %v4275_v29, %s7048_s9  ;;  %4728 = vst.msk [vmem:[#allocation7 + $0xa8] sm:$0xff] %vm4180_vm7, %v10180_v2  ;;  %v3313_v11 = vpop.permute.xlu0 %3312 }
 0x3b3   : > { %5182 = vst.msk [vmem:[#allocation7 + $0x20] sm:$0xff] %vm4180_vm7, %v10180_v2  ;;  %v2845_v59 = vpop.permute.xlu1 %2844  ;;  %4729 = vst.msk [vmem:[#allocation7 + $0xd0] sm:$0xff] %vm4180_vm7, %v10191_v56 }
 0x3b4   : > { %5183 = vst.msk [vmem:[#allocation7 + $0x48] sm:$0xff] %vm4180_vm7, %v10191_v56 }
 0x3b5   : > { %2918 = vst.msk [vmem:[#allocation6 + $0x228] sm:$0xff] %vm2894_vm6, %v2845_v59  ;;  %3385 = vst.msk [vmem:[#allocation6 + $0x230] sm:$0xff] %vm2894_vm6, %v3313_v11  ;;  %4491 = vrot.lane.b32.xlu1 %v4415_v39, %s7048_s9 }
 0x3b6   : > { %4764 = vrot.lane.b32.xlu0 %v4276_v10, %s7048_s9  ;;  %v3051_v28 = vpop.permute.xlu0 %3050 }
 0x3b7   : > { %v2507_v14 = vpop.permute.xlu1 %2506  ;;  %v3789_v31 = vpop.f32.mrb[10].mxu1  ;;  %3122 = vst.msk [vmem:[#allocation6 + $0x248] sm:$0xff] %vm2554_vm0, %v3051_v28 }
 0x3b8   : > { %2579 = vst.msk [vmem:[#allocation6 + $0x240] sm:$0xff] %vm2554_vm0, %v2507_v14  ;;  %v3790_v47 = vadd.f32 %v9903_v25, %v3789_v31  ;;  %v3791_v49 = vpop.f32.mrb[11].mxu1 }
 0x3b9   : > { %4493 = vrot.lane.b32.xlu1 %v4417_v7, %s7048_s9  ;;  %v4278_v5 = vld [vmem:[#allocation4 + $0x48] sm:$0xff] }
 0x3ba   : > { %v4015_v13 = vadd.f32 %v9907_v62, %v3790_v47  ;;  %4766 = vrot.lane.b32.xlu0 %v4278_v5, %s7048_s9  ;;  %4329 = vst.msk [vmem:[#allocation7 + $0xf0] sm:$0xff] %vm4180_vm7, %v4278_v5  ;;  %5091 = vst.msk [vmem:[#allocation7 + $0x68] sm:$0xff] %vm4180_vm7, %v4278_v5  ;;  %v3181_v29 = vpop.permute.xlu0 %3180  ;;  %v4418_v36 = vrot.slane %v4278_v5, 1  ;;  %v4627_v21 = vrot.slane %v4278_v5, 2 }
 0x3bb   : > { %v2716_v30 = vpop.permute.xlu1 %2715  ;;  %3252 = vst.msk [vmem:[#allocation6 + $0x248] sm:$0xff] %vm2763_vm5, %v3181_v29 }
 0x3bc   : > { %v3532_v23 = vld [vmem:[#allocation6 + $0x228] sm:$0xff]  ;;  %v4153_v43 = vmax.f32 %v4015_v13, 0.0  ;;  %2788 = vst.msk [vmem:[#allocation6 + $0x240] sm:$0xff] %vm2763_vm5, %v2716_v30  ;;  %v3533_v27 = vld [vmem:[#allocation6 + $0x230] sm:$0xff] }
 0x3bd   : > { %3877 = vmatprep.mubr.f32.mxu1 %v3533_v27 }
 0x3be   : > { %4242 = vst.msk [vmem:[#allocation4 + $0x51] sm:$0xff] %vm4180_vm7, %v4153_v43  ;;  %3878 = vmatmul.mubr.f32.gmra.mrb[46].mxu1 %v3532_v23  ;;  %v3315_v16 = vpop.permute.xlu0 %3314 }
 0x3bf   : > { %v2847_v62 = vpop.permute.xlu1 %2846  ;;  %v10212_v0 = vpop.f32.mrb[50].mxu0  ;;  %3386 = vst.msk [vmem:[#allocation6 + $0x248] sm:$0xff] %vm2894_vm6, %v3315_v16 }
 0x3c0   : > { %2919 = vst.msk [vmem:[#allocation6 + $0x240] sm:$0xff] %vm2894_vm6, %v2847_v62  ;;  %v10215_v3 = vpop.f32.mrb[51].mxu0 }
 0x3c2   : > { %v3053_v20 = vpop.permute.xlu0 %3052 }
 0x3c3   : > { %v2509_v50 = vpop.permute.xlu1 %2508  ;;  %v3794_v46 = vpop.f32.mrb[12].mxu1  ;;  %3123 = vst.msk [vmem:[#allocation6 + $0x260] sm:$0xff] %vm2554_vm0, %v3053_v20 }
 0x3c4   : > { %2580 = vst.msk [vmem:[#allocation6 + $0x258] sm:$0xff] %vm2554_vm0, %v2509_v50  ;;  %v3795_v34 = vadd.f32 %v9903_v25, %v3794_v46  ;;  %v3796_v26 = vpop.f32.mrb[13].mxu1 }
 0x3c5   : > { %v4279_v18 = vld [vmem:[#allocation4 + $0x50] sm:$0xff]  ;;  %v4280_v17 = vld [vmem:[#allocation4 + $0x58] sm:$0x3] }
 0x3c6   : > { %v4020_v45 = vadd.f32 %v9949_v6, %v3795_v34  ;;  %4768 = vrot.lane.b32.xlu0 %v4279_v18, %s7048_s9  ;;  %4330 = vst.msk [vmem:[#allocation7 + $0x118] sm:$0xff] %vm4180_vm7, %v4279_v18  ;;  %5092 = vst.msk [vmem:[#allocation7 + $0x90] sm:$0xff] %vm4180_vm7, %v4279_v18  ;;  %v4419_v15 = vrot.slane %v4279_v18, 1  ;;  %v4421_v60 = vrot.slane %v4280_v17, 1  ;;  %v4630_v24 = vrot.slane %v4280_v17, 2  ;;  %v3183_v52 = vpop.permute.xlu0 %3182  ;;  %v3536_v4 = vld [vmem:[#allocation6 + $0x248] sm:$0xff] }
 0x3c7   : > { %v2718_v9 = vpop.permute.xlu1 %2717  ;;  %v3535_v10 = vld [vmem:[#allocation6 + $0x240] sm:$0xff]  ;;  %v4628_v57 = vrot.slane %v4279_v18, 2  ;;  %3253 = vst.msk [vmem:[#allocation6 + $0x260] sm:$0xff] %vm2763_vm5, %v3183_v52  ;;  %3882 = vmatprep.mubr.f32.mxu1 %v3536_v4 }
 0x3c8   : > { %v4154_v35 = vmax.f32 %v4020_v45, 0.0  ;;  %2789 = vst.msk [vmem:[#allocation6 + $0x258] sm:$0xff] %vm2763_vm5, %v2718_v9  ;;  %v4420_v6 = vsel %vm534_vm3, %v4418_v36, %v4419_v15  ;;  %v4422_v40 = vsel %vm534_vm3, %v4419_v15, %v4421_v60  ;;  %3883 = vmatmul.mubr.f32.gmra.mrb[48].mxu1 %v3535_v10 }
 0x3c9   : > { %4495 = vrot.lane.b32.xlu1 %v4420_v6, %s7048_s9  ;;  %4928 = vst.msk [vmem:[#allocation7 + $0xb0] sm:$0xff] %vm4180_vm7, %v4420_v6  ;;  %4929 = vst.msk [vmem:[#allocation7 + $0xd8] sm:$0xff] %vm4180_vm7, %v4422_v40  ;;  %v10233_v42 = vsel %vm744_vm2, %v4627_v21, %v4628_v57  ;;  %v10236_v41 = vsel %vm744_vm2, %v4628_v57, %v4630_v24 }
 0x3ca   : > { %4243 = vst.msk [vmem:[#allocation4 + $0x61] sm:$0xff] %vm4180_vm7, %v4154_v35  ;;  %4730 = vst.msk [vmem:[#allocation7 + $0xf8] sm:$0xff] %vm4180_vm7, %v10233_v42  ;;  %v3317_v54 = vpop.permute.xlu0 %3316 }
 0x3cb   : > { %5184 = vst.msk [vmem:[#allocation7 + $0x70] sm:$0xff] %vm4180_vm7, %v10233_v42  ;;  %4731 = vst.msk [vmem:[#allocation7 + $0x120] sm:$0xff] %vm4180_vm7, %v10236_v41  ;;  %v2849_v48 = vpop.permute.xlu1 %2848 }
 0x3cc   : > { %5185 = vst.msk [vmem:[#allocation7 + $0x98] sm:$0xff] %vm4180_vm7, %v10236_v41 }
 0x3cd   : > { %2920 = vst.msk [vmem:[#allocation6 + $0x258] sm:$0xff] %vm2894_vm6, %v2849_v48  ;;  %3387 = vst.msk [vmem:[#allocation6 + $0x260] sm:$0xff] %vm2894_vm6, %v3317_v54  ;;  %4497 = vrot.lane.b32.xlu1 %v4422_v40, %s7048_s9 }
 0x3ce   : > { %v3055_v39 = vpop.permute.xlu0 %3054 }
 0x3cf   : > { %v2511_v44 = vpop.permute.xlu1 %2510  ;;  %v3799_v61 = vpop.f32.mrb[14].mxu1  ;;  %3124 = vst.msk [vmem:[#allocation6 + $0x278] sm:$0xff] %vm2554_vm0, %v3055_v39 }
 0x3d0   : > { %2581 = vst.msk [vmem:[#allocation6 + $0x270] sm:$0xff] %vm2554_vm0, %v2511_v44  ;;  %v3800_v7 = vadd.f32 %v9903_v25, %v3799_v61  ;;  %v3801_v59 = vpop.f32.mrb[15].mxu1 }
 0x3d1   : > { %v4281_v11 = vld [vmem:[#allocation4 + $0x60] sm:$0xff] }
 0x3d2   : > { %v4025_v14 = vadd.f32 %v9939_v12, %v3800_v7  ;;  %4770 = vrot.lane.b32.xlu0 %v4281_v11, %s7048_s9  ;;  %4331 = vst.msk [vmem:[#allocation7 + $0x140] sm:$0xff] %vm4180_vm7, %v4281_v11  ;;  %5093 = vst.msk [vmem:[#allocation7 + $0xb8] sm:$0xff] %vm4180_vm7, %v4281_v11  ;;  %v3185_v49 = vpop.permute.xlu0 %3184  ;;  %v4423_v16 = vrot.slane %v4281_v11, 1  ;;  %v4632_v45 = vrot.slane %v4281_v11, 2 }
 0x3d3   : > { %v2720_v31 = vpop.permute.xlu1 %2719  ;;  %3254 = vst.msk [vmem:[#allocation6 + $0x278] sm:$0xff] %vm2763_vm5, %v3185_v49 }
 0x3d4   : > { %v3538_v28 = vld [vmem:[#allocation6 + $0x258] sm:$0xff]  ;;  %v4155_v47 = vmax.f32 %v4025_v14, 0.0  ;;  %2790 = vst.msk [vmem:[#allocation6 + $0x270] sm:$0xff] %vm2763_vm5, %v2720_v31  ;;  %v3539_v5 = vld [vmem:[#allocation6 + $0x260] sm:$0xff] }
 0x3d5   : > { %3887 = vmatprep.mubr.f32.mxu1 %v3539_v5 }
 0x3d6   : > { %4244 = vst.msk [vmem:[#allocation4 + $0x69] sm:$0xff] %vm4180_vm7, %v4155_v47  ;;  %3888 = vmatmul.mubr.f32.gmra.mrb[50].mxu1 %v3538_v28  ;;  %v3319_v13 = vpop.permute.xlu0 %3318 }
 0x3d7   : > { %v2851_v12 = vpop.permute.xlu1 %2850  ;;  %3388 = vst.msk [vmem:[#allocation6 + $0x278] sm:$0xff] %vm2894_vm6, %v3319_v13 }
 0x3d8   : > { %2921 = vst.msk [vmem:[#allocation6 + $0x270] sm:$0xff] %vm2894_vm6, %v2851_v12 }
 0x3da   : > { %v3057_v43 = vpop.permute.xlu0 %3056 }
 0x3db   : > { %v2513_v30 = vpop.permute.xlu1 %2512  ;;  %v3804_v23 = vpop.f32.mrb[16].mxu1  ;;  %3125 = vst.msk [vmem:[#allocation6 + $0x290] sm:$0xff] %vm2554_vm0, %v3057_v43 }
 0x3dc   : > { %2582 = vst.msk [vmem:[#allocation6 + $0x288] sm:$0xff] %vm2554_vm0, %v2513_v30  ;;  %v3805_v29 = vadd.f32 %v9903_v25, %v3804_v23  ;;  %v3806_v27 = vpop.f32.mrb[17].mxu1 }
 0x3dd   : > { %v4282_v62 = vld [vmem:[#allocation4 + $0x68] sm:$0xff]  ;;  %v4283_v50 = vld [vmem:[#allocation4 + $0x70] sm:$0x3] }
 0x3de   : > { %v4030_v46 = vadd.f32 %v9969_v33, %v3805_v29  ;;  %4772 = vrot.lane.b32.xlu0 %v4282_v62, %s7048_s9  ;;  %4332 = vst.msk [vmem:[#allocation7 + $0x168] sm:$0xff] %vm4180_vm7, %v4282_v62  ;;  %5094 = vst.msk [vmem:[#allocation7 + $0xe0] sm:$0xff] %vm4180_vm7, %v4282_v62  ;;  %v4424_v20 = vrot.slane %v4282_v62, 1  ;;  %v4426_v34 = vrot.slane %v4283_v50, 1  ;;  %v4635_v26 = vrot.slane %v4283_v50, 2  ;;  %v3187_v24 = vpop.permute.xlu0 %3186  ;;  %v3542_v33 = vld [vmem:[#allocation6 + $0x278] sm:$0xff] }
 0x3df   : > { %v2722_v18 = vpop.permute.xlu1 %2721  ;;  %v10269_v36 = vpop.f32.mrb[52].mxu0  ;;  %v3541_v17 = vld [vmem:[#allocation6 + $0x270] sm:$0xff]  ;;  %v4633_v15 = vrot.slane %v4282_v62, 2  ;;  %3255 = vst.msk [vmem:[#allocation6 + $0x290] sm:$0xff] %vm2763_vm5, %v3187_v24  ;;  %3892 = vmatprep.mubr.f32.mxu1 %v3542_v33 }
 0x3e0   : > { %v4156_v60 = vmax.f32 %v4030_v46, 0.0  ;;  %2791 = vst.msk [vmem:[#allocation6 + $0x288] sm:$0xff] %vm2763_vm5, %v2722_v18  ;;  %v10272_v9 = vpop.f32.mrb[53].mxu0  ;;  %v4425_v10 = vsel %vm534_vm3, %v4423_v16, %v4424_v20  ;;  %v4427_v57 = vsel %vm534_vm3, %v4424_v20, %v4426_v34  ;;  %3893 = vmatmul.mubr.f32.gmra.mrb[52].mxu1 %v3541_v17 }
 0x3e1   : > { %4499 = vrot.lane.b32.xlu1 %v4425_v10, %s7048_s9  ;;  %4930 = vst.msk [vmem:[#allocation7 + $0x100] sm:$0xff] %vm4180_vm7, %v4425_v10  ;;  %4931 = vst.msk [vmem:[#allocation7 + $0x128] sm:$0xff] %vm4180_vm7, %v4427_v57  ;;  %v10281_v21 = vsel %vm744_vm2, %v4632_v45, %v4633_v15  ;;  %v10284_v35 = vsel %vm744_vm2, %v4633_v15, %v4635_v26 }
 0x3e2   : > { %4245 = vst.msk [vmem:[#allocation4 + $0x79] sm:$0xff] %vm4180_vm7, %v4156_v60  ;;  %4732 = vst.msk [vmem:[#allocation7 + $0x148] sm:$0xff] %vm4180_vm7, %v10281_v21  ;;  %v3321_v4 = vpop.permute.xlu0 %3320 }
 0x3e3   : > { %5186 = vst.msk [vmem:[#allocation7 + $0xc0] sm:$0xff] %vm4180_vm7, %v10281_v21  ;;  %4733 = vst.msk [vmem:[#allocation7 + $0x170] sm:$0xff] %vm4180_vm7, %v10284_v35  ;;  %v2853_v52 = vpop.permute.xlu1 %2852 }
 0x3e4   : > { %5187 = vst.msk [vmem:[#allocation7 + $0xe8] sm:$0xff] %vm4180_vm7, %v10284_v35 }
 0x3e5   : > { %2922 = vst.msk [vmem:[#allocation6 + $0x288] sm:$0xff] %vm2894_vm6, %v2853_v52  ;;  %3389 = vst.msk [vmem:[#allocation6 + $0x290] sm:$0xff] %vm2894_vm6, %v3321_v4  ;;  %4501 = vrot.lane.b32.xlu1 %v4427_v57, %s7048_s9  ;;  %v10350_v4 = vld [vmem:[%s11385_s4] ss:$0 sm:$0xff] }
 0x3e6   : > { %v3059_v48 = vpop.permute.xlu0 %3058 }
 0x3e7   : > { %v2515_v6 = vpop.permute.xlu1 %2514  ;;  %v3809_v40 = vpop.f32.mrb[18].mxu1  ;;  %3126 = vst.msk [vmem:[#allocation6 + $0x2a8] sm:$0xff] %vm2554_vm0, %v3059_v48 }
 0x3e8   : > { %2583 = vst.msk [vmem:[#allocation6 + $0x2a0] sm:$0xff] %vm2554_vm0, %v2515_v6  ;;  %v3810_v54 = vadd.f32 %v9903_v25, %v3809_v40  ;;  %v3811_v44 = vpop.f32.mrb[19].mxu1 }
 0x3e9   : > { %v4284_v61 = vld [vmem:[#allocation4 + $0x78] sm:$0xff] }
 0x3ea   : > { %v4035_v39 = vadd.f32 %v9967_v22, %v3810_v54  ;;  %4774 = vrot.lane.b32.xlu0 %v4284_v61, %s7048_s9  ;;  %4333 = vst.msk [vmem:[#allocation7 + $0x190] sm:$0xff] %vm4180_vm7, %v4284_v61  ;;  %5095 = vst.msk [vmem:[#allocation7 + $0x108] sm:$0xff] %vm4180_vm7, %v4284_v61  ;;  %v4428_v30 = vrot.slane %v4284_v61, 1  ;;  %v4637_v43 = vrot.slane %v4284_v61, 2 }
 0x3eb   : > { %v2724_v7 = vpop.permute.xlu1 %2723 }
 0x3ec   : > { %v3544_v59 = vld [vmem:[#allocation6 + $0x288] sm:$0xff]  ;;  %v4157_v11 = vmax.f32 %v4035_v39, 0.0  ;;  %2792 = vst.msk [vmem:[#allocation6 + $0x2a0] sm:$0xff] %vm2763_vm5, %v2724_v7  ;;  %v3545_v14 = vld [vmem:[#allocation6 + $0x290] sm:$0xff] }
 0x3ed   : > { %3897 = vmatprep.mubr.f32.mxu1 %v3545_v14 }
 0x3ee   : > { %4246 = vst.msk [vmem:[#allocation4 + $0x81] sm:$0xff] %vm4180_vm7, %v4157_v11  ;;  %3898 = vmatmul.mubr.f32.gmra.mrb[54].mxu1 %v3544_v59 }
 0x3ef   : > { %v2855_v31 = vpop.permute.xlu1 %2854  ;;  %v3189_v22 = vpop.permute.xlu0 %3188 }
 0x3f0   : > { %2923 = vst.msk [vmem:[#allocation6 + $0x2a0] sm:$0xff] %vm2894_vm6, %v2855_v31 }
 0x3f1   : > { %3256 = vst.msk [vmem:[#allocation6 + $0x2a8] sm:$0xff] %vm2763_vm5, %v3189_v22 }
 0x3f3   : > { %v2517_v28 = vpop.permute.xlu1 %2516  ;;  %v3814_v49 = vpop.f32.mrb[20].mxu1 }
 0x3f4   : > { %2584 = vst.msk [vmem:[#allocation6 + $0x2b8] sm:$0xff] %vm2554_vm0, %v2517_v28  ;;  %v3323_v47 = vpop.permute.xlu0 %3322  ;;  %v3815_v5 = vadd.f32 %v9903_v25, %v3814_v49  ;;  %v3816_v12 = vpop.f32.mrb[21].mxu1 }
 0x3f5   : > { %3390 = vst.msk [vmem:[#allocation6 + $0x2a8] sm:$0xff] %vm2894_vm6, %v3323_v47  ;;  %v4285_v13 = vld [vmem:[#allocation4 + $0x80] sm:$0xff]  ;;  %v4286_v23 = vld [vmem:[#allocation4 + $0x88] sm:$0x3] }
 0x3f6   : > { %4776 = vrot.lane.b32.xlu0 %v4285_v13, %s7048_s9  ;;  %4334 = vst.msk [vmem:[#allocation7 + $0x1b8] sm:$0xff] %vm4180_vm7, %v4285_v13  ;;  %5096 = vst.msk [vmem:[#allocation7 + $0x130] sm:$0xff] %vm4180_vm7, %v4285_v13  ;;  %v4429_v29 = vrot.slane %v4285_v13, 1  ;;  %v4431_v27 = vrot.slane %v4286_v23, 1  ;;  %v4640_v62 = vrot.slane %v4286_v23, 2  ;;  %v4638_v16 = vrot.slane %v4285_v13, 2 }
 0x3f7   : > { %v4040_v50 = vadd.f32 %v9987_v55, %v3815_v5  ;;  %v2726_v46 = vpop.permute.xlu1 %2725  ;;  %v3547_v60 = vld [vmem:[#allocation6 + $0x2a0] sm:$0xff] }
 0x3f8   : > { %2793 = vst.msk [vmem:[#allocation6 + $0x2b8] sm:$0xff] %vm2763_vm5, %v2726_v46  ;;  %v3061_v25 = vpop.permute.xlu0 %3060  ;;  %v4430_v20 = vsel %vm534_vm3, %v4428_v30, %v4429_v29  ;;  %v4432_v34 = vsel %vm534_vm3, %v4429_v29, %v4431_v27  ;;  %v10320_v26 = vsel %vm744_vm2, %v4637_v43, %v4638_v16  ;;  %v10323_v18 = vsel %vm744_vm2, %v4638_v16, %v4640_v62 }
 0x3f9   : > { %v4158_v17 = vmax.f32 %v4040_v50, 0.0  ;;  %3127 = vst.msk [vmem:[#allocation6 + $0x2c0] sm:$0xff] %vm2554_vm0, %v3061_v25  ;;  %4503 = vrot.lane.b32.xlu1 %v4430_v20, %s7048_s9 }
 0x3fa   : > { %4932 = vst.msk [vmem:[#allocation7 + $0x150] sm:$0xff] %vm4180_vm7, %v4430_v20  ;;  %4933 = vst.msk [vmem:[#allocation7 + $0x178] sm:$0xff] %vm4180_vm7, %v4432_v34 }
 0x3fb   : > { %4734 = vst.msk [vmem:[#allocation7 + $0x198] sm:$0xff] %vm4180_vm7, %v10320_v26  ;;  %5188 = vst.msk [vmem:[#allocation7 + $0x110] sm:$0xff] %vm4180_vm7, %v10320_v26  ;;  %v2857_v55 = vpop.permute.xlu1 %2856 }
 0x3fc   : > { %4735 = vst.msk [vmem:[#allocation7 + $0x1c0] sm:$0xff] %vm4180_vm7, %v10323_v18  ;;  %5189 = vst.msk [vmem:[#allocation7 + $0x138] sm:$0xff] %vm4180_vm7, %v10323_v18  ;;  %v3191_v45 = vpop.permute.xlu0 %3190  ;;  %v3548_v15 = vld [vmem:[#allocation6 + $0x2a8] sm:$0xff] }
 0x3fd   : > { %4247 = vst.msk [vmem:[#allocation4 + $0x91] sm:$0xff] %vm4180_vm7, %v4158_v17  ;;  %3902 = vmatprep.mubr.f32.mxu1 %v3548_v15  ;;  %4505 = vrot.lane.b32.xlu1 %v4432_v34, %s7048_s9  ;;  %v5406_v15 = vld [vmem:[%s11386_s5 + $0x100] sm:$0xff] }
 0x3fe   : > { %2924 = vst.msk [vmem:[#allocation6 + $0x2b8] sm:$0xff] %vm2894_vm6, %v2857_v55  ;;  %3903 = vmatmul.mubr.f32.gmra.mrb[56].mxu1 %v3547_v60  ;;  %v5407_v60 = vld [vmem:[%s11386_s5 + $0x108] sm:$0xff] }
 0x3ff   : > { %3257 = vst.msk [vmem:[#allocation6 + $0x2c0] sm:$0xff] %vm2763_vm5, %v3191_v45  ;;  %v2519_v24 = vpop.permute.xlu1 %2518  ;;  %v10342_v33 = vpop.f32.mrb[54].mxu0 }
 0x400   : > { %2585 = vst.msk [vmem:[#allocation6 + $0x2d0] sm:$0xff] %vm2554_vm0, %v2519_v24  ;;  %v3325_v10 = vpop.permute.xlu0 %3324  ;;  %v3819_v57 = vpop.f32.mrb[22].mxu1 }
 0x401   : > { %3391 = vst.msk [vmem:[#allocation6 + $0x2c0] sm:$0xff] %vm2894_vm6, %v3325_v10  ;;  %v10345_v52 = vpop.f32.mrb[55].mxu0  ;;  %v3820_v6 = vadd.f32 %v10350_v4, %v3819_v57  ;;  %v3821_v40 = vpop.f32.mrb[23].mxu1  ;;  %v10400_v10 = vpack.c.bf16 %v5407_v60, %v5406_v15 }
 0x403   : > { %v2728_v54 = vpop.permute.xlu1 %2727  ;;  %v4045_v44 = vadd.f32 %v9984_v53, %v3820_v6  ;;  %6906 = vmatpush1.bf16.msra.mxu1 %v10400_v10 }
 0x404   : > { %v4287_v48 = vld [vmem:[#allocation4 + $0x90] sm:$0xff]  ;;  %2794 = vst.msk [vmem:[#allocation6 + $0x2d0] sm:$0xff] %vm2763_vm5, %v2728_v54  ;;  %v3063_v61 = vpop.permute.xlu0 %3062  ;;  %6891 = vmatprep.subr.bf16.mxu1 %v7046_v63 }
 0x405   : > { %4778 = vrot.lane.b32.xlu0 %v4287_v48, %s7048_s9  ;;  %4335 = vst.msk [vmem:[#allocation7 + $0x1e0] sm:$0xff] %vm4180_vm7, %v4287_v48  ;;  %5097 = vst.msk [vmem:[#allocation7 + $0x158] sm:$0xff] %vm4180_vm7, %v4287_v48  ;;  %v4159_v39 = vmax.f32 %v4045_v44, 0.0  ;;  %v3550_v14 = vld [vmem:[#allocation6 + $0x2b8] sm:$0xff]  ;;  %v4433_v13 = vrot.slane %v4287_v48, 1  ;;  %v4642_v23 = vrot.slane %v4287_v48, 2 }
 0x406   : > { %3128 = vst.msk [vmem:[#allocation6 + $0x2d8] sm:$0xff] %vm2554_vm0, %v3063_v61  ;;  %v5408_v44 = vld [vmem:[%s11386_s5 + $0x110] sm:$0xff]  ;;  %v5409_v61 = vld [vmem:[%s11386_s5 + $0x118] sm:$0xff] }
 0x407   : > { %v2859_v7 = vpop.permute.xlu1 %2858  ;;  %4248 = vst.msk [vmem:[#allocation4 + $0x99] sm:$0xff] %vm4180_vm7, %v4159_v39 }
 0x408   : > { %2925 = vst.msk [vmem:[#allocation6 + $0x2d0] sm:$0xff] %vm2894_vm6, %v2859_v7  ;;  %v3193_v59 = vpop.permute.xlu0 %3192  ;;  %v3551_v11 = vld [vmem:[#allocation6 + $0x2c0] sm:$0xff] }
 0x409   : > { %3258 = vst.msk [vmem:[#allocation6 + $0x2d8] sm:$0xff] %vm2763_vm5, %v3193_v59  ;;  %3907 = vmatprep.mubr.f32.mxu1 %v3551_v11  ;;  %v10422_v59 = vpack.c.bf16 %v5409_v61, %v5408_v44 }
 0x40a   : > { %3908 = vmatmul.mubr.f32.gmra.mrb[58].mxu1 %v3550_v14 }
 0x40b   : > { %v2521_v31 = vpop.permute.xlu1 %2520  ;;  %v3824_v22 = vpop.f32.mrb[24].mxu1  ;;  %6907 = vmatpush1.bf16.msra.mxu1 %v10422_v59 }
 0x40c   : > { %2586 = vst.msk [vmem:[#allocation6 + $0x2e8] sm:$0xff] %vm2554_vm0, %v2521_v31  ;;  %v3327_v53 = vpop.permute.xlu0 %3326  ;;  %v3825_v28 = vadd.f32 %v10350_v4, %v3824_v22  ;;  %v3826_v47 = vpop.f32.mrb[25].mxu1  ;;  %6892 = vmatprep.subr.bf16.mxu1 %v7046_v63  ;;  %v5411_v31 = vld [vmem:[%s11386_s5 + $0x128] sm:$0xff] }
 0x40d   : > { %3392 = vst.msk [vmem:[#allocation6 + $0x2d8] sm:$0xff] %vm2894_vm6, %v3327_v53 }
 0x40e   : > { %v4050_v49 = vadd.f32 %v10011_v38, %v3825_v28  ;;  %v4288_v12 = vld [vmem:[#allocation4 + $0x98] sm:$0xff]  ;;  %v4289_v30 = vld [vmem:[#allocation4 + $0xa0] sm:$0x3] }
 0x40f   : > { %v2730_v5 = vpop.permute.xlu1 %2729  ;;  %4780 = vrot.lane.b32.xlu0 %v4288_v12, %s7048_s9  ;;  %4336 = vst.msk [vmem:[#allocation7 + $0x208] sm:$0xff] %vm4180_vm7, %v4288_v12  ;;  %5098 = vst.msk [vmem:[#allocation7 + $0x180] sm:$0xff] %vm4180_vm7, %v4288_v12  ;;  %v4434_v29 = vrot.slane %v4288_v12, 1  ;;  %v4436_v27 = vrot.slane %v4289_v30, 1  ;;  %v4645_v62 = vrot.slane %v4289_v30, 2  ;;  %v4643_v16 = vrot.slane %v4288_v12, 2 }
 0x410   : > { %2795 = vst.msk [vmem:[#allocation6 + $0x2e8] sm:$0xff] %vm2763_vm5, %v2730_v5  ;;  %v3065_v43 = vpop.permute.xlu0 %3064  ;;  %v4160_v50 = vmax.f32 %v4050_v49, 0.0  ;;  %v3553_v45 = vld [vmem:[#allocation6 + $0x2d0] sm:$0xff]  ;;  %v5413_v30 = vld [vmem:[%s11386_s5 + $0x138] sm:$0xff] }
 0x411   : > { %3129 = vst.msk [vmem:[#allocation6 + $0x2f0] sm:$0xff] %vm2554_vm0, %v3065_v43  ;;  %v4435_v38 = vsel %vm534_vm3, %v4433_v13, %v4434_v29  ;;  %v4437_v46 = vsel %vm534_vm3, %v4434_v29, %v4436_v27  ;;  %v10374_v25 = vsel %vm744_vm2, %v4642_v23, %v4643_v16  ;;  %v10377_v20 = vsel %vm744_vm2, %v4643_v16, %v4645_v62  ;;  %v5412_v13 = vld [vmem:[%s11386_s5 + $0x130] sm:$0xff] }
 0x412   : > { %4249 = vst.msk [vmem:[#allocation4 + $0xa9] sm:$0xff] %vm4180_vm7, %v4160_v50  ;;  %4507 = vrot.lane.b32.xlu1 %v4435_v38, %s7048_s9  ;;  %4934 = vst.msk [vmem:[#allocation7 + $0x1a0] sm:$0xff] %vm4180_vm7, %v4435_v38  ;;  %v10451_v29 = vpack.c.bf16 %v5413_v30, %v5412_v13  ;;  %v5418_v30 = vld [vmem:[%s11386_s5 + $0x160] sm:$0xff] }
 0x413   : > { %v2861_v34 = vpop.permute.xlu1 %2860  ;;  %4935 = vst.msk [vmem:[#allocation7 + $0x1c8] sm:$0xff] %vm4180_vm7, %v4437_v46  ;;  %4736 = vst.msk [vmem:[#allocation7 + $0x1e8] sm:$0xff] %vm4180_vm7, %v10374_v25 }
 0x414   : > { %5190 = vst.msk [vmem:[#allocation7 + $0x160] sm:$0xff] %vm4180_vm7, %v10374_v25  ;;  %4737 = vst.msk [vmem:[#allocation7 + $0x210] sm:$0xff] %vm4180_vm7, %v10377_v20  ;;  %v3195_v17 = vpop.permute.xlu0 %3194  ;;  %v3554_v55 = vld [vmem:[#allocation6 + $0x2d8] sm:$0xff] }
 0x415   : > { %5191 = vst.msk [vmem:[#allocation7 + $0x188] sm:$0xff] %vm4180_vm7, %v10377_v20  ;;  %3912 = vmatprep.mubr.f32.mxu1 %v3554_v55  ;;  %v5414_v55 = vld [vmem:[%s11386_s5 + $0x140] sm:$0xff] }
 0x416   : > { %2926 = vst.msk [vmem:[#allocation6 + $0x2e8] sm:$0xff] %vm2894_vm6, %v2861_v34  ;;  %3913 = vmatmul.mubr.f32.gmra.mrb[60].mxu1 %v3553_v45  ;;  %4509 = vrot.lane.b32.xlu1 %v4437_v46, %s7048_s9 }
 0x417   : > { %3259 = vst.msk [vmem:[#allocation6 + $0x2f0] sm:$0xff] %vm2763_vm5, %v3195_v17  ;;  %v4484_v24 = vpop.permute.xlu1 %4483  ;;  %v3829_v6 = vpop.f32.mrb[26].mxu1 }
 0x418   : > { %4580 = vst.msk [vmem:[#allocation7] sm:$0xff] %vm4579_vm9, %v4484_v24  ;;  %v3329_v57 = vpop.permute.xlu0 %3328  ;;  %v3830_v40 = vadd.f32 %v10350_v4, %v3829_v6  ;;  %v3831_v48 = vpop.f32.mrb[27].mxu1 }
 0x419   : > { %3393 = vst.msk [vmem:[#allocation6 + $0x2f0] sm:$0xff] %vm2894_vm6, %v3329_v57  ;;  %v10406_v54 = vld [vmem:[#allocation4 + $0xa8] sm:$0xff] }
 0x41a   : > { %v4055_v39 = vadd.f32 %v10008_v58, %v3830_v40  ;;  %4782 = vrot.lane.b32.xlu0 %v10406_v54, %s7048_s9  ;;  %4337 = vst.msk [vmem:[#allocation7 + $0x230] sm:$0xff] %vm4180_vm7, %v10406_v54  ;;  %5099 = vst.msk [vmem:[#allocation7 + $0x1a8] sm:$0xff] %vm4180_vm7, %v10406_v54  ;;  %v5410_v58 = vld [vmem:[%s11386_s5 + $0x120] sm:$0xff]  ;;  %v4438_v34 = vrot.slane %v10406_v54, 1  ;;  %v5415_v40 = vld [vmem:[%s11386_s5 + $0x148] sm:$0xff]  ;;  %v4647_v44 = vrot.slane %v10406_v54, 2 }
 0x41b   : > { %v4486_v7 = vpop.permute.xlu1 %4485  ;;  %v10435_v22 = vpack.c.bf16 %v5411_v31, %v5410_v58  ;;  %v5417_v58 = vld [vmem:[%s11386_s5 + $0x158] sm:$0xff] }
 0x41c   : > { %4581 = vst.msk [vmem:[#allocation7 + $0x28] sm:$0xff] %vm4579_vm9, %v4486_v7  ;;  %v4759_v11 = vpop.permute.xlu0 %4758  ;;  %v4161_v14 = vmax.f32 %v4055_v39, 0.0  ;;  %v10473_v39 = vpack.c.bf16 %v5415_v40, %v5414_v55 }
 0x41d   : > { %4854 = vst.msk [vmem:[#allocation7 + $0x8] sm:$0xff] %vm4579_vm9, %v4759_v11  ;;  %v3556_v12 = vld [vmem:[#allocation6 + $0x2e8] sm:$0xff]  ;;  %6908 = vmatpush1.bf16.msra.mxu1 %v10435_v22 }
 0x41e   : > { %4250 = vst.msk [vmem:[#allocation4 + $0xb1] sm:$0xff] %vm4180_vm7, %v4161_v14  ;;  %6893 = vmatprep.subr.bf16.mxu1 %v7046_v63  ;;  %v5416_v14 = vld [vmem:[%s11386_s5 + $0x150] sm:$0xff] }
 0x41f   : > { %v4488_v53 = vpop.permute.xlu1 %4487  ;;  %v10438_v28 = vpop.f32.mrb[56].mxu0  ;;  %v5214_v43 = vld [vmem:[#allocation7] sm:$0xff] }
 0x420   : > { %4582 = vst.msk [vmem:[#allocation7 + $0x50] sm:$0xff] %vm4579_vm9, %v4488_v53  ;;  %v4761_v47 = vpop.permute.xlu0 %4760  ;;  %v3557_v49 = vld [vmem:[#allocation6 + $0x2f0] sm:$0xff]  ;;  %v10441_v5 = vpop.f32.mrb[57].mxu0 }
 0x421   : > { %4855 = vst.msk [vmem:[#allocation7 + $0x30] sm:$0xff] %vm4579_vm9, %v4761_v47  ;;  %3917 = vmatprep.mubr.f32.mxu1 %v3557_v49  ;;  %6909 = vmatpush1.bf16.msra.mxu1 %v10451_v29  ;;  %v10503_v47 = vpack.c.bf16 %v5417_v58, %v5416_v14  ;;  %v5426_v14 = vld [vmem:[%s11386_s5 + $0x1a0] sm:$0xff] }
 0x422   : > { %3918 = vmatmul.mubr.f32.gmra.mrb[62].mxu1 %v3556_v12  ;;  %6894 = vmatprep.subr.bf16.mxu1 %v7046_v63 }
 0x423   : > { %v4490_v23 = vpop.permute.xlu1 %4489  ;;  %v3834_v62 = vpop.f32.mrb[28].mxu1  ;;  %v5219_v60 = vld [vmem:[#allocation7 + $0x28] sm:$0xff] }
 0x424   : > { %4583 = vst.msk [vmem:[#allocation7 + $0x78] sm:$0xff] %vm4579_vm9, %v4490_v23  ;;  %v4763_v27 = vpop.permute.xlu0 %4762  ;;  %v5215_v16 = vld [vmem:[#allocation7 + $0x8] sm:$0xff]  ;;  %v3835_v50 = vadd.f32 %v10350_v4, %v3834_v62  ;;  %v3836_v38 = vpop.f32.mrb[29].mxu1  ;;  %v5420_v62 = vld [vmem:[%s11386_s5 + $0x170] sm:$0xff] }
 0x425   : > { %4856 = vst.msk [vmem:[#allocation7 + $0x58] sm:$0xff] %vm4579_vm9, %v4763_v27  ;;  %5613 = vmatprep.mubr.f32.mxu0 %v5215_v16  ;;  %v4291_v46 = vld [vmem:[#allocation4 + $0xb0] sm:$0xff]  ;;  %v4292_v17 = vld [vmem:[#allocation4 + $0xb8] sm:$0x3]  ;;  %6910 = vmatpush1.bf16.msra.mxu1 %v10473_v39 }
 0x426   : > { %5614 = vmatmul.mubr.f32.vlgmr.msra.gmra.mrb[64].mxu0 %v5214_v43  ;;  %v4060_v45 = vadd.f32 %v10029_v51, %v3835_v50  ;;  %4784 = vrot.lane.b32.xlu0 %v4291_v46, %s7048_s9  ;;  %4338 = vst.msk [vmem:[#allocation7 + $0x258] sm:$0xff] %vm4180_vm7, %v4291_v46  ;;  %5100 = vst.msk [vmem:[#allocation7 + $0x1d0] sm:$0xff] %vm4180_vm7, %v4291_v46  ;;  %v4439_v24 = vrot.slane %v4291_v46, 1  ;;  %v4441_v57 = vrot.slane %v4292_v17, 1  ;;  %v4650_v6 = vrot.slane %v4292_v17, 2  ;;  %v5421_v16 = vld [vmem:[%s11386_s5 + $0x178] sm:$0xff] }
 0x427   : > { %v4492_v15 = vpop.permute.xlu1 %4491  ;;  %6828 = vmatpush1.bf16.msra.mxu0 %v10400_v10  ;;  %v4648_v61 = vrot.slane %v4291_v46, 2  ;;  %6895 = vmatprep.subr.bf16.mxu1 %v7046_v63  ;;  %v5224_v13 = vld [vmem:[#allocation7 + $0x50] sm:$0xff]  ;;  %v10544_v17 = vpack.c.bf16 %v5421_v16, %v5420_v62 }
 0x428   : > { %4584 = vst.msk [vmem:[#allocation7 + $0xa0] sm:$0xff] %vm4579_vm9, %v4492_v15  ;;  %5141 = vst.msk [vmem:[#allocation7 + $0x18] sm:$0xff] %vm4579_vm9, %v4492_v15  ;;  %v4765_v51 = vpop.permute.xlu0 %4764  ;;  %v5220_v48 = vld [vmem:[#allocation7 + $0x30] sm:$0xff]  ;;  %6829 = vmatprep.subr.bf16.mxu0 %v7046_v63  ;;  %v4162_v7 = vmax.f32 %v4060_v45, 0.0  ;;  %v4440_v11 = vsel %vm534_vm3, %v4438_v34, %v4439_v24  ;;  %v10479_v10 = vsel %vm534_vm3, %v4439_v24, %v4441_v57  ;;  %v5424_v57 = vld [vmem:[%s11386_s5 + $0x190] sm:$0xff] }
 0x429   : > { %4857 = vst.msk [vmem:[#allocation7 + $0x80] sm:$0xff] %vm4579_vm9, %v4765_v51  ;;  %5618 = vmatprep.mubr.f32.mxu0 %v5220_v48  ;;  %4511 = vrot.lane.b32.xlu1 %v4440_v11, %s7048_s9  ;;  %v10486_v54 = vsel %vm744_vm2, %v4647_v44, %v4648_v61  ;;  %v10495_v31 = vsel %vm744_vm2, %v4648_v61, %v4650_v6  ;;  %v5422_v15 = vld [vmem:[%s11386_s5 + $0x180] sm:$0xff]  ;;  %v5425_v6 = vld [vmem:[%s11386_s5 + $0x198] sm:$0xff] }
 0x42a   : > { %5619 = vmatmul.mubr.f32.gmra.mrb[66].mxu0 %v5219_v60  ;;  %4936 = vst.msk [vmem:[#allocation7 + $0x1f0] sm:$0xff] %vm4180_vm7, %v4440_v11  ;;  %4937 = vst.msk [vmem:[#allocation7 + $0x218] sm:$0xff] %vm4180_vm7, %v10479_v10  ;;  %6911 = vmatpush1.bf16.msra.mxu1 %v10503_v47  ;;  %v5423_v60 = vld [vmem:[%s11386_s5 + $0x188] sm:$0xff]  ;;  %v10570_v51 = vpack.c.bf16 %v5425_v6, %v5424_v57 }
 0x42b   : > { %4251 = vst.msk [vmem:[#allocation4 + $0xc1] sm:$0xff] %vm4180_vm7, %v4162_v7  ;;  %v4494_v53 = vpop.permute.xlu1 %4493  ;;  %4738 = vst.msk [vmem:[#allocation7 + $0x238] sm:$0xff] %vm4180_vm7, %v10486_v54  ;;  %6831 = vmatpush1.bf16.msra.mxu0 %v10422_v59  ;;  %v5419_v59 = vld [vmem:[%s11386_s5 + $0x168] sm:$0xff]  ;;  %6896 = vmatprep.subr.bf16.mxu1 %v7046_v63  ;;  %v10557_v24 = vpack.c.bf16 %v5423_v60, %v5422_v15  ;;  %v5430_v15 = vld [vmem:[%s11386_s5 + $0x1c0] sm:$0xff] }
 0x42c   : > { %5192 = vst.msk [vmem:[#allocation7 + $0x1b0] sm:$0xff] %vm4180_vm7, %v10486_v54  ;;  %4739 = vst.msk [vmem:[#allocation7 + $0x260] sm:$0xff] %vm4180_vm7, %v10495_v31  ;;  %v5225_v49 = vld [vmem:[#allocation7 + $0x58] sm:$0xff]  ;;  %v4767_v12 = vpop.permute.xlu0 %4766  ;;  %6832 = vmatprep.subr.bf16.mxu0 %v7046_v63  ;;  %v10522_v23 = vpack.c.bf16 %v5419_v59, %v5418_v30 }
 0x42d   : > { %5193 = vst.msk [vmem:[#allocation7 + $0x1d8] sm:$0xff] %vm4180_vm7, %v10495_v31  ;;  %5623 = vmatprep.mubr.f32.mxu0 %v5225_v49  ;;  %v5229_v46 = vld [vmem:[#allocation7 + $0x78] sm:$0xff] }
 0x42e   : > { %4585 = vst.msk [vmem:[#allocation7 + $0xc8] sm:$0xff] %vm4579_vm9, %v4494_v53  ;;  %5142 = vst.msk [vmem:[#allocation7 + $0x40] sm:$0xff] %vm4579_vm9, %v4494_v53  ;;  %5624 = vmatmul.mubr.f32.gmra.mrb[68].mxu0 %v5224_v13  ;;  %6912 = vmatpush1.bf16.msra.mxu1 %v10522_v23  ;;  %v5427_v30 = vld [vmem:[%s11386_s5 + $0x1a8] sm:$0xff] }
 0x42f   : > { %4858 = vst.msk [vmem:[#allocation7 + $0xa8] sm:$0xff] %vm4579_vm9, %v4767_v12  ;;  %6834 = vmatpush1.bf16.msra.mxu0 %v10435_v22  ;;  %v3839_v43 = vpop.f32.mrb[30].mxu1  ;;  %6897 = vmatprep.subr.bf16.mxu1 %v7046_v63  ;;  %v5431_v60 = vld [vmem:[%s11386_s5 + $0x1c8] sm:$0xff] }
 0x430   : > { %v5230_v27 = vld [vmem:[#allocation7 + $0x80] sm:$0xff]  ;;  %6835 = vmatprep.subr.bf16.mxu0 %v7046_v63  ;;  %v3840_v50 = vadd.f32 %v10350_v4, %v3839_v43  ;;  %v3841_v38 = vpop.f32.mrb[31].mxu1 }
 0x431   : > { %5628 = vmatprep.mubr.f32.mxu0 %v5230_v27  ;;  %v6857_v27 = vpack.c.bf16 %v5427_v30, %v5426_v14  ;;  %v5435_v14 = vld [vmem:[%s11386_s5 + $0x1e8] sm:$0xff] }
 0x432   : > { %5629 = vmatmul.mubr.f32.gmra.mrb[70].mxu0 %v5229_v46  ;;  %v10534_v22 = vld [vmem:[#allocation4 + $0xc0] sm:$0xff]  ;;  %v4065_v34 = vadd.f32 %v10026_v1, %v3840_v50  ;;  %v5234_v1 = vld [vmem:[#allocation7 + $0xa0] sm:$0xff]  ;;  %6913 = vmatpush1.bf16.msra.mxu1 %v10544_v17 }
 0x433   : > { %4786 = vrot.lane.b32.xlu0 %v10534_v22, %s7048_s9  ;;  %4339 = vst.msk [vmem:[#allocation7 + $0x280] sm:$0xff] %vm4180_vm7, %v10534_v22  ;;  %5101 = vst.msk [vmem:[#allocation7 + $0x1f8] sm:$0xff] %vm4180_vm7, %v10534_v22  ;;  %6837 = vmatpush1.bf16.msra.mxu0 %v10451_v29  ;;  %v4443_v11 = vrot.slane %v10534_v22, 1  ;;  %v4652_v58 = vrot.slane %v10534_v22, 2 }
 0x434   : > { %v4163_v45 = vmax.f32 %v4065_v34, 0.0  ;;  %6838 = vmatprep.subr.bf16.mxu0 %v7046_v63  ;;  %6898 = vmatprep.subr.bf16.mxu1 %v7046_v63  ;;  %v5428_v34 = vld [vmem:[%s11386_s5 + $0x1b0] sm:$0xff] }
 0x435   : > { %v5239_v38 = vld [vmem:[#allocation7 + $0xc8] sm:$0xff] }
 0x436   : > { %v5235_v55 = vld [vmem:[#allocation7 + $0xa8] sm:$0xff]  ;;  %4252 = vst.msk [vmem:[#allocation4 + $0xc9] sm:$0xff] %vm4180_vm7, %v4163_v45  ;;  %6914 = vmatpush1.bf16.msra.mxu1 %v10557_v24 }
 0x437   : > { %5633 = vmatprep.mubr.f32.mxu0 %v5235_v55  ;;  %6840 = vmatpush1.bf16.msra.mxu0 %v10473_v39  ;;  %v5429_v55 = vld [vmem:[%s11386_s5 + $0x1b8] sm:$0xff] }
 0x438   : > { %5634 = vmatmul.mubr.f32.gmra.mrb[72].mxu0 %v5234_v1  ;;  %v4769_v29 = vpop.permute.xlu0 %4768  ;;  %6841 = vmatprep.subr.bf16.mxu0 %v7046_v63  ;;  %v6860_v45 = vpack.c.bf16 %v5429_v55, %v5428_v34 }
 0x439   : > { %4859 = vst.msk [vmem:[#allocation7 + $0xd0] sm:$0xff] %vm4579_vm9, %v4769_v29  ;;  %6899 = vmatprep.subr.bf16.mxu1 %v7046_v63  ;;  %v6863_v29 = vpack.c.bf16 %v5431_v60, %v5430_v15 }
 0x43a   : > { %6915 = vmatpush1.bf16.msra.mxu1 %v10570_v51 }
 0x43b   : > { %v4496_v40 = vpop.permute.xlu1 %4495  ;;  %v3844_v48 = vpop.f32.mrb[32].mxu1  ;;  %6843 = vmatpush1.bf16.msra.mxu0 %v10503_v47  ;;  %6900 = vmatprep.subr.bf16.mxu1 %v7046_v63 }
 0x43c   : > { %4586 = vst.msk [vmem:[#allocation7 + $0xf0] sm:$0xff] %vm4579_vm9, %v4496_v40  ;;  %5143 = vst.msk [vmem:[#allocation7 + $0x68] sm:$0xff] %vm4579_vm9, %v4496_v40  ;;  %v3845_v44 = vadd.f32 %v10350_v4, %v3844_v48  ;;  %v3846_v61 = vpop.f32.mrb[33].mxu1  ;;  %6844 = vmatprep.subr.bf16.mxu0 %v7046_v63 }
 0x43d   : > { %v10578_v39 = vld [vmem:[#allocation4 + $0xc8] sm:$0xff]  ;;  %v4295_v7 = vld [vmem:[#allocation4 + $0xd0] sm:$0x3] }
 0x43e   : > { %v4070_v53 = vadd.f32 %v10131_v32, %v3845_v44  ;;  %v4653_v47 = vrot.slane %v10578_v39, 2  ;;  %v4655_v12 = vrot.slane %v4295_v7, 2  ;;  %4340 = vst.msk [vmem:[#allocation7 + $0x2a8] sm:$0xff] %vm4180_vm7, %v10578_v39  ;;  %5102 = vst.msk [vmem:[#allocation7 + $0x220] sm:$0xff] %vm4180_vm7, %v10578_v39  ;;  %v4444_v13 = vrot.slane %v10578_v39, 1  ;;  %6916 = vmatpush1.bf16.msra.mxu1 %v6857_v27 }
 0x43f   : > { %v4498_v49 = vpop.permute.xlu1 %4497  ;;  %v10596_v59 = vpop.f32.mrb[58].mxu0  ;;  %v4446_v43 = vrot.slane %v4295_v7, 1  ;;  %6846 = vmatpush1.bf16.msra.mxu0 %v10522_v23  ;;  %6901 = vmatprep.subr.bf16.mxu1 %v7046_v63 }
 0x440   : > { %4587 = vst.msk [vmem:[#allocation7 + $0x118] sm:$0xff] %vm4579_vm9, %v4498_v49  ;;  %5144 = vst.msk [vmem:[#allocation7 + $0x90] sm:$0xff] %vm4579_vm9, %v4498_v49  ;;  %v5240_v32 = vld [vmem:[#allocation7 + $0xd0] sm:$0xff]  ;;  %v4164_v62 = vmax.f32 %v4070_v53, 0.0  ;;  %v10602_v16 = vpop.f32.mrb[59].mxu0  ;;  %v4656_v50 = vsel %vm744_vm2, %v4653_v47, %v4655_v12  ;;  %v10606_v46 = vsel %vm534_vm3, %v4443_v11, %v4444_v13  ;;  %v10609_v22 = vsel %vm744_vm2, %v4652_v58, %v4653_v47  ;;  %v5436_v53 = vld [vmem:[%s11386_s5 + $0x1f0] sm:$0xff] }
 0x441   : > { %5638 = vmatprep.mubr.f32.mxu0 %v5240_v32  ;;  %6847 = vmatprep.subr.bf16.mxu0 %v7046_v63  ;;  %5195 = vst.msk [vmem:[#allocation7 + $0x228] sm:$0xff] %vm4180_vm7, %v4656_v50  ;;  %4741 = vst.msk [vmem:[#allocation7 + $0x2b0] sm:$0xff] %vm4180_vm7, %v4656_v50  ;;  %v10618_v23 = vsel %vm534_vm3, %v4444_v13, %v4446_v43  ;;  %v5437_v49 = vld [vmem:[%s11386_s5 + $0x1f8] sm:$0xff] }
 0x442   : > { %4991 = vrot.lane.b32.xlu1 %v4656_v50, %s7048_s9  ;;  %5639 = vmatmul.mubr.f32.gmra.mrb[74].mxu0 %v5239_v38  ;;  %4938 = vst.msk [vmem:[#allocation7 + $0x240] sm:$0xff] %vm4180_vm7, %v10606_v46  ;;  %4740 = vst.msk [vmem:[#allocation7 + $0x288] sm:$0xff] %vm4180_vm7, %v10609_v22  ;;  %v6872_v12 = vpack.c.bf16 %v5437_v49, %v5436_v53 }
 0x443   : > { %5194 = vst.msk [vmem:[#allocation7 + $0x200] sm:$0xff] %vm4180_vm7, %v10609_v22  ;;  %4253 = vst.msk [vmem:[#allocation4 + $0xd9] sm:$0xff] %vm4180_vm7, %v4164_v62  ;;  %6849 = vmatpush1.bf16.msra.mxu0 %v10544_v17  ;;  %6917 = vmatpush1.bf16.msra.mxu1 %v6860_v45  ;;  %v5432_v17 = vld [vmem:[%s11386_s5 + $0x1d0] sm:$0xff]  ;;  %v5244_v11 = vld [vmem:[#allocation7 + $0xf0] sm:$0xff] }
 0x444   : > { %4939 = vst.msk [vmem:[#allocation7 + $0x268] sm:$0xff] %vm4180_vm7, %v10618_v23  ;;  %v4771_v1 = vpop.permute.xlu0 %4770  ;;  %6850 = vmatprep.subr.bf16.mxu0 %v7046_v63  ;;  %6902 = vmatprep.subr.bf16.mxu1 %v7046_v63 }
 0x445   : > { %4860 = vst.msk [vmem:[#allocation7 + $0xf8] sm:$0xff] %vm4579_vm9, %v4771_v1 }
 0x446   : > { %4513 = vrot.lane.b32.xlu1 %v10479_v10, %s7048_s9  ;;  %v5433_v10 = vld [vmem:[%s11386_s5 + $0x1d8] sm:$0xff] }
 0x447   : > { %v3849_v57 = vpop.f32.mrb[34].mxu1  ;;  %6852 = vmatpush1.bf16.msra.mxu0 %v10557_v24  ;;  %6918 = vmatpush1.bf16.msra.mxu1 %v6863_v29  ;;  %v10662_v61 = vpack.c.bf16 %v5433_v10, %v5432_v17 }
 0x448   : > { %v3850_v6 = vadd.f32 %v10350_v4, %v3849_v57  ;;  %v3851_v40 = vpop.f32.mrb[35].mxu1  ;;  %6853 = vmatprep.subr.bf16.mxu0 %v7046_v63  ;;  %6903 = vmatprep.subr.bf16.mxu1 %v7046_v63 }
 0x44a   : > { %v10655_v48 = vld [vmem:[#allocation4 + $0xd8] sm:$0xff]  ;;  %v4075_v44 = vadd.f32 %v10123_v8, %v3850_v6  ;;  %v5434_v8 = vld [vmem:[%s11386_s5 + $0x1e0] sm:$0xff] }
 0x44b   : > { %4341 = vst.msk [vmem:[#allocation7 + $0x2d0] sm:$0xff] %vm4180_vm7, %v10655_v48  ;;  %5103 = vst.msk [vmem:[#allocation7 + $0x248] sm:$0xff] %vm4180_vm7, %v10655_v48  ;;  %6855 = vmatpush1.bf16.msra.mxu0 %v10570_v51  ;;  %6919 = vmatpush1.bf16.msra.mxu1 %v10662_v61  ;;  %v6869_v58 = vpack.c.bf16 %v5435_v14, %v5434_v8  ;;  %v4657_v62 = vrot.slane %v10655_v48, 2  ;;  %v4448_v50 = vrot.slane %v10655_v48, 1 }
 0x44c   : > { %v5245_v7 = vld [vmem:[#allocation7 + $0xf8] sm:$0xff]  ;;  %v4165_v24 = vmax.f32 %v4075_v44, 0.0  ;;  %6856 = vmatprep.subr.bf16.mxu0 %v7046_v63  ;;  %6904 = vmatprep.subr.bf16.mxu1 %v7046_v63 }
 0x44d   : > { %5643 = vmatprep.mubr.f32.mxu0 %v5245_v7 }
 0x44e   : > { %5644 = vmatmul.mubr.f32.gmra.mrb[76].mxu0 %v5244_v11  ;;  %4254 = vst.msk [vmem:[#allocation4 + $0xe1] sm:$0xff] %vm4180_vm7, %v4165_v24 }
 0x44f   : > { %6858 = vmatpush1.bf16.msra.mxu0 %v6857_v27  ;;  %6920 = vmatpush1.bf16.msra.mxu1 %v6869_v58 }
 0x450   : > { %v4773_v51 = vpop.permute.xlu0 %4772  ;;  %6859 = vmatprep.subr.bf16.mxu0 %v7046_v63  ;;  %6905 = vmatprep.subr.bf16.mxu1 %v7046_v63 }
 0x451   : > { %4861 = vst.msk [vmem:[#allocation7 + $0x120] sm:$0xff] %vm4579_vm9, %v4773_v51 }
 0x453   : > { %v4500_v47 = vpop.permute.xlu1 %4499  ;;  %6861 = vmatpush1.bf16.msra.mxu0 %v6860_v45  ;;  %6921 = vmatpush1.bf16.msra.mxu1 %v6872_v12 }
 0x454   : > { %v3854_v13 = vpop.f32.mrb[36].mxu1  ;;  %4588 = vst.msk [vmem:[#allocation7 + $0x140] sm:$0xff] %vm4579_vm9, %v4500_v47  ;;  %5145 = vst.msk [vmem:[#allocation7 + $0xb8] sm:$0xff] %vm4579_vm9, %v4500_v47  ;;  %6862 = vmatprep.subr.bf16.mxu0 %v7046_v63 }
 0x455   : > { %v3855_v30 = vadd.f32 %v10350_v4, %v3854_v13  ;;  %v3856_v32 = vpop.f32.mrb[37].mxu1  ;;  %v10689_v43 = vld [vmem:[#allocation4 + $0xe0] sm:$0xff]  ;;  %v4298_v27 = vld [vmem:[#allocation4 + $0xe8] sm:$0x3] }
 0x456   : > { %v4449_v55 = vrot.slane %v10689_v43, 1  ;;  %v4451_v1 = vrot.slane %v4298_v27, 1  ;;  %4342 = vst.msk [vmem:[#allocation7 + $0x2f8] sm:$0xff] %vm4180_vm7, %v10689_v43  ;;  %5104 = vst.msk [vmem:[#allocation7 + $0x270] sm:$0xff] %vm4180_vm7, %v10689_v43  ;;  %v4658_v45 = vrot.slane %v10689_v43, 2  ;;  %v4660_v60 = vrot.slane %v4298_v27, 2 }
 0x457   : > { %v4080_v38 = vadd.f32 %v10215_v3, %v3855_v30  ;;  %v4502_v34 = vpop.permute.xlu1 %4501  ;;  %6864 = vmatpush1.bf16.msra.mxu0 %v6863_v29  ;;  %v5249_v29 = vld [vmem:[#allocation7 + $0x118] sm:$0xff] }
 0x458   : > { %4589 = vst.msk [vmem:[#allocation7 + $0x168] sm:$0xff] %vm4579_vm9, %v4502_v34  ;;  %5146 = vst.msk [vmem:[#allocation7 + $0xe0] sm:$0xff] %vm4579_vm9, %v4502_v34  ;;  %v5250_v15 = vld [vmem:[#allocation7 + $0x120] sm:$0xff]  ;;  %v4452_v57 = vsel %vm534_vm3, %v4449_v55, %v4451_v1  ;;  %v4659_v17 = vsel %vm744_vm2, %v4657_v62, %v4658_v45  ;;  %v10705_v10 = vsel %vm534_vm3, %v4448_v50, %v4449_v55  ;;  %6865 = vmatprep.subr.bf16.mxu0 %v7046_v63 }
 0x459   : > { %v4166_v3 = vmax.f32 %v4080_v38, 0.0  ;;  %5648 = vmatprep.mubr.f32.mxu0 %v5250_v15  ;;  %4521 = vrot.lane.b32.xlu0 %v4452_v57, %s7048_s9  ;;  %4941 = vst.msk [vmem:[#allocation7 + $0x2b8] sm:$0xff] %vm4180_vm7, %v4452_v57  ;;  %5196 = vst.msk [vmem:[#allocation7 + $0x250] sm:$0xff] %vm4180_vm7, %v4659_v17  ;;  %v4661_v6 = vsel %vm744_vm2, %v4658_v45, %v4660_v60 }
 0x45a   : > { %4993 = vrot.lane.b32.xlu1 %v4659_v17, %s7048_s9  ;;  %4742 = vst.msk [vmem:[#allocation7 + $0x2d8] sm:$0xff] %vm4180_vm7, %v4659_v17  ;;  %4940 = vst.msk [vmem:[#allocation7 + $0x290] sm:$0xff] %vm4180_vm7, %v10705_v10  ;;  %5649 = vmatmul.mubr.f32.gmra.mrb[78].mxu0 %v5249_v29 }
 0x45b   : > { %4255 = vst.msk [vmem:[#allocation4 + $0xf1] sm:$0xff] %vm4180_vm7, %v4166_v3  ;;  %5197 = vst.msk [vmem:[#allocation7 + $0x278] sm:$0xff] %vm4180_vm7, %v4661_v6  ;;  %6867 = vmatpush1.bf16.msra.mxu0 %v10662_v61 }
 0x45c   : > { %4743 = vst.msk [vmem:[#allocation7 + $0x300] sm:$0xff] %vm4180_vm7, %v4661_v6  ;;  %v4775_v40 = vpop.permute.xlu0 %4774  ;;  %6868 = vmatprep.subr.bf16.mxu0 %v7046_v63 }
 0x45d   : > { %v10720_v44 = vpop.f32.mrb[60].mxu0  ;;  %4862 = vst.msk [vmem:[#allocation7 + $0x148] sm:$0xff] %vm4579_vm9, %v4775_v40  ;;  %4788 = vrot.lane.b32.xlu0 %v10578_v39, %s7048_s9 }
 0x45e   : > { %v10724_v7 = vpop.f32.mrb[61].mxu0  ;;  %4515 = vrot.lane.b32.xlu1 %v10606_v46, %s7048_s9 }
 0x45f   : > { %6870 = vmatpush1.bf16.msra.mxu0 %v6869_v58  ;;  %v5254_v58 = vld [vmem:[#allocation7 + $0x140] sm:$0xff]  ;;  %v5259_v3 = vld [vmem:[#allocation7 + $0x168] sm:$0xff] }
 0x460   : > { %v3859_v24 = vpop.f32.mrb[38].mxu1  ;;  %6871 = vmatprep.subr.bf16.mxu0 %v7046_v63 }
 0x461   : > { %v3860_v11 = vadd.f32 %v10350_v4, %v3859_v24  ;;  %v3861_v8 = vpop.f32.mrb[39].mxu1  ;;  %v10747_v47 = vpop.f32.mrb[62].mxu0 }
 0x462   : > { %4995 = vrot.lane.b32.xlu1 %v4661_v6, %s7048_s9  ;;  %v10733_v61 = vld [vmem:[#allocation4 + $0xf0] sm:$0xff]  ;;  %v10753_v32 = vpop.f32.mrb[63].mxu0 }
 0x463   : > { %v4085_v14 = vadd.f32 %v10212_v0, %v3860_v11  ;;  %4343 = vst.msk [vmem:[#allocation7 + $0x320] sm:$0xff] %vm4180_vm7, %v10733_v61  ;;  %5105 = vst.msk [vmem:[#allocation7 + $0x298] sm:$0xff] %vm4180_vm7, %v10733_v61  ;;  %6873 = vmatpush1.bf16.msra.mxu0 %v6872_v12  ;;  %v4662_v13 = vrot.slane %v10733_v61, 2 }
 0x464   : > { %v5255_v39 = vld [vmem:[#allocation7 + $0x148] sm:$0xff] }
 0x465   : > { %v4167_v46 = vmax.f32 %v4085_v14, 0.0  ;;  %5653 = vmatprep.mubr.f32.mxu0 %v5255_v39 }
 0x466   : > { %4517 = vrot.lane.b32.xlu1 %v10618_v23, %s7048_s9  ;;  %5654 = vmatmul.mubr.f32.gmra.mrb[80].mxu0 %v5254_v58  ;;  %v4453_v23 = vrot.slane %v10733_v61, 1 }
 0x467   : > { %4256 = vst.msk [vmem:[#allocation4 + $0xf9] sm:$0xff] %vm4180_vm7, %v4167_v46 }
 0x468   : > { %v4777_v63 = vpop.permute.xlu0 %4776 }
 0x469   : > { %4863 = vst.msk [vmem:[#allocation7 + $0x170] sm:$0xff] %vm4579_vm9, %v4777_v63 }
 0x46b   : > { %v4504_v0 = vpop.permute.xlu1 %4503  ;;  %v3864_v51 = vpop.f32.mrb[40].mxu1 }
 0x46c   : > { %4590 = vst.msk [vmem:[#allocation7 + $0x190] sm:$0xff] %vm4579_vm9, %v4504_v0  ;;  %5147 = vst.msk [vmem:[#allocation7 + $0x108] sm:$0xff] %vm4579_vm9, %v4504_v0  ;;  %v3865_v53 = vadd.f32 %v10350_v4, %v3864_v51  ;;  %v3866_v49 = vpop.f32.mrb[41].mxu1 }
 0x46e   : > { %v10749_v12 = vld [vmem:[#allocation4 + $0xf8] sm:$0xff]  ;;  %v4301_v30 = vld [vmem:[#allocation4 + $0x100] sm:$0x3]  ;;  %v4090_v27 = vadd.f32 %v10272_v9, %v3865_v53 }
 0x46f   : > { %v4506_v62 = vpop.permute.xlu1 %4505  ;;  %v4454_v50 = vrot.slane %v10749_v12, 1  ;;  %4344 = vst.msk [vmem:[#allocation7 + $0x348] sm:$0xff] %vm4180_vm7, %v10749_v12  ;;  %5106 = vst.msk [vmem:[#allocation7 + $0x2c0] sm:$0xff] %vm4180_vm7, %v10749_v12  ;;  %v4663_v38 = vrot.slane %v10749_v12, 2  ;;  %v4456_v34 = vrot.slane %v4301_v30, 1  ;;  %v4665_v1 = vrot.slane %v4301_v30, 2 }
 0x470   : > { %4591 = vst.msk [vmem:[#allocation7 + $0x1b8] sm:$0xff] %vm4579_vm9, %v4506_v62  ;;  %5148 = vst.msk [vmem:[#allocation7 + $0x130] sm:$0xff] %vm4579_vm9, %v4506_v62  ;;  %v5260_v55 = vld [vmem:[#allocation7 + $0x170] sm:$0xff]  ;;  %v4168_v45 = vmax.f32 %v4090_v27, 0.0 }
 0x471   : > { %v4455_v9 = vsel %vm534_vm3, %v4453_v23, %v4454_v50  ;;  %v4664_v15 = vsel %vm744_vm2, %v4662_v13, %v4663_v38  ;;  %5658 = vmatprep.mubr.f32.mxu0 %v5260_v55  ;;  %v4457_v60 = vsel %vm534_vm3, %v4454_v50, %v4456_v34  ;;  %v4666_v57 = vsel %vm744_vm2, %v4663_v38, %v4665_v1 }
 0x472   : > { %4523 = vrot.lane.b32.xlu0 %v4455_v9, %s7048_s9  ;;  %4942 = vst.msk [vmem:[#allocation7 + $0x2e0] sm:$0xff] %vm4180_vm7, %v4455_v9  ;;  %5198 = vst.msk [vmem:[#allocation7 + $0x2a0] sm:$0xff] %vm4180_vm7, %v4664_v15  ;;  %4997 = vrot.lane.b32.xlu1 %v4664_v15, %s7048_s9 }
 0x473   : > { %4744 = vst.msk [vmem:[#allocation7 + $0x328] sm:$0xff] %vm4180_vm7, %v4664_v15  ;;  %4943 = vst.msk [vmem:[#allocation7 + $0x308] sm:$0xff] %vm4180_vm7, %v4457_v60  ;;  %5659 = vmatmul.mubr.f32.gmra.mrb[82].mxu0 %v5259_v3  ;;  %v5264_v8 = vld [vmem:[#allocation7 + $0x190] sm:$0xff] }
 0x474   : > { %4257 = vst.msk [vmem:[#allocation4 + $0x109] sm:$0xff] %vm4180_vm7, %v4168_v45  ;;  %5199 = vst.msk [vmem:[#allocation7 + $0x2c8] sm:$0xff] %vm4180_vm7, %v4666_v57  ;;  %v4321_v15 = vld [vmem:[#allocation4 + $0x1a0] sm:$0xff] }
 0x475   : > { %4745 = vst.msk [vmem:[#allocation7 + $0x350] sm:$0xff] %vm4180_vm7, %v4666_v57  ;;  %5120 = vst.msk [vmem:[#allocation7 + $0x4f0] sm:$0xff] %vm4180_vm7, %v4321_v15 }
 0x476   : > { %4790 = vrot.lane.b32.xlu0 %v10655_v48, %s7048_s9  ;;  %4519 = vrot.lane.b32.xlu1 %v10705_v10, %s7048_s9 }
 0x477   : > { %v4779_v17 = vpop.permute.xlu0 %4778  ;;  %v3869_v29 = vpop.f32.mrb[42].mxu1  ;;  %v5269_v1 = vld [vmem:[#allocation7 + $0x1b8] sm:$0xff] }
 0x478   : > { %4864 = vst.msk [vmem:[#allocation7 + $0x198] sm:$0xff] %vm4579_vm9, %v4779_v17  ;;  %v3870_v6 = vadd.f32 %v10350_v4, %v3869_v29  ;;  %v3871_v40 = vpop.f32.mrb[43].mxu1  ;;  %v5125_v17 = vrot.slane %v4321_v15, 1 }
 0x479   : > { %v4320_v40 = vld [vmem:[#allocation4 + $0x198] sm:$0xff] }
 0x47a   : > { %4525 = vrot.lane.b32.xlu0 %v4457_v60, %s7048_s9  ;;  %4999 = vrot.lane.b32.xlu1 %v4666_v57, %s7048_s9  ;;  %v4095_v11 = vadd.f32 %v10269_v36, %v3870_v6  ;;  %v4322_v60 = vld [vmem:[#allocation4 + $0x1a8] sm:$0x3]  ;;  %v5174_v6 = vrot.slane %v4321_v15, 2  ;;  %5119 = vst.msk [vmem:[#allocation7 + $0x4c8] sm:$0xff] %vm4180_vm7, %v4320_v40 }
 0x47b   : > { %v10785_v24 = vld [vmem:[#allocation4 + $0x108] sm:$0xff]  ;;  %v5127_v29 = vrot.slane %v4322_v60, 1 }
 0x47c   : > { %4345 = vst.msk [vmem:[#allocation7 + $0x370] sm:$0xff] %vm4180_vm7, %v10785_v24  ;;  %5107 = vst.msk [vmem:[#allocation7 + $0x2e8] sm:$0xff] %vm4180_vm7, %v10785_v24  ;;  %v4169_v48 = vmax.f32 %v4095_v11, 0.0  ;;  %v4667_v51 = vrot.slane %v10785_v24, 2 }
 0x47e   : > { %4792 = vrot.lane.b32.xlu0 %v10689_v43, %s7048_s9  ;;  %4258 = vst.msk [vmem:[#allocation4 + $0x111] sm:$0xff] %vm4180_vm7, %v4169_v48  ;;  %v4458_v43 = vrot.slane %v10785_v24, 1  ;;  %v5176_v48 = vrot.slane %v4322_v60, 2 }
 0x47f   : > { %v5265_v10 = vld [vmem:[#allocation7 + $0x198] sm:$0xff] }
 0x480   : > { %5663 = vmatprep.mubr.f32.mxu0 %v5265_v10  ;;  %v5124_v10 = vrot.slane %v4320_v40, 1 }
 0x481   : > { %5664 = vmatmul.mubr.f32.gmra.mrb[84].mxu0 %v5264_v8  ;;  %v4781_v14 = vpop.permute.xlu0 %4780  ;;  %v5173_v8 = vrot.slane %v4320_v40, 2 }
 0x482   : > { %4865 = vst.msk [vmem:[#allocation7 + $0x1c0] sm:$0xff] %vm4579_vm9, %v4781_v14 }
 0x483   : > { %v3874_v36 = vpop.f32.mrb[44].mxu1 }
 0x484   : > { %v4508_v39 = vpop.permute.xlu1 %4507  ;;  %v3875_v46 = vadd.f32 %v10350_v4, %v3874_v36  ;;  %v3876_v58 = vpop.f32.mrb[45].mxu1  ;;  %v5177_v36 = vsel %vm744_vm2, %v5174_v6, %v5176_v48 }
 0x485   : > { %4592 = vst.msk [vmem:[#allocation7 + $0x1e0] sm:$0xff] %vm4579_vm9, %v4508_v39  ;;  %5149 = vst.msk [vmem:[#allocation7 + $0x158] sm:$0xff] %vm4579_vm9, %v4508_v39  ;;  %v10799_v63 = vld [vmem:[#allocation4 + $0x110] sm:$0xff]  ;;  %v4304_v0 = vld [vmem:[#allocation4 + $0x118] sm:$0x3]  ;;  %v10847_v39 = vsel %vm534_vm3, %v5124_v10, %v5125_v17 }
 0x486   : > { %v4459_v53 = vrot.slane %v10799_v63, 1  ;;  %4346 = vst.msk [vmem:[#allocation7 + $0x398] sm:$0xff] %vm4180_vm7, %v10799_v63  ;;  %5108 = vst.msk [vmem:[#allocation7 + $0x310] sm:$0xff] %vm4180_vm7, %v10799_v63  ;;  %v4461_v49 = vrot.slane %v4304_v0, 1  ;;  %v4668_v23 = vrot.slane %v10799_v63, 2  ;;  %v4670_v13 = vrot.slane %v4304_v0, 2 }
 0x487   : > { %v4100_v30 = vadd.f32 %v10345_v52, %v3875_v46  ;;  %v5175_v46 = vsel %vm744_vm2, %v5173_v8, %v5174_v6  ;;  %5213 = vst.msk [vmem:[#allocation7 + $0x4f8] sm:$0xff] %vm4180_vm7, %v5177_v36 }
 0x488   : > { %v4510_v27 = vpop.permute.xlu1 %4509  ;;  %v4460_v62 = vsel %vm534_vm3, %v4458_v43, %v4459_v53  ;;  %v4462_v50 = vsel %vm534_vm3, %v4459_v53, %v4461_v49  ;;  %v4669_v38 = vsel %vm744_vm2, %v4667_v51, %v4668_v23  ;;  %v10814_v34 = vsel %vm744_vm2, %v4668_v23, %v4670_v13  ;;  %5212 = vst.msk [vmem:[#allocation7 + $0x4d0] sm:$0xff] %vm4180_vm7, %v5175_v46 }
 0x489   : > { %v4170_v55 = vmax.f32 %v4100_v30, 0.0  ;;  %4593 = vst.msk [vmem:[#allocation7 + $0x208] sm:$0xff] %vm4579_vm9, %v4510_v27  ;;  %5150 = vst.msk [vmem:[#allocation7 + $0x180] sm:$0xff] %vm4579_vm9, %v4510_v27  ;;  %4527 = vrot.lane.b32.xlu0 %v4460_v62, %s7048_s9  ;;  %v5270_v52 = vld [vmem:[#allocation7 + $0x1c0] sm:$0xff] }
 0x48a   : > { %4944 = vst.msk [vmem:[#allocation7 + $0x330] sm:$0xff] %vm4180_vm7, %v4460_v62  ;;  %4945 = vst.msk [vmem:[#allocation7 + $0x358] sm:$0xff] %vm4180_vm7, %v4462_v50  ;;  %5668 = vmatprep.mubr.f32.mxu0 %v5270_v52 }
 0x48b   : > { %5200 = vst.msk [vmem:[#allocation7 + $0x2f0] sm:$0xff] %vm4180_vm7, %v4669_v38  ;;  %4746 = vst.msk [vmem:[#allocation7 + $0x378] sm:$0xff] %vm4180_vm7, %v4669_v38  ;;  %5669 = vmatmul.mubr.f32.gmra.mrb[86].mxu0 %v5269_v1 }
 0x48c   : > { %5201 = vst.msk [vmem:[#allocation7 + $0x318] sm:$0xff] %vm4180_vm7, %v10814_v34  ;;  %4747 = vst.msk [vmem:[#allocation7 + $0x3a0] sm:$0xff] %vm4180_vm7, %v10814_v34  ;;  %v4783_v45 = vpop.permute.xlu0 %4782 }
 0x48d   : > { %4259 = vst.msk [vmem:[#allocation4 + $0x121] sm:$0xff] %vm4180_vm7, %v4170_v55  ;;  %4794 = vrot.lane.b32.xlu0 %v10733_v61, %s7048_s9 }
 0x48e   : > { %4866 = vst.msk [vmem:[#allocation7 + $0x1e8] sm:$0xff] %vm4579_vm9, %v4783_v45 }
 0x490   : > { %v5279_v60 = vld [vmem:[#allocation7 + $0x208] sm:$0xff] }
 0x491   : > { %v3879_v9 = vpop.f32.mrb[46].mxu1  ;;  %4529 = vrot.lane.b32.xlu0 %v4462_v50, %s7048_s9 }
 0x492   : > { %v3880_v3 = vadd.f32 %v10350_v4, %v3879_v9  ;;  %v3881_v57 = vpop.f32.mrb[47].mxu1  ;;  %v10843_v4 = vsel %vm534_vm3, %v5125_v17, %v5127_v29 }
 0x494   : > { %v10834_v11 = vld [vmem:[#allocation4 + $0x120] sm:$0xff]  ;;  %v4105_v61 = vadd.f32 %v10342_v33, %v3880_v3  ;;  %v5274_v33 = vld [vmem:[#allocation7 + $0x1e0] sm:$0xff] }
 0x495   : > { %4347 = vst.msk [vmem:[#allocation7 + $0x3c0] sm:$0xff] %vm4180_vm7, %v10834_v11  ;;  %5109 = vst.msk [vmem:[#allocation7 + $0x338] sm:$0xff] %vm4180_vm7, %v10834_v11  ;;  %v5275_v14 = vld [vmem:[#allocation7 + $0x1e8] sm:$0xff]  ;;  %4796 = vrot.lane.b32.xlu0 %v10749_v12, %s7048_s9  ;;  %v10862_v12 = vld [vmem:[%s11385_s4] ss:$0 sm:$0xff]  ;;  %v4463_v30 = vrot.slane %v10834_v11, 1 }
 0x496   : > { %v4171_v58 = vmax.f32 %v4105_v61, 0.0  ;;  %5673 = vmatprep.mubr.f32.mxu0 %v5275_v14  ;;  %v4672_v27 = vrot.slane %v10834_v11, 2 }
 0x497   : > { %5674 = vmatmul.mubr.f32.gmra.mrb[88].mxu0 %v5274_v33 }
 0x498   : > { %4260 = vst.msk [vmem:[#allocation4 + $0x129] sm:$0xff] %vm4180_vm7, %v4171_v58  ;;  %v4785_v43 = vpop.permute.xlu0 %4784 }
 0x499   : > { %4867 = vst.msk [vmem:[#allocation7 + $0x210] sm:$0xff] %vm4579_vm9, %v4785_v43  ;;  %5001 = vrot.lane.b32.xlu0 %v4669_v38, %s7048_s9 }
 0x49b   : > { %v4512_v0 = vpop.permute.xlu1 %4511  ;;  %v3884_v51 = vpop.f32.mrb[48].mxu1 }
 0x49c   : > { %4594 = vst.msk [vmem:[#allocation7 + $0x230] sm:$0xff] %vm4579_vm9, %v4512_v0  ;;  %5151 = vst.msk [vmem:[#allocation7 + $0x1a8] sm:$0xff] %vm4579_vm9, %v4512_v0  ;;  %v3885_v53 = vadd.f32 %v10862_v12, %v3884_v51  ;;  %v3886_v49 = vpop.f32.mrb[49].mxu1 }
 0x49e   : > { %v4110_v62 = vadd.f32 %v10441_v5, %v3885_v53 }
 0x49f   : > { %v10865_v23 = vld [vmem:[#allocation4 + $0x128] sm:$0xff]  ;;  %v4307_v13 = vld [vmem:[#allocation4 + $0x130] sm:$0x3] }
 0x4a0   : > { %v4464_v50 = vrot.slane %v10865_v23, 1  ;;  %v4466_v38 = vrot.slane %v4307_v13, 1  ;;  %4348 = vst.msk [vmem:[#allocation7 + $0x3e8] sm:$0xff] %vm4180_vm7, %v10865_v23  ;;  %5110 = vst.msk [vmem:[#allocation7 + $0x360] sm:$0xff] %vm4180_vm7, %v10865_v23  ;;  %v4673_v55 = vrot.slane %v10865_v23, 2  ;;  %v5280_v52 = vld [vmem:[#allocation7 + $0x210] sm:$0xff] }
 0x4a1   : > { %v4675_v1 = vrot.slane %v4307_v13, 2  ;;  %v4172_v45 = vmax.f32 %v4110_v62, 0.0  ;;  %5678 = vmatprep.mubr.f32.mxu0 %v5280_v52 }
 0x4a2   : > { %v4467_v9 = vsel %vm534_vm3, %v4464_v50, %v4466_v38  ;;  %v4465_v15 = vsel %vm534_vm3, %v4463_v30, %v4464_v50  ;;  %v4674_v5 = vsel %vm744_vm2, %v4672_v27, %v4673_v55  ;;  %5679 = vmatmul.mubr.f32.gmra.mrb[90].mxu0 %v5279_v60 }
 0x4a3   : > { %4533 = vrot.lane.b32.xlu0 %v4467_v9, %s7048_s9  ;;  %4947 = vst.msk [vmem:[#allocation7 + $0x3a8] sm:$0xff] %vm4180_vm7, %v4467_v9  ;;  %4531 = vrot.lane.b32.xlu1 %v4465_v15, %s7048_s9  ;;  %4946 = vst.msk [vmem:[#allocation7 + $0x380] sm:$0xff] %vm4180_vm7, %v4465_v15  ;;  %v4676_v3 = vsel %vm744_vm2, %v4673_v55, %v4675_v1  ;;  %v5284_v10 = vld [vmem:[#allocation7 + $0x230] sm:$0xff] }
 0x4a4   : > { %5202 = vst.msk [vmem:[#allocation7 + $0x340] sm:$0xff] %vm4180_vm7, %v4674_v5  ;;  %4748 = vst.msk [vmem:[#allocation7 + $0x3c8] sm:$0xff] %vm4180_vm7, %v4674_v5 }
 0x4a5   : > { %4261 = vst.msk [vmem:[#allocation4 + $0x139] sm:$0xff] %vm4180_vm7, %v4172_v45  ;;  %5203 = vst.msk [vmem:[#allocation7 + $0x368] sm:$0xff] %vm4180_vm7, %v4676_v3  ;;  %v4787_v57 = vpop.permute.xlu0 %4786 }
 0x4a6   : > { %4749 = vst.msk [vmem:[#allocation7 + $0x3f0] sm:$0xff] %vm4180_vm7, %v4676_v3 }
 0x4a7   : > { %4868 = vst.msk [vmem:[#allocation7 + $0x238] sm:$0xff] %vm4579_vm9, %v4787_v57  ;;  %4800 = vrot.lane.b32.xlu0 %v10799_v63, %s7048_s9  ;;  %4798 = vrot.lane.b32.xlu1 %v10785_v24, %s7048_s9 }
 0x4a9   : > { %v3889_v17 = vpop.f32.mrb[50].mxu1 }
 0x4aa   : > { %v3890_v29 = vadd.f32 %v10862_v12, %v3889_v17  ;;  %v3891_v6 = vpop.f32.mrb[51].mxu1 }
 0x4ab   : > { %5005 = vrot.lane.b32.xlu0 %v4674_v5, %s7048_s9  ;;  %5003 = vrot.lane.b32.xlu1 %v10814_v34, %s7048_s9 }
 0x4ac   : > { %v10898_v40 = vld [vmem:[#allocation4 + $0x138] sm:$0xff]  ;;  %v4115_v48 = vadd.f32 %v10438_v28, %v3890_v29 }
 0x4ad   : > { %4349 = vst.msk [vmem:[#allocation7 + $0x410] sm:$0xff] %vm4180_vm7, %v10898_v40  ;;  %5111 = vst.msk [vmem:[#allocation7 + $0x388] sm:$0xff] %vm4180_vm7, %v10898_v40  ;;  %v4468_v46 = vrot.slane %v10898_v40, 1  ;;  %v4677_v58 = vrot.slane %v10898_v40, 2 }
 0x4ae   : > { %v5285_v24 = vld [vmem:[#allocation7 + $0x238] sm:$0xff]  ;;  %v4173_v63 = vmax.f32 %v4115_v48, 0.0 }
 0x4af   : > { %5683 = vmatprep.mubr.f32.mxu0 %v5285_v24 }
 0x4b0   : > { %5684 = vmatmul.mubr.f32.gmra.mrb[92].mxu0 %v5284_v10  ;;  %4262 = vst.msk [vmem:[#allocation4 + $0x141] sm:$0xff] %vm4180_vm7, %v4173_v63 }
 0x4b3   : > { %v3894_v61 = vpop.f32.mrb[52].mxu1 }
 0x4b4   : > { %v4992_v8 = vpop.permute.xlu1 %4991  ;;  %v3895_v34 = vadd.f32 %v10862_v12, %v3894_v61  ;;  %v3896_v28 = vpop.f32.mrb[53].mxu1 }
 0x4b5   : > { %5072 = vst.msk [vmem:[#allocation7 + $0x268] sm:$0xff] %vm4579_vm9, %v4992_v8 }
 0x4b6   : > { %v4120_v33 = vadd.f32 %v10602_v16, %v3895_v34 }
 0x4b7   : > { %v10908_v14 = vld [vmem:[#allocation4 + $0x140] sm:$0xff]  ;;  %v4310_v36 = vld [vmem:[#allocation4 + $0x148] sm:$0x3] }
 0x4b8   : > { %v4514_v43 = vpop.permute.xlu1 %4513  ;;  %v4469_v0 = vrot.slane %v10908_v14, 1  ;;  %v4471_v51 = vrot.slane %v4310_v36, 1  ;;  %4350 = vst.msk [vmem:[#allocation7 + $0x438] sm:$0xff] %vm4180_vm7, %v10908_v14  ;;  %5112 = vst.msk [vmem:[#allocation7 + $0x3b0] sm:$0xff] %vm4180_vm7, %v10908_v14  ;;  %v4678_v53 = vrot.slane %v10908_v14, 2  ;;  %v4680_v49 = vrot.slane %v4310_v36, 2 }
 0x4b9   : > { %4595 = vst.msk [vmem:[#allocation7 + $0x258] sm:$0xff] %vm4579_vm9, %v4514_v43  ;;  %5152 = vst.msk [vmem:[#allocation7 + $0x1d0] sm:$0xff] %vm4579_vm9, %v4514_v43  ;;  %v4174_v13 = vmax.f32 %v4120_v33, 0.0  ;;  %v5438_v43 = vld [vmem:[%s11386_s5 + $0x200] sm:$0xff] }
 0x4ba   : > { %v4472_v16 = vsel %vm534_vm3, %v4469_v0, %v4471_v51  ;;  %v4470_v30 = vsel %vm534_vm3, %v4468_v46, %v4469_v0  ;;  %v4679_v27 = vsel %vm744_vm2, %v4677_v58, %v4678_v53  ;;  %v10931_v62 = vsel %vm744_vm2, %v4678_v53, %v4680_v49 }
 0x4bb   : > { %4537 = vrot.lane.b32.xlu0 %v4472_v16, %s7048_s9  ;;  %4949 = vst.msk [vmem:[#allocation7 + $0x3f8] sm:$0xff] %vm4180_vm7, %v4472_v16  ;;  %4535 = vrot.lane.b32.xlu1 %v4470_v30, %s7048_s9  ;;  %4948 = vst.msk [vmem:[#allocation7 + $0x3d0] sm:$0xff] %vm4180_vm7, %v4470_v30 }
 0x4bc   : > { %5204 = vst.msk [vmem:[#allocation7 + $0x390] sm:$0xff] %vm4180_vm7, %v4679_v27  ;;  %4750 = vst.msk [vmem:[#allocation7 + $0x418] sm:$0xff] %vm4180_vm7, %v4679_v27  ;;  %v5291_v58 = vld [vmem:[#allocation7 + $0x268] sm:$0xff] }
 0x4bd   : > { %4263 = vst.msk [vmem:[#allocation4 + $0x151] sm:$0xff] %vm4180_vm7, %v4174_v13  ;;  %5205 = vst.msk [vmem:[#allocation7 + $0x3b8] sm:$0xff] %vm4180_vm7, %v10931_v62 }
 0x4be   : > { %4751 = vst.msk [vmem:[#allocation7 + $0x440] sm:$0xff] %vm4180_vm7, %v10931_v62 }
 0x4bf   : > { %4804 = vrot.lane.b32.xlu0 %v10865_v23, %s7048_s9  ;;  %4802 = vrot.lane.b32.xlu1 %v10834_v11, %s7048_s9 }
 0x4c0   : > { %v5289_v49 = vld [vmem:[#allocation7 + $0x258] sm:$0xff] }
 0x4c1   : > { %v3899_v50 = vpop.f32.mrb[54].mxu1 }
 0x4c2   : > { %v3900_v38 = vadd.f32 %v10862_v12, %v3899_v50  ;;  %v3901_v55 = vpop.f32.mrb[55].mxu1 }
 0x4c3   : > { %5009 = vrot.lane.b32.xlu0 %v4679_v27, %s7048_s9  ;;  %5007 = vrot.lane.b32.xlu1 %v4676_v3, %s7048_s9 }
 0x4c4   : > { %v10945_v52 = vld [vmem:[#allocation4 + $0x150] sm:$0xff]  ;;  %v4125_v1 = vadd.f32 %v10596_v59, %v3900_v38 }
 0x4c5   : > { %4351 = vst.msk [vmem:[#allocation7 + $0x460] sm:$0xff] %vm4180_vm7, %v10945_v52  ;;  %5113 = vst.msk [vmem:[#allocation7 + $0x3d8] sm:$0xff] %vm4180_vm7, %v10945_v52  ;;  %v4473_v15 = vrot.slane %v10945_v52, 1  ;;  %v4682_v5 = vrot.slane %v10945_v52, 2 }
 0x4c6   : > { %v4175_v23 = vmax.f32 %v4125_v1, 0.0 }
 0x4c8   : > { %4264 = vst.msk [vmem:[#allocation4 + $0x159] sm:$0xff] %vm4180_vm7, %v4175_v23 }
 0x4cb   : > { %v4522_v11 = vpop.permute.xlu0 %4521 }
 0x4cc   : > { %v4994_v45 = vpop.permute.xlu1 %4993  ;;  %4599 = vst.msk [vmem:[#allocation7 + $0x2f8] sm:$0xff] %vm4579_vm9, %v4522_v11  ;;  %5156 = vst.msk [vmem:[#allocation7 + $0x270] sm:$0xff] %vm4579_vm9, %v4522_v11 }
 0x4cd   : > { %5073 = vst.msk [vmem:[#allocation7 + $0x290] sm:$0xff] %vm4579_vm9, %v4994_v45 }
 0x4cf   : > { %v10956_v9 = vld [vmem:[#allocation4 + $0x158] sm:$0xff]  ;;  %v4313_v59 = vld [vmem:[#allocation4 + $0x160] sm:$0x3]  ;;  %v4789_v60 = vpop.permute.xlu0 %4788 }
 0x4d0   : > { %v4516_v3 = vpop.permute.xlu1 %4515  ;;  %v4474_v57 = vrot.slane %v10956_v9, 1  ;;  %v4476_v17 = vrot.slane %v4313_v59, 1  ;;  %4352 = vst.msk [vmem:[#allocation7 + $0x488] sm:$0xff] %vm4180_vm7, %v10956_v9  ;;  %5114 = vst.msk [vmem:[#allocation7 + $0x400] sm:$0xff] %vm4180_vm7, %v10956_v9  ;;  %v4683_v29 = vrot.slane %v10956_v9, 2  ;;  %v4685_v6 = vrot.slane %v4313_v59, 2 }
 0x4d1   : > { %4869 = vst.msk [vmem:[#allocation7 + $0x260] sm:$0xff] %vm4579_vm9, %v4789_v60  ;;  %4596 = vst.msk [vmem:[#allocation7 + $0x280] sm:$0xff] %vm4579_vm9, %v4516_v3  ;;  %v3904_v48 = vpop.f32.mrb[56].mxu1 }
 0x4d2   : > { %5153 = vst.msk [vmem:[#allocation7 + $0x1f8] sm:$0xff] %vm4579_vm9, %v4516_v3  ;;  %v3905_v24 = vadd.f32 %v10862_v12, %v3904_v48  ;;  %v3906_v63 = vpop.f32.mrb[57].mxu1  ;;  %v4477_v10 = vsel %vm534_vm3, %v4474_v57, %v4476_v17  ;;  %v4475_v8 = vsel %vm534_vm3, %v4473_v15, %v4474_v57  ;;  %v4684_v61 = vsel %vm744_vm2, %v4682_v5, %v4683_v29 }
 0x4d3   : > { %4541 = vrot.lane.b32.xlu0 %v4477_v10, %s7048_s9  ;;  %4951 = vst.msk [vmem:[#allocation7 + $0x448] sm:$0xff] %vm4180_vm7, %v4477_v10  ;;  %4539 = vrot.lane.b32.xlu1 %v4475_v8, %s7048_s9  ;;  %4950 = vst.msk [vmem:[#allocation7 + $0x420] sm:$0xff] %vm4180_vm7, %v4475_v8  ;;  %v10980_v34 = vsel %vm744_vm2, %v4683_v29, %v4685_v6  ;;  %v5292_v46 = vld [vmem:[#allocation7 + $0x270] sm:$0xff] }
 0x4d4   : > { %5206 = vst.msk [vmem:[#allocation7 + $0x3e0] sm:$0xff] %vm4180_vm7, %v4684_v61  ;;  %4752 = vst.msk [vmem:[#allocation7 + $0x468] sm:$0xff] %vm4180_vm7, %v4684_v61  ;;  %v4130_v28 = vadd.f32 %v10724_v7, %v3905_v24  ;;  %v4996_v36 = vpop.permute.xlu1 %4995  ;;  %5913 = vmatprep.mubr.f32.mxu1 %v5292_v46  ;;  %v5439_v7 = vld [vmem:[%s11386_s5 + $0x208] sm:$0xff] }
 0x4d5   : > { %5207 = vst.msk [vmem:[#allocation7 + $0x408] sm:$0xff] %vm4180_vm7, %v10980_v34  ;;  %4753 = vst.msk [vmem:[#allocation7 + $0x490] sm:$0xff] %vm4180_vm7, %v10980_v34  ;;  %5914 = vmatmul.mubr.f32.vlgmr.msra.gmra.mrb[64].mxu1 %v5291_v58  ;;  %v6874_v0 = vpack.c.bf16 %v5439_v7, %v5438_v43  ;;  %v5442_v7 = vld [vmem:[%s11386_s5 + $0x220] sm:$0xff] }
 0x4d6   : > { %5074 = vst.msk [vmem:[#allocation7 + $0x2b8] sm:$0xff] %vm4579_vm9, %v4996_v36  ;;  %v4176_v33 = vmax.f32 %v4130_v28, 0.0 }
 0x4d7   : > { %4808 = vrot.lane.b32.xlu0 %v10908_v14, %s7048_s9  ;;  %4806 = vrot.lane.b32.xlu1 %v10898_v40, %s7048_s9 }
 0x4d8   : > { %4265 = vst.msk [vmem:[#allocation4 + $0x169] sm:$0xff] %vm4180_vm7, %v4176_v33  ;;  %v4518_v51 = vpop.permute.xlu1 %4517  ;;  %v5290_v53 = vld [vmem:[#allocation7 + $0x260] sm:$0xff]  ;;  %6875 = vmatprep.subr.bf16.mxu1 %v6874_v0 }
 0x4d9   : > { %4597 = vst.msk [vmem:[#allocation7 + $0x2a8] sm:$0xff] %vm4579_vm9, %v4518_v51  ;;  %5154 = vst.msk [vmem:[#allocation7 + $0x220] sm:$0xff] %vm4579_vm9, %v4518_v51  ;;  %5688 = vmatprep.mubr.f32.mxu0 %v5290_v53  ;;  %6877 = vmatpush3.bf16.msra.mxu1 %v6874_v0  ;;  %v5294_v43 = vld [vmem:[#allocation7 + $0x280] sm:$0xff]  ;;  %v5443_v0 = vld [vmem:[%s11386_s5 + $0x228] sm:$0xff] }
 0x4da   : > { %5689 = vmatmul.mubr.f32.gmra.mrb[94].mxu0 %v5289_v49  ;;  %v6882_v53 = vpack.c.bf16 %v5443_v0, %v5442_v7 }
 0x4db   : > { %5013 = vrot.lane.b32.xlu0 %v4684_v61, %s7048_s9  ;;  %5011 = vrot.lane.b32.xlu1 %v10931_v62, %s7048_s9  ;;  %v5441_v62 = vld [vmem:[%s11386_s5 + $0x218] sm:$0xff] }
 0x4dd   : > { %v3909_v40 = vpop.f32.mrb[58].mxu1 }
 0x4de   : > { %v3910_v14 = vadd.f32 %v10862_v12, %v3909_v40  ;;  %v3911_v13 = vpop.f32.mrb[59].mxu1  ;;  %v5301_v40 = vld [vmem:[#allocation7 + $0x2b8] sm:$0xff] }
 0x4df   : > { %v11005_v16 = vld [vmem:[#allocation4 + $0x168] sm:$0xff] }
 0x4e0   : > { %v4135_v30 = vadd.f32 %v10720_v44, %v3910_v14  ;;  %4353 = vst.msk [vmem:[#allocation7 + $0x4b0] sm:$0xff] %vm4180_vm7, %v11005_v16  ;;  %5115 = vst.msk [vmem:[#allocation7 + $0x428] sm:$0xff] %vm4180_vm7, %v11005_v16  ;;  %v5440_v44 = vld [vmem:[%s11386_s5 + $0x210] sm:$0xff]  ;;  %v4478_v60 = vrot.slane %v11005_v16, 1  ;;  %v4687_v3 = vrot.slane %v11005_v16, 2 }
 0x4e1   : > { %v6878_v55 = vpack.c.bf16 %v5441_v62, %v5440_v44 }
 0x4e2   : > { %v4177_v27 = vmax.f32 %v4135_v30, 0.0 }
 0x4e3   : > { %6879 = vmatprep.subr.bf16.mxu1 %v6878_v55 }
 0x4e4   : > { %4266 = vst.msk [vmem:[#allocation4 + $0x171] sm:$0xff] %vm4180_vm7, %v4177_v27  ;;  %v4524_v50 = vpop.permute.xlu0 %4523  ;;  %v4998_v38 = vpop.permute.xlu1 %4997  ;;  %6881 = vmatpush3.bf16.msra.mxu1 %v6878_v55  ;;  %v5299_v27 = vld [vmem:[#allocation7 + $0x2a8] sm:$0xff] }
 0x4e5   : > { %4600 = vst.msk [vmem:[#allocation7 + $0x320] sm:$0xff] %vm4579_vm9, %v4524_v50  ;;  %5157 = vst.msk [vmem:[#allocation7 + $0x298] sm:$0xff] %vm4579_vm9, %v4524_v50  ;;  %6883 = vmatprep.subr.bf16.mxu1 %v6882_v53 }
 0x4e6   : > { %5075 = vst.msk [vmem:[#allocation7 + $0x2e0] sm:$0xff] %vm4579_vm9, %v4998_v38 }
 0x4e8   : > { %v4791_v1 = vpop.permute.xlu0 %4790  ;;  %v4520_v23 = vpop.permute.xlu1 %4519  ;;  %6885 = vmatpush3.bf16.msra.mxu1 %v6882_v53 }
 0x4e9   : > { %4870 = vst.msk [vmem:[#allocation7 + $0x288] sm:$0xff] %vm4579_vm9, %v4791_v1  ;;  %4598 = vst.msk [vmem:[#allocation7 + $0x2d0] sm:$0xff] %vm4579_vm9, %v4520_v23  ;;  %v3914_v11 = vpop.f32.mrb[60].mxu1 }
 0x4ea   : > { %5155 = vst.msk [vmem:[#allocation7 + $0x248] sm:$0xff] %vm4579_vm9, %v4520_v23  ;;  %v3915_v45 = vadd.f32 %v10862_v12, %v3914_v11  ;;  %v3916_v59 = vpop.f32.mrb[61].mxu1 }
 0x4eb   : > { %v11026_v15 = vld [vmem:[#allocation4 + $0x170] sm:$0xff]  ;;  %v4316_v5 = vld [vmem:[#allocation4 + $0x178] sm:$0x3] }
 0x4ec   : > { %v4140_v57 = vadd.f32 %v10753_v32, %v3915_v45  ;;  %v4526_v17 = vpop.permute.xlu0 %4525  ;;  %v5000_v29 = vpop.permute.xlu1 %4999  ;;  %v5297_v6 = vld [vmem:[#allocation7 + $0x298] sm:$0xff]  ;;  %v4479_v48 = vrot.slane %v11026_v15, 1  ;;  %v4481_v24 = vrot.slane %v4316_v5, 1  ;;  %4354 = vst.msk [vmem:[#allocation7 + $0x4d8] sm:$0xff] %vm4180_vm7, %v11026_v15  ;;  %5116 = vst.msk [vmem:[#allocation7 + $0x450] sm:$0xff] %vm4180_vm7, %v11026_v15  ;;  %v4688_v63 = vrot.slane %v11026_v15, 2 }
 0x4ed   : > { %4601 = vst.msk [vmem:[#allocation7 + $0x348] sm:$0xff] %vm4579_vm9, %v4526_v17  ;;  %5158 = vst.msk [vmem:[#allocation7 + $0x2c0] sm:$0xff] %vm4579_vm9, %v4526_v17  ;;  %5918 = vmatprep.mubr.f32.mxu1 %v5297_v6  ;;  %v5296_v32 = vld [vmem:[#allocation7 + $0x290] sm:$0xff]  ;;  %v4690_v10 = vrot.slane %v4316_v5, 2  ;;  %v5306_v5 = vld [vmem:[#allocation7 + $0x2e0] sm:$0xff] }
 0x4ee   : > { %5076 = vst.msk [vmem:[#allocation7 + $0x308] sm:$0xff] %vm4579_vm9, %v5000_v29  ;;  %v4178_v8 = vmax.f32 %v4140_v57, 0.0  ;;  %5919 = vmatmul.mubr.f32.gmra.mrb[66].mxu1 %v5296_v32  ;;  %v4482_v61 = vsel %vm534_vm3, %v4479_v48, %v4481_v24  ;;  %v4480_v28 = vsel %vm534_vm3, %v4478_v60, %v4479_v48  ;;  %v4689_v36 = vsel %vm744_vm2, %v4687_v3, %v4688_v63  ;;  %v5444_v48 = vld [vmem:[%s11386_s5 + $0x230] sm:$0xff]  ;;  %v5445_v24 = vld [vmem:[%s11386_s5 + $0x238] sm:$0xff] }
 0x4ef   : > { %4545 = vrot.lane.b32.xlu0 %v4482_v61, %s7048_s9  ;;  %4953 = vst.msk [vmem:[#allocation7 + $0x498] sm:$0xff] %vm4180_vm7, %v4482_v61  ;;  %4543 = vrot.lane.b32.xlu1 %v4480_v28, %s7048_s9  ;;  %4952 = vst.msk [vmem:[#allocation7 + $0x470] sm:$0xff] %vm4180_vm7, %v4480_v28  ;;  %v11050_v46 = vsel %vm744_vm2, %v4688_v63, %v4690_v10  ;;  %v6886_v32 = vpack.c.bf16 %v5445_v24, %v5444_v48  ;;  %v5314_v0 = vld [vmem:[#allocation7 + $0x320] sm:$0xff] }
 0x4f0   : > { %5208 = vst.msk [vmem:[#allocation7 + $0x430] sm:$0xff] %vm4180_vm7, %v4689_v36  ;;  %4754 = vst.msk [vmem:[#allocation7 + $0x4b8] sm:$0xff] %vm4180_vm7, %v4689_v36  ;;  %v4793_v58 = vpop.permute.xlu0 %4792  ;;  %v5295_v33 = vld [vmem:[#allocation7 + $0x288] sm:$0xff]  ;;  %v5304_v63 = vld [vmem:[#allocation7 + $0x2d0] sm:$0xff] }
 0x4f1   : > { %4267 = vst.msk [vmem:[#allocation4 + $0x181] sm:$0xff] %vm4180_vm7, %v4178_v8  ;;  %5209 = vst.msk [vmem:[#allocation7 + $0x458] sm:$0xff] %vm4180_vm7, %v11050_v46  ;;  %5693 = vmatprep.mubr.f32.mxu0 %v5295_v33  ;;  %6887 = vmatprep.subr.bf16.mxu1 %v6886_v32 }
 0x4f2   : > { %4755 = vst.msk [vmem:[#allocation7 + $0x4e0] sm:$0xff] %vm4180_vm7, %v11050_v46  ;;  %5694 = vmatmul.mubr.f32.gmra.mrb[96].mxu0 %v5294_v43  ;;  %6889 = vmatpush3.bf16.msra.mxu1 %v6886_v32 }
 0x4f3   : > { %4871 = vst.msk [vmem:[#allocation7 + $0x2b0] sm:$0xff] %vm4579_vm9, %v4793_v58  ;;  %4812 = vrot.lane.b32.xlu0 %v10956_v9, %s7048_s9  ;;  %4810 = vrot.lane.b32.xlu1 %v10945_v52, %s7048_s9 }
 0x4f4   : > { %v5302_v51 = vld [vmem:[#allocation7 + $0x2c0] sm:$0xff] }
 0x4f5   : > { %v3919_v49 = vpop.f32.mrb[62].mxu1  ;;  %5923 = vmatprep.mubr.f32.mxu1 %v5302_v51  ;;  %v5311_v61 = vld [vmem:[#allocation7 + $0x308] sm:$0xff] }
 0x4f6   : > { %v3920_v14 = vadd.f32 %v10862_v12, %v3919_v49  ;;  %v3921_v13 = vpop.f32.mrb[63].mxu1  ;;  %5924 = vmatmul.mubr.f32.gmra.mrb[68].mxu1 %v5301_v40 }
 0x4f7   : > { %5017 = vrot.lane.b32.xlu0 %v4689_v36, %s7048_s9  ;;  %5015 = vrot.lane.b32.xlu1 %v10980_v34, %s7048_s9 }
 0x4f8   : > { %v11072_v52 = vld [vmem:[#allocation4 + $0x180] sm:$0xff]  ;;  %v4145_v9 = vadd.f32 %v10747_v47, %v3920_v14 }
 0x4f9   : > { %5117 = vst.msk [vmem:[#allocation7 + $0x478] sm:$0xff] %vm4180_vm7, %v11072_v52  ;;  %v4887_v44 = vrot.slane %v11072_v52, 1  ;;  %v4956_v62 = vrot.slane %v11072_v52, 2 }
 0x4fa   : > { %v5300_v30 = vld [vmem:[#allocation7 + $0x2b0] sm:$0xff]  ;;  %v4179_v12 = vmax.f32 %v4145_v9, 0.0 }
 0x4fb   : > { %5698 = vmatprep.mubr.f32.mxu0 %v5300_v30  ;;  %v4528_v50 = vpop.permute.xlu0 %4527 }
 0x4fc   : > { %5699 = vmatmul.mubr.f32.gmra.mrb[98].mxu0 %v5299_v27  ;;  %4268 = vst.msk [vmem:[#allocation4 + $0x189] sm:$0xff] %vm4180_vm7, %v4179_v12 }
 0x4fd   : > { %4602 = vst.msk [vmem:[#allocation7 + $0x370] sm:$0xff] %vm4579_vm9, %v4528_v50  ;;  %5159 = vst.msk [vmem:[#allocation7 + $0x2e8] sm:$0xff] %vm4579_vm9, %v4528_v50 }
 0x4ff   : > { %v4795_v34 = vpop.permute.xlu0 %4794 }
 0x500   : > { %4872 = vst.msk [vmem:[#allocation7 + $0x2d8] sm:$0xff] %vm4579_vm9, %v4795_v34 }
 0x503   : > { %v4318_v47 = vld [vmem:[#allocation4 + $0x188] sm:$0xff]  ;;  %v4319_v38 = vld [vmem:[#allocation4 + $0x190] sm:$0x3]  ;;  %v4530_v55 = vpop.permute.xlu0 %4529 }
 0x504   : > { %v5307_v1 = vld [vmem:[#allocation7 + $0x2e8] sm:$0xff]  ;;  %v4888_v23 = vrot.slane %v4318_v47, 1  ;;  %v4890_v11 = vrot.slane %v4319_v38, 1  ;;  %5118 = vst.msk [vmem:[#allocation7 + $0x4a0] sm:$0xff] %vm4180_vm7, %v4318_v47  ;;  %v4957_v45 = vrot.slane %v4318_v47, 2  ;;  %v4959_v59 = vrot.slane %v4319_v38, 2 }
 0x505   : > { %4603 = vst.msk [vmem:[#allocation7 + $0x398] sm:$0xff] %vm4579_vm9, %v4530_v55  ;;  %5160 = vst.msk [vmem:[#allocation7 + $0x310] sm:$0xff] %vm4579_vm9, %v4530_v55  ;;  %5928 = vmatprep.mubr.f32.mxu1 %v5307_v1 }
 0x506   : > { %5929 = vmatmul.mubr.f32.gmra.mrb[70].mxu1 %v5306_v5  ;;  %v4891_v60 = vsel %vm534_vm3, %v4888_v23, %v4890_v11  ;;  %v4889_v3 = vsel %vm534_vm3, %v4887_v44, %v4888_v23  ;;  %v4958_v57 = vsel %vm744_vm2, %v4956_v62, %v4957_v45  ;;  %v4960_v17 = vsel %vm744_vm2, %v4957_v45, %v4959_v59 }
 0x507   : > { %5131 = vrot.lane.b32.xlu0 %v4891_v60, %s7048_s9  ;;  %4955 = vst.msk [vmem:[#allocation7 + $0x4e8] sm:$0xff] %vm4180_vm7, %v4891_v60  ;;  %5129 = vrot.lane.b32.xlu1 %v4889_v3, %s7048_s9  ;;  %4954 = vst.msk [vmem:[#allocation7 + $0x4c0] sm:$0xff] %vm4180_vm7, %v4889_v3  ;;  %v4797_v29 = vpop.permute.xlu0 %4796  ;;  %v5305_v6 = vld [vmem:[#allocation7 + $0x2d8] sm:$0xff] }
 0x508   : > { %5210 = vst.msk [vmem:[#allocation7 + $0x480] sm:$0xff] %vm4180_vm7, %v4958_v57  ;;  %5211 = vst.msk [vmem:[#allocation7 + $0x4a8] sm:$0xff] %vm4180_vm7, %v4960_v17  ;;  %5703 = vmatprep.mubr.f32.mxu0 %v5305_v6 }
 0x509   : > { %4873 = vst.msk [vmem:[#allocation7 + $0x300] sm:$0xff] %vm4579_vm9, %v4797_v29  ;;  %5704 = vmatmul.mubr.f32.gmra.mrb[100].mxu0 %v5304_v63 }
 0x50b   : > { %4816 = vrot.lane.b32.xlu0 %v11026_v15, %s7048_s9  ;;  %4814 = vrot.lane.b32.xlu1 %v11005_v16, %s7048_s9  ;;  %v5002_v10 = vpop.permute.xlu0 %5001  ;;  %v5309_v15 = vld [vmem:[#allocation7 + $0x2f8] sm:$0xff] }
 0x50c   : > { %v5312_v8 = vld [vmem:[#allocation7 + $0x310] sm:$0xff]  ;;  %5077 = vst.msk [vmem:[#allocation7 + $0x330] sm:$0xff] %vm4579_vm9, %v5002_v10  ;;  %v5329_v14 = vld [vmem:[#allocation7 + $0x398] sm:$0xff] }
 0x50d   : > { %5933 = vmatprep.mubr.f32.mxu1 %v5312_v8 }
 0x50e   : > { %5934 = vmatmul.mubr.f32.gmra.mrb[72].mxu1 %v5311_v61 }
 0x50f   : > { %5021 = vrot.lane.b32.xlu0 %v4958_v57, %s7048_s9  ;;  %5019 = vrot.lane.b32.xlu1 %v11050_v46, %s7048_s9 }
 0x510   : > { %v5310_v28 = vld [vmem:[#allocation7 + $0x300] sm:$0xff] }
 0x511   : > { %5708 = vmatprep.mubr.f32.mxu0 %v5310_v28 }
 0x512   : > { %5709 = vmatmul.mubr.f32.gmra.mrb[102].mxu0 %v5309_v15 }
 0x513   : > { %5135 = vrot.lane.b32.xlu0 %v10843_v4, %s7048_s9  ;;  %5133 = vrot.lane.b32.xlu1 %v10847_v39, %s7048_s9  ;;  %v5316_v43 = vld [vmem:[#allocation7 + $0x330] sm:$0xff] }
 0x515   : > { %v4534_v16 = vpop.permute.xlu0 %4533  ;;  %v4532_v36 = vpop.permute.xlu1 %4531 }
 0x516   : > { %4605 = vst.msk [vmem:[#allocation7 + $0x3e8] sm:$0xff] %vm4579_vm9, %v4534_v16  ;;  %5162 = vst.msk [vmem:[#allocation7 + $0x360] sm:$0xff] %vm4579_vm9, %v4534_v16 }
 0x517   : > { %4604 = vst.msk [vmem:[#allocation7 + $0x3c0] sm:$0xff] %vm4579_vm9, %v4532_v36  ;;  %5161 = vst.msk [vmem:[#allocation7 + $0x338] sm:$0xff] %vm4579_vm9, %v4532_v36  ;;  %4820 = vrot.lane.b32.xlu0 %v4318_v47, %s7048_s9  ;;  %4818 = vrot.lane.b32.xlu1 %v11072_v52, %s7048_s9 }
 0x519   : > { %v4801_v46 = vpop.permute.xlu0 %4800  ;;  %v4799_v4 = vpop.permute.xlu1 %4798 }
 0x51a   : > { %4875 = vst.msk [vmem:[#allocation7 + $0x350] sm:$0xff] %vm4579_vm9, %v4801_v46  ;;  %4874 = vst.msk [vmem:[#allocation7 + $0x328] sm:$0xff] %vm4579_vm9, %v4799_v4 }
 0x51b   : > { %4963 = vrot.lane.b32.xlu0 %v10102_v19, %s7048_s9  ;;  %5023 = vrot.lane.b32.xlu1 %v4960_v17, %s7048_s9 }
 0x51d   : > { %v5006_v39 = vpop.permute.xlu0 %5005  ;;  %v5004_v58 = vpop.permute.xlu1 %5003  ;;  %v5322_v7 = vld [vmem:[#allocation7 + $0x360] sm:$0xff]  ;;  %v5339_v62 = vld [vmem:[#allocation7 + $0x3e8] sm:$0xff] }
 0x51e   : > { %v5317_v33 = vld [vmem:[#allocation7 + $0x338] sm:$0xff]  ;;  %5079 = vst.msk [vmem:[#allocation7 + $0x380] sm:$0xff] %vm4579_vm9, %v5006_v39  ;;  %5078 = vst.msk [vmem:[#allocation7 + $0x358] sm:$0xff] %vm4579_vm9, %v5004_v58  ;;  %v5334_v47 = vld [vmem:[#allocation7 + $0x3c0] sm:$0xff] }
 0x51f   : > { %5938 = vmatprep.mubr.f32.mxu1 %v5317_v33  ;;  %4967 = vrot.lane.b32.xlu0 %v10191_v56, %s7048_s9  ;;  %v5319_v56 = vld [vmem:[#allocation7 + $0x348] sm:$0xff] }
 0x520   : > { %5939 = vmatmul.mubr.f32.gmra.mrb[74].mxu1 %v5316_v43  ;;  %4961 = vrot.lane.b32.xlu1 %v10096_v37, %s7048_s9 }
 0x521   : > { %5943 = vmatprep.mubr.f32.mxu1 %v5322_v7  ;;  %v5315_v19 = vld [vmem:[#allocation7 + $0x328] sm:$0xff]  ;;  %v5320_v51 = vld [vmem:[#allocation7 + $0x350] sm:$0xff] }
 0x522   : > { %5713 = vmatprep.mubr.f32.mxu0 %v5315_v19 }
 0x523   : > { %5714 = vmatmul.mubr.f32.gmra.mrb[104].mxu0 %v5314_v0  ;;  %4971 = vrot.lane.b32.xlu0 %v10236_v41, %s7048_s9 }
 0x524   : > { %4965 = vrot.lane.b32.xlu1 %v10180_v2, %s7048_s9  ;;  %5718 = vmatprep.mubr.f32.mxu0 %v5320_v51 }
 0x525   : > { %v5321_v53 = vld [vmem:[#allocation7 + $0x358] sm:$0xff] }
 0x526   : > { %5944 = vmatmul.mubr.f32.gmra.mrb[76].mxu1 %v5321_v53 }
 0x527   : > { %5719 = vmatmul.mubr.f32.gmra.mrb[106].mxu0 %v5319_v56  ;;  %4975 = vrot.lane.b32.xlu0 %v10284_v35, %s7048_s9 }
 0x528   : > { %4969 = vrot.lane.b32.xlu1 %v10233_v42, %s7048_s9 }
 0x52b   : > { %4979 = vrot.lane.b32.xlu0 %v10323_v18, %s7048_s9 }
 0x52c   : > { %4973 = vrot.lane.b32.xlu1 %v10281_v21, %s7048_s9 }
 0x52d   : > { %v4538_v37 = vpop.permute.xlu0 %4537  ;;  %v4536_v41 = vpop.permute.xlu1 %4535 }
 0x52e   : > { %4607 = vst.msk [vmem:[#allocation7 + $0x438] sm:$0xff] %vm4579_vm9, %v4538_v37  ;;  %5164 = vst.msk [vmem:[#allocation7 + $0x3b0] sm:$0xff] %vm4579_vm9, %v4538_v37 }
 0x52f   : > { %4606 = vst.msk [vmem:[#allocation7 + $0x410] sm:$0xff] %vm4579_vm9, %v4536_v41  ;;  %5163 = vst.msk [vmem:[#allocation7 + $0x388] sm:$0xff] %vm4579_vm9, %v4536_v41  ;;  %4983 = vrot.lane.b32.xlu0 %v10377_v20, %s7048_s9 }
 0x530   : > { %4977 = vrot.lane.b32.xlu1 %v10320_v26, %s7048_s9  ;;  %v5326_v26 = vld [vmem:[#allocation7 + $0x380] sm:$0xff] }
 0x531   : > { %v4805_v2 = vpop.permute.xlu0 %4804  ;;  %v4803_v42 = vpop.permute.xlu1 %4802 }
 0x532   : > { %4877 = vst.msk [vmem:[#allocation7 + $0x3a0] sm:$0xff] %vm4579_vm9, %v4805_v2  ;;  %4876 = vst.msk [vmem:[#allocation7 + $0x378] sm:$0xff] %vm4579_vm9, %v4803_v42 }
 0x533   : > { %4987 = vrot.lane.b32.xlu0 %v10495_v31, %s7048_s9  ;;  %v5324_v31 = vld [vmem:[#allocation7 + $0x370] sm:$0xff] }
 0x534   : > { %4981 = vrot.lane.b32.xlu1 %v10374_v25, %s7048_s9 }
 0x535   : > { %v5010_v21 = vpop.permute.xlu0 %5009  ;;  %v5008_v35 = vpop.permute.xlu1 %5007  ;;  %v5332_v20 = vld [vmem:[#allocation7 + $0x3b0] sm:$0xff]  ;;  %v5349_v48 = vld [vmem:[#allocation7 + $0x438] sm:$0xff] }
 0x536   : > { %v5327_v18 = vld [vmem:[#allocation7 + $0x388] sm:$0xff]  ;;  %5081 = vst.msk [vmem:[#allocation7 + $0x3d0] sm:$0xff] %vm4579_vm9, %v5010_v21  ;;  %5080 = vst.msk [vmem:[#allocation7 + $0x3a8] sm:$0xff] %vm4579_vm9, %v5008_v35  ;;  %v5344_v17 = vld [vmem:[#allocation7 + $0x410] sm:$0xff] }
 0x537   : > { %5948 = vmatprep.mubr.f32.mxu1 %v5327_v18 }
 0x538   : > { %5949 = vmatmul.mubr.f32.gmra.mrb[78].mxu1 %v5326_v26  ;;  %4985 = vrot.lane.b32.xlu1 %v10486_v54, %s7048_s9 }
 0x539   : > { %5953 = vmatprep.mubr.f32.mxu1 %v5332_v20  ;;  %v5325_v49 = vld [vmem:[#allocation7 + $0x378] sm:$0xff]  ;;  %v5330_v25 = vld [vmem:[#allocation7 + $0x3a0] sm:$0xff] }
 0x53a   : > { %5723 = vmatprep.mubr.f32.mxu0 %v5325_v49 }
 0x53b   : > { %5724 = vmatmul.mubr.f32.gmra.mrb[108].mxu0 %v5324_v31  ;;  %v5218_v31 = vld [vmem:[#allocation7 + $0x20] sm:$0xff] }
 0x53c   : > { %4989 = vrot.lane.b32.xlu1 %v10609_v22, %s7048_s9  ;;  %5728 = vmatprep.mubr.f32.mxu0 %v5330_v25  ;;  %v5217_v25 = vld [vmem:[#allocation7 + $0x18] sm:$0xff] }
 0x53d   : > { %v5331_v40 = vld [vmem:[#allocation7 + $0x3a8] sm:$0xff]  ;;  %v5336_v12 = vld [vmem:[#allocation7 + $0x3d0] sm:$0xff] }
 0x53e   : > { %5954 = vmatmul.mubr.f32.gmra.mrb[80].mxu1 %v5331_v40 }
 0x53f   : > { %5729 = vmatmul.mubr.f32.gmra.mrb[110].mxu0 %v5329_v14  ;;  %v5223_v14 = vld [vmem:[#allocation7 + $0x48] sm:$0xff] }
 0x545   : > { %v4542_v13 = vpop.permute.xlu0 %4541  ;;  %v4540_v52 = vpop.permute.xlu1 %4539 }
 0x546   : > { %4609 = vst.msk [vmem:[#allocation7 + $0x488] sm:$0xff] %vm4579_vm9, %v4542_v13  ;;  %5166 = vst.msk [vmem:[#allocation7 + $0x400] sm:$0xff] %vm4579_vm9, %v4542_v13 }
 0x547   : > { %4608 = vst.msk [vmem:[#allocation7 + $0x460] sm:$0xff] %vm4579_vm9, %v4540_v52  ;;  %5165 = vst.msk [vmem:[#allocation7 + $0x3d8] sm:$0xff] %vm4579_vm9, %v4540_v52 }
 0x549   : > { %v4809_v54 = vpop.permute.xlu0 %4808  ;;  %v4807_v9 = vpop.permute.xlu1 %4806 }
 0x54a   : > { %4879 = vst.msk [vmem:[#allocation7 + $0x3f0] sm:$0xff] %vm4579_vm9, %v4809_v54  ;;  %4878 = vst.msk [vmem:[#allocation7 + $0x3c8] sm:$0xff] %vm4579_vm9, %v4807_v9  ;;  %v5228_v54 = vld [vmem:[#allocation7 + $0x70] sm:$0xff]  ;;  %v5222_v9 = vld [vmem:[#allocation7 + $0x40] sm:$0xff] }
 0x54d   : > { %v5014_v22 = vpop.permute.xlu0 %5013  ;;  %v5012_v30 = vpop.permute.xlu1 %5011  ;;  %v5342_v50 = vld [vmem:[#allocation7 + $0x400] sm:$0xff]  ;;  %v5359_v19 = vld [vmem:[#allocation7 + $0x488] sm:$0xff] }
 0x54e   : > { %v5337_v27 = vld [vmem:[#allocation7 + $0x3d8] sm:$0xff]  ;;  %5083 = vst.msk [vmem:[#allocation7 + $0x420] sm:$0xff] %vm4579_vm9, %v5014_v22  ;;  %5082 = vst.msk [vmem:[#allocation7 + $0x3f8] sm:$0xff] %vm4579_vm9, %v5012_v30  ;;  %v5354_v39 = vld [vmem:[#allocation7 + $0x460] sm:$0xff] }
 0x54f   : > { %5958 = vmatprep.mubr.f32.mxu1 %v5337_v27  ;;  %v5233_v30 = vld [vmem:[#allocation7 + $0x98] sm:$0xff] }
 0x550   : > { %5959 = vmatmul.mubr.f32.gmra.mrb[82].mxu1 %v5336_v12 }
 0x551   : > { %5963 = vmatprep.mubr.f32.mxu1 %v5342_v50  ;;  %v5335_v34 = vld [vmem:[#allocation7 + $0x3c8] sm:$0xff]  ;;  %v5340_v38 = vld [vmem:[#allocation7 + $0x3f0] sm:$0xff]  ;;  %v5238_v50 = vld [vmem:[#allocation7 + $0xc0] sm:$0xff] }
 0x552   : > { %5733 = vmatprep.mubr.f32.mxu0 %v5335_v34  ;;  %v5227_v34 = vld [vmem:[#allocation7 + $0x68] sm:$0xff] }
 0x553   : > { %5734 = vmatmul.mubr.f32.gmra.mrb[112].mxu0 %v5334_v47 }
 0x554   : > { %5738 = vmatprep.mubr.f32.mxu0 %v5340_v38  ;;  %v5243_v38 = vld [vmem:[#allocation7 + $0xe8] sm:$0xff] }
 0x555   : > { %v5341_v44 = vld [vmem:[#allocation7 + $0x3f8] sm:$0xff]  ;;  %v5346_v60 = vld [vmem:[#allocation7 + $0x420] sm:$0xff] }
 0x556   : > { %5964 = vmatmul.mubr.f32.gmra.mrb[84].mxu1 %v5341_v44 }
 0x557   : > { %5739 = vmatmul.mubr.f32.gmra.mrb[114].mxu0 %v5339_v62 }
 0x561   : > { %v4546_v55 = vpop.permute.xlu0 %4545  ;;  %v4544_v1 = vpop.permute.xlu1 %4543 }
 0x562   : > { %4611 = vst.msk [vmem:[#allocation7 + $0x4d8] sm:$0xff] %vm4579_vm9, %v4546_v55  ;;  %5168 = vst.msk [vmem:[#allocation7 + $0x450] sm:$0xff] %vm4579_vm9, %v4546_v55  ;;  %v5248_v55 = vld [vmem:[#allocation7 + $0x110] sm:$0xff] }
 0x563   : > { %4610 = vst.msk [vmem:[#allocation7 + $0x4b0] sm:$0xff] %vm4579_vm9, %v4544_v1  ;;  %5167 = vst.msk [vmem:[#allocation7 + $0x428] sm:$0xff] %vm4579_vm9, %v4544_v1  ;;  %v5232_v1 = vld [vmem:[#allocation7 + $0x90] sm:$0xff] }
 0x565   : > { %v4813_v23 = vpop.permute.xlu0 %4812  ;;  %v4811_v11 = vpop.permute.xlu1 %4810 }
 0x566   : > { %4881 = vst.msk [vmem:[#allocation7 + $0x440] sm:$0xff] %vm4579_vm9, %v4813_v23  ;;  %4880 = vst.msk [vmem:[#allocation7 + $0x418] sm:$0xff] %vm4579_vm9, %v4811_v11  ;;  %v5253_v11 = vld [vmem:[#allocation7 + $0x138] sm:$0xff] }
 0x569   : > { %v5018_v45 = vpop.permute.xlu0 %5017  ;;  %v5016_v59 = vpop.permute.xlu1 %5015  ;;  %v5352_v3 = vld [vmem:[#allocation7 + $0x450] sm:$0xff]  ;;  %v5369_v49 = vld [vmem:[#allocation7 + $0x4d8] sm:$0xff] }
 0x56a   : > { %v5347_v5 = vld [vmem:[#allocation7 + $0x428] sm:$0xff]  ;;  %5085 = vst.msk [vmem:[#allocation7 + $0x470] sm:$0xff] %vm4579_vm9, %v5018_v45  ;;  %5084 = vst.msk [vmem:[#allocation7 + $0x448] sm:$0xff] %vm4579_vm9, %v5016_v59  ;;  %v5364_v21 = vld [vmem:[#allocation7 + $0x4b0] sm:$0xff] }
 0x56b   : > { %5968 = vmatprep.mubr.f32.mxu1 %v5347_v5  ;;  %v5258_v5 = vld [vmem:[#allocation7 + $0x160] sm:$0xff] }
 0x56c   : > { %5969 = vmatmul.mubr.f32.gmra.mrb[86].mxu1 %v5346_v60  ;;  %v5237_v60 = vld [vmem:[#allocation7 + $0xb8] sm:$0xff] }
 0x56d   : > { %5973 = vmatprep.mubr.f32.mxu1 %v5352_v3  ;;  %v5345_v57 = vld [vmem:[#allocation7 + $0x418] sm:$0xff]  ;;  %v5350_v29 = vld [vmem:[#allocation7 + $0x440] sm:$0xff] }
 0x56e   : > { %5743 = vmatprep.mubr.f32.mxu0 %v5345_v57  ;;  %v5263_v57 = vld [vmem:[#allocation7 + $0x188] sm:$0xff] }
 0x56f   : > { %5744 = vmatmul.mubr.f32.gmra.mrb[116].mxu0 %v5344_v17 }
 0x570   : > { %5748 = vmatprep.mubr.f32.mxu0 %v5350_v29 }
 0x571   : > { %v5351_v6 = vld [vmem:[#allocation7 + $0x448] sm:$0xff]  ;;  %v5356_v15 = vld [vmem:[#allocation7 + $0x470] sm:$0xff] }
 0x572   : > { %5974 = vmatmul.mubr.f32.gmra.mrb[88].mxu1 %v5351_v6 }
 0x573   : > { %5749 = vmatmul.mubr.f32.gmra.mrb[118].mxu0 %v5349_v48  ;;  %v5268_v48 = vld [vmem:[#allocation7 + $0x1b0] sm:$0xff] }
 0x579   : > { %v5132_v24 = vpop.permute.xlu0 %5131  ;;  %v5130_v63 = vpop.permute.xlu1 %5129 }
 0x57a   : > { %5170 = vst.msk [vmem:[#allocation7 + $0x4a0] sm:$0xff] %vm4579_vm9, %v5132_v24  ;;  %5169 = vst.msk [vmem:[#allocation7 + $0x478] sm:$0xff] %vm4579_vm9, %v5130_v63  ;;  %v5242_v24 = vld [vmem:[#allocation7 + $0xe0] sm:$0xff]  ;;  %v11220_v63 = vld [vmem:[%s11387_s6] ss:$0 sm:$0xff] }
 0x57d   : > { %v4817_v32 = vpop.permute.xlu0 %4816  ;;  %v4815_v10 = vpop.permute.xlu1 %4814 }
 0x57e   : > { %4883 = vst.msk [vmem:[#allocation7 + $0x490] sm:$0xff] %vm4579_vm9, %v4817_v32  ;;  %4882 = vst.msk [vmem:[#allocation7 + $0x468] sm:$0xff] %vm4579_vm9, %v4815_v10  ;;  %v5273_v10 = vld [vmem:[#allocation7 + $0x1d8] sm:$0xff] }
 0x581   : > { %v5022_v8 = vpop.permute.xlu0 %5021  ;;  %v5020_v61 = vpop.permute.xlu1 %5019  ;;  %v5357_v28 = vld [vmem:[#allocation7 + $0x478] sm:$0xff]  ;;  %v5362_v16 = vld [vmem:[#allocation7 + $0x4a0] sm:$0xff] }
 0x582   : > { %5087 = vst.msk [vmem:[#allocation7 + $0x4c0] sm:$0xff] %vm4579_vm9, %v5022_v8  ;;  %5086 = vst.msk [vmem:[#allocation7 + $0x498] sm:$0xff] %vm4579_vm9, %v5020_v61  ;;  %5978 = vmatprep.mubr.f32.mxu1 %v5357_v28 }
 0x583   : > { %5979 = vmatmul.mubr.f32.gmra.mrb[90].mxu1 %v5356_v15 }
 0x584   : > { %5983 = vmatprep.mubr.f32.mxu1 %v5362_v16  ;;  %v5278_v16 = vld [vmem:[#allocation7 + $0x200] sm:$0xff] }
 0x585   : > { %v5136_v36 = vpop.permute.xlu0 %5135  ;;  %v5134_v46 = vpop.permute.xlu1 %5133  ;;  %v5355_v4 = vld [vmem:[#allocation7 + $0x468] sm:$0xff]  ;;  %v5360_v58 = vld [vmem:[#allocation7 + $0x490] sm:$0xff] }
 0x586   : > { %5172 = vst.msk [vmem:[#allocation7 + $0x4f0] sm:$0xff] %vm4579_vm9, %v5136_v36  ;;  %5171 = vst.msk [vmem:[#allocation7 + $0x4c8] sm:$0xff] %vm4579_vm9, %v5134_v46  ;;  %5753 = vmatprep.mubr.f32.mxu0 %v5355_v4  ;;  %v5247_v36 = vld [vmem:[#allocation7 + $0x108] sm:$0xff] }
 0x587   : > { %5754 = vmatmul.mubr.f32.gmra.mrb[120].mxu0 %v5354_v39  ;;  %v5283_v4 = vld [vmem:[#allocation7 + $0x228] sm:$0xff] }
 0x588   : > { %5758 = vmatprep.mubr.f32.mxu0 %v5360_v58  ;;  %v5288_v58 = vld [vmem:[#allocation7 + $0x250] sm:$0xff] }
 0x589   : > { %v4821_v33 = vpop.permute.xlu0 %4820  ;;  %v4819_v43 = vpop.permute.xlu1 %4818  ;;  %v5361_v7 = vld [vmem:[#allocation7 + $0x498] sm:$0xff]  ;;  %v5366_v37 = vld [vmem:[#allocation7 + $0x4c0] sm:$0xff] }
 0x58a   : > { %4885 = vst.msk [vmem:[#allocation7 + $0x4e0] sm:$0xff] %vm4579_vm9, %v4821_v33  ;;  %4884 = vst.msk [vmem:[#allocation7 + $0x4b8] sm:$0xff] %vm4579_vm9, %v4819_v43  ;;  %5984 = vmatmul.mubr.f32.gmra.mrb[92].mxu1 %v5361_v7  ;;  %v5252_v33 = vld [vmem:[#allocation7 + $0x130] sm:$0xff]  ;;  %v5293_v43 = vld [vmem:[#allocation7 + $0x278] sm:$0xff] }
 0x58b   : > { %5759 = vmatmul.mubr.f32.gmra.mrb[122].mxu0 %v5359_v19  ;;  %v5298_v19 = vld [vmem:[#allocation7 + $0x2a0] sm:$0xff] }
 0x58d   : > { %v4964_v0 = vpop.permute.xlu0 %4963  ;;  %v5024_v51 = vpop.permute.xlu1 %5023  ;;  %v5367_v53 = vld [vmem:[#allocation7 + $0x4c8] sm:$0xff]  ;;  %v5372_v56 = vld [vmem:[#allocation7 + $0x4f0] sm:$0xff] }
 0x58e   : > { %5058 = vst.msk [vmem:[#allocation7 + $0x38] sm:$0xff] %vm4579_vm9, %v4964_v0  ;;  %5088 = vst.msk [vmem:[#allocation7 + $0x4e8] sm:$0xff] %vm4579_vm9, %v5024_v51  ;;  %5988 = vmatprep.mubr.f32.mxu1 %v5367_v53  ;;  %v5257_v0 = vld [vmem:[#allocation7 + $0x158] sm:$0xff]  ;;  %v5303_v51 = vld [vmem:[#allocation7 + $0x2c8] sm:$0xff] }
 0x58f   : > { %5989 = vmatmul.mubr.f32.gmra.mrb[94].mxu1 %v5366_v37  ;;  %v5262_v37 = vld [vmem:[#allocation7 + $0x180] sm:$0xff] }
 0x590   : > { %5993 = vmatprep.mubr.f32.mxu1 %v5372_v56  ;;  %v5308_v56 = vld [vmem:[#allocation7 + $0x2f0] sm:$0xff] }
 0x591   : > { %v4968_v41 = vpop.permute.xlu0 %4967  ;;  %v5365_v2 = vld [vmem:[#allocation7 + $0x4b8] sm:$0xff]  ;;  %v5370_v35 = vld [vmem:[#allocation7 + $0x4e0] sm:$0xff] }
 0x592   : > { %5060 = vst.msk [vmem:[#allocation7 + $0x88] sm:$0xff] %vm4579_vm9, %v4968_v41  ;;  %v4962_v42 = vpop.permute.xlu1 %4961  ;;  %5763 = vmatprep.mubr.f32.mxu0 %v5365_v2  ;;  %v5313_v41 = vld [vmem:[#allocation7 + $0x318] sm:$0xff] }
 0x593   : > { %5057 = vst.msk [vmem:[#allocation7 + $0x10] sm:$0xff] %vm4579_vm9, %v4962_v42  ;;  %5764 = vmatmul.mubr.f32.gmra.mrb[124].mxu0 %v5364_v21  ;;  %v5318_v42 = vld [vmem:[#allocation7 + $0x340] sm:$0xff]  ;;  %v5267_v21 = vld [vmem:[#allocation7 + $0x1a8] sm:$0xff] }
 0x594   : > { %5768 = vmatprep.mubr.f32.mxu0 %v5370_v35 }
 0x595   : > { %v4972_v18 = vpop.permute.xlu0 %4971  ;;  %v5371_v26 = vld [vmem:[#allocation7 + $0x4e8] sm:$0xff]  ;;  %v5221_v12 = vld [vmem:[#allocation7 + $0x38] sm:$0xff] }
 0x596   : > { %5062 = vst.msk [vmem:[#allocation7 + $0xd8] sm:$0xff] %vm4579_vm9, %v4972_v18  ;;  %v4966_v20 = vpop.permute.xlu1 %4965  ;;  %5994 = vmatmul.mubr.f32.gmra.mrb[96].mxu1 %v5371_v26  ;;  %v5323_v18 = vld [vmem:[#allocation7 + $0x368] sm:$0xff] }
 0x597   : > { %5059 = vst.msk [vmem:[#allocation7 + $0x60] sm:$0xff] %vm4579_vm9, %v4966_v20  ;;  %5769 = vmatmul.mubr.f32.gmra.mrb[126].mxu0 %v5369_v49  ;;  %6664 = vmatprep.mubr.msk.f32.mxu1 %vm4180_vm7, %v5218_v31  ;;  %v5328_v49 = vld [vmem:[#allocation7 + $0x390] sm:$0xff] }
 0x598   : > { %5838 = vmatprep.mubr.f32.mxu0 %v5217_v25  ;;  %v5272_v31 = vld [vmem:[#allocation7 + $0x1d0] sm:$0xff] }
 0x599   : > { %v4976_v40 = vpop.permute.xlu0 %4975  ;;  %v5231_v59 = vld [vmem:[#allocation7 + $0x88] sm:$0xff] }
 0x59a   : > { %5064 = vst.msk [vmem:[#allocation7 + $0x128] sm:$0xff] %vm4579_vm9, %v4976_v40  ;;  %v4970_v13 = vpop.permute.xlu1 %4969  ;;  %6665 = vmatmul.mubr.msk.f32.vlgmr.msra.gmra.mrb[98].mxu1 %vm4180_vm7, %v5223_v14  ;;  %v5216_v52 = vld [vmem:[#allocation7 + $0x10] sm:$0xff]  ;;  %v5333_v40 = vld [vmem:[#allocation7 + $0x3b8] sm:$0xff] }
 0x59b   : > { %5061 = vst.msk [vmem:[#allocation7 + $0xb0] sm:$0xff] %vm4579_vm9, %v4970_v13  ;;  %5839 = vmatmul.mubr.f32.vlgmr.msra.gmra.mrb[64].mxu0 %v5216_v52  ;;  %6667 = vmatprep.mubr.msk.f32.mxu1 %vm4180_vm7, %v5228_v54  ;;  %v5338_v54 = vld [vmem:[#allocation7 + $0x3e0] sm:$0xff] }
 0x59c   : > { %5843 = vmatprep.mubr.f32.mxu0 %v5222_v9  ;;  %v5277_v9 = vld [vmem:[#allocation7 + $0x1f8] sm:$0xff] }
 0x59d   : > { %v4980_v22 = vpop.permute.xlu0 %4979  ;;  %v5241_v15 = vld [vmem:[#allocation7 + $0xd8] sm:$0xff] }
 0x59e   : > { %5066 = vst.msk [vmem:[#allocation7 + $0x178] sm:$0xff] %vm4579_vm9, %v4980_v22  ;;  %v4974_v27 = vpop.permute.xlu1 %4973  ;;  %6668 = vmatmul.mubr.msk.f32.gmra.mrb[100].mxu1 %vm4180_vm7, %v5233_v30  ;;  %v5226_v62 = vld [vmem:[#allocation7 + $0x60] sm:$0xff] }
 0x59f   : > { %5063 = vst.msk [vmem:[#allocation7 + $0x100] sm:$0xff] %vm4579_vm9, %v4974_v27  ;;  %5844 = vmatmul.mubr.f32.gmra.mrb[66].mxu0 %v5221_v12  ;;  %6670 = vmatprep.mubr.msk.f32.mxu1 %vm4180_vm7, %v5238_v50  ;;  %v5343_v27 = vld [vmem:[#allocation7 + $0x408] sm:$0xff] }
 0x5a0   : > { %5848 = vmatprep.mubr.f32.mxu0 %v5227_v34  ;;  %v5348_v34 = vld [vmem:[#allocation7 + $0x430] sm:$0xff] }
 0x5a1   : > { %v4984_v47 = vpop.permute.xlu0 %4983  ;;  %v5251_v7 = vld [vmem:[#allocation7 + $0x128] sm:$0xff] }
 0x5a2   : > { %5068 = vst.msk [vmem:[#allocation7 + $0x1c8] sm:$0xff] %vm4579_vm9, %v4984_v47  ;;  %v4978_v44 = vpop.permute.xlu1 %4977  ;;  %6671 = vmatmul.mubr.msk.f32.gmra.mrb[102].mxu1 %vm4180_vm7, %v5243_v38  ;;  %v5236_v6 = vld [vmem:[#allocation7 + $0xb0] sm:$0xff]  ;;  %v5282_v47 = vld [vmem:[#allocation7 + $0x220] sm:$0xff] }
 0x5a3   : > { %5065 = vst.msk [vmem:[#allocation7 + $0x150] sm:$0xff] %vm4579_vm9, %v4978_v44  ;;  %5849 = vmatmul.mubr.f32.gmra.mrb[68].mxu0 %v5226_v62  ;;  %6673 = vmatprep.mubr.msk.f32.mxu1 %vm4180_vm7, %v5248_v55  ;;  %v5353_v44 = vld [vmem:[#allocation7 + $0x458] sm:$0xff] }
 0x5a4   : > { %5853 = vmatprep.mubr.f32.mxu0 %v5232_v1 }
 0x5a5   : > { %v4988_v23 = vpop.permute.xlu0 %4987  ;;  %v5261_v2 = vld [vmem:[#allocation7 + $0x178] sm:$0xff] }
 0x5a6   : > { %5070 = vst.msk [vmem:[#allocation7 + $0x218] sm:$0xff] %vm4579_vm9, %v4988_v23  ;;  %v4982_v45 = vpop.permute.xlu1 %4981  ;;  %6674 = vmatmul.mubr.msk.f32.gmra.mrb[104].mxu1 %vm4180_vm7, %v5253_v11  ;;  %v5246_v39 = vld [vmem:[#allocation7 + $0x100] sm:$0xff]  ;;  %v5287_v11 = vld [vmem:[#allocation7 + $0x248] sm:$0xff] }
 0x5a7   : > { %5067 = vst.msk [vmem:[#allocation7 + $0x1a0] sm:$0xff] %vm4579_vm9, %v4982_v45  ;;  %5854 = vmatmul.mubr.f32.gmra.mrb[70].mxu0 %v5231_v59  ;;  %6676 = vmatprep.mubr.msk.f32.mxu1 %vm4180_vm7, %v5258_v5  ;;  %v5358_v23 = vld [vmem:[#allocation7 + $0x480] sm:$0xff]  ;;  %v5368_v45 = vld [vmem:[#allocation7 + $0x4d0] sm:$0xff]  ;;  %v5363_v5 = vld [vmem:[#allocation7 + $0x4a8] sm:$0xff] }
 0x5a8   : > { %5858 = vmatprep.mubr.f32.mxu0 %v5237_v60  ;;  %v5915_v3 = vpop.f32.mrb[64].mxu1 }
 0x5a9   : > { %v5917_v29 = vpop.f32.mrb[65].mxu1  ;;  %v5271_v52 = vld [vmem:[#allocation7 + $0x1c8] sm:$0xff] }
 0x5aa   : > { %v4986_v17 = vpop.permute.xlu1 %4985  ;;  %6677 = vmatmul.mubr.msk.f32.gmra.mrb[106].mxu1 %vm4180_vm7, %v5263_v57  ;;  %v5256_v53 = vld [vmem:[#allocation7 + $0x150] sm:$0xff] }
 0x5ab   : > { %5069 = vst.msk [vmem:[#allocation7 + $0x1f0] sm:$0xff] %vm4579_vm9, %v4986_v17  ;;  %5859 = vmatmul.mubr.f32.gmra.mrb[72].mxu0 %v5236_v6  ;;  %6679 = vmatprep.mubr.msk.f32.mxu1 %vm4180_vm7, %v5268_v48 }
 0x5ac   : > { %5863 = vmatprep.mubr.f32.mxu0 %v5242_v24 }
 0x5ad   : > { %v5690_v32 = vpop.f32.mrb[94].mxu0  ;;  %v5281_v1 = vld [vmem:[#allocation7 + $0x218] sm:$0xff] }
 0x5ae   : > { %v4990_v8 = vpop.permute.xlu1 %4989  ;;  %v5691_v61 = vadd.f32 %v11220_v63, %v5690_v32  ;;  %v5692_v28 = vpop.f32.mrb[95].mxu0  ;;  %6680 = vmatmul.mubr.msk.f32.gmra.mrb[108].mxu1 %vm4180_vm7, %v5273_v10  ;;  %v5266_v20 = vld [vmem:[#allocation7 + $0x1a0] sm:$0xff] }
 0x5af   : > { %5071 = vst.msk [vmem:[#allocation7 + $0x240] sm:$0xff] %vm4579_vm9, %v4990_v8  ;;  %5864 = vmatmul.mubr.f32.gmra.mrb[74].mxu0 %v5241_v15  ;;  %6682 = vmatprep.mubr.msk.f32.mxu1 %vm4180_vm7, %v5278_v16 }
 0x5b0   : > { %5868 = vmatprep.mubr.f32.mxu0 %v5247_v36  ;;  %v11226_v46 = vadd.f32 %v5915_v3, %v5691_v61  ;;  %v5373_v3 = vld [vmem:[#allocation7 + $0x4f8] sm:$0xff] }
 0x5b2   : > { %6683 = vmatmul.mubr.msk.f32.gmra.mrb[110].mxu1 %vm4180_vm7, %v5283_v4  ;;  %v5276_v50 = vld [vmem:[#allocation7 + $0x1f0] sm:$0xff] }
 0x5b3   : > { %5869 = vmatmul.mubr.f32.gmra.mrb[76].mxu0 %v5246_v39  ;;  %6685 = vmatprep.mubr.msk.f32.mxu1 %vm4180_vm7, %v5288_v58 }
 0x5b4   : > { %5873 = vmatprep.mubr.f32.mxu0 %v5252_v33 }
 0x5b6   : > { %6686 = vmatmul.mubr.msk.f32.gmra.mrb[112].mxu1 %vm4180_vm7, %v5293_v43  ;;  %v5286_v60 = vld [vmem:[#allocation7 + $0x240] sm:$0xff] }
 0x5b7   : > { %5874 = vmatmul.mubr.f32.gmra.mrb[78].mxu0 %v5251_v7  ;;  %6688 = vmatprep.mubr.msk.f32.mxu1 %vm4180_vm7, %v5298_v19 }
 0x5b8   : > { %5878 = vmatprep.mubr.f32.mxu0 %v5257_v0 }
 0x5ba   : > { %6689 = vmatmul.mubr.msk.f32.gmra.mrb[114].mxu1 %vm4180_vm7, %v5303_v51 }
 0x5bb   : > { %5879 = vmatmul.mubr.f32.gmra.mrb[80].mxu0 %v5256_v53  ;;  %6691 = vmatprep.mubr.msk.f32.mxu1 %vm4180_vm7, %v5308_v56 }
 0x5bc   : > { %5883 = vmatprep.mubr.f32.mxu0 %v5262_v37 }
 0x5be   : > { %6692 = vmatmul.mubr.msk.f32.gmra.mrb[116].mxu1 %vm4180_vm7, %v5313_v41 }
 0x5bf   : > { %5884 = vmatmul.mubr.f32.gmra.mrb[82].mxu0 %v5261_v2  ;;  %6694 = vmatprep.mubr.msk.f32.mxu1 %vm4180_vm7, %v5318_v42 }
 0x5c0   : > { %5888 = vmatprep.mubr.f32.mxu0 %v5267_v21 }
 0x5c1   : > { %v5920_v35 = vpop.f32.mrb[66].mxu1 }
 0x5c2   : > { %v5922_v26 = vpop.f32.mrb[67].mxu1  ;;  %6695 = vmatmul.mubr.msk.f32.gmra.mrb[118].mxu1 %vm4180_vm7, %v5323_v18 }
 0x5c3   : > { %5889 = vmatmul.mubr.f32.gmra.mrb[84].mxu0 %v5266_v20  ;;  %6697 = vmatprep.mubr.msk.f32.mxu1 %vm4180_vm7, %v5328_v49 }
 0x5c4   : > { %5893 = vmatprep.mubr.f32.mxu0 %v5272_v31 }
 0x5c5   : > { %v5695_v25 = vpop.f32.mrb[96].mxu0 }
 0x5c6   : > { %v5696_v14 = vadd.f32 %v11220_v63, %v5695_v25  ;;  %v5697_v13 = vpop.f32.mrb[97].mxu0  ;;  %6698 = vmatmul.mubr.msk.f32.gmra.mrb[120].mxu1 %vm4180_vm7, %v5333_v40 }
 0x5c7   : > { %5894 = vmatmul.mubr.f32.gmra.mrb[86].mxu0 %v5271_v52  ;;  %6700 = vmatprep.mubr.msk.f32.mxu1 %vm4180_vm7, %v5338_v54 }
 0x5c8   : > { %5898 = vmatprep.mubr.f32.mxu0 %v5277_v9  ;;  %v11241_v22 = vadd.f32 %v5920_v35, %v5696_v14 }
 0x5c9   : > { %v5925_v30 = vpop.f32.mrb[68].mxu1 }
 0x5ca   : > { %v5927_v12 = vpop.f32.mrb[69].mxu1  ;;  %6701 = vmatmul.mubr.msk.f32.gmra.mrb[122].mxu1 %vm4180_vm7, %v5343_v27 }
 0x5cb   : > { %5899 = vmatmul.mubr.f32.gmra.mrb[88].mxu0 %v5276_v50  ;;  %6703 = vmatprep.mubr.msk.f32.mxu1 %vm4180_vm7, %v5348_v34 }
 0x5cc   : > { %5903 = vmatprep.mubr.f32.mxu0 %v5282_v47 }
 0x5ce   : > { %6704 = vmatmul.mubr.msk.f32.gmra.mrb[124].mxu1 %vm4180_vm7, %v5353_v44 }
 0x5cf   : > { %v5700_v38 = vpop.f32.mrb[98].mxu0  ;;  %5904 = vmatmul.mubr.f32.gmra.mrb[90].mxu0 %v5281_v1  ;;  %6706 = vmatprep.mubr.msk.f32.mxu1 %vm4180_vm7, %v5358_v23 }
 0x5d0   : > { %v5701_v62 = vadd.f32 %v11220_v63, %v5700_v38  ;;  %v5702_v55 = vpop.f32.mrb[99].mxu0  ;;  %5908 = vmatprep.mubr.f32.mxu0 %v5287_v11 }
 0x5d2   : > { %v11248_v59 = vadd.f32 %v5925_v30, %v5701_v62  ;;  %6707 = vmatmul.mubr.msk.f32.gmra.mrb[126].mxu1 %vm4180_vm7, %v5363_v5 }
 0x5d3   : > { %5909 = vmatmul.mubr.f32.gmra.mrb[92].mxu0 %v5286_v60  ;;  %6709 = vmatprep.mubr.msk.f32.mxu1 %vm4180_vm7, %v5368_v45 }
 0x5d6   : > { %6710 = vmatmul.mubr.msk.f32.gmra.mrb[128].mxu1 %vm4180_vm7, %v5373_v3 }
 0x5d9   : > { %v5930_v57 = vpop.f32.mrb[70].mxu1 }
 0x5da   : > { %v5932_v17 = vpop.f32.mrb[71].mxu1 }
 0x5dc   : > { %v5705_v29 = vpop.f32.mrb[100].mxu0 }
 0x5dd   : > { %v5706_v6 = vadd.f32 %v11220_v63, %v5705_v29  ;;  %v5707_v48 = vpop.f32.mrb[101].mxu0 }
 0x5df   : > { %v11254_v24 = vadd.f32 %v5930_v57, %v5706_v6 }
 0x5e1   : > { %v5935_v32 = vpop.f32.mrb[72].mxu1 }
 0x5e2   : > { %v5937_v10 = vpop.f32.mrb[73].mxu1 }
 0x5e5   : > { %v5710_v8 = vpop.f32.mrb[102].mxu0 }
 0x5e6   : > { %v5711_v61 = vadd.f32 %v11220_v63, %v5710_v8  ;;  %v5712_v28 = vpop.f32.mrb[103].mxu0 }
 0x5e8   : > { %v11257_v15 = vadd.f32 %v5935_v32, %v5711_v61 }
 0x5f3   : > { %v5940_v16 = vpop.f32.mrb[74].mxu1 }
 0x5f4   : > { %v5942_v36 = vpop.f32.mrb[75].mxu1 }
 0x5f6   : > { %v5715_v4 = vpop.f32.mrb[104].mxu0 }
 0x5f7   : > { %v5716_v39 = vadd.f32 %v11220_v63, %v5715_v4  ;;  %v5717_v58 = vpop.f32.mrb[105].mxu0 }
 0x5f9   : > { %v5945_v33 = vpop.f32.mrb[76].mxu1  ;;  %v11260_v43 = vadd.f32 %v5940_v16, %v5716_v39 }
 0x5fa   : > { %v5720_v7 = vpop.f32.mrb[106].mxu0  ;;  %v5947_v19 = vpop.f32.mrb[77].mxu1 }
 0x5fb   : > { %v5721_v0 = vadd.f32 %v11220_v63, %v5720_v7  ;;  %v5722_v51 = vpop.f32.mrb[107].mxu0 }
 0x5fd   : > { %v11263_v53 = vadd.f32 %v5945_v33, %v5721_v0 }
 0x60b   : > { %v5950_v56 = vpop.f32.mrb[78].mxu1 }
 0x60c   : > { %v5952_v37 = vpop.f32.mrb[79].mxu1 }
 0x60e   : > { %v5725_v41 = vpop.f32.mrb[108].mxu0 }
 0x60f   : > { %v5726_v2 = vadd.f32 %v11220_v63, %v5725_v41  ;;  %v5727_v42 = vpop.f32.mrb[109].mxu0 }
 0x611   : > { %v5955_v21 = vpop.f32.mrb[80].mxu1  ;;  %v11266_v35 = vadd.f32 %v5950_v56, %v5726_v2 }
 0x612   : > { %v5730_v18 = vpop.f32.mrb[110].mxu0  ;;  %v5957_v26 = vpop.f32.mrb[81].mxu1 }
 0x613   : > { %v5731_v20 = vadd.f32 %v11220_v63, %v5730_v18  ;;  %v5732_v49 = vpop.f32.mrb[111].mxu0 }
 0x615   : > { %v11269_v31 = vadd.f32 %v5955_v21, %v5731_v20 }
 0x623   : > { %v5960_v25 = vpop.f32.mrb[82].mxu1 }
 0x624   : > { %v5962_v40 = vpop.f32.mrb[83].mxu1 }
 0x626   : > { %v5735_v14 = vpop.f32.mrb[112].mxu0 }
 0x627   : > { %v5736_v13 = vadd.f32 %v11220_v63, %v5735_v14  ;;  %v5737_v52 = vpop.f32.mrb[113].mxu0 }
 0x629   : > { %v5965_v54 = vpop.f32.mrb[84].mxu1  ;;  %v11272_v9 = vadd.f32 %v5960_v25, %v5736_v13 }
 0x62a   : > { %v5740_v30 = vpop.f32.mrb[114].mxu0  ;;  %v5967_v27 = vpop.f32.mrb[85].mxu1 }
 0x62b   : > { %v5741_v12 = vadd.f32 %v11220_v63, %v5740_v30  ;;  %v5742_v50 = vpop.f32.mrb[115].mxu0 }
 0x62d   : > { %v11275_v34 = vadd.f32 %v5965_v54, %v5741_v12 }
 0x63f   : > { %v5970_v47 = vpop.f32.mrb[86].mxu1 }
 0x640   : > { %v5972_v38 = vpop.f32.mrb[87].mxu1 }
 0x642   : > { %v5745_v44 = vpop.f32.mrb[116].mxu0 }
 0x643   : > { %v5746_v62 = vadd.f32 %v11220_v63, %v5745_v44  ;;  %v5747_v55 = vpop.f32.mrb[117].mxu0 }
 0x645   : > { %v5975_v1 = vpop.f32.mrb[88].mxu1  ;;  %v11278_v23 = vadd.f32 %v5970_v47, %v5746_v62 }
 0x646   : > { %v5750_v11 = vpop.f32.mrb[118].mxu0  ;;  %v5977_v45 = vpop.f32.mrb[89].mxu1 }
 0x647   : > { %v5751_v5 = vadd.f32 %v11220_v63, %v5750_v11  ;;  %v5752_v60 = vpop.f32.mrb[119].mxu0 }
 0x649   : > { %v11281_v3 = vadd.f32 %v5975_v1, %v5751_v5 }
 0x656   : > { %v5980_v57 = vpop.f32.mrb[90].mxu1 }
 0x657   : > { %v5982_v17 = vpop.f32.mrb[91].mxu1 }
 0x65a   : > { %v5755_v29 = vpop.f32.mrb[120].mxu0 }
 0x65b   : > { %v5756_v6 = vadd.f32 %v11220_v63, %v5755_v29  ;;  %v5757_v48 = vpop.f32.mrb[121].mxu0 }
 0x65d   : > { %v5985_v32 = vpop.f32.mrb[92].mxu1  ;;  %v11284_v10 = vadd.f32 %v5980_v57, %v5756_v6 }
 0x65e   : > { %v5760_v8 = vpop.f32.mrb[122].mxu0  ;;  %v5987_v61 = vpop.f32.mrb[93].mxu1 }
 0x65f   : > { %v5761_v28 = vadd.f32 %v11220_v63, %v5760_v8  ;;  %v5762_v16 = vpop.f32.mrb[123].mxu0 }
 0x661   : > { %v11287_v36 = vadd.f32 %v5985_v32, %v5761_v28 }
 0x662   : > { %v5990_v4 = vpop.f32.mrb[94].mxu1 }
 0x663   : > { %v5992_v39 = vpop.f32.mrb[95].mxu1 }
 0x666   : > { %v5765_v58 = vpop.f32.mrb[124].mxu0 }
 0x667   : > { %v5766_v33 = vadd.f32 %v11220_v63, %v5765_v58  ;;  %v5767_v7 = vpop.f32.mrb[125].mxu0 }
 0x669   : > { %v5995_v19 = vpop.f32.mrb[96].mxu1  ;;  %v11290_v0 = vadd.f32 %v5990_v4, %v5766_v33 }
 0x66a   : > { %v5770_v51 = vpop.f32.mrb[126].mxu0  ;;  %v5997_v56 = vpop.f32.mrb[97].mxu1 }
 0x66b   : > { %v5771_v37 = vadd.f32 %v11220_v63, %v5770_v51  ;;  %v5772_v41 = vpop.f32.mrb[127].mxu0 }
 0x66d   : > { %v6666_v2 = vpop.f32.mrb[98].mxu1  ;;  %v11293_v42 = vadd.f32 %v5995_v19, %v5771_v37 }
 0x66e   : > { %v5840_v21 = vpop.f32.mrb[64].mxu0  ;;  %v6065_v18 = vpop.f32.mrb[99].mxu1 }
 0x66f   : > { %v6922_v26 = vadd.f32 %v11220_v63, %v5840_v21  ;;  %v5842_v20 = vpop.f32.mrb[65].mxu0 }
 0x671   : > { %v6066_v49 = vadd.f32 %v6922_v26, %v6065_v18  ;;  %v6669_v25 = vpop.f32.mrb[100].mxu1 }
 0x672   : > { %v5845_v40 = vpop.f32.mrb[66].mxu0  ;;  %v6075_v14 = vpop.f32.mrb[101].mxu1 }
 0x673   : > { %6224 = vst [vmem:[%s11301_s20] sm:$0xff] %v6066_v49  ;;  %v6923_v13 = vadd.f32 %v11220_v63, %v5845_v40  ;;  %v5847_v52 = vpop.f32.mrb[67].mxu0 }
 0x675   : > { %v6071_v54 = vadd.f32 %v6923_v13, %v6666_v2  ;;  %v6672_v30 = vpop.f32.mrb[102].mxu1 }
 0x676   : > { %v5850_v27 = vpop.f32.mrb[68].mxu0  ;;  %v6085_v12 = vpop.f32.mrb[103].mxu1 }
 0x677   : > { %6225 = vst [vmem:[%s11301_s20 + $0x8] sm:$0xff] %v6071_v54  ;;  %v6924_v50 = vadd.f32 %v11220_v63, %v5850_v27  ;;  %v5852_v47 = vpop.f32.mrb[69].mxu0 }
 0x679   : > { %v6076_v38 = vadd.f32 %v6924_v50, %v6075_v14  ;;  %v6675_v44 = vpop.f32.mrb[104].mxu1 }
 0x67a   : > { %v5855_v62 = vpop.f32.mrb[70].mxu0  ;;  %v6095_v55 = vpop.f32.mrb[105].mxu1 }
 0x67b   : > { %6226 = vst [vmem:[%s11301_s20 + $0x10] sm:$0xff] %v6076_v38  ;;  %v6925_v1 = vadd.f32 %v11220_v63, %v5855_v62  ;;  %v5857_v11 = vpop.f32.mrb[71].mxu0 }
 0x67d   : > { %v6081_v45 = vadd.f32 %v6925_v1, %v6669_v25  ;;  %v6678_v5 = vpop.f32.mrb[106].mxu1 }
 0x67e   : > { %v5860_v60 = vpop.f32.mrb[72].mxu0  ;;  %v6105_v57 = vpop.f32.mrb[107].mxu1 }
 0x67f   : > { %6227 = vst [vmem:[%s11301_s20 + $0x18] sm:$0xff] %v6081_v45  ;;  %v6926_v17 = vadd.f32 %v11220_v63, %v5860_v60  ;;  %v5862_v29 = vpop.f32.mrb[73].mxu0 }
 0x681   : > { %v6086_v6 = vadd.f32 %v6926_v17, %v6085_v12  ;;  %v11311_v48 = vpop.f32.mrb[108].mxu1 }
 0x682   : > { %v5865_v32 = vpop.f32.mrb[74].mxu0  ;;  %v6115_v8 = vpop.f32.mrb[109].mxu1 }
 0x683   : > { %6228 = vst [vmem:[%s11301_s20 + $0x20] sm:$0xff] %v6086_v6  ;;  %v6927_v61 = vadd.f32 %v11220_v63, %v5865_v32  ;;  %v5867_v28 = vpop.f32.mrb[75].mxu0 }
 0x685   : > { %v6091_v16 = vadd.f32 %v6927_v61, %v6672_v30  ;;  %v11315_v4 = vpop.f32.mrb[110].mxu1 }
 0x686   : > { %v5870_v39 = vpop.f32.mrb[76].mxu0  ;;  %v11317_v58 = vpop.f32.mrb[111].mxu1 }
 0x687   : > { %6229 = vst [vmem:[%s11301_s20 + $0x28] sm:$0xff] %v6091_v16  ;;  %v6928_v33 = vadd.f32 %v11220_v63, %v5870_v39  ;;  %v5872_v7 = vpop.f32.mrb[77].mxu0 }
 0x689   : > { %v6096_v19 = vadd.f32 %v6928_v33, %v6095_v55  ;;  %v6687_v51 = vpop.f32.mrb[112].mxu1 }
 0x68a   : > { %v6141_v56 = vadd.f32 %v6687_v51, %v11226_v46  ;;  %v5875_v37 = vpop.f32.mrb[78].mxu0  ;;  %v11322_v41 = vpop.f32.mrb[113].mxu1 }
 0x68b   : > { %6230 = vst [vmem:[%s11301_s20 + $0x30] sm:$0xff] %v6096_v19  ;;  %v6929_v2 = vadd.f32 %v11220_v63, %v5875_v37  ;;  %v5877_v21 = vpop.f32.mrb[79].mxu0 }
 0x68c   : > { %6239 = vst [vmem:[%s11301_s20 + $0x78] sm:$0xff] %v6141_v56 }
 0x68d   : > { %v6101_v18 = vadd.f32 %v6929_v2, %v6675_v44  ;;  %v6690_v26 = vpop.f32.mrb[114].mxu1 }
 0x68e   : > { %v6151_v20 = vadd.f32 %v6690_v26, %v11248_v59  ;;  %v5880_v49 = vpop.f32.mrb[80].mxu0  ;;  %v6145_v25 = vpop.f32.mrb[115].mxu1 }
 0x68f   : > { %6231 = vst [vmem:[%s11301_s20 + $0x38] sm:$0xff] %v6101_v18  ;;  %v6930_v46 = vadd.f32 %v11220_v63, %v5880_v49  ;;  %v6146_v40 = vadd.f32 %v6145_v25, %v11241_v22  ;;  %v5882_v14 = vpop.f32.mrb[81].mxu0 }
 0x690   : > { %6241 = vst [vmem:[%s11301_s20 + $0x88] sm:$0xff] %v6151_v20 }
 0x691   : > { %v6106_v13 = vadd.f32 %v6930_v46, %v6105_v57  ;;  %6240 = vst [vmem:[%s11301_s20 + $0x80] sm:$0xff] %v6146_v40  ;;  %v6693_v52 = vpop.f32.mrb[116].mxu1 }
 0x692   : > { %v6161_v54 = vadd.f32 %v6693_v52, %v11257_v15  ;;  %v5885_v30 = vpop.f32.mrb[82].mxu0  ;;  %v6155_v27 = vpop.f32.mrb[117].mxu1 }
 0x693   : > { %6232 = vst [vmem:[%s11301_s20 + $0x40] sm:$0xff] %v6106_v13  ;;  %v6931_v59 = vadd.f32 %v11220_v63, %v5885_v30  ;;  %v6156_v12 = vadd.f32 %v6155_v27, %v11254_v24  ;;  %v5887_v50 = vpop.f32.mrb[83].mxu0 }
 0x694   : > { %6243 = vst [vmem:[%s11301_s20 + $0x98] sm:$0xff] %v6161_v54 }
 0x695   : > { %v6111_v22 = vadd.f32 %v6931_v59, %v6678_v5  ;;  %6242 = vst [vmem:[%s11301_s20 + $0x90] sm:$0xff] %v6156_v12  ;;  %v6696_v47 = vpop.f32.mrb[118].mxu1 }
 0x696   : > { %v6171_v38 = vadd.f32 %v6696_v47, %v11263_v53  ;;  %v5890_v44 = vpop.f32.mrb[84].mxu0  ;;  %v6165_v62 = vpop.f32.mrb[119].mxu1 }
 0x697   : > { %6233 = vst [vmem:[%s11301_s20 + $0x48] sm:$0xff] %v6111_v22  ;;  %v6932_v15 = vadd.f32 %v11220_v63, %v5890_v44  ;;  %v6166_v55 = vadd.f32 %v6165_v62, %v11260_v43  ;;  %v5892_v1 = vpop.f32.mrb[85].mxu0 }
 0x698   : > { %6245 = vst [vmem:[%s11301_s20 + $0xa8] sm:$0xff] %v6171_v38 }
 0x699   : > { %v6116_v24 = vadd.f32 %v6932_v15, %v6115_v8  ;;  %6244 = vst [vmem:[%s11301_s20 + $0xa0] sm:$0xff] %v6166_v55  ;;  %v6699_v11 = vpop.f32.mrb[120].mxu1 }
 0x69a   : > { %v6181_v45 = vadd.f32 %v6699_v11, %v11269_v31  ;;  %v5895_v5 = vpop.f32.mrb[86].mxu0  ;;  %v6175_v60 = vpop.f32.mrb[121].mxu1 }
 0x69b   : > { %6234 = vst [vmem:[%s11301_s20 + $0x50] sm:$0xff] %v6116_v24  ;;  %v6933_v53 = vadd.f32 %v11220_v63, %v5895_v5  ;;  %v6176_v57 = vadd.f32 %v6175_v60, %v11266_v35  ;;  %v5897_v17 = vpop.f32.mrb[87].mxu0 }
 0x69c   : > { %6247 = vst [vmem:[%s11301_s20 + $0xb8] sm:$0xff] %v6181_v45 }
 0x69d   : > { %v6121_v43 = vadd.f32 %v6933_v53, %v11311_v48  ;;  %6246 = vst [vmem:[%s11301_s20 + $0xb0] sm:$0xff] %v6176_v57  ;;  %v6702_v29 = vpop.f32.mrb[122].mxu1 }
 0x69e   : > { %v6191_v6 = vadd.f32 %v6702_v29, %v11275_v34  ;;  %v5900_v32 = vpop.f32.mrb[88].mxu0  ;;  %v6185_v31 = vpop.f32.mrb[123].mxu1 }
 0x69f   : > { %6235 = vst [vmem:[%s11301_s20 + $0x58] sm:$0xff] %v6121_v43  ;;  %v6934_v8 = vadd.f32 %v11220_v63, %v5900_v32  ;;  %v6186_v61 = vadd.f32 %v6185_v31, %v11272_v9  ;;  %v5902_v28 = vpop.f32.mrb[89].mxu0 }
 0x6a0   : > { %6249 = vst [vmem:[%s11301_s20 + $0xc8] sm:$0xff] %v6191_v6 }
 0x6a1   : > { %v6126_v35 = vadd.f32 %v6934_v8, %v11317_v58  ;;  %6248 = vst [vmem:[%s11301_s20 + $0xc0] sm:$0xff] %v6186_v61  ;;  %v6705_v48 = vpop.f32.mrb[124].mxu1 }
 0x6a2   : > { %v6201_v16 = vadd.f32 %v6705_v48, %v11281_v3  ;;  %v5905_v39 = vpop.f32.mrb[90].mxu0  ;;  %v6195_v34 = vpop.f32.mrb[125].mxu1 }
 0x6a3   : > { %6236 = vst [vmem:[%s11301_s20 + $0x60] sm:$0xff] %v6126_v35  ;;  %v6935_v33 = vadd.f32 %v11220_v63, %v5905_v39  ;;  %v6196_v7 = vadd.f32 %v6195_v34, %v11278_v23  ;;  %v5907_v19 = vpop.f32.mrb[91].mxu0 }
 0x6a4   : > { %6251 = vst [vmem:[%s11301_s20 + $0xd8] sm:$0xff] %v6201_v16 }
 0x6a5   : > { %v6131_v9 = vadd.f32 %v6935_v33, %v11315_v4  ;;  %6250 = vst [vmem:[%s11301_s20 + $0xd0] sm:$0xff] %v6196_v7  ;;  %v6708_v58 = vpop.f32.mrb[126].mxu1 }
 0x6a6   : > { %v6211_v51 = vadd.f32 %v6708_v58, %v11287_v36  ;;  %v5910_v3 = vpop.f32.mrb[92].mxu0  ;;  %v6205_v56 = vpop.f32.mrb[127].mxu1 }
 0x6a7   : > { %6237 = vst [vmem:[%s11301_s20 + $0x68] sm:$0xff] %v6131_v9  ;;  %v6936_v37 = vadd.f32 %v11220_v63, %v5910_v3  ;;  %v6206_v2 = vadd.f32 %v6205_v56, %v11284_v10  ;;  %v5912_v21 = vpop.f32.mrb[93].mxu0 }
 0x6a8   : > { %6253 = vst [vmem:[%s11301_s20 + $0xe8] sm:$0xff] %v6211_v51 }
 0x6a9   : > { %v6136_v23 = vadd.f32 %v6936_v37, %v11322_v41  ;;  %6252 = vst [vmem:[%s11301_s20 + $0xe0] sm:$0xff] %v6206_v2  ;;  %v6711_v4 = vpop.f32.mrb[128].mxu1 }
 0x6aa   : > { %v6221_v18 = vadd.f32 %v6711_v4, %v11293_v42  ;;  %v6215_v26 = vpop.f32.mrb[129].mxu1 }
 0x6ab   : > { %6238 = vst [vmem:[%s11301_s20 + $0x70] sm:$0xff] %v6136_v23  ;;  %v6216_v36 = vadd.f32 %v6215_v26, %v11290_v0 }
 0x6ac   : > { %6255 = vst [vmem:[%s11301_s20 + $0xf8] sm:$0xff] %v6221_v18 }
 0x6ad   : > { %6254 = vst [vmem:[%s11301_s20 + $0xf0] sm:$0xff] %v6216_v36 }
 0x6ae PF: > { %s17_s24 = sadd.s32 1, %s7034_s24  }
 0x6af   : > { %p14_p4 = scmp.ge.s32.totalorder %s17_s24, 4  }
 0x6b1   :  { %16 = sbr.rel (!%p14_p4) target bundleno = 1 (0x1), region = 81 }

</bundles_post_ra>
